<compile_context>
chip_gen: v5e
topology: v5e:2x2
jax: 0.10.0
libtpu: 0.0.40
codegen_flags: <defaults>
</compile_context>

<pallas_src>
import numpy as np
import jax
import jax.numpy as jnp
from jax import lax
from jax.experimental import pallas as pl
from jax.experimental.pallas import tpu as pltpu


def se_basic_block_kernel(x_ref, w1_ref, s1_ref, b1_ref, w2_ref, b2_ref,
                          fc1w_ref, fc1b_ref, fc2w_ref, fc2b_ref,
                          out_ref, pad_ref, col_ref):
    _, H, W, Cp = x_ref.shape
    Hp, Wp = H + 2, W + 2
    HW = H * W

    xv = x_ref[...].reshape(H, W, Cp)                       # this sample (bf16)

    # ---- zero only the 1-px halo of the padded scratch; the interior is
    #      always fully rewritten and the halo stays zero for both convs ----
    zrow = jnp.zeros((1, Wp, Cp), pad_ref.dtype)
    zcol = jnp.zeros((Hp, 1, Cp), pad_ref.dtype)
    pad_ref[0:1, :, :] = zrow
    pad_ref[Hp - 1:Hp, :, :] = zrow
    pad_ref[:, 0:1, :] = zcol
    pad_ref[:, Wp - 1:Wp, :] = zcol

    def build_im2col():
        # (H*W, 9*Cp) slab; every column block is 128-lane aligned.
        for di in range(3):
            for dj in range(3):
                tap = 3 * di + dj
                col_ref[:, tap * Cp:(tap + 1) * Cp] = (
                    pad_ref[di:di + H, dj:dj + W, :]
                    .reshape(HW, Cp).astype(col_ref.dtype))

    # ---- conv1 (3x3, pad 1, no bias) as a single K = 9*Cp MXU matmul ----
    pad_ref[1:H + 1, 1:W + 1, :] = xv.astype(pad_ref.dtype)
    build_im2col()
    acc1 = jnp.dot(col_ref[...], w1_ref[...], preferred_element_type=jnp.float32)
    # module order: conv1 -> relu -> bn1 (eval-mode per-channel scale/bias)
    h1 = jnp.maximum(acc1, 0.0) * s1_ref[...] + b1_ref[...]

    # ---- conv2 (bn2 scale folded into the weights; bias added here) ----
    pad_ref[1:H + 1, 1:W + 1, :] = h1.reshape(H, W, Cp)
    build_im2col()
    h2 = jnp.dot(col_ref[...], w2_ref[...],
                 preferred_element_type=jnp.float32) + b2_ref[...]

    # ---- Squeeze-Excitation (tiny matmuls, kept in f32) ----
    pooled = jnp.mean(h2, axis=0, keepdims=True)                       # (1, Cp)
    z = jnp.maximum(
        jnp.dot(pooled, fc1w_ref[...],
                preferred_element_type=jnp.float32) + fc1b_ref[...], 0.0)
    gate = jax.nn.sigmoid(
        jnp.dot(z, fc2w_ref[...],
                preferred_element_type=jnp.float32) + fc2b_ref[...])

    # ---- fused: channel gate + residual add + final relu + lane-dense store ----
    residual = xv.reshape(HW, Cp).astype(jnp.float32)
    out = jnp.maximum(h2 * gate + residual, 0.0)
    out_ref[...] = out.reshape(1, H, W, Cp).astype(out_ref.dtype)


def se_basic_block(x_nchw, params):
    """x_nchw: (B, C, H, W) float32 -> (B, C, H, W) float32."""
    x = jnp.transpose(x_nchw, (0, 2, 3, 1)).astype(jnp.float32)       # -> NHWC
    B, H, W, C = x.shape
    P = params["w1"].shape[-1]
    assert C == P, "residual path requires inplanes == planes (downsample=None)"
    Cr = params["fc1_w"].shape[-1]

    LANE = 128
    Cp = ((C + LANE - 1) // LANE) * LANE        # lane-dense channel count
    Crp = ((Cr + LANE - 1) // LANE) * LANE
    eps = 1e-5

    # eval-mode BN folded to per-channel scale/bias; bn2 scale folded into w2.
    s1 = params["bn1_gamma"] / jnp.sqrt(params["bn1_var"] + eps)
    b1 = params["bn1_beta"] - params["bn1_mean"] * s1
    s2 = params["bn2_gamma"] / jnp.sqrt(params["bn2_var"] + eps)
    b2 = params["bn2_beta"] - params["bn2_mean"] * s2

    # conv weights HWIO (3,3,Cin,Cout): channel-pad to (9, Cp, Cp) and flatten
    # tap-major so rows [tap*Cp,(tap+1)*Cp) line up with the im2col column blocks.
    w1 = params["w1"].reshape(9, C, P)
    w2 = params["w2"].reshape(9, C, P) * s2[None, None, :]             # fold bn2
    w1p = jnp.zeros((9, Cp, Cp), jnp.float32).at[:, :C, :P].set(w1)
    w2p = jnp.zeros((9, Cp, Cp), jnp.float32).at[:, :C, :P].set(w2)
    w1p = w1p.reshape(9 * Cp, Cp).astype(jnp.bfloat16)
    w2p = w2p.reshape(9 * Cp, Cp).astype(jnp.bfloat16)

    def padvec(v, n):
        return jnp.zeros((1, n), jnp.float32).at[0, :v.shape[0]].set(v)

    s1p, b1p, b2p = padvec(s1, Cp), padvec(b1, Cp), padvec(b2, Cp)
    fc1w = jnp.zeros((Cp, Crp), jnp.float32).at[:C, :Cr].set(params["fc1_w"])
    fc1b = padvec(params["fc1_b"], Crp)
    fc2w = jnp.zeros((Crp, Cp), jnp.float32).at[:Cr, :C].set(params["fc2_w"])
    fc2b = padvec(params["fc2_b"], Cp)

    # channel-pad the input and cast to bf16 (MXU-native; halves HBM traffic).
    xp = jnp.zeros((B, H, W, Cp), jnp.bfloat16).at[..., :C].set(x.astype(jnp.bfloat16))

    def const(shape):
        return pl.BlockSpec(shape, lambda b: (0,) * len(shape))

    grid_spec = pltpu.PrefetchScalarGridSpec(
        num_scalar_prefetch=0,
        grid=(B,),
        in_specs=[
            pl.BlockSpec((1, H, W, Cp), lambda b: (b, 0, 0, 0)),
            const((9 * Cp, Cp)), const((1, Cp)), const((1, Cp)),
            const((9 * Cp, Cp)), const((1, Cp)),
            const((Cp, Crp)), const((1, Crp)),
            const((Crp, Cp)), const((1, Cp)),
        ],
        out_specs=pl.BlockSpec((1, H, W, Cp), lambda b: (b, 0, 0, 0)),
        scratch_shapes=[
            pltpu.VMEM((H + 2, W + 2, Cp), jnp.float32),    # 1-px padded activation
            pltpu.VMEM((H * W, 9 * Cp), jnp.bfloat16),      # im2col slab (K = 9*Cp)
        ],
    )

    cost = pl.CostEstimate(
        flops=4 * B * H * W * 9 * Cp * Cp + 4 * B * Cp * Crp,
        transcendentals=B * Cp,
        bytes_accessed=(xp.size * 2 + B * H * W * Cp * 4
                        + (w1p.size + w2p.size) * 2
                        + (fc1w.size + fc2w.size + 5 * Cp + Crp) * 4),
    )

    out_nhwc = pl.pallas_call(
        se_basic_block_kernel,
        out_shape=jax.ShapeDtypeStruct((B, H, W, Cp), jnp.float32),
        grid_spec=grid_spec,
        compiler_params=pltpu.CompilerParams(
            dimension_semantics=("parallel",),
            vmem_limit_bytes=48 * 1024 * 1024,
        ),
        cost_estimate=cost,
    )(xp, w1p, s1p, b1p, w2p, b2p, fc1w, fc1b, fc2w, fc2b)

    return jnp.transpose(out_nhwc[..., :C], (0, 3, 1, 2))             # back to NCHW


def se_basic_block_reference(x_nchw, params):
    """Pure-JAX f32 reference (same math, no Pallas) for verification."""
    x = jnp.transpose(x_nchw, (0, 2, 3, 1)).astype(jnp.float32)
    eps = 1e-5
    dn = ("NHWC", "HWIO", "NHWC")

    def bn(v, g, b, m, var):
        return (v - m) / jnp.sqrt(var + eps) * g + b

    out = lax.conv_general_dilated(x, params["w1"], (1, 1), "SAME",
                                   dimension_numbers=dn)
    out = jnp.maximum(out, 0.0)
    out = bn(out, params["bn1_gamma"], params["bn1_beta"],
             params["bn1_mean"], params["bn1_var"])
    out = lax.conv_general_dilated(out, params["w2"], (1, 1), "SAME",
                                   dimension_numbers=dn)
    out = bn(out, params["bn2_gamma"], params["bn2_beta"],
             params["bn2_mean"], params["bn2_var"])
    pooled = out.mean(axis=(1, 2))
    z = jnp.maximum(pooled @ params["fc1_w"] + params["fc1_b"], 0.0)
    gate = jax.nn.sigmoid(z @ params["fc2_w"] + params["fc2_b"])
    out = out * gate[:, None, None, :]
    out = jnp.maximum(out + x, 0.0)
    return jnp.transpose(out, (0, 3, 1, 2))


if __name__ == "__main__":
    # inplanes == planes (downsample=None), stride=1, reduction=8.
    B, C, H, W = 2, 32, 16, 16
    reduction = 8
    Cr = C // reduction

    key = jax.random.PRNGKey(0)
    ks = jax.random.split(key, 16)
    params = {
        # conv weights stored HWIO (3, 3, in, out)
        "w1": 0.1 * jax.random.normal(ks[0], (3, 3, C, C), jnp.float32),
        "w2": 0.1 * jax.random.normal(ks[1], (3, 3, C, C), jnp.float32),
        "bn1_gamma": 1.0 + 0.1 * jax.random.normal(ks[2], (C,), jnp.float32),
        "bn1_beta": 0.1 * jax.random.normal(ks[3], (C,), jnp.float32),
        "bn1_mean": 0.1 * jax.random.normal(ks[4], (C,), jnp.float32),
        "bn1_var": 1.0 + 0.1 * jax.random.uniform(ks[5], (C,), jnp.float32),
        "bn2_gamma": 1.0 + 0.1 * jax.random.normal(ks[6], (C,), jnp.float32),
        "bn2_beta": 0.1 * jax.random.normal(ks[7], (C,), jnp.float32),
        "bn2_mean": 0.1 * jax.random.normal(ks[8], (C,), jnp.float32),
        "bn2_var": 1.0 + 0.1 * jax.random.uniform(ks[9], (C,), jnp.float32),
        # SE fc weights stored (in, out) so forward is x @ W + b
        "fc1_w": 0.2 * jax.random.normal(ks[10], (C, Cr), jnp.float32),
        "fc1_b": 0.1 * jax.random.normal(ks[11], (Cr,), jnp.float32),
        "fc2_w": 0.2 * jax.random.normal(ks[12], (Cr, C), jnp.float32),
        "fc2_b": 0.1 * jax.random.normal(ks[13], (C,), jnp.float32),
    }
    x = jax.random.normal(ks[14], (B, C, H, W), jnp.float32)

    out = jax.block_until_ready(se_basic_block(x, params))
    ref = jax.block_until_ready(se_basic_block_reference(x, params))

    # bf16 matmul path vs f32 reference -> relaxed tolerance.
    np.testing.assert_allclose(np.asarray(out), np.asarray(ref), atol=5e-2, rtol=5e-2)
    assert out.shape == (B, C, H, W) and out.dtype == jnp.float32
    print("KERNEL_OK")
</pallas_src>

<mosaic_0001>
module attributes {stable_mosaic.version = 11 : i64} {
  func.func @se_basic_block_kernel(%arg0: i32, %arg1: memref<1x16x16x128xbf16, #tpu.memory_space<vmem>>, %arg2: memref<1152x128xbf16, #tpu.memory_space<vmem>>, %arg3: memref<1x128xf32, #tpu.memory_space<vmem>>, %arg4: memref<1x128xf32, #tpu.memory_space<vmem>>, %arg5: memref<1152x128xbf16, #tpu.memory_space<vmem>>, %arg6: memref<1x128xf32, #tpu.memory_space<vmem>>, %arg7: memref<128x128xf32, #tpu.memory_space<vmem>>, %arg8: memref<1x128xf32, #tpu.memory_space<vmem>>, %arg9: memref<128x128xf32, #tpu.memory_space<vmem>>, %arg10: memref<1x128xf32, #tpu.memory_space<vmem>>, %arg11: memref<1x16x16x128xf32, #tpu.memory_space<vmem>>, %arg12: memref<18x18x128xf32, #tpu.memory_space<vmem>>, %arg13: memref<256x1152xbf16, #tpu.memory_space<vmem>>) attributes {dimension_semantics = [#tpu.dimension_semantics<parallel>], iteration_bounds = array<i64: 2>, scalar_prefetch = 0 : i64, scratch_operands = 2 : i64, tpu.core_type = #tpu.core_type<tc>, window_params = [{transform_indices = @transform_0, window_bounds = array<i64: 1, 16, 16, 128>}, {pipeline_mode = #tpu.pipeline_mode<synchronous>, transform_indices = @transform_1, window_bounds = array<i64: 1152, 128>}, {pipeline_mode = #tpu.pipeline_mode<synchronous>, transform_indices = @transform_2, window_bounds = array<i64: 1, 128>}, {pipeline_mode = #tpu.pipeline_mode<synchronous>, transform_indices = @transform_3, window_bounds = array<i64: 1, 128>}, {pipeline_mode = #tpu.pipeline_mode<synchronous>, transform_indices = @transform_4, window_bounds = array<i64: 1152, 128>}, {pipeline_mode = #tpu.pipeline_mode<synchronous>, transform_indices = @transform_5, window_bounds = array<i64: 1, 128>}, {pipeline_mode = #tpu.pipeline_mode<synchronous>, transform_indices = @transform_6, window_bounds = array<i64: 128, 128>}, {pipeline_mode = #tpu.pipeline_mode<synchronous>, transform_indices = @transform_7, window_bounds = array<i64: 1, 128>}, {pipeline_mode = #tpu.pipeline_mode<synchronous>, transform_indices = @transform_8, window_bounds = array<i64: 128, 128>}, {pipeline_mode = #tpu.pipeline_mode<synchronous>, transform_indices = @transform_9, window_bounds = array<i64: 1, 128>}, {transform_indices = @transform_10, window_bounds = array<i64: 1, 16, 16, 128>}]} {
    %c0 = arith.constant 0 : index
    %c0_0 = arith.constant 0 : index
    %c0_1 = arith.constant 0 : index
    %c0_2 = arith.constant 0 : index
    %0 = vector.load %arg1[%c0, %c0_0, %c0_1, %c0_2] : memref<1x16x16x128xbf16, #tpu.memory_space<vmem>>, vector<1x16x16x128xbf16>
    %1 = vector.shape_cast %0 : vector<1x16x16x128xbf16> to vector<16x16x128xbf16>
    %cst = arith.constant 0.000000e+00 : f32
    %2 = vector.broadcast %cst : f32 to vector<1x18x128xf32>
    %cst_3 = arith.constant 0.000000e+00 : f32
    %3 = vector.broadcast %cst_3 : f32 to vector<18x1x128xf32>
    %c0_4 = arith.constant 0 : index
    %c0_5 = arith.constant 0 : index
    %c0_6 = arith.constant 0 : index
    %4 = vector.load %arg12[%c0_4, %c0_5, %c0_6] : memref<18x18x128xf32, #tpu.memory_space<vmem>>, vector<1x18x128xf32>
    tpu.vector_store %arg12[%c0_4, %c0_5, %c0_6], %2 {strides = array<i32>} : memref<18x18x128xf32, #tpu.memory_space<vmem>>, vector<1x18x128xf32>,
    %c17 = arith.constant 17 : index
    %c0_7 = arith.constant 0 : index
    %c0_8 = arith.constant 0 : index
    %5 = vector.load %arg12[%c17, %c0_7, %c0_8] : memref<18x18x128xf32, #tpu.memory_space<vmem>>, vector<1x18x128xf32>
    tpu.vector_store %arg12[%c17, %c0_7, %c0_8], %2 {strides = array<i32>} : memref<18x18x128xf32, #tpu.memory_space<vmem>>, vector<1x18x128xf32>,
    %c0_9 = arith.constant 0 : index
    %c0_10 = arith.constant 0 : index
    %c0_11 = arith.constant 0 : index
    %6 = vector.load %arg12[%c0_9, %c0_10, %c0_11] : memref<18x18x128xf32, #tpu.memory_space<vmem>>, vector<18x1x128xf32>
    tpu.vector_store %arg12[%c0_9, %c0_10, %c0_11], %3 {strides = array<i32>} : memref<18x18x128xf32, #tpu.memory_space<vmem>>, vector<18x1x128xf32>,
    %c0_12 = arith.constant 0 : index
    %c17_13 = arith.constant 17 : index
    %c0_14 = arith.constant 0 : index
    %7 = vector.load %arg12[%c0_12, %c17_13, %c0_14] : memref<18x18x128xf32, #tpu.memory_space<vmem>>, vector<18x1x128xf32>
    tpu.vector_store %arg12[%c0_12, %c17_13, %c0_14], %3 {strides = array<i32>} : memref<18x18x128xf32, #tpu.memory_space<vmem>>, vector<18x1x128xf32>,
    %8 = arith.extf %1 : vector<16x16x128xbf16> to vector<16x16x128xf32>
    %c1 = arith.constant 1 : index
    %c1_15 = arith.constant 1 : index
    %c0_16 = arith.constant 0 : index
    %9 = vector.load %arg12[%c1, %c1_15, %c0_16] : memref<18x18x128xf32, #tpu.memory_space<vmem>>, vector<16x16x128xf32>
    tpu.vector_store %arg12[%c1, %c1_15, %c0_16], %8 {strides = array<i32>} : memref<18x18x128xf32, #tpu.memory_space<vmem>>, vector<16x16x128xf32>,
    %c0_17 = arith.constant 0 : index
    %c0_18 = arith.constant 0 : index
    %c0_19 = arith.constant 0 : index
    %10 = vector.load %arg12[%c0_17, %c0_18, %c0_19] : memref<18x18x128xf32, #tpu.memory_space<vmem>>, vector<16x16x128xf32>
    %11 = vector.shape_cast %10 : vector<16x16x128xf32> to vector<256x128xf32>
    %12 = arith.truncf %11 : vector<256x128xf32> to vector<256x128xbf16>
    %c0_20 = arith.constant 0 : index
    %c0_21 = arith.constant 0 : index
    %13 = vector.load %arg13[%c0_20, %c0_21] : memref<256x1152xbf16, #tpu.memory_space<vmem>>, vector<256x128xbf16>
    tpu.vector_store %arg13[%c0_20, %c0_21], %12 {strides = array<i32>} : memref<256x1152xbf16, #tpu.memory_space<vmem>>, vector<256x128xbf16>,
    %c0_22 = arith.constant 0 : index
    %c1_23 = arith.constant 1 : index
    %c0_24 = arith.constant 0 : index
    %14 = vector.load %arg12[%c0_22, %c1_23, %c0_24] : memref<18x18x128xf32, #tpu.memory_space<vmem>>, vector<16x16x128xf32>
    %15 = vector.shape_cast %14 : vector<16x16x128xf32> to vector<256x128xf32>
    %16 = arith.truncf %15 : vector<256x128xf32> to vector<256x128xbf16>
    %c0_25 = arith.constant 0 : index
    %c128 = arith.constant 128 : index
    %17 = vector.load %arg13[%c0_25, %c128] : memref<256x1152xbf16, #tpu.memory_space<vmem>>, vector<256x128xbf16>
    tpu.vector_store %arg13[%c0_25, %c128], %16 {strides = array<i32>} : memref<256x1152xbf16, #tpu.memory_space<vmem>>, vector<256x128xbf16>,
    %c0_26 = arith.constant 0 : index
    %c2 = arith.constant 2 : index
    %c0_27 = arith.constant 0 : index
    %18 = vector.load %arg12[%c0_26, %c2, %c0_27] : memref<18x18x128xf32, #tpu.memory_space<vmem>>, vector<16x16x128xf32>
    %19 = vector.shape_cast %18 : vector<16x16x128xf32> to vector<256x128xf32>
    %20 = arith.truncf %19 : vector<256x128xf32> to vector<256x128xbf16>
    %c0_28 = arith.constant 0 : index
    %c256 = arith.constant 256 : index
    %21 = vector.load %arg13[%c0_28, %c256] : memref<256x1152xbf16, #tpu.memory_space<vmem>>, vector<256x128xbf16>
    tpu.vector_store %arg13[%c0_28, %c256], %20 {strides = array<i32>} : memref<256x1152xbf16, #tpu.memory_space<vmem>>, vector<256x128xbf16>,
    %c1_29 = arith.constant 1 : index
    %c0_30 = arith.constant 0 : index
    %c0_31 = arith.constant 0 : index
    %22 = vector.load %arg12[%c1_29, %c0_30, %c0_31] : memref<18x18x128xf32, #tpu.memory_space<vmem>>, vector<16x16x128xf32>
    %23 = vector.shape_cast %22 : vector<16x16x128xf32> to vector<256x128xf32>
    %24 = arith.truncf %23 : vector<256x128xf32> to vector<256x128xbf16>
    %c0_32 = arith.constant 0 : index
    %c384 = arith.constant 384 : index
    %25 = vector.load %arg13[%c0_32, %c384] : memref<256x1152xbf16, #tpu.memory_space<vmem>>, vector<256x128xbf16>
    tpu.vector_store %arg13[%c0_32, %c384], %24 {strides = array<i32>} : memref<256x1152xbf16, #tpu.memory_space<vmem>>, vector<256x128xbf16>,
    %c1_33 = arith.constant 1 : index
    %c1_34 = arith.constant 1 : index
    %c0_35 = arith.constant 0 : index
    %26 = vector.load %arg12[%c1_33, %c1_34, %c0_35] : memref<18x18x128xf32, #tpu.memory_space<vmem>>, vector<16x16x128xf32>
    %27 = vector.shape_cast %26 : vector<16x16x128xf32> to vector<256x128xf32>
    %28 = arith.truncf %27 : vector<256x128xf32> to vector<256x128xbf16>
    %c0_36 = arith.constant 0 : index
    %c512 = arith.constant 512 : index
    %29 = vector.load %arg13[%c0_36, %c512] : memref<256x1152xbf16, #tpu.memory_space<vmem>>, vector<256x128xbf16>
    tpu.vector_store %arg13[%c0_36, %c512], %28 {strides = array<i32>} : memref<256x1152xbf16, #tpu.memory_space<vmem>>, vector<256x128xbf16>,
    %c1_37 = arith.constant 1 : index
    %c2_38 = arith.constant 2 : index
    %c0_39 = arith.constant 0 : index
    %30 = vector.load %arg12[%c1_37, %c2_38, %c0_39] : memref<18x18x128xf32, #tpu.memory_space<vmem>>, vector<16x16x128xf32>
    %31 = vector.shape_cast %30 : vector<16x16x128xf32> to vector<256x128xf32>
    %32 = arith.truncf %31 : vector<256x128xf32> to vector<256x128xbf16>
    %c0_40 = arith.constant 0 : index
    %c640 = arith.constant 640 : index
    %33 = vector.load %arg13[%c0_40, %c640] : memref<256x1152xbf16, #tpu.memory_space<vmem>>, vector<256x128xbf16>
    tpu.vector_store %arg13[%c0_40, %c640], %32 {strides = array<i32>} : memref<256x1152xbf16, #tpu.memory_space<vmem>>, vector<256x128xbf16>,
    %c2_41 = arith.constant 2 : index
    %c0_42 = arith.constant 0 : index
    %c0_43 = arith.constant 0 : index
    %34 = vector.load %arg12[%c2_41, %c0_42, %c0_43] : memref<18x18x128xf32, #tpu.memory_space<vmem>>, vector<16x16x128xf32>
    %35 = vector.shape_cast %34 : vector<16x16x128xf32> to vector<256x128xf32>
    %36 = arith.truncf %35 : vector<256x128xf32> to vector<256x128xbf16>
    %c0_44 = arith.constant 0 : index
    %c768 = arith.constant 768 : index
    %37 = vector.load %arg13[%c0_44, %c768] : memref<256x1152xbf16, #tpu.memory_space<vmem>>, vector<256x128xbf16>
    tpu.vector_store %arg13[%c0_44, %c768], %36 {strides = array<i32>} : memref<256x1152xbf16, #tpu.memory_space<vmem>>, vector<256x128xbf16>,
    %c2_45 = arith.constant 2 : index
    %c1_46 = arith.constant 1 : index
    %c0_47 = arith.constant 0 : index
    %38 = vector.load %arg12[%c2_45, %c1_46, %c0_47] : memref<18x18x128xf32, #tpu.memory_space<vmem>>, vector<16x16x128xf32>
    %39 = vector.shape_cast %38 : vector<16x16x128xf32> to vector<256x128xf32>
    %40 = arith.truncf %39 : vector<256x128xf32> to vector<256x128xbf16>
    %c0_48 = arith.constant 0 : index
    %c896 = arith.constant 896 : index
    %41 = vector.load %arg13[%c0_48, %c896] : memref<256x1152xbf16, #tpu.memory_space<vmem>>, vector<256x128xbf16>
    tpu.vector_store %arg13[%c0_48, %c896], %40 {strides = array<i32>} : memref<256x1152xbf16, #tpu.memory_space<vmem>>, vector<256x128xbf16>,
    %c2_49 = arith.constant 2 : index
    %c2_50 = arith.constant 2 : index
    %c0_51 = arith.constant 0 : index
    %42 = vector.load %arg12[%c2_49, %c2_50, %c0_51] : memref<18x18x128xf32, #tpu.memory_space<vmem>>, vector<16x16x128xf32>
    %43 = vector.shape_cast %42 : vector<16x16x128xf32> to vector<256x128xf32>
    %44 = arith.truncf %43 : vector<256x128xf32> to vector<256x128xbf16>
    %c0_52 = arith.constant 0 : index
    %c1024 = arith.constant 1024 : index
    %45 = vector.load %arg13[%c0_52, %c1024] : memref<256x1152xbf16, #tpu.memory_space<vmem>>, vector<256x128xbf16>
    tpu.vector_store %arg13[%c0_52, %c1024], %44 {strides = array<i32>} : memref<256x1152xbf16, #tpu.memory_space<vmem>>, vector<256x128xbf16>,
    %c0_53 = arith.constant 0 : index
    %c0_54 = arith.constant 0 : index
    %46 = vector.load %arg13[%c0_53, %c0_54] : memref<256x1152xbf16, #tpu.memory_space<vmem>>, vector<256x1152xbf16>
    %c0_55 = arith.constant 0 : index
    %c0_56 = arith.constant 0 : index
    %47 = vector.load %arg2[%c0_55, %c0_56] : memref<1152x128xbf16, #tpu.memory_space<vmem>>, vector<1152x128xbf16>
    %cst_57 = arith.constant dense<0.000000e+00> : vector<256x128xf32>
    %48 = tpu.matmul %46, %47, %cst_57 {dimension_numbers = #tpu.dot_dimension_numbers<[1], [0], [0], [1], [0, 0, 1, 1], [], []>} : vector<256x1152xbf16>, vector<1152x128xbf16>, vector<256x128xf32> -> vector<256x128xf32>
    %cst_58 = arith.constant 0.000000e+00 : f32
    %49 = vector.broadcast %cst_58 : f32 to vector<256x128xf32>
    %50 = arith.maximumf %48, %49 : vector<256x128xf32>
    %c0_59 = arith.constant 0 : index
    %c0_60 = arith.constant 0 : index
    %51 = vector.load %arg3[%c0_59, %c0_60] : memref<1x128xf32, #tpu.memory_space<vmem>>, vector<1x128xf32>
    %52 = vector.broadcast %51 : vector<1x128xf32> to vector<256x128xf32>
    %53 = arith.mulf %50, %52 : vector<256x128xf32>
    %c0_61 = arith.constant 0 : index
    %c0_62 = arith.constant 0 : index
    %54 = vector.load %arg4[%c0_61, %c0_62] : memref<1x128xf32, #tpu.memory_space<vmem>>, vector<1x128xf32>
    %55 = vector.broadcast %54 : vector<1x128xf32> to vector<256x128xf32>
    %56 = arith.addf %53, %55 : vector<256x128xf32>
    %57 = vector.shape_cast %56 : vector<256x128xf32> to vector<16x16x128xf32>
    %c1_63 = arith.constant 1 : index
    %c1_64 = arith.constant 1 : index
    %c0_65 = arith.constant 0 : index
    %58 = vector.load %arg12[%c1_63, %c1_64, %c0_65] : memref<18x18x128xf32, #tpu.memory_space<vmem>>, vector<16x16x128xf32>
    tpu.vector_store %arg12[%c1_63, %c1_64, %c0_65], %57 {strides = array<i32>} : memref<18x18x128xf32, #tpu.memory_space<vmem>>, vector<16x16x128xf32>,
    %c0_66 = arith.constant 0 : index
    %c0_67 = arith.constant 0 : index
    %c0_68 = arith.constant 0 : index
    %59 = vector.load %arg12[%c0_66, %c0_67, %c0_68] : memref<18x18x128xf32, #tpu.memory_space<vmem>>, vector<16x16x128xf32>
    %60 = vector.shape_cast %59 : vector<16x16x128xf32> to vector<256x128xf32>
    %61 = arith.truncf %60 : vector<256x128xf32> to vector<256x128xbf16>
    %c0_69 = arith.constant 0 : index
    %c0_70 = arith.constant 0 : index
    %62 = vector.load %arg13[%c0_69, %c0_70] : memref<256x1152xbf16, #tpu.memory_space<vmem>>, vector<256x128xbf16>
    tpu.vector_store %arg13[%c0_69, %c0_70], %61 {strides = array<i32>} : memref<256x1152xbf16, #tpu.memory_space<vmem>>, vector<256x128xbf16>,
    %c0_71 = arith.constant 0 : index
    %c1_72 = arith.constant 1 : index
    %c0_73 = arith.constant 0 : index
    %63 = vector.load %arg12[%c0_71, %c1_72, %c0_73] : memref<18x18x128xf32, #tpu.memory_space<vmem>>, vector<16x16x128xf32>
    %64 = vector.shape_cast %63 : vector<16x16x128xf32> to vector<256x128xf32>
    %65 = arith.truncf %64 : vector<256x128xf32> to vector<256x128xbf16>
    %c0_74 = arith.constant 0 : index
    %c128_75 = arith.constant 128 : index
    %66 = vector.load %arg13[%c0_74, %c128_75] : memref<256x1152xbf16, #tpu.memory_space<vmem>>, vector<256x128xbf16>
    tpu.vector_store %arg13[%c0_74, %c128_75], %65 {strides = array<i32>} : memref<256x1152xbf16, #tpu.memory_space<vmem>>, vector<256x128xbf16>,
    %c0_76 = arith.constant 0 : index
    %c2_77 = arith.constant 2 : index
    %c0_78 = arith.constant 0 : index
    %67 = vector.load %arg12[%c0_76, %c2_77, %c0_78] : memref<18x18x128xf32, #tpu.memory_space<vmem>>, vector<16x16x128xf32>
    %68 = vector.shape_cast %67 : vector<16x16x128xf32> to vector<256x128xf32>
    %69 = arith.truncf %68 : vector<256x128xf32> to vector<256x128xbf16>
    %c0_79 = arith.constant 0 : index
    %c256_80 = arith.constant 256 : index
    %70 = vector.load %arg13[%c0_79, %c256_80] : memref<256x1152xbf16, #tpu.memory_space<vmem>>, vector<256x128xbf16>
    tpu.vector_store %arg13[%c0_79, %c256_80], %69 {strides = array<i32>} : memref<256x1152xbf16, #tpu.memory_space<vmem>>, vector<256x128xbf16>,
    %c1_81 = arith.constant 1 : index
    %c0_82 = arith.constant 0 : index
    %c0_83 = arith.constant 0 : index
    %71 = vector.load %arg12[%c1_81, %c0_82, %c0_83] : memref<18x18x128xf32, #tpu.memory_space<vmem>>, vector<16x16x128xf32>
    %72 = vector.shape_cast %71 : vector<16x16x128xf32> to vector<256x128xf32>
    %73 = arith.truncf %72 : vector<256x128xf32> to vector<256x128xbf16>
    %c0_84 = arith.constant 0 : index
    %c384_85 = arith.constant 384 : index
    %74 = vector.load %arg13[%c0_84, %c384_85] : memref<256x1152xbf16, #tpu.memory_space<vmem>>, vector<256x128xbf16>
    tpu.vector_store %arg13[%c0_84, %c384_85], %73 {strides = array<i32>} : memref<256x1152xbf16, #tpu.memory_space<vmem>>, vector<256x128xbf16>,
    %c1_86 = arith.constant 1 : index
    %c1_87 = arith.constant 1 : index
    %c0_88 = arith.constant 0 : index
    %75 = vector.load %arg12[%c1_86, %c1_87, %c0_88] : memref<18x18x128xf32, #tpu.memory_space<vmem>>, vector<16x16x128xf32>
    %76 = vector.shape_cast %75 : vector<16x16x128xf32> to vector<256x128xf32>
    %77 = arith.truncf %76 : vector<256x128xf32> to vector<256x128xbf16>
    %c0_89 = arith.constant 0 : index
    %c512_90 = arith.constant 512 : index
    %78 = vector.load %arg13[%c0_89, %c512_90] : memref<256x1152xbf16, #tpu.memory_space<vmem>>, vector<256x128xbf16>
    tpu.vector_store %arg13[%c0_89, %c512_90], %77 {strides = array<i32>} : memref<256x1152xbf16, #tpu.memory_space<vmem>>, vector<256x128xbf16>,
    %c1_91 = arith.constant 1 : index
    %c2_92 = arith.constant 2 : index
    %c0_93 = arith.constant 0 : index
    %79 = vector.load %arg12[%c1_91, %c2_92, %c0_93] : memref<18x18x128xf32, #tpu.memory_space<vmem>>, vector<16x16x128xf32>
    %80 = vector.shape_cast %79 : vector<16x16x128xf32> to vector<256x128xf32>
    %81 = arith.truncf %80 : vector<256x128xf32> to vector<256x128xbf16>
    %c0_94 = arith.constant 0 : index
    %c640_95 = arith.constant 640 : index
    %82 = vector.load %arg13[%c0_94, %c640_95] : memref<256x1152xbf16, #tpu.memory_space<vmem>>, vector<256x128xbf16>
    tpu.vector_store %arg13[%c0_94, %c640_95], %81 {strides = array<i32>} : memref<256x1152xbf16, #tpu.memory_space<vmem>>, vector<256x128xbf16>,
    %c2_96 = arith.constant 2 : index
    %c0_97 = arith.constant 0 : index
    %c0_98 = arith.constant 0 : index
    %83 = vector.load %arg12[%c2_96, %c0_97, %c0_98] : memref<18x18x128xf32, #tpu.memory_space<vmem>>, vector<16x16x128xf32>
    %84 = vector.shape_cast %83 : vector<16x16x128xf32> to vector<256x128xf32>
    %85 = arith.truncf %84 : vector<256x128xf32> to vector<256x128xbf16>
    %c0_99 = arith.constant 0 : index
    %c768_100 = arith.constant 768 : index
    %86 = vector.load %arg13[%c0_99, %c768_100] : memref<256x1152xbf16, #tpu.memory_space<vmem>>, vector<256x128xbf16>
    tpu.vector_store %arg13[%c0_99, %c768_100], %85 {strides = array<i32>} : memref<256x1152xbf16, #tpu.memory_space<vmem>>, vector<256x128xbf16>,
    %c2_101 = arith.constant 2 : index
    %c1_102 = arith.constant 1 : index
    %c0_103 = arith.constant 0 : index
    %87 = vector.load %arg12[%c2_101, %c1_102, %c0_103] : memref<18x18x128xf32, #tpu.memory_space<vmem>>, vector<16x16x128xf32>
    %88 = vector.shape_cast %87 : vector<16x16x128xf32> to vector<256x128xf32>
    %89 = arith.truncf %88 : vector<256x128xf32> to vector<256x128xbf16>
    %c0_104 = arith.constant 0 : index
    %c896_105 = arith.constant 896 : index
    %90 = vector.load %arg13[%c0_104, %c896_105] : memref<256x1152xbf16, #tpu.memory_space<vmem>>, vector<256x128xbf16>
    tpu.vector_store %arg13[%c0_104, %c896_105], %89 {strides = array<i32>} : memref<256x1152xbf16, #tpu.memory_space<vmem>>, vector<256x128xbf16>,
    %c2_106 = arith.constant 2 : index
    %c2_107 = arith.constant 2 : index
    %c0_108 = arith.constant 0 : index
    %91 = vector.load %arg12[%c2_106, %c2_107, %c0_108] : memref<18x18x128xf32, #tpu.memory_space<vmem>>, vector<16x16x128xf32>
    %92 = vector.shape_cast %91 : vector<16x16x128xf32> to vector<256x128xf32>
    %93 = arith.truncf %92 : vector<256x128xf32> to vector<256x128xbf16>
    %c0_109 = arith.constant 0 : index
    %c1024_110 = arith.constant 1024 : index
    %94 = vector.load %arg13[%c0_109, %c1024_110] : memref<256x1152xbf16, #tpu.memory_space<vmem>>, vector<256x128xbf16>
    tpu.vector_store %arg13[%c0_109, %c1024_110], %93 {strides = array<i32>} : memref<256x1152xbf16, #tpu.memory_space<vmem>>, vector<256x128xbf16>,
    %c0_111 = arith.constant 0 : index
    %c0_112 = arith.constant 0 : index
    %95 = vector.load %arg13[%c0_111, %c0_112] : memref<256x1152xbf16, #tpu.memory_space<vmem>>, vector<256x1152xbf16>
    %c0_113 = arith.constant 0 : index
    %c0_114 = arith.constant 0 : index
    %96 = vector.load %arg5[%c0_113, %c0_114] : memref<1152x128xbf16, #tpu.memory_space<vmem>>, vector<1152x128xbf16>
    %cst_115 = arith.constant dense<0.000000e+00> : vector<256x128xf32>
    %97 = tpu.matmul %95, %96, %cst_115 {dimension_numbers = #tpu.dot_dimension_numbers<[1], [0], [0], [1], [0, 0, 1, 1], [], []>} : vector<256x1152xbf16>, vector<1152x128xbf16>, vector<256x128xf32> -> vector<256x128xf32>
    %c0_116 = arith.constant 0 : index
    %c0_117 = arith.constant 0 : index
    %98 = vector.load %arg6[%c0_116, %c0_117] : memref<1x128xf32, #tpu.memory_space<vmem>>, vector<1x128xf32>
    %99 = vector.broadcast %98 : vector<1x128xf32> to vector<256x128xf32>
    %100 = arith.addf %97, %99 : vector<256x128xf32>
    %cst_118 = arith.constant dense<0.000000e+00> : vector<128xf32>
    %101 = vector.multi_reduction <add>, %100, %cst_118 [0] : vector<256x128xf32> to vector<128xf32>
    %102 = vector.shape_cast %101 : vector<128xf32> to vector<1x128xf32>
    %cst_119 = arith.constant 2.560000e+02 : f32
    %103 = vector.broadcast %cst_119 : f32 to vector<1x128xf32>
    %104 = arith.divf %102, %103 : vector<1x128xf32>
    %c0_120 = arith.constant 0 : index
    %c0_121 = arith.constant 0 : index
    %105 = vector.load %arg7[%c0_120, %c0_121] : memref<128x128xf32, #tpu.memory_space<vmem>>, vector<128x128xf32>
    %cst_122 = arith.constant dense<0.000000e+00> : vector<1x128xf32>
    %106 = tpu.matmul %104, %105, %cst_122 {dimension_numbers = #tpu.dot_dimension_numbers<[1], [0], [0], [1], [0, 0, 1, 1], [], []>} : vector<1x128xf32>, vector<128x128xf32>, vector<1x128xf32> -> vector<1x128xf32>
    %c0_123 = arith.constant 0 : index
    %c0_124 = arith.constant 0 : index
    %107 = vector.load %arg8[%c0_123, %c0_124] : memref<1x128xf32, #tpu.memory_space<vmem>>, vector<1x128xf32>
    %108 = arith.addf %106, %107 : vector<1x128xf32>
    %cst_125 = arith.constant 0.000000e+00 : f32
    %109 = vector.broadcast %cst_125 : f32 to vector<1x128xf32>
    %110 = arith.maximumf %108, %109 : vector<1x128xf32>
    %c0_126 = arith.constant 0 : index
    %c0_127 = arith.constant 0 : index
    %111 = vector.load %arg9[%c0_126, %c0_127] : memref<128x128xf32, #tpu.memory_space<vmem>>, vector<128x128xf32>
    %cst_128 = arith.constant dense<0.000000e+00> : vector<1x128xf32>
    %112 = tpu.matmul %110, %111, %cst_128 {dimension_numbers = #tpu.dot_dimension_numbers<[1], [0], [0], [1], [0, 0, 1, 1], [], []>} : vector<1x128xf32>, vector<128x128xf32>, vector<1x128xf32> -> vector<1x128xf32>
    %c0_129 = arith.constant 0 : index
    %c0_130 = arith.constant 0 : index
    %113 = vector.load %arg10[%c0_129, %c0_130] : memref<1x128xf32, #tpu.memory_space<vmem>>, vector<1x128xf32>
    %114 = arith.addf %112, %113 : vector<1x128xf32>
    %115 = arith.negf %114 : vector<1x128xf32>
    %116 = math.exp %115 : vector<1x128xf32>
    %cst_131 = arith.constant 1.000000e+00 : f32
    %117 = vector.broadcast %cst_131 : f32 to vector<1x128xf32>
    %118 = arith.addf %117, %116 : vector<1x128xf32>
    %119 = arith.divf %117, %118 : vector<1x128xf32>
    %120 = vector.shape_cast %1 : vector<16x16x128xbf16> to vector<256x128xbf16>
    %121 = arith.extf %120 : vector<256x128xbf16> to vector<256x128xf32>
    %122 = vector.broadcast %119 : vector<1x128xf32> to vector<256x128xf32>
    %123 = arith.mulf %100, %122 : vector<256x128xf32>
    %124 = arith.addf %123, %121 : vector<256x128xf32>
    %cst_132 = arith.constant 0.000000e+00 : f32
    %125 = vector.broadcast %cst_132 : f32 to vector<256x128xf32>
    %126 = arith.maximumf %124, %125 : vector<256x128xf32>
    %127 = vector.shape_cast %126 : vector<256x128xf32> to vector<1x16x16x128xf32>
    %c0_133 = arith.constant 0 : index
    %c0_134 = arith.constant 0 : index
    %c0_135 = arith.constant 0 : index
    %c0_136 = arith.constant 0 : index
    %128 = vector.load %arg11[%c0_133, %c0_134, %c0_135, %c0_136] : memref<1x16x16x128xf32, #tpu.memory_space<vmem>>, vector<1x16x16x128xf32>
    tpu.vector_store %arg11[%c0_133, %c0_134, %c0_135, %c0_136], %127 {strides = array<i32>} : memref<1x16x16x128xf32, #tpu.memory_space<vmem>>, vector<1x16x16x128xf32>,
    return
  }
  func.func @transform_0(%arg0: i32) -> (i32, i32, i32, i32) {
    %c0_i32 = arith.constant 0 : i32
    %c0_i32_0 = arith.constant 0 : i32
    %c0_i32_1 = arith.constant 0 : i32
    %c0_i32_2 = arith.constant 0 : i32
    return %arg0, %c0_i32, %c0_i32_0, %c0_i32_1 : i32, i32, i32, i32
  }
  func.func @transform_1(%arg0: i32) -> (i32, i32) {
    %c0_i32 = arith.constant 0 : i32
    %c0_i32_0 = arith.constant 0 : i32
    %c0_i32_1 = arith.constant 0 : i32
    return %c0_i32, %c0_i32_0 : i32, i32
  }
  func.func @transform_2(%arg0: i32) -> (i32, i32) {
    %c0_i32 = arith.constant 0 : i32
    %c0_i32_0 = arith.constant 0 : i32
    %c0_i32_1 = arith.constant 0 : i32
    return %c0_i32, %c0_i32_0 : i32, i32
  }
  func.func @transform_3(%arg0: i32) -> (i32, i32) {
    %c0_i32 = arith.constant 0 : i32
    %c0_i32_0 = arith.constant 0 : i32
    %c0_i32_1 = arith.constant 0 : i32
    return %c0_i32, %c0_i32_0 : i32, i32
  }
  func.func @transform_4(%arg0: i32) -> (i32, i32) {
    %c0_i32 = arith.constant 0 : i32
    %c0_i32_0 = arith.constant 0 : i32
    %c0_i32_1 = arith.constant 0 : i32
    return %c0_i32, %c0_i32_0 : i32, i32
  }
  func.func @transform_5(%arg0: i32) -> (i32, i32) {
    %c0_i32 = arith.constant 0 : i32
    %c0_i32_0 = arith.constant 0 : i32
    %c0_i32_1 = arith.constant 0 : i32
    return %c0_i32, %c0_i32_0 : i32, i32
  }
  func.func @transform_6(%arg0: i32) -> (i32, i32) {
    %c0_i32 = arith.constant 0 : i32
    %c0_i32_0 = arith.constant 0 : i32
    %c0_i32_1 = arith.constant 0 : i32
    return %c0_i32, %c0_i32_0 : i32, i32
  }
  func.func @transform_7(%arg0: i32) -> (i32, i32) {
    %c0_i32 = arith.constant 0 : i32
    %c0_i32_0 = arith.constant 0 : i32
    %c0_i32_1 = arith.constant 0 : i32
    return %c0_i32, %c0_i32_0 : i32, i32
  }
  func.func @transform_8(%arg0: i32) -> (i32, i32) {
    %c0_i32 = arith.constant 0 : i32
    %c0_i32_0 = arith.constant 0 : i32
    %c0_i32_1 = arith.constant 0 : i32
    return %c0_i32, %c0_i32_0 : i32, i32
  }
  func.func @transform_9(%arg0: i32) -> (i32, i32) {
    %c0_i32 = arith.constant 0 : i32
    %c0_i32_0 = arith.constant 0 : i32
    %c0_i32_1 = arith.constant 0 : i32
    return %c0_i32, %c0_i32_0 : i32, i32
  }
  func.func @transform_10(%arg0: i32) -> (i32, i32, i32, i32) {
    %c0_i32 = arith.constant 0 : i32
    %c0_i32_0 = arith.constant 0 : i32
    %c0_i32_1 = arith.constant 0 : i32
    %c0_i32_2 = arith.constant 0 : i32
    return %arg0, %c0_i32, %c0_i32_0, %c0_i32_1 : i32, i32, i32, i32
  }
}

</mosaic_0001>

<bundles_post_ra>
// kernel: tpu_custom_call.1
= control target key start
LH: loop header
LB: loop body
LE: loop exit
PB: predicated region body
PF: predicated region fallthrough
CT: control target
= control target key end

     0   :  { %s11987_s0 = inlined_call_operand.hbm [shape: bf16[2,16,16,128], index: 0, kind: input, shape index: {}]   ;;  %s11988_s1 = inlined_call_operand.hbm [shape: bf16[1152,128], index: 1, kind: input, shape index: {}]   ;;  %s11989_s2 = inlined_call_operand.vmem [shape: f32[1,128], index: 2, kind: input, shape index: {}]   ;;  %s11990_s3 = inlined_call_operand.vmem [shape: f32[1,128], index: 3, kind: input, shape index: {}]   ;;  %s11991_s4 = inlined_call_operand.hbm [shape: bf16[1152,128], index: 4, kind: input, shape index: {}]   ;;  %s11992_s5 = inlined_call_operand.vmem [shape: f32[1,128], index: 5, kind: input, shape index: {}]   ;;  %s11993_s6 = inlined_call_operand.hbm [shape: f32[128,128], index: 6, kind: input, shape index: {}]   ;;  %s11994_s7 = inlined_call_operand.vmem [shape: f32[1,128], index: 7, kind: input, shape index: {}]   ;;  %s11995_s8 = inlined_call_operand.hbm [shape: f32[128,128], index: 8, kind: input, shape index: {}]   ;;  %s11996_s9 = inlined_call_operand.vmem [shape: f32[1,128], index: 9, kind: input, shape index: {}]   ;;  %s11997_s10 = inlined_call_operand.hbm [shape: f32[2,16,16,128], index: 10, kind: output, shape index: {}]  }
   0x1   :  { %12047 = sst [smem:[#allocation64_spill]] %s11988_s1 }
   0x2   :  { %12048 = sst [smem:[#allocation65_spill]] %s11991_s4 }
   0x3   :  { %12049 = sst [smem:[#allocation66_spill]] %s11993_s6 }
   0x4   :  { %12050 = sst [smem:[#allocation67_spill]] %s11995_s8 }
   0x5   :  { %15 = vsyncpa [#allocation5], 0 }
   0x6   :  { %17 = vsyncpa [#allocation5 + $0x1], 0 }
   0x7   :  { %18 = vsyncpa [#allocation8], 0 }
   0x8   :  { %19 = vsyncpa [#allocation11], 0 }
   0x9   :  { %20 = vsyncpa [#allocation6], 0 }
   0xa   :  { %22 = vsyncpa [#allocation6 + $0x1], 0  ;;  %s10080_s13 = smov 0   ;;  %s10082_s14 = smov 0  }
   0xb   :  { %s10084_s15 = smov 0   ;;  %s10086_s16 = smov 0  }
   0xc LB: > { %12051 = sst [smem:[#allocation18_spill]] %s10006_s15  ;;  %s10101_s17 = sadd.s32 4294967295, %s10010_s16   ;;  %s10010_s16 = sphi %s10086_s16, %s12176_s16   ;;  %s10006_s15 = sphi %s10084_s15, %s12173_s15   ;;  %s10002_s14 = sphi %s10082_s14, %s12175_s14   ;;  %s9998_s13 = sphi %s10080_s13, %s12174_s13  }
   0xd   : > { %s7396_s18 = sadd.s32 4294967294, %s10010_s16   ;;  %p48_p0 = scmp.ne.s32.totalorder %s10002_s14, %s9998_s13 }
   0xe   : > { %p49_p1 = scmp.eq.s32.totalorder %s10101_s17, 0  ;;  %p261_p2 = scmp.eq.s32.totalorder %s10101_s17, 1 }
   0xf   : > { %p267_p3 = scmp.eq.s32.totalorder %s7396_s18, 1  ;;  %p7397_p5 = scmp.ge.s32.totalorder %s10010_s16, 1 }
  0x10   : > { %p10110_p4 = por %p49_p1, %p48_p0  ;;  %p274_p7 = scmp.lt.s32.totalorder %s10010_s16, 3 }
  0x11   : > { %p10115_p6 = por %p267_p3, %p48_p0  ;;  %s12054_s1 = sld [smem:[#allocation64_spill]] }
  0x12   : > { %p10123_p8 = pnand %p7397_p5, %p274_p7  ;;  %s10012_s25 = smov [#allocation7]  }
  0x13   : > { %s287_s26 = sshll.u32 %s10012_s25, 4  ;;  %s12057_s6 = sld [smem:[#allocation66_spill]]  ;;  %s288_s26 = int_to_ptr.vmem [resolvable:$true] %s287_s26 }
  0x14   : > { %p9696_p9 = pneg %p10123_p8  ;;  %s11998_s11 = smov 64  }
  0x15   : > { %s12000_s12 = smov 4   ;;  %s10015_s18 = smov [#allocation10]  }
  0x16   : > { %p10131_p10 = pnand %p9696_p9, %p49_p1  ;;  %s324_s21 = sshll.u32 %s10015_s18, 4  ;;  %s325_s21 = int_to_ptr.vmem [resolvable:$true] %s324_s21 }
  0x17   : > { %s285_s23 = sshll.u32 %s12054_s1, 4  ;;  %s10016_s22 = smov 128   ;;  %s286_s23 = int_to_ptr.hbm [resolvable:$true] %s285_s23 }
  0x18   : > { %9699 = dma.hbm_to_vmem [thread:$0]  (!%p10131_p10), %s286_s23, 9216, %s288_s26, [#allocation8], %s11998_s11, %s11998_s11, %s12000_s12  }
  0x19   : > { %s322_s30 = sshll.u32 %s12057_s6, 4  ;;  %s10017_s25 = smov 8   ;;  %s323_s30 = int_to_ptr.hbm [resolvable:$true] %s322_s30 }
  0x1a   : > { %9705 = dma.hbm_to_vmem [thread:$0]  (!%p10131_p10), %s323_s30, 2048, %s325_s21, [#allocation11], %s10016_s22, %s10016_s22, %s10017_s25  }
  0x1b   : > { %s12058_s4 = sld [smem:[#allocation65_spill]]  ;;  %s10018_s23 = smov [#allocation9]  }
  0x1c   : > { %s307_s26 = sshll.u32 %s10018_s23, 4  ;;  %s12059_s8 = sld [smem:[#allocation67_spill]]  ;;  %s308_s26 = int_to_ptr.vmem [resolvable:$true] %s307_s26 }
  0x1d   : > { %s12060_s30 = smov 4   ;;  %s12061_s21 = smov 64  }
  0x1e   : > { %s10019_s28 = smov [#allocation12]   ;;  %s10160_s23 = sadd.s32 1, %s10010_s16  }
  0x1f   : > { %s341_s29 = sshll.u32 %s10019_s28, 4  ;;  %s32_s11 = ssub.s32 %s10010_s16, %s10160_s23  ;;  %s342_s29 = int_to_ptr.vmem [resolvable:$true] %s341_s29 }
  0x20   : > { %p42_p12 = scmp.ne.s32.totalorder %s10006_s15, %s10002_s14  ;;  %p33_p13 = scmp.eq.s32.totalorder %s32_s11, 0 }
  0x21   : > { %s305_s1 = sshll.u32 %s12058_s4, 4  ;;  %s35_s4 = sadd.s32 1, %s10006_s15  ;;  %s306_s1 = int_to_ptr.hbm [resolvable:$true] %s305_s1 }
  0x22   : > { %s339_s12 = sshll.u32 %s12059_s8, 4  ;;  %p43_p0 = scmp.eq.s32.totalorder %s10010_s16, 0  ;;  %s340_s12 = int_to_ptr.hbm [resolvable:$true] %s339_s12 }
  0x23   : > { %9702 = dma.hbm_to_vmem [thread:$0]  (!%p10131_p10), %s306_s1, 9216, %s308_s26, [#allocation8], %s12061_s21, %s12061_s21, %s12060_s30  }
  0x24   : > { %9708 = dma.hbm_to_vmem [thread:$0]  (!%p10131_p10), %s340_s12, 2048, %s342_s29, [#allocation11], %s10016_s22, %s10016_s22, %s10017_s25  }
  0x25   : > { %p10170_p3 = por %p261_p2, %p42_p12  ;;  %p9721_p5 = scmp.lt.s32.totalorder %s10010_s16, 2 }
  0x26   : > { %s10176_s1 = scalar_select %p33_p13, %s10006_s15, %s35_s4  }
  0x27   : > { %p44_p7 = por %p43_p0, %p42_p12  ;;  %s358_s26 = sand.u32 1, %s10006_s15  }
  0x28   : > { %12063 = sst [smem:[#allocation19_spill]] %s10176_s1  ;;  %s7403_s27 = sshll.u32 %s358_s26, 7 }
  0x29   : > { %s9147_s12 = sshll.u32 %s10010_s16, 7  ;;  %s362_s29 = scalar_lea.vmem [#allocation4], %s7403_s27 }
  0x2a   : > { %s367_s28 = scalar_lea.hbm %s11987_s0, %s9147_s12  ;;  %s370_s6 = sshll.u32 %s362_s29, 4  ;;  %s371_s6 = int_to_ptr.vmem [resolvable:$true] %s370_s6 }
  0x2b   : > { %s368_s11 = sshll.u32 %s367_s28, 4  ;;  %p10183_p2 = pnand %p9721_p5, %p44_p7  ;;  %s369_s11 = int_to_ptr.hbm [resolvable:$true] %s368_s11 }
  0x2c   : > { %s359_s4 = scalar_lea.sflag [#allocation5], %s358_s26  ;;  %s9906_s1 = sshra.s32 %s369_s11, 4  ;;  %s9907_s1 = int_to_ptr.hbm [resolvable:$true] %s9906_s1 }
  0x2d   : > { %s9908_s15 = scalar_lea.hbm %s9907_s1, 128  ;;  %p9910_p10 = pneg %p10183_p2 }
  0x2e   : > { %p9909_p9 = scmp.ne.s32.totalorder %s9907_s1, %s9908_s15  ;;  %s9913_s22 = scalar_lea.hbm %s11987_s0, 256 }
  0x2f   : > { %p9914_p0 = scmp.lt.s32.totalorder %s9907_s1, %s11987_s0  ;;  %p9915_p5 = scmp.lt.s32.totalorder %s9913_s22, %s9908_s15 }
  0x30   : > { %p9911_p12 = pnand %p9910_p10, %p9909_p9 }
  0x31   : > { %p9916_p7 = por %p9915_p5, %p9914_p0 }
  0x32   : > { %p9912_p13 = pneg %p9911_p12 }
  0x34   : > { %p9917_p11 = pnand %p9916_p7, %p9912_p13 }
  0x36   : > { %9920 = shalt.err (!%p9917_p11)
}
  0x37   : > { %9712 = dma.hbm_to_vmem [thread:$0]  (!%p10183_p2), %s369_s11, 2048, %s371_s6, %s359_s4, %s12061_s21, %s12061_s21, %s12060_s30  }
  0x38   : > { %382 = sbr.rel (%p10123_p8) target bundleno = 1940 (0x794), region = 60 }
  0x3d   : > { %s10203_s26 = sand.u32 1, %s10002_s14  }
  0x3e   : > { %s7407_s1 = sshll.u32 %s10203_s26, 7  ;;  %s385_s15 = scalar_lea.sflag [#allocation5], %s10203_s26 }
  0x3f   : > { %s10207_s29 = scalar_lea.vmem [#allocation4], %s7407_s1 }
  0x40   : > { %9981 = dma.done.wait (%p10110_p4), %s385_s15, 2048  }
  0x41   : > { %9983 = vsyncadd (%p10110_p4), %s385_s15, 4294965248 }
  0x42   : > { %9985 = dma.done.wait (%p49_p1), [#allocation8], 18432  }
  0x43   : > { %9987 = vsyncadd (%p49_p1), [#allocation8], 4294948864 }
  0x44   : > { %9989 = dma.done.wait (%p49_p1), [#allocation11], 4096  }
  0x45   : > { %9991 = vsyncadd (%p49_p1), [#allocation11], 4294963200  ;;  %v10020_v0 = vmov 0.0   ;;  %v10021_v1 = vmov 0.0|0.0   ;;  %v9299_v2 = vld [vmem:[#allocation7 + $0x38] sm:$0xff]  ;;  %v9298_v4 = vld [vmem:[#allocation7 + $0x30] sm:$0xff] }
  0x46   : > { %478 = vst [vmem:[#allocation2] sm:$0xff] %v10020_v0  ;;  %v9307_v3 = vld [vmem:[#allocation7 + $0x78] sm:$0xff]  ;;  %2923 = vmatpush.bf16.msra.mxu0 %v9299_v2  ;;  %9660 = vmatpush.bf16.msra.mxu2 %v9299_v2  ;;  %v9306_v5 = vld [vmem:[#allocation7 + $0x70] sm:$0xff]  ;;  %v9297_v8 = vld [vmem:[#allocation7 + $0x28] sm:$0xff]  ;;  %s7412_s30 = sshll.u32 %s10203_s26, 8  ;;  %s9580_s11 = sshll.u32 %s10101_s17, 8 }
  0x47   : > { %479 = vst [vmem:[#allocation2 + $0x8] sm:$0xff] %v10020_v0  ;;  %3012 = vmatpush.bf16.msra.mxu1 %v9307_v3  ;;  %9668 = vmatpush.bf16.msra.mxu3 %v9307_v3  ;;  %v9305_v9 = vld [vmem:[#allocation7 + $0x68] sm:$0xff]  ;;  %v9296_v11 = vld [vmem:[#allocation7 + $0x20] sm:$0xff]  ;;  %v9295_v13 = vld [vmem:[#allocation7 + $0x18] sm:$0xff]  ;;  %s11858_s21 = scalar_lea.vmem [#allocation13], %s7412_s30  ;;  %s7281_s17 = scalar_lea.hbm %s11997_s10, %s9580_s11 }
  0x48   : > { %485 = vst [vmem:[#allocation2] sm:$0x1] %v10020_v0  ;;  %v9304_v12 = vld [vmem:[#allocation7 + $0x60] sm:$0xff]  ;;  %v9303_v14 = vld [vmem:[#allocation7 + $0x58] sm:$0xff]  ;;  %v9294_v16 = vld [vmem:[#allocation7 + $0x10] sm:$0xff]  ;;  %s7282_s27 = sshll.u32 %s11858_s21, 4  ;;  %s7283_s27 = int_to_ptr.vmem [resolvable:$true] %s7282_s27 }
  0x49   : > { %651 = vst [vmem:[#allocation3 + $0x24] sm:$0xf] %v10021_v1  ;;  %v9302_v17 = vld [vmem:[#allocation7 + $0x50] sm:$0xff]  ;;  %v9293_v18 = vld [vmem:[#allocation7 + $0x8] sm:$0xff]  ;;  %v9292_v20 = vld [vmem:[#allocation7] sm:$0xff]  ;;  %s7284_s22 = sshll.u32 %s7281_s17, 4  ;;  %s7285_s22 = int_to_ptr.hbm [resolvable:$true] %s7284_s22 }
  0x4a   : > { %480 = vst [vmem:[#allocation2 + $0x10] sm:$0x3] %v10020_v0  ;;  %2924 = vmatpush.bf16.msra.mxu0 %v9298_v4  ;;  %9661 = vmatpush.bf16.msra.mxu2 %v9298_v4  ;;  %v9301_v19 = vld [vmem:[#allocation7 + $0x48] sm:$0xff]  ;;  %v9300_v21 = vld [vmem:[#allocation7 + $0x40] sm:$0xff]  ;;  %v9331_v22 = vld [vmem:[#allocation7 + $0x138] sm:$0xff]  ;;  %s7270_s25 = scalar_lea.sflag [#allocation6], %s10203_s26 }
  0x4b   : > { %482 = vst [vmem:[#allocation2 + $0x198] sm:$0xff] %v10020_v0  ;;  %3013 = vmatpush.bf16.msra.mxu1 %v9306_v5  ;;  %9669 = vmatpush.bf16.msra.mxu3 %v9306_v5  ;;  %v9652_v24 = vld [vmem:[%s10207_s29 + $0x40] sm:$0xff]   ;;  %v9330_v35 = vld [vmem:[#allocation7 + $0x130] sm:$0xff]  ;;  %v9315_v36 = vld [vmem:[#allocation7 + $0xb8] sm:$0xff]  ;;  %s9950_s28 = sshra.s32 %s7285_s22, 4  ;;  %s9956_s6 = scalar_lea.hbm %s11997_s10, 512  ;;  %s9951_s28 = int_to_ptr.hbm [resolvable:$true] %s9950_s28 }
  0x4c   : > { %483 = vst [vmem:[#allocation2 + $0x1a0] sm:$0xff] %v10020_v0  ;;  %v10261_v25 = vunpack.c.l.bf16 %v9652_v24  ;;  %v10264_v26 = vunpack.c.h.bf16 %v9652_v24  ;;  %v9582_v31 = vld [vmem:[%s10207_s29] sm:$0xff]   ;;  %v9323_v37 = vld [vmem:[#allocation7 + $0xf8] sm:$0xff]  ;;  %v9653_v42 = vld [vmem:[%s10207_s29 + $0x48] sm:$0xff]   ;;  %s9952_s1 = scalar_lea.hbm %s9951_s28, 256  ;;  %p9957_p11 = scmp.lt.s32.totalorder %s9951_s28, %s11997_s10 }
  0x4d   : > { %484 = vst [vmem:[#allocation2 + $0x1a8] sm:$0x3] %v10020_v0  ;;  %v10278_v34 = vunpack.c.l.bf16 %v9582_v31  ;;  %v10280_v41 = vunpack.c.h.bf16 %v9582_v31  ;;  %v10284_v44 = vunpack.c.l.bf16 %v9653_v42  ;;  %v10287_v46 = vunpack.c.h.bf16 %v9653_v42  ;;  %v9645_v56 = vld [vmem:[%s10207_s29 + $0x8] sm:$0xff]   ;;  %v9654_v2 = vld [vmem:[%s10207_s29 + $0x50] sm:$0xff]   ;;  %p9953_p1 = scmp.ne.s32.totalorder %s9951_s28, %s9952_s1  ;;  %p9958_p2 = scmp.lt.s32.totalorder %s9956_s6, %s9952_s1 }
  0x4e   : > { %486 = vst [vmem:[#allocation2 + $0x18] sm:$0x1] %v10020_v0  ;;  %2925 = vmatpush.bf16.msra.mxu0 %v9297_v8  ;;  %9662 = vmatpush.bf16.msra.mxu2 %v9297_v8  ;;  %v682_v27 = vld [vmem:[#allocation2 + $0x1] sm:$0xff]  ;;  %v732_v32 = vpack.c.bf16 %v10261_v25, %v10261_v25  ;;  %v733_v33 = vpack.c.bf16 %v10264_v26, %v10264_v26  ;;  %v10303_v63 = vunpack.c.l.bf16 %v9645_v56  ;;  %v9329_v4 = vld [vmem:[#allocation7 + $0x128] sm:$0xff] }
  0x4f   : > { %487 = vst [vmem:[#allocation2 + $0x30] sm:$0x1] %v10020_v0  ;;  %v586_v6 = vld [vmem:[#allocation2] sm:$0xff]  ;;  %3014 = vmatpush.bf16.msra.mxu1 %v9305_v9  ;;  %9670 = vmatpush.bf16.msra.mxu3 %v9305_v9  ;;  %v714_v29 = vpack.c.bf16 %v682_v27, %v682_v27  ;;  %v716_v48 = vpack.c.bf16 %v10278_v34, %v10278_v34  ;;  %v10312_v9 = vunpack.c.l.bf16 %v9654_v2  ;;  %p9954_p4 = pnand %p9953_p1, %p10170_p3  ;;  %p9959_p9 = por %p9958_p2, %p9957_p11 }
  0x50   : > { %488 = vst [vmem:[#allocation2 + $0x48] sm:$0x1] %v10020_v0  ;;  %v10231_v7 = vld [vmem:[#allocation3 + $0x20] sm:$0xf0]  ;;  %v618_v10 = vpack.c.bf16 %v586_v6, %v586_v6  ;;  %v717_v51 = vpack.c.bf16 %v10280_v41, %v10280_v41  ;;  %v734_v55 = vpack.c.bf16 %v10284_v44, %v10284_v44  ;;  %v735_v59 = vpack.c.bf16 %v10287_v46, %v10287_v46  ;;  %v9314_v3 = vld [vmem:[#allocation7 + $0xb0] sm:$0xff] }
  0x51   : > { %489 = vst [vmem:[#allocation2 + $0x60] sm:$0x1] %v10020_v0  ;;  %v683_v28 = vld [vmem:[#allocation2 + $0x9] sm:$0xff]  ;;  %v9322_v5 = vld [vmem:[#allocation7 + $0xf0] sm:$0xff]  ;;  %p9955_p8 = pneg %p9954_p4 }
  0x52   : > { %3925 = vst [vmem:[#allocation3 + $0x24] sm:$0xf] %v10021_v1  ;;  %2926 = vmatpush.bf16.msra.mxu0 %v9296_v11  ;;  %9663 = vmatpush.bf16.msra.mxu2 %v9296_v11  ;;  %v715_v30 = vpack.c.bf16 %v683_v28, %v683_v28  ;;  %v10307_v1 = vunpack.c.h.bf16 %v9645_v56  ;;  %v10315_v11 = vunpack.c.h.bf16 %v9654_v2 }
  0x53   : > { %490 = vst [vmem:[#allocation2 + $0x78] sm:$0x1] %v10020_v0  ;;  %3015 = vmatpush.bf16.msra.mxu1 %v9304_v12  ;;  %9671 = vmatpush.bf16.msra.mxu3 %v9304_v12  ;;  %p9960_p10 = pnand %p9959_p9, %p9955_p8 }
  0x54   : > { %650 = vst [vmem:[#allocation3] sm:$0xf] %v618_v10 }
  0x55   : > { %491 = vst [vmem:[#allocation2 + $0x90] sm:$0x1] %v10020_v0 }
  0x56   : > { %492 = vst [vmem:[#allocation2 + $0xa8] sm:$0x1] %v10020_v0  ;;  %2927 = vmatpush.bf16.msra.mxu0 %v9295_v13  ;;  %9664 = vmatpush.bf16.msra.mxu2 %v9295_v13 }
  0x57   : > { %493 = vst [vmem:[#allocation2 + $0xc0] sm:$0x1] %v10020_v0  ;;  %3016 = vmatpush.bf16.msra.mxu1 %v9303_v14  ;;  %9672 = vmatpush.bf16.msra.mxu3 %v9303_v14  ;;  %v718_v14 = vpack.c.bf16 %v10303_v63, %v10303_v63 }
  0x58   : > { %494 = vst [vmem:[#allocation2 + $0xd8] sm:$0x1] %v10020_v0 }
  0x59   : > { %495 = vst [vmem:[#allocation2 + $0xf0] sm:$0x1] %v10020_v0 }
  0x5a   : > { %496 = vst [vmem:[#allocation2 + $0x108] sm:$0x1] %v10020_v0  ;;  %2928 = vmatpush.bf16.msra.mxu0 %v9294_v16  ;;  %9665 = vmatpush.bf16.msra.mxu2 %v9294_v16 }
  0x5b   : > { %v7415_v15 = vld [vmem:[#allocation3] sm:$0xf]  ;;  %497 = vst [vmem:[#allocation2 + $0x120] sm:$0x1] %v10020_v0  ;;  %3017 = vmatpush.bf16.msra.mxu1 %v9302_v17  ;;  %9673 = vmatpush.bf16.msra.mxu3 %v9302_v17 }
  0x5c   : > { %3924 = vst [vmem:[#allocation3] sm:$0xf] %v618_v10  ;;  %v7416_v23 = vor.u32 %v10231_v7, %v7415_v15  ;;  %v719_v15 = vpack.c.bf16 %v10307_v1, %v10307_v1 }
  0x5d   : > { %498 = vst [vmem:[#allocation2 + $0x138] sm:$0x1] %v10020_v0 }
  0x5e   : > { %499 = vst [vmem:[#allocation2 + $0x150] sm:$0x1] %v10020_v0  ;;  %2929 = vmatpush.bf16.msra.mxu0 %v9293_v18  ;;  %9666 = vmatpush.bf16.msra.mxu2 %v9293_v18  ;;  %v736_v18 = vpack.c.bf16 %v10312_v9, %v10312_v9 }
  0x5f   : > { %500 = vst [vmem:[#allocation2 + $0x168] sm:$0x1] %v10020_v0  ;;  %3018 = vmatpush.bf16.msra.mxu1 %v9301_v19  ;;  %9674 = vmatpush.bf16.msra.mxu3 %v9301_v19 }
  0x60   : > { %501 = vst [vmem:[#allocation2 + $0x180] sm:$0x1] %v10020_v0 }
  0x61   : > { %504 = vst [vmem:[#allocation2 + $0x29] sm:$0x1] %v10020_v0 }
  0x62   : > { %505 = vst [vmem:[#allocation2 + $0x41] sm:$0x1] %v10020_v0  ;;  %2930 = vmatpush.bf16.msra.mxu0 %v9292_v20  ;;  %9667 = vmatpush.bf16.msra.mxu2 %v9292_v20 }
  0x63   : > { %506 = vst [vmem:[#allocation2 + $0x59] sm:$0x1] %v10020_v0  ;;  %3019 = vmatpush.bf16.msra.mxu1 %v9300_v21  ;;  %9675 = vmatpush.bf16.msra.mxu3 %v9300_v21  ;;  %v737_v21 = vpack.c.bf16 %v10315_v11, %v10315_v11 }
  0x64   : > { %507 = vst [vmem:[#allocation2 + $0x71] sm:$0x1] %v10020_v0 }
  0x65   : > { %508 = vst [vmem:[#allocation2 + $0x89] sm:$0x1] %v10020_v0  ;;  %2931 = vmatmul.bf16.vlgmr.msra.gmra.mxu0 %v7416_v23 }
  0x66   : > { %509 = vst [vmem:[#allocation2 + $0xa1] sm:$0x1] %v10020_v0  ;;  %3279 = vmatpush.bf16.msrb.mxu0 %v9331_v22  ;;  %3101 = vmatpush.bf16.msrb.mxu2 %v9315_v36  ;;  %v9646_v22 = vld [vmem:[%s10207_s29 + $0x10] sm:$0xff]   ;;  %v9655_v36 = vld [vmem:[%s10207_s29 + $0x58] sm:$0xff]  }
  0x67   : > { %510 = vst [vmem:[#allocation2 + $0xb9] sm:$0x1] %v10020_v0  ;;  %3190 = vmatpush.bf16.msrb.mxu3 %v9323_v37  ;;  %v10330_v31 = vunpack.c.l.bf16 %v9646_v22 }
  0x68   : > { %511 = vst [vmem:[#allocation2 + $0xd1] sm:$0x1] %v10020_v0 }
  0x69   : > { %512 = vst [vmem:[#allocation2 + $0xe9] sm:$0x1] %v10020_v0 }
  0x6a   : > { %513 = vst [vmem:[#allocation2 + $0x101] sm:$0x1] %v10020_v0  ;;  %3280 = vmatpush.bf16.msrb.mxu0 %v9330_v35  ;;  %3102 = vmatpush.bf16.msrb.mxu2 %v9314_v3  ;;  %v10334_v35 = vunpack.c.h.bf16 %v9646_v22 }
  0x6b   : > { %514 = vst [vmem:[#allocation2 + $0x119] sm:$0x1] %v10020_v0  ;;  %3191 = vmatpush.bf16.msrb.mxu3 %v9322_v5 }
  0x6c   : > { %515 = vst [vmem:[#allocation2 + $0x131] sm:$0x1] %v10020_v0 }
  0x6d   : > { %516 = vst [vmem:[#allocation2 + $0x149] sm:$0x1] %v10020_v0 }
  0x6e   : > { %12065 = vst [vmem:[#allocation20_spill] sm:$0xff] %v10261_v25  ;;  %3281 = vmatpush.bf16.msrb.mxu0 %v9329_v4 }
  0x6f   : > { %517 = vst [vmem:[#allocation2 + $0x161] sm:$0x1] %v10020_v0 }
  0x70   : > { %12066 = vst [vmem:[#allocation21_spill] sm:$0xff] %v10264_v26 }
  0x71   : > { %518 = vst [vmem:[#allocation2 + $0x179] sm:$0x1] %v10020_v0 }
  0x72   : > { %519 = vst [vmem:[#allocation2 + $0x191] sm:$0x1] %v10020_v0 }
  0x73   : > { %570 = vst [vmem:[#allocation2 + $0xd9] sm:$0xff] %v10261_v25 }
  0x74   : > { %571 = vst [vmem:[#allocation2 + $0xe1] sm:$0xff] %v10264_v26  ;;  %v9351_v26 = vld [vmem:[#allocation7 + $0x1d8] sm:$0xff] }
  0x75   : > { %502 = vst [vmem:[#allocation2 + $0x198] sm:$0x1] %v10020_v0 }
  0x76   : > { %503 = vst [vmem:[#allocation2 + $0x11] sm:$0x1] %v10020_v0 }
  0x77   : > { %520 = vst [vmem:[#allocation2 + $0x1a9] sm:$0x1] %v10020_v0 }
  0x78   : > { %746 = vst [vmem:[#allocation3 + $0x4] sm:$0xf] %v714_v29 }
  0x79   : > { %12067 = vst [vmem:[#allocation22_spill] sm:$0xff] %v10278_v34 }
  0x7a   : > { %747 = vst [vmem:[#allocation3 + $0x28] sm:$0xf] %v715_v30  ;;  %v604_v38 = vld [vmem:[#allocation2 + $0xd8] sm:$0xff] }
  0x7b   : > { %764 = vst [vmem:[#allocation3 + $0x28c] sm:$0xf] %v732_v32  ;;  %v605_v39 = vld [vmem:[#allocation2 + $0xe0] sm:$0xff]  ;;  %v636_v40 = vpack.c.bf16 %v604_v38, %v604_v38 }
  0x7c   : > { %765 = vst [vmem:[#allocation3 + $0x2b0] sm:$0xf] %v733_v33  ;;  %v637_v43 = vpack.c.bf16 %v605_v39, %v605_v39 }
  0x7d   : > { %12068 = vst [vmem:[#allocation23_spill] sm:$0xff] %v10280_v41 }
  0x7e   : > { %554 = vst [vmem:[#allocation2 + $0x19] sm:$0xff] %v10278_v34 }
  0x7f   : > { %668 = vst [vmem:[#allocation3 + $0x288] sm:$0xf] %v636_v40  ;;  %v9148_v45 = vld [vmem:[#allocation3 + $0x4] sm:$0xf] }
  0x80   : > { %669 = vst [vmem:[#allocation3 + $0x2ac] sm:$0xf] %v637_v43  ;;  %v10340_v43 = vunpack.c.l.bf16 %v9655_v36 }
  0x81   : > { %12069 = vst [vmem:[#allocation24_spill] sm:$0xff] %v10284_v44  ;;  %v7417_v47 = vld [vmem:[#allocation3 + $0x24] sm:$0xf0] }
  0x82   : > { %555 = vst [vmem:[#allocation2 + $0x21] sm:$0xff] %v10280_v41  ;;  %v7420_v49 = vor.u32 %v9148_v45, %v7417_v47  ;;  %v9229_v50 = vld [vmem:[#allocation3 + $0x28c] sm:$0xf]  ;;  %v10343_v47 = vunpack.c.h.bf16 %v9655_v36  ;;  %v9320_v36 = vld [vmem:[#allocation7 + $0xe0] sm:$0xff] }
  0x83   : > { %12070 = vst [vmem:[#allocation25_spill] sm:$0xff] %v10287_v46  ;;  %v7741_v52 = vld [vmem:[#allocation3 + $0x2ac] sm:$0xf0] }
  0x84   : > { %4020 = vst [vmem:[#allocation3 + $0x4] sm:$0xf] %v714_v29  ;;  %3020 = vmatmul.bf16.vlgmr.msra.gmra.mxu1 %v7420_v49  ;;  %v7744_v53 = vor.u32 %v9229_v50, %v7741_v52  ;;  %v9313_v49 = vld [vmem:[#allocation7 + $0xa8] sm:$0xff]  ;;  %v9328_v52 = vld [vmem:[#allocation7 + $0x120] sm:$0xff]  ;;  %v739_v56 = vpack.c.bf16 %v10343_v47, %v10343_v47 }
  0x85   : > { %4021 = vst [vmem:[#allocation3 + $0x28] sm:$0xf] %v715_v30  ;;  %v588_v54 = vld [vmem:[#allocation2 + $0x18] sm:$0xff]  ;;  %3103 = vmatpush.bf16.msrb.mxu2 %v9313_v49  ;;  %3282 = vmatpush.bf16.msrb.mxu0 %v9328_v52 }
  0x86   : > { %572 = vst [vmem:[#allocation2 + $0xf1] sm:$0xff] %v10284_v44  ;;  %v7739_v57 = vld [vmem:[#allocation3 + $0x288] sm:$0xf]  ;;  %v10298_v58 = vpack.c.bf16 %v588_v54, %v588_v54  ;;  %3065 = vmatmul.bf16.vlgmr.msra.gmra.mxu3 %v7744_v53  ;;  %v738_v53 = vpack.c.bf16 %v10340_v43, %v10340_v43 }
  0x87   : > { %573 = vst [vmem:[#allocation2 + $0xf9] sm:$0xff] %v10287_v46  ;;  %v9233_v60 = vld [vmem:[#allocation3 + $0x2a8] sm:$0xf0] }
  0x88   : > { %748 = vst [vmem:[#allocation3 + $0x4c] sm:$0xf] %v716_v48  ;;  %v7740_v61 = vor.u32 %v9233_v60, %v7739_v57  ;;  %v720_v48 = vpack.c.bf16 %v10330_v31, %v10330_v31  ;;  %v9321_v50 = vld [vmem:[#allocation7 + $0xe8] sm:$0xff]  ;;  %v9647_v57 = vld [vmem:[%s10207_s29 + $0x18] sm:$0xff]  }
  0x89   : > { %749 = vst [vmem:[#allocation3 + $0x70] sm:$0xf] %v717_v51  ;;  %v589_v62 = vld [vmem:[#allocation2 + $0x20] sm:$0xff]  ;;  %v721_v51 = vpack.c.bf16 %v10334_v35, %v10334_v35  ;;  %3192 = vmatpush.bf16.msrb.mxu3 %v9321_v50  ;;  %v10358_v5 = vunpack.c.l.bf16 %v9647_v57 }
  0x8a   : > { %652 = vst [vmem:[#allocation3 + $0x48] sm:$0xf] %v10298_v58  ;;  %v10305_v0 = vpack.c.bf16 %v589_v62, %v589_v62  ;;  %2976 = vmatmul.bf16.vlgmr.msra.gmra.mxu2 %v7740_v61 }
  0x8b   : > { %12071 = vst [vmem:[#allocation26_spill] sm:$0xff] %v10303_v63 }
  0x8c   : > { %766 = vst [vmem:[#allocation3 + $0x2d4] sm:$0xf] %v734_v55 }
  0x8d   : > { %12072 = vst [vmem:[#allocation27_spill] sm:$0xff] %v10307_v1  ;;  %v606_v6 = vld [vmem:[#allocation2 + $0xf0] sm:$0xff]  ;;  %3193 = vmatpush.bf16.msrb.mxu3 %v9320_v36  ;;  %v9319_v36 = vld [vmem:[#allocation7 + $0xd8] sm:$0xff] }
  0x8e   : > { %767 = vst [vmem:[#allocation3 + $0x2f8] sm:$0xf] %v735_v59  ;;  %v607_v7 = vld [vmem:[#allocation2 + $0xf8] sm:$0xff]  ;;  %v638_v8 = vpack.c.bf16 %v606_v6, %v606_v6 }
  0x8f   : > { %653 = vst [vmem:[#allocation3 + $0x6c] sm:$0xf] %v10305_v0  ;;  %v639_v10 = vpack.c.bf16 %v607_v7, %v607_v7  ;;  %v9157_v12 = vld [vmem:[#allocation3 + $0x4c] sm:$0xf] }
  0x90   : > { %556 = vst [vmem:[#allocation2 + $0x31] sm:$0xff] %v10303_v63  ;;  %v7453_v13 = vld [vmem:[#allocation3 + $0x6c] sm:$0xf0] }
  0x91   : > { %12073 = vst [vmem:[#allocation28_spill] sm:$0xff] %v10312_v9  ;;  %v7451_v16 = vld [vmem:[#allocation3 + $0x48] sm:$0xf]  ;;  %v7456_v19 = vor.u32 %v9157_v12, %v7453_v13  ;;  %v9656_v12 = vld [vmem:[%s10207_s29 + $0x60] sm:$0xff]   ;;  %3194 = vmatpush.bf16.msrb.mxu3 %v9319_v36 }
  0x92   : > { %557 = vst [vmem:[#allocation2 + $0x39] sm:$0xff] %v10307_v1 }
  0x93   : > { %12074 = vst [vmem:[#allocation29_spill] sm:$0xff] %v10315_v11  ;;  %v9238_v17 = vld [vmem:[#allocation3 + $0x2d4] sm:$0xf] }
  0x94   : > { %670 = vst [vmem:[#allocation3 + $0x2d0] sm:$0xf] %v638_v8  ;;  %3025 = vmatmul.bf16.gmra.mxu1 %v7456_v19  ;;  %v10368_v19 = vunpack.c.l.bf16 %v9656_v12 }
  0x95   : > { %671 = vst [vmem:[#allocation3 + $0x2f4] sm:$0xf] %v639_v10  ;;  %v7777_v20 = vld [vmem:[#allocation3 + $0x2f4] sm:$0xf0]  ;;  %v10362_v10 = vunpack.c.h.bf16 %v9647_v57 }
  0x96   : > { %574 = vst [vmem:[#allocation2 + $0x109] sm:$0xff] %v10312_v9  ;;  %v9161_v23 = vld [vmem:[#allocation3 + $0x68] sm:$0xf0]  ;;  %v7780_v27 = vor.u32 %v9238_v17, %v7777_v20 }
  0x97   : > { %575 = vst [vmem:[#allocation2 + $0x111] sm:$0xff] %v10315_v11  ;;  %v7452_v24 = vor.u32 %v9161_v23, %v7451_v16  ;;  %v590_v28 = vld [vmem:[#allocation2 + $0x30] sm:$0xff]  ;;  %v722_v23 = vpack.c.bf16 %v10358_v5, %v10358_v5 }
  0x98   : > { %750 = vst [vmem:[#allocation3 + $0x94] sm:$0xf] %v718_v14  ;;  %v10328_v30 = vpack.c.bf16 %v590_v28, %v590_v28  ;;  %3070 = vmatmul.bf16.gmra.mxu3 %v7780_v27  ;;  %v740_v27 = vpack.c.bf16 %v10368_v19, %v10368_v19 }
  0x99   : > { %751 = vst [vmem:[#allocation3 + $0xb8] sm:$0xf] %v719_v15  ;;  %v591_v29 = vld [vmem:[#allocation2 + $0x38] sm:$0xff]  ;;  %2936 = vmatmul.bf16.gmra.mxu0 %v7452_v24  ;;  %v723_v24 = vpack.c.bf16 %v10362_v10, %v10362_v10 }
  0x9a   : > { %768 = vst [vmem:[#allocation3 + $0x31c] sm:$0xf] %v736_v18  ;;  %v10332_v33 = vpack.c.bf16 %v591_v29, %v591_v29  ;;  %v9648_v29 = vld [vmem:[%s10207_s29 + $0x20] sm:$0xff]  }
  0x9b   : > { %12075 = vst [vmem:[#allocation30_spill] sm:$0xff] %v10330_v31  ;;  %v7775_v32 = vld [vmem:[#allocation3 + $0x2d0] sm:$0xf]  ;;  %v10391_v52 = vunpack.c.h.bf16 %v9648_v29 }
  0x9c   : > { %769 = vst [vmem:[#allocation3 + $0x340] sm:$0xf] %v737_v21  ;;  %v9242_v37 = vld [vmem:[#allocation3 + $0x2f0] sm:$0xf0]  ;;  %v10371_v21 = vunpack.c.h.bf16 %v9656_v12 }
  0x9d   : > { %12076 = vst [vmem:[#allocation31_spill] sm:$0xff] %v10334_v35  ;;  %v7776_v38 = vor.u32 %v9242_v37, %v7775_v32  ;;  %v608_v39 = vld [vmem:[#allocation2 + $0x108] sm:$0xff]  ;;  %v9312_v32 = vld [vmem:[#allocation7 + $0xa0] sm:$0xff] }
  0x9e   : > { %654 = vst [vmem:[#allocation3 + $0x90] sm:$0xf] %v10328_v30  ;;  %v609_v40 = vld [vmem:[#allocation2 + $0x110] sm:$0xff]  ;;  %v640_v42 = vpack.c.bf16 %v608_v39, %v608_v39  ;;  %v741_v28 = vpack.c.bf16 %v10371_v21, %v10371_v21  ;;  %3104 = vmatpush.bf16.msrb.mxu2 %v9312_v32  ;;  %v9658_v32 = vld [vmem:[%s10207_s29 + $0x70] sm:$0xff]  }
  0x9f   : > { %655 = vst [vmem:[#allocation3 + $0xb4] sm:$0xf] %v10332_v33  ;;  %v641_v45 = vpack.c.bf16 %v609_v40, %v609_v40  ;;  %2981 = vmatmul.bf16.gmra.mxu2 %v7776_v38  ;;  %v9166_v54 = vld [vmem:[#allocation3 + $0x94] sm:$0xf]  ;;  %v9327_v38 = vld [vmem:[#allocation7 + $0x118] sm:$0xff] }
  0xa0   : > { %558 = vst [vmem:[#allocation2 + $0x49] sm:$0xff] %v10330_v31  ;;  %v7489_v55 = vld [vmem:[#allocation3 + $0xb4] sm:$0xf0]  ;;  %3283 = vmatpush.bf16.msrb.mxu0 %v9327_v38 }
  0xa1   : > { %12077 = vst [vmem:[#allocation32_spill] sm:$0xff] %v10340_v43  ;;  %v9247_v61 = vld [vmem:[#allocation3 + $0x31c] sm:$0xf]  ;;  %v7492_v7 = vor.u32 %v9166_v54, %v7489_v55 }
  0xa2   : > { %559 = vst [vmem:[#allocation2 + $0x51] sm:$0xff] %v10334_v35 }
  0xa3   : > { %12078 = vst [vmem:[#allocation33_spill] sm:$0xff] %v10343_v47  ;;  %v7813_v2 = vld [vmem:[#allocation3 + $0x33c] sm:$0xf0] }
  0xa4   : > { %672 = vst [vmem:[#allocation3 + $0x318] sm:$0xf] %v640_v42  ;;  %v7816_v15 = vor.u32 %v9247_v61, %v7813_v2  ;;  %3030 = vmatmul.bf16.gmra.mxu1 %v7492_v7  ;;  %v9311_v42 = vld [vmem:[#allocation7 + $0x98] sm:$0xff] }
  0xa5   : > { %673 = vst [vmem:[#allocation3 + $0x33c] sm:$0xf] %v641_v45  ;;  %v7487_v59 = vld [vmem:[#allocation3 + $0x90] sm:$0xf]  ;;  %v10386_v45 = vunpack.c.l.bf16 %v9648_v29  ;;  %3105 = vmatpush.bf16.msrb.mxu2 %v9311_v42 }
  0xa6   : > { %576 = vst [vmem:[#allocation2 + $0x121] sm:$0xff] %v10340_v43  ;;  %v9170_v60 = vld [vmem:[#allocation3 + $0xb0] sm:$0xf0] }
  0xa7   : > { %577 = vst [vmem:[#allocation2 + $0x129] sm:$0xff] %v10343_v47  ;;  %v592_v62 = vld [vmem:[#allocation2 + $0x48] sm:$0xff]  ;;  %v7488_v6 = vor.u32 %v9170_v60, %v7487_v59  ;;  %v724_v7 = vpack.c.bf16 %v10386_v45, %v10386_v45 }
  0xa8   : > { %752 = vst [vmem:[#allocation3 + $0xdc] sm:$0xf] %v720_v48  ;;  %v10356_v4 = vpack.c.bf16 %v592_v62, %v592_v62  ;;  %3075 = vmatmul.bf16.gmra.mxu3 %v7816_v15  ;;  %v9657_v48 = vld [vmem:[%s10207_s29 + $0x68] sm:$0xff]   ;;  %v725_v15 = vpack.c.bf16 %v10391_v52, %v10391_v52 }
  0xa9   : > { %753 = vst [vmem:[#allocation3 + $0x100] sm:$0xf] %v721_v51  ;;  %v593_v3 = vld [vmem:[#allocation2 + $0x50] sm:$0xff]  ;;  %2941 = vmatmul.bf16.gmra.mxu0 %v7488_v6  ;;  %v10396_v61 = vunpack.c.l.bf16 %v9657_v48  ;;  %v10399_v6 = vunpack.c.h.bf16 %v9657_v48 }
  0xaa   : > { %770 = vst [vmem:[#allocation3 + $0x364] sm:$0xf] %v738_v53  ;;  %v10360_v8 = vpack.c.bf16 %v593_v3, %v593_v3 }
  0xab   : > { %12079 = vst [vmem:[#allocation34_spill] sm:$0xff] %v10358_v5  ;;  %v7811_v13 = vld [vmem:[#allocation3 + $0x318] sm:$0xf] }
  0xac   : > { %771 = vst [vmem:[#allocation3 + $0x388] sm:$0xf] %v739_v56  ;;  %v9251_v14 = vld [vmem:[#allocation3 + $0x338] sm:$0xf0] }
  0xad   : > { %12080 = vst [vmem:[#allocation35_spill] sm:$0xff] %v10362_v10  ;;  %v610_v16 = vld [vmem:[#allocation2 + $0x120] sm:$0xff]  ;;  %v7812_v22 = vor.u32 %v9251_v14, %v7811_v13 }
  0xae   : > { %656 = vst [vmem:[#allocation3 + $0xd8] sm:$0xf] %v10356_v4  ;;  %v611_v17 = vld [vmem:[#allocation2 + $0x128] sm:$0xff]  ;;  %v642_v18 = vpack.c.bf16 %v610_v16, %v610_v16  ;;  %v742_v16 = vpack.c.bf16 %v10396_v61, %v10396_v61 }
  0xaf   : > { %657 = vst [vmem:[#allocation3 + $0xfc] sm:$0xf] %v10360_v8  ;;  %v643_v20 = vpack.c.bf16 %v611_v17, %v611_v17  ;;  %2986 = vmatmul.bf16.gmra.mxu2 %v7812_v22  ;;  %v9175_v49 = vld [vmem:[#allocation3 + $0xdc] sm:$0xf]  ;;  %v743_v17 = vpack.c.bf16 %v10399_v6, %v10399_v6 }
  0xb0   : > { %560 = vst [vmem:[#allocation2 + $0x61] sm:$0xff] %v10358_v5  ;;  %v7525_v50 = vld [vmem:[#allocation3 + $0xfc] sm:$0xf0] }
  0xb1   : > { %12081 = vst [vmem:[#allocation36_spill] sm:$0xff] %v10368_v19  ;;  %v9256_v56 = vld [vmem:[#allocation3 + $0x364] sm:$0xf]  ;;  %v7528_v2 = vor.u32 %v9175_v49, %v7525_v50  ;;  %v9318_v49 = vld [vmem:[#allocation7 + $0xd0] sm:$0xff]  ;;  %v10424_v50 = vunpack.c.l.bf16 %v9658_v32 }
  0xb2   : > { %561 = vst [vmem:[#allocation2 + $0x69] sm:$0xff] %v10362_v10  ;;  %3195 = vmatpush.bf16.msrb.mxu3 %v9318_v49 }
  0xb3   : > { %12082 = vst [vmem:[#allocation37_spill] sm:$0xff] %v10371_v21  ;;  %v7849_v57 = vld [vmem:[#allocation3 + $0x384] sm:$0xf0] }
  0xb4   : > { %674 = vst [vmem:[#allocation3 + $0x360] sm:$0xf] %v642_v18  ;;  %v7852_v14 = vor.u32 %v9256_v56, %v7849_v57  ;;  %3035 = vmatmul.bf16.gmra.mxu1 %v7528_v2  ;;  %v9649_v18 = vld [vmem:[%s10207_s29 + $0x28] sm:$0xff]   ;;  %v10427_v56 = vunpack.c.h.bf16 %v9658_v32 }
  0xb5   : > { %675 = vst [vmem:[#allocation3 + $0x384] sm:$0xf] %v643_v20  ;;  %v7523_v53 = vld [vmem:[#allocation3 + $0xd8] sm:$0xf]  ;;  %v10418_v29 = vunpack.c.h.bf16 %v9649_v18 }
  0xb6   : > { %578 = vst [vmem:[#allocation2 + $0x139] sm:$0xff] %v10368_v19  ;;  %v9179_v54 = vld [vmem:[#allocation3 + $0xf8] sm:$0xf0] }
  0xb7   : > { %579 = vst [vmem:[#allocation2 + $0x141] sm:$0xff] %v10371_v21  ;;  %v594_v37 = vld [vmem:[#allocation2 + $0x60] sm:$0xff]  ;;  %v7524_v62 = vor.u32 %v9179_v54, %v7523_v53 }
  0xb8   : > { %754 = vst [vmem:[#allocation3 + $0x124] sm:$0xf] %v722_v23  ;;  %v10384_v40 = vpack.c.bf16 %v594_v37, %v594_v37  ;;  %3080 = vmatmul.bf16.gmra.mxu3 %v7852_v14  ;;  %v9326_v37 = vld [vmem:[#allocation7 + $0x110] sm:$0xff]  ;;  %v745_v14 = vpack.c.bf16 %v10427_v56, %v10427_v56 }
  0xb9   : > { %755 = vst [vmem:[#allocation3 + $0x148] sm:$0xf] %v723_v24  ;;  %v595_v39 = vld [vmem:[#allocation2 + $0x68] sm:$0xff]  ;;  %2946 = vmatmul.bf16.gmra.mxu0 %v7524_v62  ;;  %v727_v62 = vpack.c.bf16 %v10418_v29, %v10418_v29 }
  0xba   : > { %772 = vst [vmem:[#allocation3 + $0x3ac] sm:$0xf] %v740_v27  ;;  %v10389_v51 = vpack.c.bf16 %v595_v39, %v595_v39  ;;  %v10414_v27 = vunpack.c.l.bf16 %v9649_v18  ;;  %v9310_v39 = vld [vmem:[#allocation7 + $0x90] sm:$0xff]  ;;  %3284 = vmatpush.bf16.msrb.mxu0 %v9326_v37 }
  0xbb   : > { %12083 = vst [vmem:[#allocation38_spill] sm:$0xff] %v10386_v45  ;;  %v7847_v12 = vld [vmem:[#allocation3 + $0x360] sm:$0xf]  ;;  %3106 = vmatpush.bf16.msrb.mxu2 %v9310_v39 }
  0xbc   : > { %773 = vst [vmem:[#allocation3 + $0x3d0] sm:$0xf] %v741_v28  ;;  %v9260_v13 = vld [vmem:[#allocation3 + $0x380] sm:$0xf0] }
  0xbd   : > { %12084 = vst [vmem:[#allocation39_spill] sm:$0xff] %v10391_v52  ;;  %v612_v55 = vld [vmem:[#allocation2 + $0x138] sm:$0xff]  ;;  %v7848_v20 = vor.u32 %v9260_v13, %v7847_v12 }
  0xbe   : > { %658 = vst [vmem:[#allocation3 + $0x120] sm:$0xf] %v10384_v40  ;;  %v613_v59 = vld [vmem:[#allocation2 + $0x140] sm:$0xff]  ;;  %v644_v60 = vpack.c.bf16 %v612_v55, %v612_v55 }
  0xbf   : > { %659 = vst [vmem:[#allocation3 + $0x144] sm:$0xf] %v10389_v51  ;;  %v645_v3 = vpack.c.bf16 %v613_v59, %v613_v59  ;;  %2991 = vmatmul.bf16.gmra.mxu2 %v7848_v20  ;;  %v9184_v53 = vld [vmem:[#allocation3 + $0x124] sm:$0xf]  ;;  %v9650_v20 = vld [vmem:[%s10207_s29 + $0x30] sm:$0xff]  }
  0xc0   : > { %562 = vst [vmem:[#allocation2 + $0x79] sm:$0xff] %v10386_v45  ;;  %v7561_v54 = vld [vmem:[#allocation3 + $0x144] sm:$0xf0]  ;;  %v10442_v32 = vunpack.c.l.bf16 %v9650_v20  ;;  %v10446_v37 = vunpack.c.h.bf16 %v9650_v20 }
  0xc1   : > { %12085 = vst [vmem:[#allocation40_spill] sm:$0xff] %v10396_v61  ;;  %v9265_v2 = vld [vmem:[#allocation3 + $0x3ac] sm:$0xf]  ;;  %v7564_v13 = vor.u32 %v9184_v53, %v7561_v54 }
  0xc2   : > { %563 = vst [vmem:[#allocation2 + $0x81] sm:$0xff] %v10391_v52  ;;  %v9309_v53 = vld [vmem:[#allocation7 + $0x88] sm:$0xff] }
  0xc3   : > { %12086 = vst [vmem:[#allocation41_spill] sm:$0xff] %v10399_v6  ;;  %v9317_v54 = vld [vmem:[#allocation7 + $0xc8] sm:$0xff]  ;;  %3107 = vmatpush.bf16.msrb.mxu2 %v9309_v53 }
  0xc4   : > { %676 = vst [vmem:[#allocation3 + $0x3a8] sm:$0xf] %v644_v60  ;;  %v726_v60 = vpack.c.bf16 %v10414_v27, %v10414_v27  ;;  %3040 = vmatmul.bf16.gmra.mxu1 %v7564_v13  ;;  %3196 = vmatpush.bf16.msrb.mxu3 %v9317_v54  ;;  %v729_v13 = vpack.c.bf16 %v10446_v37, %v10446_v37 }
  0xc5   : > { %677 = vst [vmem:[#allocation3 + $0x3cc] sm:$0xf] %v645_v3  ;;  %v7559_v57 = vld [vmem:[#allocation3 + $0x120] sm:$0xf]  ;;  %v7885_v3 = vld [vmem:[#allocation3 + $0x3cc] sm:$0xf0] }
  0xc6   : > { %580 = vst [vmem:[#allocation2 + $0x151] sm:$0xff] %v10396_v61  ;;  %v9188_v59 = vld [vmem:[#allocation3 + $0x140] sm:$0xf0] }
  0xc7   : > { %581 = vst [vmem:[#allocation2 + $0x159] sm:$0xff] %v10399_v6  ;;  %v596_v22 = vld [vmem:[#allocation2 + $0x78] sm:$0xff]  ;;  %v7560_v12 = vor.u32 %v9188_v59, %v7559_v57 }
  0xc8   : > { %756 = vst [vmem:[#allocation3 + $0x16c] sm:$0xf] %v724_v7  ;;  %v10412_v24 = vpack.c.bf16 %v596_v22, %v596_v22  ;;  %v744_v7 = vpack.c.bf16 %v10424_v50, %v10424_v50 }
  0xc9   : > { %757 = vst [vmem:[#allocation3 + $0x190] sm:$0xf] %v725_v15  ;;  %v597_v23 = vld [vmem:[#allocation2 + $0x80] sm:$0xff]  ;;  %2951 = vmatmul.bf16.gmra.mxu0 %v7560_v12  ;;  %v728_v12 = vpack.c.bf16 %v10442_v32, %v10442_v32 }
  0xca   : > { %774 = vst [vmem:[#allocation3 + $0x3f4] sm:$0xf] %v742_v16  ;;  %v10416_v28 = vpack.c.bf16 %v597_v23, %v597_v23 }
  0xcb   : > { %12087 = vst [vmem:[#allocation42_spill] sm:$0xff] %v10414_v27  ;;  %v7883_v15 = vld [vmem:[#allocation3 + $0x3a8] sm:$0xf] }
  0xcc   : > { %775 = vst [vmem:[#allocation3 + $0x418] sm:$0xf] %v743_v17  ;;  %v9269_v16 = vld [vmem:[#allocation3 + $0x3c8] sm:$0xf0]  ;;  %v7888_v17 = vor.u32 %v9265_v2, %v7885_v3  ;;  %v778_v3 = vld [vmem:[#allocation2 + $0x2] sm:$0xff] }
  0xcd   : > { %12088 = vst [vmem:[#allocation43_spill] sm:$0xff] %v10418_v29  ;;  %v614_v38 = vld [vmem:[#allocation2 + $0x150] sm:$0xff] }
  0xce   : > { %660 = vst [vmem:[#allocation3 + $0x168] sm:$0xf] %v10412_v24  ;;  %v615_v42 = vld [vmem:[#allocation2 + $0x158] sm:$0xff]  ;;  %v646_v48 = vpack.c.bf16 %v614_v38, %v614_v38  ;;  %v7884_v38 = vor.u32 %v9269_v16, %v7883_v15  ;;  %3085 = vmatmul.bf16.gmra.mxu3 %v7888_v17 }
  0xcf   : > { %661 = vst [vmem:[#allocation3 + $0x18c] sm:$0xf] %v10416_v28  ;;  %v647_v55 = vpack.c.bf16 %v615_v42, %v615_v42  ;;  %v9193_v57 = vld [vmem:[#allocation3 + $0x16c] sm:$0xf] }
  0xd0   : > { %564 = vst [vmem:[#allocation2 + $0x91] sm:$0xff] %v10414_v27  ;;  %2996 = vmatmul.bf16.gmra.mxu2 %v7884_v38  ;;  %v7597_v59 = vld [vmem:[#allocation3 + $0x18c] sm:$0xf0] }
  0xd1   : > { %12089 = vst [vmem:[#allocation44_spill] sm:$0xff] %v10424_v50  ;;  %v9274_v15 = vld [vmem:[#allocation3 + $0x3f4] sm:$0xf] }
  0xd2   : > { %565 = vst [vmem:[#allocation2 + $0x99] sm:$0xff] %v10418_v29 }
  0xd3   : > { %12090 = vst [vmem:[#allocation45_spill] sm:$0xff] %v10427_v56 }
  0xd4   : > { %678 = vst [vmem:[#allocation3 + $0x3f0] sm:$0xf] %v646_v48 }
  0xd5   : > { %679 = vst [vmem:[#allocation3 + $0x414] sm:$0xf] %v647_v55  ;;  %v9325_v55 = vld [vmem:[#allocation7 + $0x108] sm:$0xff] }
  0xd6   : > { %582 = vst [vmem:[#allocation2 + $0x169] sm:$0xff] %v10424_v50  ;;  %v7595_v2 = vld [vmem:[#allocation3 + $0x168] sm:$0xf]  ;;  %3285 = vmatpush.bf16.msrb.mxu0 %v9325_v55  ;;  %v9339_v55 = vld [vmem:[#allocation7 + $0x178] sm:$0xff] }
  0xd7   : > { %583 = vst [vmem:[#allocation2 + $0x171] sm:$0xff] %v10427_v56  ;;  %v598_v18 = vld [vmem:[#allocation2 + $0x90] sm:$0xff]  ;;  %3368 = vmatpush.bf16.msrb.mxu1 %v9339_v55  ;;  %v9335_v55 = vld [vmem:[#allocation7 + $0x158] sm:$0xff] }
  0xd8   : > { %758 = vst [vmem:[#allocation3 + $0x1b4] sm:$0xf] %v726_v60  ;;  %v10440_v23 = vpack.c.bf16 %v598_v18, %v598_v18  ;;  %v9308_v60 = vld [vmem:[#allocation7 + $0x80] sm:$0xff]  ;;  %v810_v18 = vpack.c.bf16 %v778_v3, %v778_v3 }
  0xd9   : > { %759 = vst [vmem:[#allocation3 + $0x1d8] sm:$0xf] %v727_v62  ;;  %v599_v22 = vld [vmem:[#allocation2 + $0x98] sm:$0xff]  ;;  %v9316_v62 = vld [vmem:[#allocation7 + $0xc0] sm:$0xff]  ;;  %3108 = vmatpush.bf16.msrb.mxu2 %v9308_v60 }
  0xda   : > { %776 = vst [vmem:[#allocation3 + $0x43c] sm:$0xf] %v744_v7  ;;  %v10444_v36 = vpack.c.bf16 %v599_v22, %v599_v22  ;;  %v9197_v7 = vld [vmem:[#allocation3 + $0x188] sm:$0xf0]  ;;  %3197 = vmatpush.bf16.msrb.mxu3 %v9316_v62  ;;  %v7600_v22 = vor.u32 %v9193_v57, %v7597_v59 }
  0xdb   : > { %12091 = vst [vmem:[#allocation46_spill] sm:$0xff] %v10442_v32  ;;  %v7596_v20 = vor.u32 %v9197_v7, %v7595_v2  ;;  %v9338_v2 = vld [vmem:[#allocation7 + $0x170] sm:$0xff] }
  0xdc   : > { %777 = vst [vmem:[#allocation3 + $0x460] sm:$0xf] %v745_v14  ;;  %v779_v14 = vld [vmem:[#allocation2 + $0xa] sm:$0xff]  ;;  %3045 = vmatmul.bf16.gmra.mxu1 %v7600_v22 }
  0xdd   : > { %12092 = vst [vmem:[#allocation47_spill] sm:$0xff] %v10446_v37  ;;  %v616_v39 = vld [vmem:[#allocation2 + $0x168] sm:$0xff]  ;;  %2956 = vmatmul.bf16.gmra.mxu0 %v7596_v20  ;;  %3369 = vmatpush.bf16.msrb.mxu1 %v9338_v2 }
  0xde   : > { %662 = vst [vmem:[#allocation3 + $0x1b0] sm:$0xf] %v10440_v23  ;;  %v617_v42 = vld [vmem:[#allocation2 + $0x170] sm:$0xff]  ;;  %v648_v48 = vpack.c.bf16 %v616_v39, %v616_v39  ;;  %v811_v39 = vpack.c.bf16 %v779_v14, %v779_v14  ;;  %v781_v14 = vld [vmem:[#allocation2 + $0x22] sm:$0xff] }
  0xdf   : > { %663 = vst [vmem:[#allocation3 + $0x1d4] sm:$0xf] %v10444_v36  ;;  %v649_v49 = vpack.c.bf16 %v617_v42, %v617_v42  ;;  %v9278_v42 = vld [vmem:[#allocation3 + $0x410] sm:$0xf0] }
  0xe0   : > { %566 = vst [vmem:[#allocation2 + $0xa9] sm:$0xff] %v10442_v32  ;;  %v9202_v59 = vld [vmem:[#allocation3 + $0x1b4] sm:$0xf]  ;;  %v7633_v60 = vld [vmem:[#allocation3 + $0x1d4] sm:$0xf0] }
  0xe1   : > { %567 = vst [vmem:[#allocation2 + $0xb1] sm:$0xff] %v10446_v37 }
  0xe2   : > { %680 = vst [vmem:[#allocation3 + $0x438] sm:$0xf] %v648_v48  ;;  %v9651_v48 = vld [vmem:[%s10207_s29 + $0x38] sm:$0xff]  }
  0xe3   : > { %681 = vst [vmem:[#allocation3 + $0x45c] sm:$0xf] %v649_v49  ;;  %v10467_v49 = vunpack.c.l.bf16 %v9651_v48  ;;  %v10469_v53 = vunpack.c.h.bf16 %v9651_v48  ;;  %v9324_v48 = vld [vmem:[#allocation7 + $0x100] sm:$0xff] }
  0xe4   : > { %938 = vst [vmem:[#allocation3 + $0xc] sm:$0xf] %v10298_v58  ;;  %v7921_v58 = vld [vmem:[#allocation3 + $0x414] sm:$0xf0]  ;;  %3286 = vmatpush.bf16.msrb.mxu0 %v9324_v48 }
  0xe5   : > { %939 = vst [vmem:[#allocation3 + $0x30] sm:$0xf] %v10305_v0  ;;  %v7631_v3 = vld [vmem:[#allocation3 + $0x1b0] sm:$0xf]  ;;  %v784_v48 = vld [vmem:[#allocation2 + $0x4a] sm:$0xff] }
  0xe6   : > { %940 = vst [vmem:[#allocation3 + $0x54] sm:$0xf] %v10328_v30  ;;  %v7919_v30 = vld [vmem:[#allocation3 + $0x3f0] sm:$0xf] }
  0xe7   : > { %v600_v16 = vld [vmem:[#allocation2 + $0xa8] sm:$0xff]  ;;  %941 = vst [vmem:[#allocation3 + $0x78] sm:$0xf] %v10332_v33  ;;  %v7924_v33 = vor.u32 %v9274_v15, %v7921_v58  ;;  %v7920_v54 = vor.u32 %v9278_v42, %v7919_v30  ;;  %v7957_v58 = vld [vmem:[#allocation3 + $0x45c] sm:$0xf0]  ;;  %v813_v30 = vpack.c.bf16 %v781_v14, %v781_v14 }
  0xe8   : > { %v601_v17 = vld [vmem:[#allocation2 + $0xb0] sm:$0xff]  ;;  %v10460_v0 = vpack.c.bf16 %v600_v16, %v600_v16  ;;  %760 = vst [vmem:[#allocation3 + $0x1fc] sm:$0xf] %v728_v12  ;;  %v780_v12 = vld [vmem:[#allocation2 + $0x1a] sm:$0xff]  ;;  %v10487_v16 = vpack.c.bf16 %v10469_v53, %v10469_v53  ;;  %v9347_v14 = vld [vmem:[#allocation7 + $0x1b8] sm:$0xff] }
  0xe9   : > { %v10462_v38 = vpack.c.bf16 %v601_v17, %v601_v17  ;;  %761 = vst [vmem:[#allocation3 + $0x220] sm:$0xf] %v729_v13  ;;  %3090 = vmatmul.bf16.gmra.mxu3 %v7924_v33  ;;  %3001 = vmatmul.bf16.gmra.mxu2 %v7920_v54  ;;  %v9337_v17 = vld [vmem:[#allocation7 + $0x168] sm:$0xff]  ;;  %v812_v20 = vpack.c.bf16 %v780_v12, %v780_v12 }
  0xea   : > { %664 = vst [vmem:[#allocation3 + $0x1f8] sm:$0xf] %v10460_v0  ;;  %v9287_v42 = vld [vmem:[#allocation3 + $0x458] sm:$0xf0]  ;;  %3370 = vmatpush.bf16.msrb.mxu1 %v9337_v17  ;;  %v783_v12 = vld [vmem:[#allocation2 + $0x3a] sm:$0xff]  ;;  %3457 = vmatpush.bf16.msra.mxu2 %v9347_v14 }
  0xeb   : > { %665 = vst [vmem:[#allocation3 + $0x21c] sm:$0xf] %v10462_v38  ;;  %v9149_v17 = vld [vmem:[#allocation3 + $0xc] sm:$0xf] }
  0xec   : > { %842 = vst [vmem:[#allocation3 + $0x8] sm:$0xf] %v810_v18 }
  0xed   : > { %12093 = vst [vmem:[#allocation48_spill] sm:$0xff] %v10467_v49 }
  0xee   : > { %12094 = vst [vmem:[#allocation49_spill] sm:$0xff] %v10469_v53 }
  0xef   : > { %843 = vst [vmem:[#allocation3 + $0x2c] sm:$0xf] %v811_v39  ;;  %v9211_v2 = vld [vmem:[#allocation3 + $0x1fc] sm:$0xf] }
  0xf0   : > { %568 = vst [vmem:[#allocation2 + $0xc1] sm:$0xff] %v10467_v49 }
  0xf1   : > { %569 = vst [vmem:[#allocation2 + $0xc9] sm:$0xff] %v10469_v53 }
  0xf2   : > { %942 = vst [vmem:[#allocation3 + $0x9c] sm:$0xf] %v10356_v4  ;;  %v9206_v4 = vld [vmem:[#allocation3 + $0x1d0] sm:$0xf0] }
  0xf3   : > { %943 = vst [vmem:[#allocation3 + $0xc0] sm:$0xf] %v10360_v8  ;;  %v10475_v57 = vld [vmem:[#allocation3 + $0x8] sm:$0xf]  ;;  %v10482_v8 = vpack.c.bf16 %v10467_v49, %v10467_v49  ;;  %v7632_v22 = vor.u32 %v9206_v4, %v7631_v3  ;;  %v7669_v3 = vld [vmem:[#allocation3 + $0x21c] sm:$0xf0] }
  0xf4   : > { %944 = vst [vmem:[#allocation3 + $0xe4] sm:$0xf] %v10384_v40  ;;  %v9283_v40 = vld [vmem:[#allocation3 + $0x43c] sm:$0xf]  ;;  %v970_v4 = vld [vmem:[#allocation2 + $0x19] sm:$0xff] }
  0xf5   : > { %4116 = vst [vmem:[#allocation3 + $0x8] sm:$0xf] %v810_v18  ;;  %v7960_v33 = vor.u32 %v9283_v40, %v7957_v58  ;;  %2961 = vmatmul.bf16.gmra.mxu0 %v7632_v22  ;;  %v9355_v40 = vld [vmem:[#allocation7 + $0x1f8] sm:$0xff]  ;;  %v1002_v58 = vpack.c.bf16 %v970_v4, %v970_v4 }
  0xf6   : > { %v10478_v62 = vld [vmem:[#allocation3 + $0x28] sm:$0xf0]  ;;  %945 = vst [vmem:[#allocation3 + $0x108] sm:$0xf] %v10389_v51  ;;  %v7955_v51 = vld [vmem:[#allocation3 + $0x438] sm:$0xf]  ;;  %3546 = vmatpush.bf16.msra.mxu3 %v9355_v40 }
  0xf7   : > { %4117 = vst [vmem:[#allocation3 + $0x2c] sm:$0xf] %v811_v39  ;;  %v602_v7 = vld [vmem:[#allocation2 + $0xc0] sm:$0xff]  ;;  %v7636_v39 = vor.u32 %v9202_v59, %v7633_v60  ;;  %v7956_v54 = vor.u32 %v9287_v42, %v7955_v51  ;;  %v7667_v59 = vld [vmem:[#allocation3 + $0x1f8] sm:$0xf] }
  0xf8   : > { %v634_v13 = vpack.c.bf16 %v602_v7, %v602_v7  ;;  %v603_v15 = vld [vmem:[#allocation2 + $0xc8] sm:$0xff]  ;;  %946 = vst [vmem:[#allocation3 + $0x12c] sm:$0xf] %v10412_v24  ;;  %v9336_v24 = vld [vmem:[#allocation7 + $0x160] sm:$0xff] }
  0xf9   : > { %v635_v18 = vpack.c.bf16 %v603_v15, %v603_v15  ;;  %762 = vst [vmem:[#allocation3 + $0x244] sm:$0xf] %v10482_v8  ;;  %3050 = vmatmul.bf16.gmra.mxu1 %v7636_v39  ;;  %3095 = vmatmul.bf16.gmra.mxu3 %v7960_v33  ;;  %v9215_v60 = vld [vmem:[#allocation3 + $0x218] sm:$0xf0]  ;;  %v782_v7 = vld [vmem:[#allocation2 + $0x32] sm:$0xff]  ;;  %v7672_v39 = vor.u32 %v9211_v2, %v7669_v3 }
  0xfa   : > { %666 = vst [vmem:[#allocation3 + $0x240] sm:$0xf] %v634_v13  ;;  %3371 = vmatpush.bf16.msrb.mxu1 %v9336_v24  ;;  %3006 = vmatmul.bf16.gmra.mxu2 %v7956_v54  ;;  %v814_v15 = vpack.c.bf16 %v782_v7, %v782_v7  ;;  %v7668_v22 = vor.u32 %v9215_v60, %v7667_v59  ;;  %v9363_v51 = vld [vmem:[#allocation7 + $0x238] sm:$0xff]  ;;  %v785_v24 = vld [vmem:[#allocation2 + $0x52] sm:$0xff]  ;;  %v9158_v7 = vld [vmem:[#allocation3 + $0x54] sm:$0xf] }
  0xfb   : > { %667 = vst [vmem:[#allocation3 + $0x264] sm:$0xf] %v635_v18  ;;  %3635 = vmatpush.bf16.msra.mxu0 %v9363_v51  ;;  %v972_v54 = vld [vmem:[#allocation2 + $0x31] sm:$0xff]  ;;  %v973_v2 = vld [vmem:[#allocation2 + $0x39] sm:$0xff] }
  0xfc   : > { %763 = vst [vmem:[#allocation3 + $0x268] sm:$0xf] %v10487_v16  ;;  %v1004_v3 = vpack.c.bf16 %v972_v54, %v972_v54  ;;  %v787_v51 = vld [vmem:[#allocation2 + $0x6a] sm:$0xff] }
  0xfd   : > { %844 = vst [vmem:[#allocation3 + $0x50] sm:$0xf] %v812_v20 }
  0xfe   : > { %845 = vst [vmem:[#allocation3 + $0x74] sm:$0xf] %v813_v30  ;;  %3372 = vmatpush.bf16.msrb.mxu1 %v9335_v55  ;;  %v2932_v55 = vpop.f32.mrf.mxu0 }
  0xff   : > { %1130 = vst [vmem:[#allocation3 + $0x14] sm:$0xf] %v812_v20  ;;  %v7425_v20 = vld [vmem:[#allocation3 + $0x2c] sm:$0xf0] }
 0x100   : > { %1131 = vst [vmem:[#allocation3 + $0x38] sm:$0xf] %v813_v30  ;;  %v9333_v30 = vld [vmem:[#allocation7 + $0x148] sm:$0xff]  ;;  %v9220_v33 = vld [vmem:[#allocation3 + $0x244] sm:$0xf] }
 0x101   : > { %947 = vst [vmem:[#allocation3 + $0x150] sm:$0xf] %v10416_v28  ;;  %v9334_v28 = vld [vmem:[#allocation7 + $0x150] sm:$0xff]  ;;  %v7703_v42 = vld [vmem:[#allocation3 + $0x240] sm:$0xf]  ;;  %v3021_v14 = vpop.f32.mrf.mxu1 }
 0x102   : > { %948 = vst [vmem:[#allocation3 + $0x174] sm:$0xf] %v10440_v23  ;;  %v815_v23 = vpack.c.bf16 %v783_v12, %v783_v12  ;;  %3373 = vmatpush.bf16.msrb.mxu1 %v9334_v28  ;;  %v9224_v59 = vld [vmem:[#allocation3 + $0x260] sm:$0xf0]  ;;  %v7461_v12 = vld [vmem:[#allocation3 + $0x74] sm:$0xf0]  ;;  %v10501_v28 = vadd.f32 %v3021_v14, %v2932_v55  ;;  %v819_v55 = vpack.c.bf16 %v787_v51, %v787_v51 }
 0x103   : > { %949 = vst [vmem:[#allocation3 + $0x198] sm:$0xf] %v10444_v36  ;;  %v971_v36 = vld [vmem:[#allocation2 + $0x21] sm:$0xff]  ;;  %v7705_v60 = vld [vmem:[#allocation3 + $0x264] sm:$0xf0] }
 0x104   : > { %950 = vst [vmem:[#allocation3 + $0x1bc] sm:$0xf] %v10460_v0  ;;  %v1003_v0 = vpack.c.bf16 %v971_v36, %v971_v36  ;;  %v7708_v4 = vor.u32 %v9220_v33, %v7705_v60  ;;  %v7459_v40 = vld [vmem:[#allocation3 + $0x50] sm:$0xf] }
 0x105   : > { %951 = vst [vmem:[#allocation3 + $0x1e0] sm:$0xf] %v10462_v38  ;;  %v7428_v38 = vor.u32 %v9149_v17, %v7425_v20  ;;  %2966 = vmatmul.bf16.gmra.mxu0 %v7668_v22  ;;  %v788_v51 = vld [vmem:[#allocation2 + $0x7a] sm:$0xff] }
 0x106   : > { %952 = vst [vmem:[#allocation3 + $0x204] sm:$0xf] %v634_v13  ;;  %v7424_v13 = vor.u32 %v10478_v62, %v10475_v57  ;;  %3374 = vmatpush.bf16.msrb.mxu1 %v9333_v30  ;;  %v816_v57 = vpack.c.bf16 %v784_v48, %v784_v48  ;;  %v817_v62 = vpack.c.bf16 %v785_v24, %v785_v24  ;;  %v2934_v36 = vpop.f32.mrf.mxu0  ;;  %v9346_v48 = vld [vmem:[#allocation7 + $0x1b0] sm:$0xff] }
 0x107   : > { %953 = vst [vmem:[#allocation3 + $0x228] sm:$0xf] %v635_v18  ;;  %v9332_v18 = vld [vmem:[#allocation7 + $0x140] sm:$0xff]  ;;  %v7433_v30 = vld [vmem:[#allocation3 + $0x34] sm:$0xf0]  ;;  %v9354_v24 = vld [vmem:[#allocation7 + $0x1f0] sm:$0xff]  ;;  %3458 = vmatpush.bf16.msra.mxu2 %v9346_v48 }
 0x108   : > { %846 = vst [vmem:[#allocation3 + $0x98] sm:$0xf] %v814_v15  ;;  %3547 = vmatpush.bf16.msra.mxu3 %v9354_v24  ;;  %v976_v48 = vld [vmem:[#allocation2 + $0x61] sm:$0xff] }
 0x109   : > { %847 = vst [vmem:[#allocation3 + $0xbc] sm:$0xf] %v815_v23  ;;  %3055 = vmatmul.bf16.gmra.mxu1 %v7672_v39  ;;  %3198 = vmatmul.bf16.vlgmr.msrb.gmra.mxu3 %v7428_v38  ;;  %v3066_v17 = vpop.f32.mrf.mxu3  ;;  %v3023_v20 = vpop.f32.mrf.mxu1  ;;  %v9150_v38 = vld [vmem:[#allocation3 + $0x14] sm:$0xf] }
 0x10a   : > { %1034 = vst [vmem:[#allocation3 + $0x10] sm:$0xf] %v1002_v58  ;;  %3109 = vmatmul.bf16.vlgmr.msrb.gmra.mxu2 %v7424_v13  ;;  %3375 = vmatpush.bf16.msrb.mxu1 %v9332_v18  ;;  %v786_v18 = vld [vmem:[#allocation2 + $0x62] sm:$0xff] }
 0x10b   : > { %1035 = vst [vmem:[#allocation3 + $0x34] sm:$0xf] %v1003_v0  ;;  %v10503_v0 = vadd.f32 %v3023_v20, %v2934_v36  ;;  %v818_v54 = vpack.c.bf16 %v786_v18, %v786_v18 }
 0x10c   : > { %1132 = vst [vmem:[#allocation3 + $0x5c] sm:$0xf] %v814_v15  ;;  %v9162_v15 = vld [vmem:[#allocation3 + $0x70] sm:$0xf0]  ;;  %v7641_v21 = vld [vmem:[#allocation3 + $0x1dc] sm:$0xf0] }
 0x10d   : > { %1133 = vst [vmem:[#allocation3 + $0x80] sm:$0xf] %v815_v23  ;;  %v7464_v23 = vor.u32 %v9158_v7, %v7461_v12  ;;  %v7460_v58 = vor.u32 %v9162_v15, %v7459_v40  ;;  %v2977_v13 = vpop.f32.mrf.mxu2 }
 0x10e   : > { %1048 = vst [vmem:[#allocation3 + $0x208] sm:$0xf] %v10482_v8  ;;  %v1005_v8 = vpack.c.bf16 %v973_v2, %v973_v2  ;;  %v10505_v33 = vadd.f32 %v3066_v17, %v2977_v13  ;;  %v7497_v2 = vld [vmem:[#allocation3 + $0xbc] sm:$0xf0] }
 0x10f   : > { %1049 = vst [vmem:[#allocation3 + $0x22c] sm:$0xf] %v10487_v16  ;;  %v7704_v16 = vor.u32 %v9224_v59, %v7703_v42  ;;  %v974_v42 = vld [vmem:[#allocation2 + $0x49] sm:$0xff]  ;;  %v975_v59 = vld [vmem:[#allocation2 + $0x51] sm:$0xff] }
 0x110   : > { %848 = vst [vmem:[#allocation3 + $0xe0] sm:$0xf] %v816_v57  ;;  %v1006_v60 = vpack.c.bf16 %v974_v42, %v974_v42  ;;  %v9171_v14 = vld [vmem:[#allocation3 + $0xb8] sm:$0xf0]  ;;  %v789_v42 = vld [vmem:[#allocation2 + $0x82] sm:$0xff] }
 0x111   : > { %849 = vst [vmem:[#allocation3 + $0x104] sm:$0xf] %v817_v62  ;;  %v7431_v22 = vld [vmem:[#allocation3 + $0x10] sm:$0xf]  ;;  %v3068_v7 = vpop.f32.mrf.mxu3 }
 0x112   : > { %1036 = vst [vmem:[#allocation3 + $0x58] sm:$0xf] %v1004_v3  ;;  %v9154_v39 = vld [vmem:[#allocation3 + $0x30] sm:$0xf0] }
 0x113   : > { %1037 = vst [vmem:[#allocation3 + $0x7c] sm:$0xf] %v1005_v8  ;;  %v7432_v3 = vor.u32 %v9154_v39, %v7431_v22  ;;  %v7436_v8 = vor.u32 %v9150_v38, %v7433_v30  ;;  %v9362_v22 = vld [vmem:[#allocation7 + $0x230] sm:$0xff]  ;;  %v9159_v13 = vld [vmem:[#allocation3 + $0x5c] sm:$0xf] }
 0x114   : > { %1134 = vst [vmem:[#allocation3 + $0xa4] sm:$0xf] %v816_v57  ;;  %v1007_v57 = vpack.c.bf16 %v975_v59, %v975_v59  ;;  %3636 = vmatpush.bf16.msra.mxu0 %v9362_v22  ;;  %v820_v59 = vpack.c.bf16 %v788_v51, %v788_v51 }
 0x115   : > { %2971 = vmatmul.bf16.gmra.mxu0 %v7704_v16  ;;  %1135 = vst [vmem:[#allocation3 + $0xc8] sm:$0xf] %v817_v62  ;;  %v9167_v62 = vld [vmem:[#allocation3 + $0x9c] sm:$0xf]  ;;  %v3026_v16 = vpop.f32.mrf.mxu1 }
 0x116   : > { %850 = vst [vmem:[#allocation3 + $0x128] sm:$0xf] %v818_v54  ;;  %v2937_v12 = vpop.f32.mrf.mxu0  ;;  %v7500_v40 = vor.u32 %v9167_v62, %v7497_v2  ;;  %v1008_v62 = vpack.c.bf16 %v976_v48, %v976_v48 }
 0x117   : > { %851 = vst [vmem:[#allocation3 + $0x14c] sm:$0xf] %v819_v55  ;;  %v10507_v15 = vadd.f32 %v3026_v16, %v2937_v12 }
 0x118   : > { %1038 = vst [vmem:[#allocation3 + $0xa0] sm:$0xf] %v1006_v60  ;;  %v821_v60 = vpack.c.bf16 %v789_v42, %v789_v42 }
 0x119   : > { %3060 = vmatmul.bf16.gmra.mxu1 %v7708_v4  ;;  %3203 = vmatmul.bf16.gmra.mxu3 %v7464_v23  ;;  %v7495_v4 = vld [vmem:[#allocation3 + $0x98] sm:$0xf]  ;;  %1039 = vst [vmem:[#allocation3 + $0xc4] sm:$0xf] %v1007_v57  ;;  %v2979_v23 = vpop.f32.mrf.mxu2 }
 0x11a   : > { %3114 = vmatmul.bf16.gmra.mxu2 %v7460_v58  ;;  %1136 = vst [vmem:[#allocation3 + $0xec] sm:$0xf] %v818_v54  ;;  %v10509_v58 = vadd.f32 %v3068_v7, %v2979_v23  ;;  %v7496_v36 = vor.u32 %v9171_v14, %v7495_v4  ;;  %v7467_v30 = vld [vmem:[#allocation3 + $0x58] sm:$0xf]  ;;  %v9163_v54 = vld [vmem:[#allocation3 + $0x78] sm:$0xf0] }
 0x11b   : > { %1137 = vst [vmem:[#allocation3 + $0x110] sm:$0xf] %v819_v55  ;;  %v3071_v17 = vpop.f32.mrf.mxu3  ;;  %v7469_v55 = vld [vmem:[#allocation3 + $0x7c] sm:$0xf0]  ;;  %v7468_v7 = vor.u32 %v9163_v54, %v7467_v30  ;;  %v9180_v23 = vld [vmem:[#allocation3 + $0x100] sm:$0xf0] }
 0x11c   : > { %v977_v57 = vld [vmem:[#allocation2 + $0x69] sm:$0xff]  ;;  %852 = vst [vmem:[#allocation3 + $0x170] sm:$0xf] %v820_v59  ;;  %v7472_v12 = vor.u32 %v9159_v13, %v7469_v55  ;;  %v9168_v54 = vld [vmem:[#allocation3 + $0xa4] sm:$0xf] }
 0x11d   : > { %v3028_v39 = vpop.f32.mrf.mxu1  ;;  %v1009_v2 = vpack.c.bf16 %v977_v57, %v977_v57  ;;  %853 = vst [vmem:[#allocation3 + $0x194] sm:$0xf] %v821_v60  ;;  %v7505_v55 = vld [vmem:[#allocation3 + $0xc4] sm:$0xf0] }
 0x11e   : > { %v2939_v20 = vpop.f32.mrf.mxu0  ;;  %1040 = vst [vmem:[#allocation3 + $0xe8] sm:$0xf] %v1008_v62  ;;  %v791_v62 = vld [vmem:[#allocation2 + $0x9a] sm:$0xff] }
 0x11f   : > { %v10511_v38 = vadd.f32 %v3028_v39, %v2939_v20  ;;  %1041 = vst [vmem:[#allocation3 + $0x10c] sm:$0xf] %v1009_v2  ;;  %v7503_v42 = vld [vmem:[#allocation3 + $0xa0] sm:$0xf]  ;;  %v978_v2 = vld [vmem:[#allocation2 + $0x79] sm:$0xff] }
 0x120   : > { %1138 = vst [vmem:[#allocation3 + $0x134] sm:$0xf] %v820_v59  ;;  %v9172_v48 = vld [vmem:[#allocation3 + $0xc0] sm:$0xf0] }
 0x121   : > { %1139 = vst [vmem:[#allocation3 + $0x158] sm:$0xf] %v821_v60  ;;  %v790_v59 = vld [vmem:[#allocation2 + $0x92] sm:$0xff] }
 0x122   : > { %v2982_v18 = vpop.f32.mrf.mxu2  ;;  %v9345_v60 = vld [vmem:[#allocation7 + $0x1a8] sm:$0xff] }
 0x123   : > { %v10513_v24 = vadd.f32 %v3071_v17, %v2982_v18  ;;  %v3073_v16 = vpop.f32.mrf.mxu3  ;;  %3459 = vmatpush.bf16.msra.mxu2 %v9345_v60  ;;  %v7603_v6 = vld [vmem:[#allocation3 + $0x170] sm:$0xf] }
 0x125   : > { %3287 = vmatmul.bf16.vlgmr.msrb.gmra.mxu0 %v7432_v3  ;;  %v9176_v3 = vld [vmem:[#allocation3 + $0xe4] sm:$0xf]  ;;  %v3031_v14 = vpop.f32.mrf.mxu1 }
 0x126   : > { %v2942_v4 = vpop.f32.mrf.mxu0 }
 0x127   : > { %v10515_v17 = vadd.f32 %v3031_v14, %v2942_v4  ;;  %v1010_v4 = vpack.c.bf16 %v978_v2, %v978_v2 }
 0x129   : > { %3376 = vmatmul.bf16.vlgmr.msrb.gmra.mxu1 %v7436_v8  ;;  %3208 = vmatmul.bf16.gmra.mxu3 %v7500_v40  ;;  %v7533_v8 = vld [vmem:[#allocation3 + $0x104] sm:$0xf0]  ;;  %v7531_v40 = vld [vmem:[#allocation3 + $0xe0] sm:$0xf]  ;;  %1042 = vst [vmem:[#allocation3 + $0x130] sm:$0xf] %v1010_v4 }
 0x12a   : > { %3119 = vmatmul.bf16.gmra.mxu2 %v7496_v36  ;;  %v7536_v36 = vor.u32 %v9176_v3, %v7533_v8  ;;  %v2984_v20 = vpop.f32.mrf.mxu2  ;;  %v7532_v39 = vor.u32 %v9180_v23, %v7531_v40  ;;  %v9353_v8 = vld [vmem:[#allocation7 + $0x1e8] sm:$0xff]  ;;  %v7569_v23 = vld [vmem:[#allocation3 + $0x14c] sm:$0xf0] }
 0x12b   : > { %v10517_v22 = vadd.f32 %v3073_v16, %v2984_v20  ;;  %v3076_v30 = vpop.f32.mrf.mxu3  ;;  %v979_v16 = vld [vmem:[#allocation2 + $0x81] sm:$0xff]  ;;  %v9185_v40 = vld [vmem:[#allocation3 + $0x12c] sm:$0xf]  ;;  %3548 = vmatpush.bf16.msra.mxu3 %v9353_v8  ;;  %v7508_v20 = vor.u32 %v9168_v54, %v7505_v55 }
 0x12c   : > { %v1011_v14 = vpack.c.bf16 %v979_v16, %v979_v16  ;;  %v7572_v56 = vor.u32 %v9185_v40, %v7569_v23  ;;  %v9361_v55 = vld [vmem:[#allocation7 + $0x228] sm:$0xff] }
 0x12d   : > { %v3033_v18 = vpop.f32.mrf.mxu1  ;;  %v7539_v16 = vld [vmem:[#allocation3 + $0xe8] sm:$0xf]  ;;  %v9177_v4 = vld [vmem:[#allocation3 + $0xec] sm:$0xf]  ;;  %3637 = vmatpush.bf16.msra.mxu0 %v9361_v55 }
 0x12e   : > { %v2944_v13 = vpop.f32.mrf.mxu0  ;;  %1043 = vst [vmem:[#allocation3 + $0x154] sm:$0xf] %v1011_v14  ;;  %v793_v40 = vld [vmem:[#allocation2 + $0xb2] sm:$0xff] }
 0x12f   : > { %v10519_v51 = vadd.f32 %v3033_v18, %v2944_v13  ;;  %v7567_v18 = vld [vmem:[#allocation3 + $0x128] sm:$0xf] }
 0x130   : > { %v980_v23 = vld [vmem:[#allocation2 + $0x91] sm:$0xff] }
 0x132   : > { %v2987_v57 = vpop.f32.mrf.mxu2 }
 0x133   : > { %v10521_v3 = vadd.f32 %v3076_v30, %v2987_v57  ;;  %v9189_v57 = vld [vmem:[#allocation3 + $0x148] sm:$0xf0] }
 0x135   : > { %3292 = vmatmul.bf16.gmra.mxu0 %v7468_v7  ;;  %v822_v7 = vpack.c.bf16 %v790_v59, %v790_v59  ;;  %v3036_v30 = vpop.f32.mrf.mxu1 }
 0x136   : > { %v2947_v13 = vpop.f32.mrf.mxu0 }
 0x137   : > { %854 = vst [vmem:[#allocation3 + $0x1b8] sm:$0xf] %v822_v7  ;;  %v10523_v59 = vadd.f32 %v3036_v30, %v2947_v13  ;;  %v981_v13 = vld [vmem:[#allocation2 + $0x99] sm:$0xff]  ;;  %v1012_v30 = vpack.c.bf16 %v980_v23, %v980_v23 }
 0x138   : > { %1140 = vst [vmem:[#allocation3 + $0x17c] sm:$0xf] %v822_v7  ;;  %v792_v7 = vld [vmem:[#allocation2 + $0xaa] sm:$0xff] }
 0x139   : > { %3381 = vmatmul.bf16.gmra.mxu1 %v7472_v12  ;;  %3213 = vmatmul.bf16.gmra.mxu3 %v7536_v36  ;;  %v823_v12 = vpack.c.bf16 %v791_v62, %v791_v62  ;;  %v7504_v36 = vor.u32 %v9172_v48, %v7503_v42  ;;  %v7568_v42 = vor.u32 %v9189_v57, %v7567_v18  ;;  %v9194_v57 = vld [vmem:[#allocation3 + $0x174] sm:$0xf] }
 0x13a   : > { %3124 = vmatmul.bf16.gmra.mxu2 %v7532_v39  ;;  %v3078_v39 = vpop.f32.mrf.mxu3  ;;  %v2989_v62 = vpop.f32.mrf.mxu2  ;;  %v1013_v18 = vpack.c.bf16 %v981_v13, %v981_v13  ;;  %1044 = vst [vmem:[#allocation3 + $0x178] sm:$0xf] %v1012_v30  ;;  %v7575_v13 = vld [vmem:[#allocation3 + $0x130] sm:$0xf]  ;;  %v9190_v30 = vld [vmem:[#allocation3 + $0x150] sm:$0xf0] }
 0x13b   : > { %855 = vst [vmem:[#allocation3 + $0x1dc] sm:$0xf] %v823_v12  ;;  %v10525_v2 = vadd.f32 %v3078_v39, %v2989_v62  ;;  %v824_v39 = vpack.c.bf16 %v792_v7, %v792_v7  ;;  %v7605_v62 = vld [vmem:[#allocation3 + $0x194] sm:$0xf0]  ;;  %v7576_v47 = vor.u32 %v9190_v30, %v7575_v13 }
 0x13c   : > { %1141 = vst [vmem:[#allocation3 + $0x1a0] sm:$0xf] %v823_v12  ;;  %v9181_v12 = vld [vmem:[#allocation3 + $0x108] sm:$0xf0] }
 0x13d   : > { %v3038_v60 = vpop.f32.mrf.mxu1  ;;  %856 = vst [vmem:[#allocation3 + $0x200] sm:$0xf] %v824_v39 }
 0x13e   : > { %v2949_v54 = vpop.f32.mrf.mxu0  ;;  %1045 = vst [vmem:[#allocation3 + $0x19c] sm:$0xf] %v1013_v18  ;;  %v9186_v18 = vld [vmem:[#allocation3 + $0x134] sm:$0xf] }
 0x13f   : > { %v10527_v8 = vadd.f32 %v3038_v60, %v2949_v54  ;;  %1142 = vst [vmem:[#allocation3 + $0x1c4] sm:$0xf] %v824_v39  ;;  %v794_v39 = vld [vmem:[#allocation2 + $0xc2] sm:$0xff] }
 0x142   : > { %v3081_v48 = vpop.f32.mrf.mxu3  ;;  %v2992_v14 = vpop.f32.mrf.mxu2  ;;  %v9207_v9 = vld [vmem:[#allocation3 + $0x1d8] sm:$0xf0] }
 0x145   : > { %3297 = vmatmul.bf16.gmra.mxu0 %v7504_v36  ;;  %v10529_v36 = vadd.f32 %v3081_v48, %v2992_v14  ;;  %v3041_v50 = vpop.f32.mrf.mxu1  ;;  %v9198_v48 = vld [vmem:[#allocation3 + $0x190] sm:$0xf0]  ;;  %v7608_v14 = vor.u32 %v9194_v57, %v7605_v62  ;;  %v795_v62 = vld [vmem:[#allocation2 + $0xca] sm:$0xff] }
 0x146   : > { %v2952_v60 = vpop.f32.mrf.mxu0 }
 0x147   : > { %v10531_v61 = vadd.f32 %v3041_v50, %v2952_v60  ;;  %v7577_v50 = vld [vmem:[#allocation3 + $0x154] sm:$0xf0]  ;;  %v827_v60 = vpack.c.bf16 %v795_v62, %v795_v62 }
 0x148   : > { %v7580_v43 = vor.u32 %v9186_v18, %v7577_v50  ;;  %v7639_v62 = vld [vmem:[#allocation3 + $0x1b8] sm:$0xf]  ;;  %v9360_v50 = vld [vmem:[#allocation7 + $0x220] sm:$0xff] }
 0x149   : > { %3386 = vmatmul.bf16.gmra.mxu1 %v7508_v20  ;;  %3218 = vmatmul.bf16.gmra.mxu3 %v7572_v56  ;;  %v7541_v20 = vld [vmem:[#allocation3 + $0x10c] sm:$0xf0]  ;;  %v825_v56 = vpack.c.bf16 %v793_v40, %v793_v40  ;;  %859 = vst [vmem:[#allocation3 + $0x26c] sm:$0xf] %v827_v60  ;;  %v7640_v13 = vor.u32 %v9207_v9, %v7639_v62  ;;  %v9199_v9 = vld [vmem:[#allocation3 + $0x198] sm:$0xf0] }
 0x14a   : > { %3129 = vmatmul.bf16.gmra.mxu2 %v7568_v42  ;;  %v7540_v42 = vor.u32 %v9181_v12, %v7539_v16  ;;  %v7544_v54 = vor.u32 %v9177_v4, %v7541_v20  ;;  %v3083_v55 = vpop.f32.mrf.mxu3  ;;  %v2994_v7 = vpop.f32.mrf.mxu2  ;;  %v7604_v16 = vor.u32 %v9198_v48, %v7603_v6  ;;  %v826_v6 = vpack.c.bf16 %v794_v39, %v794_v39  ;;  %v891_v48 = vld [vmem:[#allocation2 + $0xe0] sm:$0xff] }
 0x14b   : > { %857 = vst [vmem:[#allocation3 + $0x224] sm:$0xf] %v825_v56  ;;  %v10533_v40 = vadd.f32 %v3083_v55, %v2994_v7  ;;  %v9352_v55 = vld [vmem:[#allocation7 + $0x1e0] sm:$0xff]  ;;  %v923_v7 = vpack.c.bf16 %v891_v48, %v891_v48  ;;  %3638 = vmatpush.bf16.msra.mxu0 %v9360_v50 }
 0x14c   : > { %1143 = vst [vmem:[#allocation3 + $0x1e8] sm:$0xf] %v825_v56  ;;  %v9344_v56 = vld [vmem:[#allocation7 + $0x1a0] sm:$0xff]  ;;  %3549 = vmatpush.bf16.msra.mxu3 %v9352_v55 }
 0x14d   : > { %v3043_v12 = vpop.f32.mrf.mxu1  ;;  %3460 = vmatpush.bf16.msra.mxu2 %v9344_v56  ;;  %858 = vst [vmem:[#allocation3 + $0x248] sm:$0xf] %v826_v6 }
 0x14e   : > { %v2954_v23 = vpop.f32.mrf.mxu0  ;;  %955 = vst [vmem:[#allocation3 + $0x270] sm:$0xf] %v923_v7  ;;  %v892_v7 = vld [vmem:[#allocation2 + $0xf0] sm:$0xff] }
 0x14f   : > { %v10535_v20 = vadd.f32 %v3043_v12, %v2954_v23  ;;  %v983_v23 = vld [vmem:[#allocation2 + $0xb1] sm:$0xff]  ;;  %v9203_v12 = vld [vmem:[#allocation3 + $0x1bc] sm:$0xf]  ;;  %1144 = vst [vmem:[#allocation3 + $0x20c] sm:$0xf] %v826_v6 }
 0x150   : > { %1145 = vst [vmem:[#allocation3 + $0x230] sm:$0xf] %v827_v60  ;;  %v7613_v6 = vld [vmem:[#allocation3 + $0x19c] sm:$0xf0]  ;;  %3550 = vmatpush.bf16.msra.mxu3 %v9351_v26 }
 0x152   : > { %v3086_v4 = vpop.f32.mrf.mxu3 }
 0x153   : > { %v2997_v57 = vpop.f32.mrf.mxu2 }
 0x155   : > { %3302 = vmatmul.bf16.gmra.mxu0 %v7540_v42  ;;  %v890_v42 = vld [vmem:[#allocation2 + $0xd8] sm:$0xff] }
 0x159   : > { %3391 = vmatmul.bf16.gmra.mxu1 %v7544_v54  ;;  %3223 = vmatmul.bf16.gmra.mxu3 %v7608_v14  ;;  %v10537_v54 = vadd.f32 %v3086_v4, %v2997_v57  ;;  %v922_v14 = vpack.c.bf16 %v890_v42, %v890_v42  ;;  %v1015_v4 = vpack.c.bf16 %v983_v23, %v983_v23  ;;  %v3046_v39 = vpop.f32.mrf.mxu1  ;;  %v893_v23 = vld [vmem:[#allocation2 + $0xf8] sm:$0xff] }
 0x15a   : > { %3134 = vmatmul.bf16.gmra.mxu2 %v7604_v16  ;;  %v982_v16 = vld [vmem:[#allocation2 + $0xa9] sm:$0xff]  ;;  %v3088_v57 = vpop.f32.mrf.mxu3  ;;  %v2957_v11 = vpop.f32.mrf.mxu0  ;;  %v7644_v42 = vor.u32 %v9203_v12, %v7641_v21  ;;  %v924_v12 = vpack.c.bf16 %v892_v7, %v892_v7 }
 0x15b   : > { %v1014_v19 = vpack.c.bf16 %v982_v16, %v982_v16  ;;  %954 = vst [vmem:[#allocation3 + $0x24c] sm:$0xf] %v922_v14  ;;  %v10539_v48 = vadd.f32 %v3046_v39, %v2957_v11  ;;  %v2999_v46 = vpop.f32.mrf.mxu2  ;;  %v7611_v11 = vld [vmem:[#allocation3 + $0x178] sm:$0xf]  ;;  %v9195_v14 = vld [vmem:[#allocation3 + $0x17c] sm:$0xf] }
 0x15c   : > { %1047 = vst [vmem:[#allocation3 + $0x1e4] sm:$0xf] %v1015_v4  ;;  %v10541_v56 = vadd.f32 %v3088_v57, %v2999_v46  ;;  %v925_v4 = vpack.c.bf16 %v893_v23, %v893_v23  ;;  %v9212_v57 = vld [vmem:[#allocation3 + $0x204] sm:$0xf]  ;;  %v7677_v39 = vld [vmem:[#allocation3 + $0x224] sm:$0xf0]  ;;  %v7612_v62 = vor.u32 %v9199_v9, %v7611_v11 }
 0x15d   : > { %1046 = vst [vmem:[#allocation3 + $0x1c0] sm:$0xf] %v1014_v19 }
 0x15e   : > { %956 = vst [vmem:[#allocation3 + $0x294] sm:$0xf] %v924_v12 }
 0x15f   : > { %957 = vst [vmem:[#allocation3 + $0x2b8] sm:$0xf] %v925_v4  ;;  %v9204_v4 = vld [vmem:[#allocation3 + $0x1c4] sm:$0xf] }
 0x161   : > { %v3048_v55 = vpop.f32.mrf.mxu1 }
 0x162   : > { %v2959_v18 = vpop.f32.mrf.mxu0 }
 0x163   : > { %v10543_v21 = vadd.f32 %v3048_v55, %v2959_v18  ;;  %v7675_v55 = vld [vmem:[#allocation3 + $0x200] sm:$0xf]  ;;  %v9208_v12 = vld [vmem:[#allocation3 + $0x1e0] sm:$0xf0] }
 0x164   : > { %v7647_v23 = vld [vmem:[#allocation3 + $0x1c0] sm:$0xf] }
 0x165   : > { %3307 = vmatmul.bf16.gmra.mxu0 %v7576_v47  ;;  %v796_v47 = vld [vmem:[#allocation2 + $0xda] sm:$0xff]  ;;  %v7648_v53 = vor.u32 %v9208_v12, %v7647_v23 }
 0x166   : > { %v828_v16 = vpack.c.bf16 %v796_v47, %v796_v47 }
 0x168   : > { %860 = vst [vmem:[#allocation3 + $0x290] sm:$0xf] %v828_v16 }
 0x169   : > { %3396 = vmatmul.bf16.gmra.mxu1 %v7580_v43  ;;  %3228 = vmatmul.bf16.gmra.mxu3 %v7644_v42  ;;  %v797_v43 = vld [vmem:[#allocation2 + $0xe2] sm:$0xff]  ;;  %v7616_v42 = vor.u32 %v9195_v14, %v7613_v6  ;;  %1146 = vst [vmem:[#allocation3 + $0x254] sm:$0xf] %v828_v16  ;;  %v798_v16 = vld [vmem:[#allocation2 + $0xf2] sm:$0xff] }
 0x16a   : > { %3139 = vmatmul.bf16.gmra.mxu2 %v7640_v13  ;;  %v829_v60 = vpack.c.bf16 %v797_v43, %v797_v43 }
 0x16c   : > { %v3091_v30 = vpop.f32.mrf.mxu3  ;;  %v3002_v19 = vpop.f32.mrf.mxu2  ;;  %861 = vst [vmem:[#allocation3 + $0x2b4] sm:$0xf] %v829_v60 }
 0x16d   : > { %v10545_v46 = vadd.f32 %v3091_v30, %v3002_v19  ;;  %v9216_v30 = vld [vmem:[#allocation3 + $0x220] sm:$0xf0]  ;;  %v7680_v19 = vor.u32 %v9212_v57, %v7677_v39  ;;  %1147 = vst [vmem:[#allocation3 + $0x278] sm:$0xf] %v829_v60  ;;  %v7649_v57 = vld [vmem:[#allocation3 + $0x1e4] sm:$0xf0]  ;;  %v830_v60 = vpack.c.bf16 %v798_v16, %v798_v16 }
 0x16e   : > { %v7676_v11 = vor.u32 %v9216_v30, %v7675_v55  ;;  %v986_v30 = vld [vmem:[#allocation2 + $0xd9] sm:$0xff]  ;;  %v7652_v49 = vor.u32 %v9204_v4, %v7649_v57  ;;  %v9359_v57 = vld [vmem:[#allocation7 + $0x218] sm:$0xff] }
 0x16f   : > { %862 = vst [vmem:[#allocation3 + $0x2d8] sm:$0xf] %v830_v60  ;;  %v1018_v25 = vpack.c.bf16 %v986_v30, %v986_v30  ;;  %v7711_v16 = vld [vmem:[#allocation3 + $0x248] sm:$0xf]  ;;  %3639 = vmatpush.bf16.msra.mxu0 %v9359_v57 }
 0x170   : > { %1148 = vst [vmem:[#allocation3 + $0x29c] sm:$0xf] %v830_v60 }
 0x171   : > { %1050 = vst [vmem:[#allocation3 + $0x250] sm:$0xf] %v1018_v25  ;;  %v9213_v25 = vld [vmem:[#allocation3 + $0x20c] sm:$0xf] }
 0x172   : > { %v2962_v18 = vpop.f32.mrf.mxu0 }
 0x174   : > { %v3093_v13 = vpop.f32.mrf.mxu3  ;;  %v3004_v47 = vpop.f32.mrf.mxu2 }
 0x175   : > { %3312 = vmatmul.bf16.gmra.mxu0 %v7612_v62  ;;  %v10549_v43 = vadd.f32 %v3093_v13, %v3004_v47  ;;  %v894_v62 = vld [vmem:[#allocation2 + $0x108] sm:$0xff]  ;;  %v9221_v47 = vld [vmem:[#allocation3 + $0x24c] sm:$0xf] }
 0x176   : > { %v3051_v50 = vpop.f32.mrf.mxu1  ;;  %v926_v55 = vpack.c.bf16 %v894_v62, %v894_v62 }
 0x177   : > { %v10547_v44 = vadd.f32 %v3051_v50, %v2962_v18  ;;  %v799_v18 = vld [vmem:[#allocation2 + $0xfa] sm:$0xff]  ;;  %v895_v50 = vld [vmem:[#allocation2 + $0x110] sm:$0xff] }
 0x178   : > { %v831_v13 = vpack.c.bf16 %v799_v18, %v799_v18  ;;  %958 = vst [vmem:[#allocation3 + $0x2dc] sm:$0xf] %v926_v55  ;;  %v9225_v18 = vld [vmem:[#allocation3 + $0x268] sm:$0xf0] }
 0x179   : > { %3401 = vmatmul.bf16.gmra.mxu1 %v7616_v42  ;;  %3233 = vmatmul.bf16.gmra.mxu3 %v7680_v19  ;;  %v987_v19 = vld [vmem:[#allocation2 + $0xe1] sm:$0xff]  ;;  %v7712_v12 = vor.u32 %v9225_v18, %v7711_v16 }
 0x17a   : > { %3144 = vmatmul.bf16.gmra.mxu2 %v7676_v11  ;;  %v2964_v7 = vpop.f32.mrf.mxu0  ;;  %v927_v11 = vpack.c.bf16 %v895_v50, %v895_v50  ;;  %863 = vst [vmem:[#allocation3 + $0x2fc] sm:$0xf] %v831_v13  ;;  %v1019_v37 = vpack.c.bf16 %v987_v19, %v987_v19  ;;  %v7683_v19 = vld [vmem:[#allocation3 + $0x208] sm:$0xf] }
 0x17b   : > { %1149 = vst [vmem:[#allocation3 + $0x2c0] sm:$0xf] %v831_v13 }
 0x17c   : > { %v3096_v14 = vpop.f32.mrf.mxu3  ;;  %959 = vst [vmem:[#allocation3 + $0x300] sm:$0xf] %v927_v11  ;;  %v7685_v11 = vld [vmem:[#allocation3 + $0x22c] sm:$0xf0] }
 0x17d   : > { %v3007_v39 = vpop.f32.mrf.mxu2  ;;  %1051 = vst [vmem:[#allocation3 + $0x274] sm:$0xf] %v1019_v37  ;;  %v800_v37 = vld [vmem:[#allocation2 + $0x10a] sm:$0xff] }
 0x17e   : > { %v3053_v9 = vpop.f32.mrf.mxu1  ;;  %v10553_v42 = vadd.f32 %v3096_v14, %v3007_v39  ;;  %v832_v60 = vpack.c.bf16 %v800_v37, %v800_v37  ;;  %v9234_v37 = vld [vmem:[#allocation3 + $0x2b0] sm:$0xf0] }
 0x17f   : > { %v10551_v6 = vadd.f32 %v3053_v9, %v2964_v7  ;;  %v7713_v7 = vld [vmem:[#allocation3 + $0x26c] sm:$0xf0]  ;;  %v9343_v9 = vld [vmem:[#allocation7 + $0x198] sm:$0xff] }
 0x180   : > { %3461 = vmatpush.bf16.msra.mxu2 %v9343_v9  ;;  %v7716_v62 = vor.u32 %v9221_v47, %v7713_v7  ;;  %v9217_v47 = vld [vmem:[#allocation3 + $0x228] sm:$0xf0]  ;;  %v897_v7 = vld [vmem:[#allocation2 + $0x128] sm:$0xff]  ;;  %864 = vst [vmem:[#allocation3 + $0x320] sm:$0xf] %v832_v60 }
 0x181   : > { %v929_v16 = vpack.c.bf16 %v897_v7, %v897_v7  ;;  %v7684_v57 = vor.u32 %v9217_v47, %v7683_v19  ;;  %1150 = vst [vmem:[#allocation3 + $0x2e4] sm:$0xf] %v832_v60  ;;  %v9515_v7 = vld [vmem:[#allocation9 + $0x38] sm:$0xff] }
 0x182   : > { %v2967_v14 = vpop.f32.mrf.mxu0  ;;  %6200 = vmatpush.bf16.msra.mxu1 %v9515_v7 }
 0x183   : > { %961 = vst [vmem:[#allocation3 + $0x348] sm:$0xf] %v929_v16  ;;  %v9222_v16 = vld [vmem:[#allocation3 + $0x254] sm:$0xf] }
 0x184   : > { %v3098_v32 = vpop.f32.mrf.mxu3 }
 0x185   : > { %v3009_v29 = vpop.f32.mrf.mxu2  ;;  %3317 = vmatmul.bf16.gmra.mxu0 %v7648_v53 }
 0x186   : > { %v3056_v39 = vpop.f32.mrf.mxu1  ;;  %v10557_v23 = vadd.f32 %v3098_v32, %v3009_v29  ;;  %v801_v29 = vld [vmem:[#allocation2 + $0x112] sm:$0xff]  ;;  %v896_v32 = vld [vmem:[#allocation2 + $0x120] sm:$0xff] }
 0x187   : > { %v10555_v50 = vadd.f32 %v3056_v39, %v2967_v14  ;;  %v833_v13 = vpack.c.bf16 %v801_v29, %v801_v29  ;;  %v928_v9 = vpack.c.bf16 %v896_v32, %v896_v32  ;;  %v988_v14 = vld [vmem:[#allocation2 + $0xf1] sm:$0xff]  ;;  %v989_v39 = vld [vmem:[#allocation2 + $0xf9] sm:$0xff] }
 0x188   : > { %v1021_v27 = vpack.c.bf16 %v989_v39, %v989_v39  ;;  %v9226_v39 = vld [vmem:[#allocation3 + $0x270] sm:$0xf0] }
 0x189   : > { %3406 = vmatmul.bf16.gmra.mxu1 %v7652_v49  ;;  %3238 = vmatmul.bf16.gmra.mxu3 %v7716_v62  ;;  %v9230_v62 = vld [vmem:[#allocation3 + $0x294] sm:$0xf]  ;;  %865 = vst [vmem:[#allocation3 + $0x344] sm:$0xf] %v833_v13 }
 0x18a   : > { %3149 = vmatmul.bf16.gmra.mxu2 %v7712_v12  ;;  %v2969_v4 = vpop.f32.mrf.mxu0  ;;  %v7749_v12 = vld [vmem:[#allocation3 + $0x2b4] sm:$0xf0]  ;;  %960 = vst [vmem:[#allocation3 + $0x324] sm:$0xf] %v928_v9 }
 0x18b   : > { %v7752_v29 = vor.u32 %v9230_v62, %v7749_v12  ;;  %1053 = vst [vmem:[#allocation3 + $0x2bc] sm:$0xf] %v1021_v27  ;;  %v7721_v62 = vld [vmem:[#allocation3 + $0x274] sm:$0xf0] }
 0x18c   : > { %v3199_v26 = vpop.f32.mrf.mxu3  ;;  %1151 = vst [vmem:[#allocation3 + $0x308] sm:$0xf] %v833_v13  ;;  %v802_v12 = vld [vmem:[#allocation2 + $0x122] sm:$0xff]  ;;  %v7724_v10 = vor.u32 %v9222_v16, %v7721_v62 }
 0x18d   : > { %v3110_v49 = vpop.f32.mrf.mxu2  ;;  %v834_v13 = vpack.c.bf16 %v802_v12, %v802_v12 }
 0x18e   : > { %v3058_v55 = vpop.f32.mrf.mxu1  ;;  %v3111_v53 = vadd.f32 %v3110_v49, %v10501_v28  ;;  %v7747_v49 = vld [vmem:[#allocation3 + $0x290] sm:$0xf] }
 0x18f   : > { %v10559_v30 = vadd.f32 %v3058_v55, %v2969_v4  ;;  %v1020_v4 = vpack.c.bf16 %v988_v14, %v988_v14  ;;  %v7688_v55 = vor.u32 %v9213_v25, %v7685_v11  ;;  %v7748_v47 = vor.u32 %v9234_v37, %v7747_v49  ;;  %v991_v49 = vld [vmem:[#allocation2 + $0x111] sm:$0xff]  ;;  %v9239_v37 = vld [vmem:[#allocation3 + $0x2dc] sm:$0xf]  ;;  %866 = vst [vmem:[#allocation3 + $0x368] sm:$0xf] %v834_v13 }
 0x190   : > { %v10562_v18 = vadd.f32 %v3199_v26, %v3111_v53  ;;  %v1023_v5 = vpack.c.bf16 %v991_v49, %v991_v49  ;;  %1152 = vst [vmem:[#allocation3 + $0x32c] sm:$0xf] %v834_v13  ;;  %v900_v13 = vld [vmem:[#allocation2 + $0x150] sm:$0xff] }
 0x191   : > { %1052 = vst [vmem:[#allocation3 + $0x298] sm:$0xf] %v1020_v4  ;;  %v898_v4 = vld [vmem:[#allocation2 + $0x138] sm:$0xff] }
 0x192   : > { %v2972_v45 = vpop.f32.mrf.mxu0  ;;  %1055 = vst [vmem:[#allocation3 + $0x304] sm:$0xf] %v1023_v5 }
 0x194   : > { %v3201_v52 = vpop.f32.mrf.mxu3 }
 0x195   : > { %v3112_v26 = vpop.f32.mrf.mxu2  ;;  %3322 = vmatmul.bf16.gmra.mxu0 %v7684_v57  ;;  %v899_v57 = vld [vmem:[#allocation2 + $0x140] sm:$0xff] }
 0x196   : > { %v3061_v28 = vpop.f32.mrf.mxu1  ;;  %v3113_v19 = vadd.f32 %v3112_v26, %v10503_v0  ;;  %v803_v0 = vld [vmem:[#allocation2 + $0x12a] sm:$0xff] }
 0x197   : > { %v10564_v32 = vadd.f32 %v3061_v28, %v2972_v45  ;;  %v7719_v45 = vld [vmem:[#allocation3 + $0x250] sm:$0xf]  ;;  %v990_v28 = vld [vmem:[#allocation2 + $0x109] sm:$0xff] }
 0x198   : > { %v3202_v25 = vadd.f32 %v3201_v52, %v3113_v19  ;;  %v835_v52 = vpack.c.bf16 %v803_v0, %v803_v0  ;;  %v7785_v19 = vld [vmem:[#allocation3 + $0x2fc] sm:$0xf0]  ;;  %v1022_v7 = vpack.c.bf16 %v990_v28, %v990_v28 }
 0x199   : > { %3411 = vmatmul.bf16.gmra.mxu1 %v7688_v55  ;;  %3243 = vmatmul.bf16.gmra.mxu3 %v7752_v29  ;;  %v930_v55 = vpack.c.bf16 %v898_v4, %v898_v4  ;;  %v931_v29 = vpack.c.bf16 %v899_v57, %v899_v57  ;;  %v7783_v4 = vld [vmem:[#allocation3 + $0x2d8] sm:$0xf] }
 0x19a   : > { %3154 = vmatmul.bf16.gmra.mxu2 %v7748_v47  ;;  %v2974_v53 = vpop.f32.mrf.mxu0  ;;  %v9342_v47 = vld [vmem:[#allocation7 + $0x190] sm:$0xff]  ;;  %867 = vst [vmem:[#allocation3 + $0x38c] sm:$0xf] %v835_v52 }
 0x19b   : > { %3462 = vmatpush.bf16.msra.mxu2 %v9342_v47  ;;  %962 = vst [vmem:[#allocation3 + $0x36c] sm:$0xf] %v930_v55  ;;  %v9358_v55 = vld [vmem:[#allocation7 + $0x210] sm:$0xff]  ;;  %v7757_v47 = vld [vmem:[#allocation3 + $0x2bc] sm:$0xf0] }
 0x19c   : > { %v3204_v11 = vpop.f32.mrf.mxu3  ;;  %963 = vst [vmem:[#allocation3 + $0x390] sm:$0xf] %v931_v29  ;;  %v9235_v29 = vld [vmem:[#allocation3 + $0x2b8] sm:$0xf0]  ;;  %3640 = vmatpush.bf16.msra.mxu0 %v9358_v55 }
 0x19d   : > { %v3115_v27 = vpop.f32.mrf.mxu2  ;;  %1054 = vst [vmem:[#allocation3 + $0x2e0] sm:$0xf] %v1022_v7 }
 0x19e   : > { %v3063_v9 = vpop.f32.mrf.mxu1  ;;  %v3116_v60 = vadd.f32 %v3115_v27, %v10507_v15  ;;  %1153 = vst [vmem:[#allocation3 + $0x350] sm:$0xf] %v835_v52 }
 0x19f   : > { %v10567_v14 = vadd.f32 %v3063_v9, %v2974_v53  ;;  %v9350_v53 = vld [vmem:[#allocation7 + $0x1d0] sm:$0xff]  ;;  %v7720_v9 = vor.u32 %v9226_v39, %v7719_v45 }
 0x1a0   : > { %v10570_v26 = vadd.f32 %v3204_v11, %v3116_v60  ;;  %3551 = vmatpush.bf16.msra.mxu3 %v9350_v53  ;;  %v9243_v11 = vld [vmem:[#allocation3 + $0x2f8] sm:$0xf0]  ;;  %v7788_v60 = vor.u32 %v9239_v37, %v7785_v19  ;;  %v7755_v37 = vld [vmem:[#allocation3 + $0x298] sm:$0xf] }
 0x1a1   : > { %v7784_v39 = vor.u32 %v9243_v11, %v7783_v4  ;;  %v9231_v19 = vld [vmem:[#allocation3 + $0x29c] sm:$0xf]  ;;  %v805_v53 = vld [vmem:[#allocation2 + $0x142] sm:$0xff]  ;;  %v9248_v11 = vld [vmem:[#allocation3 + $0x324] sm:$0xf] }
 0x1a2   : > { %v3288_v27 = vpop.f32.mrf.mxu0 }
 0x1a3   : > { %v3289_v12 = vadd.f32 %v3288_v27, %v10562_v18  ;;  %v932_v27 = vpack.c.bf16 %v900_v13, %v900_v13 }
 0x1a4   : > { %v3206_v15 = vpop.f32.mrf.mxu3 }
 0x1a5   : > { %v3117_v57 = vpop.f32.mrf.mxu2  ;;  %3327 = vmatmul.bf16.gmra.mxu0 %v7720_v9  ;;  %v837_v9 = vpack.c.bf16 %v805_v53, %v805_v53  ;;  %964 = vst [vmem:[#allocation3 + $0x3b4] sm:$0xf] %v932_v27 }
 0x1a6   : > { %v3377_v0 = vpop.f32.mrf.mxu1  ;;  %v3118_v45 = vadd.f32 %v3117_v57, %v10511_v38  ;;  %v804_v38 = vld [vmem:[#allocation2 + $0x13a] sm:$0xff] }
 0x1a7   : > { %v10573_v35 = vadd.f32 %v3377_v0, %v3289_v12  ;;  %v836_v7 = vpack.c.bf16 %v804_v38, %v804_v38  ;;  %v992_v12 = vld [vmem:[#allocation2 + $0x121] sm:$0xff]  ;;  %869 = vst [vmem:[#allocation3 + $0x3d4] sm:$0xf] %v837_v9  ;;  %v9252_v38 = vld [vmem:[#allocation3 + $0x340] sm:$0xf0] }
 0x1a8   : > { %v3207_v16 = vadd.f32 %v3206_v15, %v3118_v45  ;;  %v901_v15 = vld [vmem:[#allocation2 + $0x158] sm:$0xff]  ;;  %v1024_v57 = vpack.c.bf16 %v992_v12, %v992_v12  ;;  %v7756_v45 = vor.u32 %v9235_v29, %v7755_v37  ;;  %1155 = vst [vmem:[#allocation3 + $0x398] sm:$0xf] %v837_v9  ;;  %v7791_v12 = vld [vmem:[#allocation3 + $0x2e0] sm:$0xf] }
 0x1a9   : > { %3416 = vmatmul.bf16.gmra.mxu1 %v7724_v10  ;;  %3248 = vmatmul.bf16.gmra.mxu3 %v7788_v60  ;;  %v933_v0 = vpack.c.bf16 %v901_v15, %v901_v15  ;;  %v7821_v60 = vld [vmem:[#allocation3 + $0x344] sm:$0xf0]  ;;  %868 = vst [vmem:[#allocation3 + $0x3b0] sm:$0xf] %v836_v7 }
 0x1aa   : > { %3159 = vmatmul.bf16.gmra.mxu2 %v7784_v39  ;;  %v3290_v62 = vpop.f32.mrf.mxu0  ;;  %v7760_v39 = vor.u32 %v9231_v19, %v7757_v47  ;;  %v7824_v53 = vor.u32 %v9248_v11, %v7821_v60  ;;  %1056 = vst [vmem:[#allocation3 + $0x328] sm:$0xf] %v1024_v57  ;;  %v7793_v11 = vld [vmem:[#allocation3 + $0x304] sm:$0xf0] }
 0x1ab   : > { %v3291_v28 = vadd.f32 %v3290_v62, %v3202_v25  ;;  %v993_v25 = vld [vmem:[#allocation2 + $0x129] sm:$0xff]  ;;  %965 = vst [vmem:[#allocation3 + $0x3d8] sm:$0xf] %v933_v0  ;;  %v9240_v0 = vld [vmem:[#allocation3 + $0x2e4] sm:$0xf] }
 0x1ac   : > { %v3209_v18 = vpop.f32.mrf.mxu3  ;;  %v1025_v62 = vpack.c.bf16 %v993_v25, %v993_v25  ;;  %1154 = vst [vmem:[#allocation3 + $0x374] sm:$0xf] %v836_v7  ;;  %v9244_v25 = vld [vmem:[#allocation3 + $0x300] sm:$0xf0]  ;;  %v807_v7 = vld [vmem:[#allocation2 + $0x15a] sm:$0xff] }
 0x1ad   : > { %v3120_v10 = vpop.f32.mrf.mxu2 }
 0x1ae   : > { %v3379_v49 = vpop.f32.mrf.mxu1  ;;  %v3121_v52 = vadd.f32 %v3120_v10, %v10515_v17  ;;  %v7819_v10 = vld [vmem:[#allocation3 + $0x320] sm:$0xf]  ;;  %1057 = vst [vmem:[#allocation3 + $0x34c] sm:$0xf] %v1025_v62  ;;  %v839_v62 = vpack.c.bf16 %v807_v7, %v807_v7  ;;  %v9261_v7 = vld [vmem:[#allocation3 + $0x388] sm:$0xf0] }
 0x1af   : > { %v10576_v5 = vadd.f32 %v3379_v49, %v3291_v28  ;;  %v7820_v29 = vor.u32 %v9252_v38, %v7819_v10 }
 0x1b0   : > { %v10579_v4 = vadd.f32 %v3209_v18, %v3121_v52  ;;  %v9514_v52 = vld [vmem:[#allocation9 + $0x30] sm:$0xff]  ;;  %871 = vst [vmem:[#allocation3 + $0x41c] sm:$0xf] %v839_v62 }
 0x1b1   : > { %6201 = vmatpush.bf16.msra.mxu1 %v9514_v52  ;;  %v7796_v52 = vor.u32 %v9240_v0, %v7793_v11  ;;  %1157 = vst [vmem:[#allocation3 + $0x3e0] sm:$0xf] %v839_v62 }
 0x1b2   : > { %v3293_v28 = vpop.f32.mrf.mxu0 }
 0x1b3   : > { %v3294_v17 = vadd.f32 %v3293_v28, %v10570_v26 }
 0x1b4   : > { %v3211_v55 = vpop.f32.mrf.mxu3 }
 0x1b5   : > { %v3122_v18 = vpop.f32.mrf.mxu2  ;;  %3332 = vmatmul.bf16.gmra.mxu0 %v7756_v45  ;;  %v902_v45 = vld [vmem:[#allocation2 + $0x168] sm:$0xff] }
 0x1b6   : > { %v3382_v49 = vpop.f32.mrf.mxu1  ;;  %v3123_v37 = vadd.f32 %v3122_v18, %v10519_v51  ;;  %v806_v51 = vld [vmem:[#allocation2 + $0x152] sm:$0xff]  ;;  %v934_v28 = vpack.c.bf16 %v902_v45, %v902_v45 }
 0x1b7   : > { %v10582_v13 = vadd.f32 %v3382_v49, %v3294_v17  ;;  %v994_v17 = vld [vmem:[#allocation2 + $0x139] sm:$0xff] }
 0x1b8   : > { %v10585_v19 = vadd.f32 %v3211_v55, %v3123_v37  ;;  %v903_v55 = vld [vmem:[#allocation2 + $0x170] sm:$0xff]  ;;  %v9257_v49 = vld [vmem:[#allocation3 + $0x36c] sm:$0xf]  ;;  %966 = vst [vmem:[#allocation3 + $0x3fc] sm:$0xf] %v934_v28 }
 0x1b9   : > { %3421 = vmatmul.bf16.gmra.mxu1 %v7760_v39  ;;  %3253 = vmatmul.bf16.gmra.mxu3 %v7824_v53  ;;  %v838_v39 = vpack.c.bf16 %v806_v51, %v806_v51  ;;  %v935_v10 = vpack.c.bf16 %v903_v55, %v903_v55  ;;  %v7857_v53 = vld [vmem:[#allocation3 + $0x38c] sm:$0xf0]  ;;  %v9341_v18 = vld [vmem:[#allocation7 + $0x188] sm:$0xff] }
 0x1ba   : > { %3164 = vmatmul.bf16.gmra.mxu2 %v7820_v29  ;;  %v3295_v47 = vpop.f32.mrf.mxu0  ;;  %v9349_v37 = vld [vmem:[#allocation7 + $0x1c8] sm:$0xff]  ;;  %v1026_v29 = vpack.c.bf16 %v994_v17, %v994_v17  ;;  %v7860_v45 = vor.u32 %v9257_v49, %v7857_v53 }
 0x1bb   : > { %v3296_v15 = vadd.f32 %v3295_v47, %v3207_v16  ;;  %v995_v16 = vld [vmem:[#allocation2 + $0x141] sm:$0xff]  ;;  %870 = vst [vmem:[#allocation3 + $0x3f8] sm:$0xf] %v838_v39  ;;  %v7792_v47 = vor.u32 %v9244_v25, %v7791_v12  ;;  %3463 = vmatpush.bf16.msra.mxu2 %v9341_v18  ;;  %3552 = vmatpush.bf16.msra.mxu3 %v9349_v37  ;;  %v9357_v49 = vld [vmem:[#allocation7 + $0x208] sm:$0xff] }
 0x1bc   : > { %v3214_v26 = vpop.f32.mrf.mxu3  ;;  %967 = vst [vmem:[#allocation3 + $0x420] sm:$0xf] %v935_v10  ;;  %v7827_v18 = vld [vmem:[#allocation3 + $0x328] sm:$0xf]  ;;  %v9253_v37 = vld [vmem:[#allocation3 + $0x348] sm:$0xf0]  ;;  %3641 = vmatpush.bf16.msra.mxu0 %v9357_v49 }
 0x1bd   : > { %v3125_v60 = vpop.f32.mrf.mxu2  ;;  %1058 = vst [vmem:[#allocation3 + $0x370] sm:$0xf] %v1026_v29  ;;  %v9249_v29 = vld [vmem:[#allocation3 + $0x32c] sm:$0xf] }
 0x1be   : > { %v3384_v27 = vpop.f32.mrf.mxu1  ;;  %v3126_v9 = vadd.f32 %v3125_v60, %v10523_v59  ;;  %v1027_v59 = vpack.c.bf16 %v995_v16, %v995_v16  ;;  %v7855_v60 = vld [vmem:[#allocation3 + $0x368] sm:$0xf]  ;;  %1156 = vst [vmem:[#allocation3 + $0x3bc] sm:$0xf] %v838_v39 }
 0x1bf   : > { %v10587_v57 = vadd.f32 %v3384_v27, %v3296_v15  ;;  %v7856_v28 = vor.u32 %v9261_v7, %v7855_v60  ;;  %v996_v7 = vld [vmem:[#allocation2 + $0x151] sm:$0xff] }
 0x1c0   : > { %v10590_v38 = vadd.f32 %v3214_v26, %v3126_v9  ;;  %v9659_v9 = vld [vmem:[%s10207_s29 + $0x78] sm:$0xff]   ;;  %1059 = vst [vmem:[#allocation3 + $0x394] sm:$0xf] %v1027_v59 }
 0x1c1   : > { %v10594_v55 = vunpack.c.l.bf16 %v9659_v9  ;;  %v10596_v12 = vunpack.c.h.bf16 %v9659_v9  ;;  %v808_v59 = vld [vmem:[#allocation2 + $0x16a] sm:$0xff] }
 0x1c2   : > { %v3298_v27 = vpop.f32.mrf.mxu0  ;;  %v840_v60 = vpack.c.bf16 %v808_v59, %v808_v59  ;;  %v7891_v59 = vld [vmem:[#allocation3 + $0x3b0] sm:$0xf] }
 0x1c3   : > { %v3299_v51 = vadd.f32 %v3298_v27, %v10579_v4  ;;  %12095 = vst [vmem:[#allocation50_spill] sm:$0xff] %v10594_v55  ;;  %v809_v27 = vld [vmem:[#allocation2 + $0x172] sm:$0xff] }
 0x1c4   : > { %v3216_v15 = vpop.f32.mrf.mxu3  ;;  %12096 = vst [vmem:[#allocation51_spill] sm:$0xff] %v10596_v12 }
 0x1c5   : > { %v3127_v25 = vpop.f32.mrf.mxu2  ;;  %3337 = vmatmul.bf16.gmra.mxu0 %v7792_v47  ;;  %584 = vst [vmem:[#allocation2 + $0x181] sm:$0xff] %v10594_v55 }
 0x1c6   : > { %v3387_v26 = vpop.f32.mrf.mxu1  ;;  %v3128_v11 = vadd.f32 %v3127_v25, %v10527_v8  ;;  %585 = vst [vmem:[#allocation2 + $0x189] sm:$0xff] %v10596_v12  ;;  %v7829_v8 = vld [vmem:[#allocation3 + $0x34c] sm:$0xf0]  ;;  %v9266_v25 = vld [vmem:[#allocation3 + $0x3b4] sm:$0xf] }
 0x1c7   : > { %v10598_v0 = vadd.f32 %v3387_v26, %v3299_v51  ;;  %v841_v51 = vpack.c.bf16 %v809_v27, %v809_v27  ;;  %872 = vst [vmem:[#allocation3 + $0x440] sm:$0xf] %v840_v60  ;;  %v7832_v49 = vor.u32 %v9249_v29, %v7829_v8  ;;  %v9270_v27 = vld [vmem:[#allocation3 + $0x3d0] sm:$0xf0]  ;;  %v9513_v8 = vld [vmem:[#allocation9 + $0x28] sm:$0xff] }
 0x1c8   : > { %v3217_v4 = vadd.f32 %v3216_v15, %v3128_v11  ;;  %v7893_v11 = vld [vmem:[#allocation3 + $0x3d4] sm:$0xf0]  ;;  %1158 = vst [vmem:[#allocation3 + $0x404] sm:$0xf] %v840_v60  ;;  %6202 = vmatpush.bf16.msra.mxu1 %v9513_v8  ;;  %v1163_v60 = vld [vmem:[#allocation2 + $0x30] sm:$0xff] }
 0x1c9   : > { %3426 = vmatmul.bf16.gmra.mxu1 %v7796_v52  ;;  %3258 = vmatmul.bf16.gmra.mxu3 %v7860_v45  ;;  %873 = vst [vmem:[#allocation3 + $0x464] sm:$0xf] %v841_v51 }
 0x1ca   : > { %3169 = vmatmul.bf16.gmra.mxu2 %v7856_v28  ;;  %v3300_v16 = vpop.f32.mrf.mxu0  ;;  %v1028_v28 = vpack.c.bf16 %v996_v7, %v996_v7  ;;  %1159 = vst [vmem:[#allocation3 + $0x428] sm:$0xf] %v841_v51  ;;  %v7863_v7 = vld [vmem:[#allocation3 + $0x370] sm:$0xf] }
 0x1cb   : > { %v3301_v10 = vadd.f32 %v3300_v16, %v10585_v19  ;;  %v997_v19 = vld [vmem:[#allocation2 + $0x159] sm:$0xff]  ;;  %v7828_v16 = vor.u32 %v9253_v37, %v7827_v18  ;;  %v7892_v37 = vor.u32 %v9270_v27, %v7891_v59  ;;  %v9275_v59 = vld [vmem:[#allocation3 + $0x3fc] sm:$0xf] }
 0x1cc   : > { %v3219_v17 = vpop.f32.mrf.mxu3  ;;  %v904_v15 = vld [vmem:[#allocation2 + $0x180] sm:$0xff]  ;;  %1060 = vst [vmem:[#allocation3 + $0x3b8] sm:$0xf] %v1028_v28 }
 0x1cd   : > { %v3130_v47 = vpop.f32.mrf.mxu2  ;;  %v905_v26 = vld [vmem:[#allocation2 + $0x188] sm:$0xff]  ;;  %v936_v62 = vpack.c.bf16 %v904_v15, %v904_v15  ;;  %v7896_v15 = vor.u32 %v9266_v25, %v7893_v11 }
 0x1ce   : > { %v3389_v53 = vpop.f32.mrf.mxu1  ;;  %v3131_v39 = vadd.f32 %v3130_v47, %v10531_v61  ;;  %v937_v45 = vpack.c.bf16 %v905_v26, %v905_v26  ;;  %v7865_v25 = vld [vmem:[#allocation3 + $0x394] sm:$0xf0] }
 0x1cf   : > { %v10604_v52 = vadd.f32 %v3389_v53, %v3301_v10  ;;  %v1029_v10 = vpack.c.bf16 %v997_v19, %v997_v19  ;;  %968 = vst [vmem:[#allocation3 + $0x444] sm:$0xf] %v936_v62  ;;  %v9262_v19 = vld [vmem:[#allocation3 + $0x390] sm:$0xf0] }
 0x1d0   : > { %v10607_v9 = vadd.f32 %v3219_v17, %v3131_v39  ;;  %969 = vst [vmem:[#allocation3 + $0x468] sm:$0xf] %v937_v45  ;;  %v9258_v45 = vld [vmem:[#allocation3 + $0x374] sm:$0xf]  ;;  %v7864_v8 = vor.u32 %v9262_v19, %v7863_v7 }
 0x1d1   : > { %1061 = vst [vmem:[#allocation3 + $0x3dc] sm:$0xf] %v1029_v10 }
 0x1d2   : > { %v3303_v31 = vpop.f32.mrf.mxu0 }
 0x1d3   : > { %v3304_v61 = vadd.f32 %v3303_v31, %v10590_v38 }
 0x1d4   : > { %v3221_v53 = vpop.f32.mrf.mxu3 }
 0x1d5   : > { %v3132_v17 = vpop.f32.mrf.mxu2  ;;  %3342 = vmatmul.bf16.gmra.mxu0 %v7828_v16  ;;  %v999_v16 = vld [vmem:[#allocation2 + $0x171] sm:$0xff] }
 0x1d6   : > { %v3392_v47 = vpop.f32.mrf.mxu1  ;;  %v3133_v18 = vadd.f32 %v3132_v17, %v10535_v20  ;;  %v998_v20 = vld [vmem:[#allocation2 + $0x169] sm:$0xff]  ;;  %v1031_v10 = vpack.c.bf16 %v999_v16, %v999_v16 }
 0x1d7   : > { %v10610_v39 = vadd.f32 %v3392_v47, %v3304_v61  ;;  %v1195_v61 = vpack.c.bf16 %v1163_v60, %v1163_v60  ;;  %v1259_v47 = vld [vmem:[#allocation2 + $0x31] sm:$0xff]  ;;  %v7927_v60 = vld [vmem:[#allocation3 + $0x3f8] sm:$0xf] }
 0x1d8   : > { %v3222_v29 = vadd.f32 %v3221_v53, %v3133_v18  ;;  %v1164_v53 = vld [vmem:[#allocation2 + $0x38] sm:$0xff]  ;;  %v7929_v17 = vld [vmem:[#allocation3 + $0x41c] sm:$0xf0]  ;;  %1063 = vst [vmem:[#allocation3 + $0x424] sm:$0xf] %v1031_v10 }
 0x1d9   : > { %3431 = vmatmul.bf16.gmra.mxu1 %v7832_v49  ;;  %3263 = vmatmul.bf16.gmra.mxu3 %v7896_v15  ;;  %v1030_v49 = vpack.c.bf16 %v998_v20, %v998_v20  ;;  %v1196_v27 = vpack.c.bf16 %v1164_v53, %v1164_v53  ;;  %v9340_v18 = vld [vmem:[#allocation7 + $0x180] sm:$0xff]  ;;  %1227 = vst [vmem:[#allocation3 + $0x18] sm:$0xf] %v1195_v61 }
 0x1da   : > { %3174 = vmatmul.bf16.gmra.mxu2 %v7892_v37  ;;  %v3305_v38 = vpop.f32.mrf.mxu0  ;;  %v9348_v37 = vld [vmem:[#allocation7 + $0x1c0] sm:$0xff] }
 0x1db   : > { %v3306_v26 = vadd.f32 %v3305_v38, %v3217_v4  ;;  %v1260_v4 = vld [vmem:[#allocation2 + $0x39] sm:$0xff]  ;;  %1062 = vst [vmem:[#allocation3 + $0x400] sm:$0xf] %v1030_v49  ;;  %v1291_v38 = vpack.c.bf16 %v1259_v47, %v1259_v47  ;;  %3464 = vmatpush.bf16.msra.mxu2 %v9340_v18  ;;  %3553 = vmatpush.bf16.msra.mxu3 %v9348_v37  ;;  %v9356_v10 = vld [vmem:[#allocation7 + $0x200] sm:$0xff] }
 0x1dc   : > { %v3224_v31 = vpop.f32.mrf.mxu3  ;;  %1228 = vst [vmem:[#allocation3 + $0x3c] sm:$0xf] %v1196_v27  ;;  %3642 = vmatpush.bf16.msra.mxu0 %v9356_v10  ;;  %v1166_v18 = vld [vmem:[#allocation2 + $0x50] sm:$0xff] }
 0x1dd   : > { %v3135_v11 = vpop.f32.mrf.mxu2  ;;  %1323 = vst [vmem:[#allocation3 + $0x1c] sm:$0xf] %v1291_v38  ;;  %v1261_v37 = vld [vmem:[#allocation2 + $0x49] sm:$0xff] }
 0x1de   : > { %v3394_v62 = vpop.f32.mrf.mxu1  ;;  %v3136_v51 = vadd.f32 %v3135_v11, %v10539_v48  ;;  %v7899_v38 = vld [vmem:[#allocation3 + $0x3b8] sm:$0xf] }
 0x1df   : > { %v10613_v28 = vadd.f32 %v3394_v62, %v3306_v26  ;;  %v7868_v26 = vor.u32 %v9258_v45, %v7865_v25  ;;  %v1292_v62 = vpack.c.bf16 %v1260_v4, %v1260_v4  ;;  %v9267_v4 = vld [vmem:[#allocation3 + $0x3bc] sm:$0xf] }
 0x1e0   : > { %v10616_v15 = vadd.f32 %v3224_v31, %v3136_v51  ;;  %v9279_v31 = vld [vmem:[#allocation3 + $0x418] sm:$0xf0]  ;;  %v7932_v51 = vor.u32 %v9275_v59, %v7929_v17  ;;  %v7901_v59 = vld [vmem:[#allocation3 + $0x3dc] sm:$0xf0] }
 0x1e1   : > { %1324 = vst [vmem:[#allocation3 + $0x40] sm:$0xf] %v1292_v62  ;;  %v7928_v19 = vor.u32 %v9279_v31, %v7927_v60  ;;  %v1165_v17 = vld [vmem:[#allocation2 + $0x48] sm:$0xff]  ;;  %v7965_v31 = vld [vmem:[#allocation3 + $0x464] sm:$0xf0] }
 0x1e2   : > { %v3308_v11 = vpop.f32.mrf.mxu0  ;;  %v1197_v62 = vpack.c.bf16 %v1165_v17, %v1165_v17 }
 0x1e3   : > { %v3309_v20 = vadd.f32 %v3308_v11, %v10607_v9  ;;  %v9284_v11 = vld [vmem:[#allocation3 + $0x444] sm:$0xf] }
 0x1e4   : > { %v3226_v48 = vpop.f32.mrf.mxu3  ;;  %1229 = vst [vmem:[#allocation3 + $0x60] sm:$0xf] %v1197_v62  ;;  %v7968_v1 = vor.u32 %v9284_v11, %v7965_v31 }
 0x1e5   : > { %v3137_v53 = vpop.f32.mrf.mxu2  ;;  %3347 = vmatmul.bf16.gmra.mxu0 %v7864_v8  ;;  %v9271_v8 = vld [vmem:[#allocation3 + $0x3d8] sm:$0xf0] }
 0x1e6   : > { %v3397_v16 = vpop.f32.mrf.mxu1  ;;  %v3138_v7 = vadd.f32 %v3137_v53, %v10543_v21  ;;  %v1097_v53 = vld [vmem:[#allocation2 + $0x18a] sm:$0xff] }
 0x1e7   : > { %v10619_v49 = vadd.f32 %v3397_v16, %v3309_v20  ;;  %v1198_v20 = vpack.c.bf16 %v1166_v18, %v1166_v18  ;;  %v1096_v16 = vld [vmem:[#allocation2 + $0x182] sm:$0xff]  ;;  %v9288_v18 = vld [vmem:[#allocation3 + $0x460] sm:$0xf0] }
 0x1e8   : > { %v3227_v45 = vadd.f32 %v3226_v48, %v3138_v7  ;;  %v1262_v48 = vld [vmem:[#allocation2 + $0x51] sm:$0xff]  ;;  %v7904_v7 = vor.u32 %v9267_v4, %v7901_v59 }
 0x1e9   : > { %3436 = vmatmul.bf16.gmra.mxu1 %v7868_v26  ;;  %3268 = vmatmul.bf16.gmra.mxu3 %v7932_v51  ;;  %v1032_v26 = vpack.c.bf16 %v10594_v55, %v10594_v55  ;;  %v1293_v51 = vpack.c.bf16 %v1261_v37, %v1261_v37  ;;  %v7963_v55 = vld [vmem:[#allocation3 + $0x440] sm:$0xf]  ;;  %1230 = vst [vmem:[#allocation3 + $0x84] sm:$0xf] %v1198_v20  ;;  %v9276_v20 = vld [vmem:[#allocation3 + $0x404] sm:$0xf] }
 0x1ea   : > { %3179 = vmatmul.bf16.gmra.mxu2 %v7928_v19  ;;  %v3310_v9 = vpop.f32.mrf.mxu0  ;;  %v1294_v19 = vpack.c.bf16 %v1262_v48, %v1262_v48  ;;  %v7964_v59 = vor.u32 %v9288_v18, %v7963_v55  ;;  %v9280_v48 = vld [vmem:[#allocation3 + $0x420] sm:$0xf0] }
 0x1eb   : > { %v10622_v61 = vadd.f32 %v3310_v9, %v3222_v29  ;;  %v1033_v29 = vpack.c.bf16 %v10596_v12, %v10596_v12  ;;  %1064 = vst [vmem:[#allocation3 + $0x448] sm:$0xf] %v1032_v26  ;;  %v9512_v26 = vld [vmem:[#allocation9 + $0x20] sm:$0xff] }
 0x1ec   : > { %v3229_v25 = vpop.f32.mrf.mxu3  ;;  %1325 = vst [vmem:[#allocation3 + $0x64] sm:$0xf] %v1293_v51  ;;  %6203 = vmatpush.bf16.msra.mxu1 %v9512_v26 }
 0x1ed   : > { %v3140_v27 = vpop.f32.mrf.mxu2  ;;  %1065 = vst [vmem:[#allocation3 + $0x46c] sm:$0xf] %v1033_v29 }
 0x1ee   : > { %v10624_v47 = vpop.f32.mrf.mxu1  ;;  %v3141_v21 = vadd.f32 %v3140_v27, %v10547_v44  ;;  %v7900_v44 = vor.u32 %v9271_v8, %v7899_v38  ;;  %v1128_v27 = vpack.c.bf16 %v1096_v16, %v1096_v16  ;;  %1326 = vst [vmem:[#allocation3 + $0x88] sm:$0xf] %v1294_v19  ;;  %v1167_v16 = vld [vmem:[#allocation2 + $0x60] sm:$0xff] }
 0x1ef   : > { %v1199_v31 = vpack.c.bf16 %v1167_v16, %v1167_v16  ;;  %v9155_v16 = vld [vmem:[#allocation3 + $0x38] sm:$0xf0] }
 0x1f0   : > { %v10631_v60 = vadd.f32 %v3229_v25, %v3141_v21  ;;  %v1129_v25 = vpack.c.bf16 %v1097_v53, %v1097_v53  ;;  %1160 = vst [vmem:[#allocation3 + $0x44c] sm:$0xf] %v1128_v27  ;;  %v1263_v53 = vld [vmem:[#allocation2 + $0x61] sm:$0xff]  ;;  %v9151_v27 = vld [vmem:[#allocation3 + $0x1c] sm:$0xf] }
 0x1f1   : > { %1231 = vst [vmem:[#allocation3 + $0xa8] sm:$0xf] %v1199_v31 }
 0x1f2   : > { %v3313_v10 = vpop.f32.mrf.mxu0  ;;  %1161 = vst [vmem:[#allocation3 + $0x470] sm:$0xf] %v1129_v25 }
 0x1f3   : > { %v3314_v17 = vadd.f32 %v3313_v10, %v10616_v15 }
 0x1f4   : > { %v3231_v9 = vpop.f32.mrf.mxu3 }
 0x1f5   : > { %v3142_v21 = vpop.f32.mrf.mxu2  ;;  %3352 = vmatmul.bf16.gmra.mxu0 %v7900_v44  ;;  %v1264_v44 = vld [vmem:[#allocation2 + $0x69] sm:$0xff] }
 0x1f6   : > { %v3402_v12 = vpop.f32.mrf.mxu1  ;;  %v3143_v4 = vadd.f32 %v3142_v21, %v10551_v6  ;;  %v1168_v6 = vld [vmem:[#allocation2 + $0x68] sm:$0xff]  ;;  %v1296_v19 = vpack.c.bf16 %v1264_v44, %v1264_v44  ;;  %v9289_v44 = vld [vmem:[#allocation3 + $0x468] sm:$0xf0] }
 0x1f7   : > { %v10634_v37 = vadd.f32 %v3402_v12, %v3314_v17  ;;  %v7935_v12 = vld [vmem:[#allocation3 + $0x400] sm:$0xf]  ;;  %v1200_v51 = vpack.c.bf16 %v1168_v6, %v1168_v6 }
 0x1f8   : > { %v3232_v15 = vadd.f32 %v3231_v9, %v3143_v4  ;;  %v1356_v9 = vld [vmem:[#allocation2 + $0x3a] sm:$0xff]  ;;  %v7441_v17 = vld [vmem:[#allocation3 + $0x3c] sm:$0xf0]  ;;  %v7936_v25 = vor.u32 %v9280_v48, %v7935_v12  ;;  %1328 = vst [vmem:[#allocation3 + $0xd0] sm:$0xf] %v1296_v19 }
 0x1f9   : > { %3441 = vmatmul.bf16.gmra.mxu1 %v7904_v7  ;;  %3273 = vmatmul.bf16.gmra.mxu3 %v7968_v1  ;;  %v7937_v1 = vld [vmem:[#allocation3 + $0x424] sm:$0xf0]  ;;  %v1295_v7 = vpack.c.bf16 %v1263_v53, %v1263_v53  ;;  %1232 = vst [vmem:[#allocation3 + $0xcc] sm:$0xf] %v1200_v51  ;;  %v1388_v4 = vpack.c.bf16 %v1356_v9, %v1356_v9  ;;  %v7973_v19 = vld [vmem:[#allocation3 + $0x46c] sm:$0xf0] }
 0x1fa   : > { %3184 = vmatmul.bf16.gmra.mxu2 %v7964_v59  ;;  %v3315_v8 = vpop.f32.mrf.mxu0  ;;  %v7940_v21 = vor.u32 %v9276_v20, %v7937_v1  ;;  %v7444_v6 = vor.u32 %v9151_v27, %v7441_v17  ;;  %v7971_v53 = vld [vmem:[#allocation3 + $0x448] sm:$0xf]  ;;  %v1170_v27 = vld [vmem:[#allocation2 + $0x80] sm:$0xff] }
 0x1fb   : > { %v10637_v29 = vadd.f32 %v3315_v8, %v3227_v45  ;;  %v1355_v45 = vld [vmem:[#allocation2 + $0x32] sm:$0xff]  ;;  %1327 = vst [vmem:[#allocation3 + $0xac] sm:$0xf] %v1295_v7  ;;  %v9285_v7 = vld [vmem:[#allocation3 + $0x44c] sm:$0xf] }
 0x1fc   : > { %v3234_v38 = vpop.f32.mrf.mxu3  ;;  %v1387_v18 = vpack.c.bf16 %v1355_v45, %v1355_v45  ;;  %1420 = vst [vmem:[#allocation3 + $0x44] sm:$0xf] %v1388_v4  ;;  %v1169_v9 = vld [vmem:[#allocation2 + $0x78] sm:$0xff] }
 0x1fd   : > { %v3145_v11 = vpop.f32.mrf.mxu2  ;;  %v1265_v17 = vld [vmem:[#allocation2 + $0x79] sm:$0xff] }
 0x1fe   : > { %v10639_v62 = vpop.f32.mrf.mxu1  ;;  %v3146_v55 = vadd.f32 %v3145_v11, %v10555_v50  ;;  %v7439_v11 = vld [vmem:[#allocation3 + $0x18] sm:$0xf]  ;;  %1419 = vst [vmem:[#allocation3 + $0x20] sm:$0xf] %v1387_v18  ;;  %v1201_v18 = vpack.c.bf16 %v1169_v9, %v1169_v9  ;;  %v1297_v4 = vpack.c.bf16 %v1265_v17, %v1265_v17  ;;  %v7475_v9 = vld [vmem:[#allocation3 + $0x60] sm:$0xf] }
 0x1ff   : > { %v7440_v48 = vor.u32 %v9155_v16, %v7439_v11  ;;  %v7477_v11 = vld [vmem:[#allocation3 + $0x84] sm:$0xf0] }
 0x200   : > { %v3235_v10 = vadd.f32 %v3234_v38, %v3146_v55  ;;  %1233 = vst [vmem:[#allocation3 + $0xf0] sm:$0xf] %v1201_v18 }
 0x201   : > { %1329 = vst [vmem:[#allocation3 + $0xf4] sm:$0xf] %v1297_v4 }
 0x202   : > { %v3318_v50 = vpop.f32.mrf.mxu0 }
 0x203   : > { %v3319_v8 = vadd.f32 %v3318_v50, %v10631_v60  ;;  %v1358_v50 = vld [vmem:[#allocation2 + $0x52] sm:$0xff] }
 0x204   : > { %v3236_v59 = vpop.f32.mrf.mxu3 }
 0x205   : > { %v3147_v38 = vpop.f32.mrf.mxu2  ;;  %3357 = vmatmul.bf16.gmra.mxu0 %v7936_v25  ;;  %v1202_v25 = vpack.c.bf16 %v1170_v27, %v1170_v27  ;;  %v9164_v27 = vld [vmem:[#allocation3 + $0x80] sm:$0xf0]  ;;  %v7447_v4 = vld [vmem:[#allocation3 + $0x20] sm:$0xf] }
 0x206   : > { %v3407_v26 = vpop.f32.mrf.mxu1  ;;  %v3148_v12 = vadd.f32 %v3147_v38, %v10559_v30  ;;  %v7976_v38 = vor.u32 %v9285_v7, %v7973_v19 }
 0x207   : > { %v10643_v55 = vadd.f32 %v3407_v26, %v3319_v8  ;;  %v9160_v26 = vld [vmem:[#allocation3 + $0x64] sm:$0xf]  ;;  %1234 = vst [vmem:[#allocation3 + $0x114] sm:$0xf] %v1202_v25 }
 0x208   : > { %v3237_v20 = vadd.f32 %v3236_v59, %v3148_v12  ;;  %v1357_v59 = vld [vmem:[#allocation2 + $0x4a] sm:$0xff]  ;;  %v1390_v12 = vpack.c.bf16 %v1358_v50, %v1358_v50  ;;  %v7480_v17 = vor.u32 %v9160_v26, %v7477_v11  ;;  %v1172_v26 = vld [vmem:[#allocation2 + $0x98] sm:$0xff] }
 0x209   : > { %3446 = vmatmul.bf16.gmra.mxu1 %v7940_v21  ;;  %3554 = vmatmul.bf16.vlgmr.msra.gmra.mxu3 %v7444_v6  ;;  %v1266_v21 = vld [vmem:[#allocation2 + $0x81] sm:$0xff]  ;;  %v1389_v16 = vpack.c.bf16 %v1357_v59, %v1357_v59  ;;  %v7972_v6 = vor.u32 %v9289_v44, %v7971_v53  ;;  %v7476_v44 = vor.u32 %v9164_v27, %v7475_v9  ;;  %v9156_v59 = vld [vmem:[#allocation3 + $0x40] sm:$0xf0] }
 0x20a   : > { %3465 = vmatmul.bf16.vlgmr.msra.gmra.mxu2 %v7440_v48  ;;  %v3320_v60 = vpop.f32.mrf.mxu0  ;;  %1422 = vst [vmem:[#allocation3 + $0x8c] sm:$0xf] %v1390_v12  ;;  %v1267_v11 = vld [vmem:[#allocation2 + $0x91] sm:$0xff]  ;;  %v7513_v9 = vld [vmem:[#allocation3 + $0xcc] sm:$0xf0] }
 0x20b   : > { %v10646_v31 = vadd.f32 %v3320_v60, %v3232_v15  ;;  %v1298_v15 = vpack.c.bf16 %v1266_v21, %v1266_v21  ;;  %1421 = vst [vmem:[#allocation3 + $0x68] sm:$0xf] %v1389_v16  ;;  %v1299_v12 = vpack.c.bf16 %v1267_v11, %v1267_v11 }
 0x20c   : > { %v3239_v1 = vpop.f32.mrf.mxu3 }
 0x20d   : > { %v3150_v45 = vpop.f32.mrf.mxu2  ;;  %1330 = vst [vmem:[#allocation3 + $0x118] sm:$0xf] %v1298_v15  ;;  %v1171_v15 = vld [vmem:[#allocation2 + $0x90] sm:$0xff] }
 0x20e   : > { %v10648_v51 = vpop.f32.mrf.mxu1  ;;  %v3151_v30 = vadd.f32 %v3150_v45, %v10564_v32  ;;  %v1203_v16 = vpack.c.bf16 %v1171_v15, %v1171_v15  ;;  %1331 = vst [vmem:[#allocation3 + $0x13c] sm:$0xf] %v1299_v12 }
 0x210   : > { %v3240_v8 = vadd.f32 %v3239_v1, %v3151_v30  ;;  %v9511_v30 = vld [vmem:[#allocation9 + $0x18] sm:$0xff]  ;;  %1235 = vst [vmem:[#allocation3 + $0x138] sm:$0xf] %v1203_v16 }
 0x211   : > { %6204 = vmatpush.bf16.msra.mxu1 %v9511_v30  ;;  %v7511_v30 = vld [vmem:[#allocation3 + $0xa8] sm:$0xf]  ;;  %v9165_v12 = vld [vmem:[#allocation3 + $0x88] sm:$0xf0] }
 0x212   : > { %v3323_v60 = vpop.f32.mrf.mxu0 }
 0x213   : > { %v3324_v32 = vadd.f32 %v3323_v60, %v3235_v10  ;;  %v1360_v60 = vld [vmem:[#allocation2 + $0x6a] sm:$0xff] }
 0x214   : > { %v3241_v48 = vpop.f32.mrf.mxu3 }
 0x215   : > { %v3152_v21 = vpop.f32.mrf.mxu2  ;;  %3362 = vmatmul.bf16.gmra.mxu0 %v7972_v6  ;;  %v1204_v6 = vpack.c.bf16 %v1172_v26, %v1172_v26 }
 0x216   : > { %v3412_v45 = vpop.f32.mrf.mxu1  ;;  %v3153_v53 = vadd.f32 %v3152_v21, %v10567_v14  ;;  %v1392_v21 = vpack.c.bf16 %v1360_v60, %v1360_v60  ;;  %v1173_v60 = vld [vmem:[#allocation2 + $0xa8] sm:$0xff] }
 0x217   : > { %v10651_v1 = vadd.f32 %v3412_v45, %v3324_v32  ;;  %v9169_v45 = vld [vmem:[#allocation3 + $0xac] sm:$0xf]  ;;  %1236 = vst [vmem:[#allocation3 + $0x15c] sm:$0xf] %v1204_v6 }
 0x218   : > { %v3242_v7 = vadd.f32 %v3241_v48, %v3153_v53  ;;  %v1359_v48 = vld [vmem:[#allocation2 + $0x62] sm:$0xff]  ;;  %v7516_v15 = vor.u32 %v9169_v45, %v7513_v9  ;;  %1424 = vst [vmem:[#allocation3 + $0xd4] sm:$0xf] %v1392_v21 }
 0x219   : > { %3451 = vmatmul.bf16.gmra.mxu1 %v7976_v38  ;;  %3559 = vmatmul.bf16.gmra.mxu3 %v7480_v17  ;;  %v1268_v38 = vld [vmem:[#allocation2 + $0x99] sm:$0xff]  ;;  %v1391_v27 = vpack.c.bf16 %v1359_v48, %v1359_v48  ;;  %v7448_v17 = vor.u32 %v9156_v59, %v7447_v4  ;;  %v1269_v45 = vld [vmem:[#allocation2 + $0xa9] sm:$0xff] }
 0x21a   : > { %3470 = vmatmul.bf16.gmra.mxu2 %v7476_v44  ;;  %v3325_v10 = vpop.f32.mrf.mxu0  ;;  %v1300_v32 = vpack.c.bf16 %v1268_v38, %v1268_v38  ;;  %v7483_v38 = vld [vmem:[#allocation3 + $0x68] sm:$0xf]  ;;  %v1301_v21 = vpack.c.bf16 %v1269_v45, %v1269_v45 }
 0x21b   : > { %v10654_v18 = vadd.f32 %v3325_v10, %v3237_v20  ;;  %1423 = vst [vmem:[#allocation3 + $0xb0] sm:$0xf] %v1391_v27  ;;  %v1205_v27 = vpack.c.bf16 %v1173_v60, %v1173_v60  ;;  %v9182_v60 = vld [vmem:[#allocation3 + $0x110] sm:$0xf0] }
 0x21c   : > { %v3244_v19 = vpop.f32.mrf.mxu3  ;;  %1332 = vst [vmem:[#allocation3 + $0x160] sm:$0xf] %v1300_v32  ;;  %v1174_v32 = vld [vmem:[#allocation2 + $0xb0] sm:$0xff] }
 0x21d   : > { %v3155_v50 = vpop.f32.mrf.mxu2  ;;  %1237 = vst [vmem:[#allocation3 + $0x180] sm:$0xf] %v1205_v27 }
 0x21e   : > { %v10656_v25 = vpop.f32.mrf.mxu1  ;;  %v3156_v14 = vadd.f32 %v3155_v50, %v10505_v33  ;;  %v9173_v50 = vld [vmem:[#allocation3 + $0xc8] sm:$0xf0]  ;;  %1333 = vst [vmem:[#allocation3 + $0x184] sm:$0xf] %v1301_v21 }
 0x21f   : > { %v7512_v4 = vor.u32 %v9173_v50, %v7511_v30  ;;  %v7549_v30 = vld [vmem:[#allocation3 + $0x114] sm:$0xf0] }
 0x220   : > { %v3245_v20 = vadd.f32 %v3244_v19, %v3156_v14 }
 0x222   : > { %v3328_v44 = vpop.f32.mrf.mxu0 }
 0x223   : > { %v3329_v10 = vadd.f32 %v3328_v44, %v3240_v8  ;;  %v1362_v44 = vld [vmem:[#allocation2 + $0x82] sm:$0xff] }
 0x224   : > { %v3246_v53 = vpop.f32.mrf.mxu3 }
 0x225   : > { %v3157_v26 = vpop.f32.mrf.mxu2  ;;  %3643 = vmatmul.bf16.vlgmr.msra.gmra.mxu0 %v7448_v17  ;;  %v1270_v17 = vld [vmem:[#allocation2 + $0xb1] sm:$0xff] }
 0x226   : > { %v3417_v33 = vpop.f32.mrf.mxu1  ;;  %v3158_v19 = vadd.f32 %v3157_v26, %v10509_v58  ;;  %v1206_v58 = vpack.c.bf16 %v1174_v32, %v1174_v32  ;;  %v1394_v26 = vpack.c.bf16 %v1362_v44, %v1362_v44  ;;  %v9174_v44 = vld [vmem:[#allocation3 + $0xd0] sm:$0xf0] }
 0x227   : > { %v10659_v11 = vadd.f32 %v3417_v33, %v3329_v10  ;;  %v1302_v10 = vpack.c.bf16 %v1270_v17, %v1270_v17 }
 0x228   : > { %v3247_v59 = vadd.f32 %v3246_v53, %v3158_v19  ;;  %v1361_v53 = vld [vmem:[#allocation2 + $0x7a] sm:$0xff]  ;;  %1238 = vst [vmem:[#allocation3 + $0x1a4] sm:$0xf] %v1206_v58 }
 0x229   : > { %3564 = vmatmul.bf16.gmra.mxu3 %v7516_v15  ;;  %v1393_v50 = vpack.c.bf16 %v1361_v53, %v1361_v53  ;;  %v7484_v15 = vor.u32 %v9165_v12, %v7483_v38  ;;  %1334 = vst [vmem:[#allocation3 + $0x1a8] sm:$0xf] %v1302_v10  ;;  %v7519_v53 = vld [vmem:[#allocation3 + $0xb0] sm:$0xf] }
 0x22a   : > { %3475 = vmatmul.bf16.gmra.mxu2 %v7512_v4  ;;  %v3330_v16 = vpop.f32.mrf.mxu0  ;;  %1426 = vst [vmem:[#allocation3 + $0x11c] sm:$0xf] %v1394_v26 }
 0x22b   : > { %v10662_v8 = vadd.f32 %v3330_v16, %v3242_v7  ;;  %v9178_v7 = vld [vmem:[#allocation3 + $0xf4] sm:$0xf]  ;;  %1425 = vst [vmem:[#allocation3 + $0xf8] sm:$0xf] %v1393_v50 }
 0x22c   : > { %v3249_v14 = vpop.f32.mrf.mxu3  ;;  %v7552_v32 = vor.u32 %v9178_v7, %v7549_v30  ;;  %v1175_v7 = vld [vmem:[#allocation2 + $0xc0] sm:$0xff]  ;;  %v1176_v30 = vld [vmem:[#allocation2 + $0xc8] sm:$0xff] }
 0x22d   : > { %v3160_v48 = vpop.f32.mrf.mxu2  ;;  %v1271_v50 = vld [vmem:[#allocation2 + $0xc1] sm:$0xff]  ;;  %v1208_v26 = vpack.c.bf16 %v1176_v30, %v1176_v30 }
 0x22e   : > { %v10664_v6 = vpop.f32.mrf.mxu1  ;;  %v3161_v9 = vadd.f32 %v3160_v48, %v10513_v24  ;;  %v7547_v48 = vld [vmem:[#allocation3 + $0xf0] sm:$0xf] }
 0x22f   : > { %v7548_v38 = vor.u32 %v9182_v60, %v7547_v48  ;;  %v9187_v60 = vld [vmem:[#allocation3 + $0x13c] sm:$0xf]  ;;  %1240 = vst [vmem:[#allocation3 + $0x1ec] sm:$0xf] %v1208_v26 }
 0x230   : > { %v3250_v33 = vadd.f32 %v3249_v14, %v3161_v9 }
 0x232   : > { %v3333_v4 = vpop.f32.mrf.mxu0 }
 0x233   : > { %v3334_v16 = vadd.f32 %v3333_v4, %v3245_v20  ;;  %v9510_v20 = vld [vmem:[#allocation9 + $0x10] sm:$0xff]  ;;  %v1303_v4 = vpack.c.bf16 %v1271_v50, %v1271_v50 }
 0x234   : > { %v3251_v19 = vpop.f32.mrf.mxu3  ;;  %6205 = vmatpush.bf16.msra.mxu1 %v9510_v20 }
 0x235   : > { %v3162_v45 = vpop.f32.mrf.mxu2  ;;  %3648 = vmatmul.bf16.gmra.mxu0 %v7484_v15  ;;  %v1207_v15 = vpack.c.bf16 %v1175_v7, %v1175_v7  ;;  %1335 = vst [vmem:[#allocation3 + $0x1cc] sm:$0xf] %v1303_v4  ;;  %v9191_v7 = vld [vmem:[#allocation3 + $0x158] sm:$0xf0]  ;;  %v7555_v4 = vld [vmem:[#allocation3 + $0xf8] sm:$0xf] }
 0x236   : > { %v3422_v24 = vpop.f32.mrf.mxu1  ;;  %v3163_v14 = vadd.f32 %v3162_v45, %v10517_v22 }
 0x237   : > { %v10667_v17 = vadd.f32 %v3422_v24, %v3334_v16  ;;  %v1363_v16 = vld [vmem:[#allocation2 + $0x92] sm:$0xff]  ;;  %v1364_v24 = vld [vmem:[#allocation2 + $0x9a] sm:$0xff]  ;;  %1239 = vst [vmem:[#allocation3 + $0x1c8] sm:$0xf] %v1207_v15 }
 0x238   : > { %v3252_v12 = vadd.f32 %v3251_v19, %v3163_v14  ;;  %v1272_v19 = vld [vmem:[#allocation2 + $0xc9] sm:$0xff]  ;;  %v1395_v45 = vpack.c.bf16 %v1363_v16, %v1363_v16  ;;  %v7520_v14 = vor.u32 %v9174_v44, %v7519_v53 }
 0x239   : > { %3569 = vmatmul.bf16.gmra.mxu3 %v7552_v32  ;;  %v1304_v48 = vpack.c.bf16 %v1272_v19, %v1272_v19  ;;  %v7585_v32 = vld [vmem:[#allocation3 + $0x15c] sm:$0xf0]  ;;  %v9183_v16 = vld [vmem:[#allocation3 + $0x118] sm:$0xf0] }
 0x23a   : > { %3480 = vmatmul.bf16.gmra.mxu2 %v7548_v38  ;;  %v3335_v27 = vpop.f32.mrf.mxu0  ;;  %v1396_v38 = vpack.c.bf16 %v1364_v24, %v1364_v24  ;;  %v7588_v30 = vor.u32 %v9187_v60, %v7585_v32  ;;  %1427 = vst [vmem:[#allocation3 + $0x140] sm:$0xf] %v1395_v45  ;;  %v1273_v60 = vld [vmem:[#allocation2 + $0xd9] sm:$0xff] }
 0x23b   : > { %v10670_v58 = vadd.f32 %v3335_v27, %v3247_v59  ;;  %1336 = vst [vmem:[#allocation3 + $0x1f0] sm:$0xf] %v1304_v48  ;;  %v1177_v48 = vld [vmem:[#allocation2 + $0xd8] sm:$0xff] }
 0x23c   : > { %v3254_v9 = vpop.f32.mrf.mxu3  ;;  %1428 = vst [vmem:[#allocation3 + $0x164] sm:$0xf] %v1396_v38  ;;  %v1209_v45 = vpack.c.bf16 %v1177_v48, %v1177_v48  ;;  %v1305_v38 = vpack.c.bf16 %v1273_v60, %v1273_v60  ;;  %v9200_v48 = vld [vmem:[#allocation3 + $0x1a0] sm:$0xf0] }
 0x23d   : > { %v3165_v10 = vpop.f32.mrf.mxu2 }
 0x23e   : > { %v10672_v21 = vpop.f32.mrf.mxu1  ;;  %v3166_v22 = vadd.f32 %v3165_v10, %v10521_v3  ;;  %v7583_v10 = vld [vmem:[#allocation3 + $0x138] sm:$0xf]  ;;  %1241 = vst [vmem:[#allocation3 + $0x210] sm:$0xf] %v1209_v45 }
 0x23f   : > { %v7584_v53 = vor.u32 %v9191_v7, %v7583_v10  ;;  %v7621_v7 = vld [vmem:[#allocation3 + $0x1a4] sm:$0xf0]  ;;  %1337 = vst [vmem:[#allocation3 + $0x214] sm:$0xf] %v1305_v38 }
 0x240   : > { %v3255_v59 = vadd.f32 %v3254_v9, %v3166_v22 }
 0x242   : > { %v3338_v20 = vpop.f32.mrf.mxu0 }
 0x243   : > { %v3339_v63 = vadd.f32 %v3338_v20, %v3250_v33  ;;  %v1366_v20 = vld [vmem:[#allocation2 + $0xb2] sm:$0xff] }
 0x244   : > { %v3256_v27 = vpop.f32.mrf.mxu3 }
 0x245   : > { %v3167_v50 = vpop.f32.mrf.mxu2  ;;  %3653 = vmatmul.bf16.gmra.mxu0 %v7520_v14  ;;  %v1274_v14 = vld [vmem:[#allocation2 + $0xe1] sm:$0xff] }
 0x246   : > { %v3427_v3 = vpop.f32.mrf.mxu1  ;;  %v3168_v9 = vadd.f32 %v3167_v50, %v10525_v2  ;;  %v7556_v50 = vor.u32 %v9183_v16, %v7555_v4 }
 0x247   : > { %v10675_v19 = vadd.f32 %v3427_v3, %v3339_v63  ;;  %v1178_v63 = vld [vmem:[#allocation2 + $0xe0] sm:$0xff]  ;;  %v1306_v3 = vpack.c.bf16 %v1274_v14, %v1274_v14 }
 0x248   : > { %v3257_v44 = vadd.f32 %v3256_v27, %v3168_v9  ;;  %v1210_v2 = vpack.c.bf16 %v1178_v63, %v1178_v63  ;;  %v1365_v27 = vld [vmem:[#allocation2 + $0xaa] sm:$0xff]  ;;  %v1398_v9 = vpack.c.bf16 %v1366_v20, %v1366_v20  ;;  %v9192_v20 = vld [vmem:[#allocation3 + $0x160] sm:$0xf0] }
 0x249   : > { %3574 = vmatmul.bf16.gmra.mxu3 %v7588_v30  ;;  %v1397_v30 = vpack.c.bf16 %v1365_v27, %v1365_v27  ;;  %1338 = vst [vmem:[#allocation3 + $0x238] sm:$0xf] %v1306_v3  ;;  %v7591_v27 = vld [vmem:[#allocation3 + $0x140] sm:$0xf] }
 0x24a   : > { %3485 = vmatmul.bf16.gmra.mxu2 %v7584_v53  ;;  %v3340_v15 = vpop.f32.mrf.mxu0  ;;  %1242 = vst [vmem:[#allocation3 + $0x234] sm:$0xf] %v1210_v2  ;;  %v1179_v3 = vld [vmem:[#allocation2 + $0xf0] sm:$0xff] }
 0x24b   : > { %v10678_v33 = vadd.f32 %v3340_v15, %v3252_v12  ;;  %v9196_v12 = vld [vmem:[#allocation3 + $0x184] sm:$0xf]  ;;  %1429 = vst [vmem:[#allocation3 + $0x188] sm:$0xf] %v1397_v30  ;;  %v1211_v30 = vpack.c.bf16 %v1179_v3, %v1179_v3  ;;  %v9209_v3 = vld [vmem:[#allocation3 + $0x1e8] sm:$0xf0] }
 0x24c   : > { %v3259_v22 = vpop.f32.mrf.mxu3  ;;  %v7624_v63 = vor.u32 %v9196_v12, %v7621_v7  ;;  %1430 = vst [vmem:[#allocation3 + $0x1ac] sm:$0xf] %v1398_v9  ;;  %v1180_v12 = vld [vmem:[#allocation2 + $0xf8] sm:$0xff] }
 0x24d   : > { %v3170_v24 = vpop.f32.mrf.mxu2  ;;  %v1275_v7 = vld [vmem:[#allocation2 + $0xf1] sm:$0xff]  ;;  %v1276_v9 = vld [vmem:[#allocation2 + $0xf9] sm:$0xff]  ;;  %1243 = vst [vmem:[#allocation3 + $0x258] sm:$0xf] %v1211_v30 }
 0x24e   : > { %v10680_v26 = vpop.f32.mrf.mxu1  ;;  %v3171_v32 = vadd.f32 %v3170_v24, %v10529_v36  ;;  %v7619_v24 = vld [vmem:[#allocation3 + $0x180] sm:$0xf] }
 0x24f   : > { %v7620_v4 = vor.u32 %v9200_v48, %v7619_v24  ;;  %v1308_v24 = vpack.c.bf16 %v1276_v9, %v1276_v9  ;;  %v9205_v48 = vld [vmem:[#allocation3 + $0x1cc] sm:$0xf] }
 0x250   : > { %v3260_v10 = vadd.f32 %v3259_v22, %v3171_v32 }
 0x251   : > { %1340 = vst [vmem:[#allocation3 + $0x280] sm:$0xf] %v1308_v24  ;;  %v1181_v24 = vld [vmem:[#allocation2 + $0x108] sm:$0xff] }
 0x252   : > { %v3343_v15 = vpop.f32.mrf.mxu0 }
 0x253   : > { %v3344_v41 = vadd.f32 %v3343_v15, %v3255_v59  ;;  %v9509_v59 = vld [vmem:[#allocation9 + $0x8] sm:$0xff]  ;;  %v1367_v15 = vld [vmem:[#allocation2 + $0xc2] sm:$0xff] }
 0x254   : > { %v3261_v53 = vpop.f32.mrf.mxu3  ;;  %6206 = vmatpush.bf16.msra.mxu1 %v9509_v59 }
 0x255   : > { %v3172_v60 = vpop.f32.mrf.mxu2  ;;  %3658 = vmatmul.bf16.gmra.mxu0 %v7556_v50  ;;  %v1212_v50 = vpack.c.bf16 %v1180_v12, %v1180_v12 }
 0x256   : > { %v3432_v36 = vpop.f32.mrf.mxu1  ;;  %v3173_v22 = vadd.f32 %v3172_v60, %v10533_v40  ;;  %v1399_v60 = vpack.c.bf16 %v1367_v15, %v1367_v15  ;;  %v9201_v15 = vld [vmem:[#allocation3 + $0x1a8] sm:$0xf0] }
 0x257   : > { %v10683_v14 = vadd.f32 %v3432_v36, %v3344_v41  ;;  %v1368_v36 = vld [vmem:[#allocation2 + $0xca] sm:$0xff]  ;;  %1244 = vst [vmem:[#allocation3 + $0x27c] sm:$0xf] %v1212_v50 }
 0x258   : > { %v3262_v16 = vadd.f32 %v3261_v53, %v3173_v22  ;;  %v1307_v53 = vpack.c.bf16 %v1275_v7, %v1275_v7  ;;  %v7592_v22 = vor.u32 %v9192_v20, %v7591_v27  ;;  %1431 = vst [vmem:[#allocation3 + $0x1d0] sm:$0xf] %v1399_v60  ;;  %v1213_v60 = vpack.c.bf16 %v1181_v24, %v1181_v24  ;;  %v9218_v24 = vld [vmem:[#allocation3 + $0x230] sm:$0xf0] }
 0x259   : > { %3579 = vmatmul.bf16.gmra.mxu3 %v7624_v63  ;;  %v7657_v63 = vld [vmem:[#allocation3 + $0x1ec] sm:$0xf0] }
 0x25a   : > { %3490 = vmatmul.bf16.gmra.mxu2 %v7620_v4  ;;  %v3345_v45 = vpop.f32.mrf.mxu0  ;;  %v1400_v4 = vpack.c.bf16 %v1368_v36, %v1368_v36  ;;  %1339 = vst [vmem:[#allocation3 + $0x25c] sm:$0xf] %v1307_v53  ;;  %v7660_v12 = vor.u32 %v9205_v48, %v7657_v63  ;;  %v7627_v53 = vld [vmem:[#allocation3 + $0x188] sm:$0xf]  ;;  %v1277_v48 = vld [vmem:[#allocation2 + $0x109] sm:$0xff] }
 0x25b   : > { %v10686_v2 = vadd.f32 %v3345_v45, %v3257_v44  ;;  %1245 = vst [vmem:[#allocation3 + $0x2a0] sm:$0xf] %v1213_v60 }
 0x25c   : > { %v3264_v32 = vpop.f32.mrf.mxu3  ;;  %1432 = vst [vmem:[#allocation3 + $0x1f4] sm:$0xf] %v1400_v4  ;;  %v1309_v4 = vpack.c.bf16 %v1277_v48, %v1277_v48 }
 0x25d   : > { %v3175_v41 = vpop.f32.mrf.mxu2 }
 0x25e   : > { %v10688_v38 = vpop.f32.mrf.mxu1  ;;  %v3176_v40 = vadd.f32 %v3175_v41, %v10537_v54  ;;  %v7655_v41 = vld [vmem:[#allocation3 + $0x1c8] sm:$0xf]  ;;  %1341 = vst [vmem:[#allocation3 + $0x2a4] sm:$0xf] %v1309_v4 }
 0x25f   : > { %v7656_v27 = vor.u32 %v9209_v3, %v7655_v41  ;;  %v7693_v3 = vld [vmem:[#allocation3 + $0x234] sm:$0xf0] }
 0x260   : > { %v3265_v44 = vadd.f32 %v3264_v32, %v3176_v40 }
 0x262   : > { %v3348_v59 = vpop.f32.mrf.mxu0 }
 0x263   : > { %v3349_v34 = vadd.f32 %v3348_v59, %v3260_v10  ;;  %v1370_v59 = vld [vmem:[#allocation2 + $0xe2] sm:$0xff] }
 0x264   : > { %v3266_v45 = vpop.f32.mrf.mxu3 }
 0x265   : > { %v3177_v7 = vpop.f32.mrf.mxu2  ;;  %3663 = vmatmul.bf16.gmra.mxu0 %v7592_v22  ;;  %v1278_v22 = vld [vmem:[#allocation2 + $0x111] sm:$0xff] }
 0x266   : > { %v3437_v54 = vpop.f32.mrf.mxu1  ;;  %v3178_v32 = vadd.f32 %v3177_v7, %v10541_v56  ;;  %v7628_v7 = vor.u32 %v9201_v15, %v7627_v53 }
 0x267   : > { %v10691_v9 = vadd.f32 %v3437_v54, %v3349_v34  ;;  %v1182_v34 = vld [vmem:[#allocation2 + $0x110] sm:$0xff]  ;;  %v1310_v54 = vpack.c.bf16 %v1278_v22, %v1278_v22 }
 0x268   : > { %v3267_v20 = vadd.f32 %v3266_v45, %v3178_v32  ;;  %v1214_v56 = vpack.c.bf16 %v1182_v34, %v1182_v34  ;;  %v1369_v45 = vld [vmem:[#allocation2 + $0xda] sm:$0xff]  ;;  %v1402_v32 = vpack.c.bf16 %v1370_v59, %v1370_v59  ;;  %v9210_v59 = vld [vmem:[#allocation3 + $0x1f0] sm:$0xf0] }
 0x269   : > { %3584 = vmatmul.bf16.gmra.mxu3 %v7660_v12  ;;  %v1401_v12 = vpack.c.bf16 %v1369_v45, %v1369_v45  ;;  %1342 = vst [vmem:[#allocation3 + $0x2c8] sm:$0xf] %v1310_v54  ;;  %v7663_v45 = vld [vmem:[#allocation3 + $0x1d0] sm:$0xf] }
 0x26a   : > { %3495 = vmatmul.bf16.gmra.mxu2 %v7656_v27  ;;  %v3350_v30 = vpop.f32.mrf.mxu0  ;;  %1246 = vst [vmem:[#allocation3 + $0x2c4] sm:$0xf] %v1214_v56  ;;  %v1183_v54 = vld [vmem:[#allocation2 + $0x120] sm:$0xff] }
 0x26b   : > { %v10694_v10 = vadd.f32 %v3350_v30, %v3262_v16  ;;  %v9214_v16 = vld [vmem:[#allocation3 + $0x214] sm:$0xf]  ;;  %1433 = vst [vmem:[#allocation3 + $0x218] sm:$0xf] %v1401_v12  ;;  %v1215_v12 = vpack.c.bf16 %v1183_v54, %v1183_v54  ;;  %v9227_v54 = vld [vmem:[#allocation3 + $0x278] sm:$0xf0] }
 0x26c   : > { %v3269_v40 = vpop.f32.mrf.mxu3  ;;  %v7696_v34 = vor.u32 %v9214_v16, %v7693_v3  ;;  %1434 = vst [vmem:[#allocation3 + $0x23c] sm:$0xf] %v1402_v32  ;;  %v1184_v16 = vld [vmem:[#allocation2 + $0x128] sm:$0xff] }
 0x26d   : > { %v3180_v36 = vpop.f32.mrf.mxu2  ;;  %v1279_v3 = vld [vmem:[#allocation2 + $0x121] sm:$0xff]  ;;  %v1280_v32 = vld [vmem:[#allocation2 + $0x129] sm:$0xff]  ;;  %1247 = vst [vmem:[#allocation3 + $0x2e8] sm:$0xf] %v1215_v12 }
 0x26e   : > { %v10696_v50 = vpop.f32.mrf.mxu1  ;;  %v3181_v63 = vadd.f32 %v3180_v36, %v10545_v46  ;;  %v7691_v36 = vld [vmem:[#allocation3 + $0x210] sm:$0xf] }
 0x26f   : > { %12097 = vst [vmem:[#allocation52_spill] sm:$0xff] %v10696_v50  ;;  %v7692_v53 = vor.u32 %v9218_v24, %v7691_v36  ;;  %v1312_v36 = vpack.c.bf16 %v1280_v32, %v1280_v32  ;;  %v9223_v24 = vld [vmem:[#allocation3 + $0x25c] sm:$0xf] }
 0x270   : > { %v3270_v41 = vadd.f32 %v3269_v40, %v3181_v63 }
 0x271   : > { %1344 = vst [vmem:[#allocation3 + $0x310] sm:$0xf] %v1312_v36  ;;  %v1186_v36 = vld [vmem:[#allocation2 + $0x140] sm:$0xff] }
 0x272   : > { %v3353_v30 = vpop.f32.mrf.mxu0 }
 0x273   : > { %v3354_v50 = vadd.f32 %v3353_v30, %v3265_v44  ;;  %v9508_v44 = vld [vmem:[#allocation9] sm:$0xff] }
 0x274   : > { %v3271_v27 = vpop.f32.mrf.mxu3  ;;  %6207 = vmatpush.bf16.msra.mxu1 %v9508_v44  ;;  %v1371_v30 = vld [vmem:[#allocation2 + $0xf2] sm:$0xff] }
 0x275   : > { %v3182_v48 = vpop.f32.mrf.mxu2  ;;  %3668 = vmatmul.bf16.gmra.mxu0 %v7628_v7  ;;  %v1216_v7 = vpack.c.bf16 %v1184_v16, %v1184_v16 }
 0x276   : > { %v3442_v46 = vpop.f32.mrf.mxu1  ;;  %v3183_v40 = vadd.f32 %v3182_v48, %v10549_v43  ;;  %v1403_v48 = vpack.c.bf16 %v1371_v30, %v1371_v30  ;;  %v9219_v30 = vld [vmem:[#allocation3 + $0x238] sm:$0xf0] }
 0x277   : > { %v10699_v22 = vadd.f32 %v3442_v46, %v3354_v50  ;;  %v1372_v46 = vld [vmem:[#allocation2 + $0xfa] sm:$0xff]  ;;  %1248 = vst [vmem:[#allocation3 + $0x30c] sm:$0xf] %v1216_v7 }
 0x278   : > { %v3272_v15 = vadd.f32 %v3271_v27, %v3183_v40  ;;  %v1311_v27 = vpack.c.bf16 %v1279_v3, %v1279_v3  ;;  %v7664_v40 = vor.u32 %v9210_v59, %v7663_v45  ;;  %1435 = vst [vmem:[#allocation3 + $0x260] sm:$0xf] %v1403_v48  ;;  %v1218_v48 = vpack.c.bf16 %v1186_v36, %v1186_v36 }
 0x279   : > { %12098 = vst [vmem:[#allocation53_spill] sm:$0xff] %v10699_v22  ;;  %3589 = vmatmul.bf16.gmra.mxu3 %v7696_v34  ;;  %v7729_v34 = vld [vmem:[#allocation3 + $0x27c] sm:$0xf0]  ;;  %v9530_v22 = vld [vmem:[#allocation9 + $0xb0] sm:$0xff] }
 0x27a   : > { %3500 = vmatmul.bf16.gmra.mxu2 %v7692_v53  ;;  %v3355_v60 = vpop.f32.mrf.mxu0  ;;  %v1404_v53 = vpack.c.bf16 %v1372_v46, %v1372_v46  ;;  %1343 = vst [vmem:[#allocation3 + $0x2ec] sm:$0xf] %v1311_v27  ;;  %v7732_v16 = vor.u32 %v9223_v24, %v7729_v34  ;;  %v7699_v27 = vld [vmem:[#allocation3 + $0x218] sm:$0xf]  ;;  %v1281_v24 = vld [vmem:[#allocation2 + $0x139] sm:$0xff] }
 0x27b   : > { %v10702_v56 = vadd.f32 %v3355_v60, %v3267_v20  ;;  %1250 = vst [vmem:[#allocation3 + $0x354] sm:$0xf] %v1218_v48 }
 0x27c   : > { %v3274_v63 = vpop.f32.mrf.mxu3  ;;  %1436 = vst [vmem:[#allocation3 + $0x284] sm:$0xf] %v1404_v53  ;;  %v1373_v53 = vld [vmem:[#allocation2 + $0x10a] sm:$0xff] }
 0x27d   : > { %12099 = vst [vmem:[#allocation54_spill] sm:$0xff] %v10702_v56  ;;  %v3185_v50 = vpop.f32.mrf.mxu2  ;;  %v9531_v56 = vld [vmem:[#allocation9 + $0xb8] sm:$0xff] }
 0x27e   : > { %v10704_v4 = vpop.f32.mrf.mxu1  ;;  %v3186_v43 = vadd.f32 %v3185_v50, %v10553_v42  ;;  %v7727_v50 = vld [vmem:[#allocation3 + $0x258] sm:$0xf]  ;;  %6378 = vmatpush.bf16.msrb.mxu3 %v9531_v56 }
 0x27f   : > { %12100 = vst [vmem:[#allocation55_spill] sm:$0xff] %v10704_v4  ;;  %v7728_v45 = vor.u32 %v9227_v54, %v7727_v50  ;;  %v7765_v50 = vld [vmem:[#allocation3 + $0x2c4] sm:$0xf0]  ;;  %v7700_v54 = vor.u32 %v9219_v30, %v7699_v27 }
 0x280   : > { %v3275_v20 = vadd.f32 %v3274_v63, %v3186_v43 }
 0x282   : > { %v3358_v44 = vpop.f32.mrf.mxu0  ;;  %6379 = vmatpush.bf16.msrb.mxu3 %v9530_v22 }
 0x283   : > { %v3359_v4 = vadd.f32 %v3358_v44, %v3270_v41 }
 0x284   : > { %v3276_v60 = vpop.f32.mrf.mxu3 }
 0x285   : > { %v3187_v3 = vpop.f32.mrf.mxu2  ;;  %3673 = vmatmul.bf16.gmra.mxu0 %v7664_v40  ;;  %v1313_v40 = vpack.c.bf16 %v1281_v24, %v1281_v24 }
 0x286   : > { %v3447_v42 = vpop.f32.mrf.mxu1  ;;  %v3188_v63 = vadd.f32 %v3187_v3, %v10557_v23  ;;  %v1282_v23 = vld [vmem:[#allocation2 + $0x141] sm:$0xff]  ;;  %v9368_v3 = vld [vmem:[#allocation3 + $0x20] sm:$0xf0] }
 0x287   : > { %v10707_v32 = vadd.f32 %v3447_v42, %v3359_v4  ;;  %v1185_v4 = vld [vmem:[#allocation2 + $0x138] sm:$0xff]  ;;  %v1314_v44 = vpack.c.bf16 %v1282_v23, %v1282_v23  ;;  %v9232_v42 = vld [vmem:[#allocation3 + $0x2a4] sm:$0xf]  ;;  %1345 = vst [vmem:[#allocation3 + $0x334] sm:$0xf] %v1313_v40  ;;  %v9523_v23 = vld [vmem:[#allocation9 + $0x78] sm:$0xff] }
 0x288   : > { %v3277_v59 = vadd.f32 %v3276_v60, %v3188_v63  ;;  %v1217_v34 = vpack.c.bf16 %v1185_v4, %v1185_v4  ;;  %v1374_v60 = vld [vmem:[#allocation2 + $0x112] sm:$0xff]  ;;  %6289 = vmatpush.bf16.msrb.mxu2 %v9523_v23 }
 0x289   : > { %12101 = vst [vmem:[#allocation56_spill] sm:$0xff] %v10707_v32  ;;  %3594 = vmatmul.bf16.gmra.mxu3 %v7732_v16  ;;  %v8279_v16 = vld [vmem:[#allocation3] sm:$0xf]  ;;  %v1406_v63 = vpack.c.bf16 %v1374_v60, %v1374_v60  ;;  %v7768_v32 = vor.u32 %v9232_v42, %v7765_v50  ;;  %v9547_v60 = vld [vmem:[#allocation9 + $0x138] sm:$0xff]  ;;  %v9228_v42 = vld [vmem:[#allocation3 + $0x280] sm:$0xf0] }
 0x28a   : > { %3505 = vmatmul.bf16.gmra.mxu2 %v7728_v45  ;;  %v3360_v41 = vpop.f32.mrf.mxu0  ;;  %1249 = vst [vmem:[#allocation3 + $0x330] sm:$0xf] %v1217_v34  ;;  %v8280_v4 = vor.u32 %v9368_v3, %v8279_v16  ;;  %6556 = vmatpush.bf16.msrb.mxu1 %v9547_v60  ;;  %v1188_v16 = vld [vmem:[#allocation2 + $0x158] sm:$0xff] }
 0x28b   : > { %v10712_v12 = vadd.f32 %v3360_v41, %v3272_v15  ;;  %v1405_v15 = vpack.c.bf16 %v1373_v53, %v1373_v53  ;;  %1346 = vst [vmem:[#allocation3 + $0x358] sm:$0xf] %v1314_v44  ;;  %v9539_v53 = vld [vmem:[#allocation9 + $0xf8] sm:$0xff]  ;;  %v7735_v44 = vld [vmem:[#allocation3 + $0x260] sm:$0xf] }
 0x28c   : > { %v10710_v43 = vpop.f32.mrf.mxu3  ;;  %6208 = vmatmul.bf16.vlgmr.msra.gmra.mxu1 %v8280_v4  ;;  %1438 = vst [vmem:[#allocation3 + $0x2cc] sm:$0xf] %v1406_v63  ;;  %6467 = vmatpush.bf16.msrb.mxu0 %v9539_v53  ;;  %v1375_v63 = vld [vmem:[#allocation2 + $0x122] sm:$0xff]  ;;  %v9241_v4 = vld [vmem:[#allocation3 + $0x2ec] sm:$0xf] }
 0x28d   : > { %12102 = vst [vmem:[#allocation57_spill] sm:$0xff] %v10712_v12  ;;  %v3466_v46 = vpop.f32.mrf.mxu2  ;;  %v9236_v12 = vld [vmem:[#allocation3 + $0x2c0] sm:$0xf0]  ;;  %v7799_v53 = vld [vmem:[#allocation3 + $0x2e8] sm:$0xf] }
 0x28e   : > { %v10714_v7 = vpop.f32.mrf.mxu1  ;;  %1437 = vst [vmem:[#allocation3 + $0x2a8] sm:$0xf] %v1405_v15  ;;  %v3467_v50 = vadd.f32 %v3466_v46, %v10573_v35  ;;  %v7736_v35 = vor.u32 %v9228_v42, %v7735_v44 }
 0x28f   : > { %12103 = vst [vmem:[#allocation58_spill] sm:$0xff] %v10714_v7  ;;  %v7763_v7 = vld [vmem:[#allocation3 + $0x2a0] sm:$0xf] }
 0x290   : > { %v7764_v34 = vor.u32 %v9236_v12, %v7763_v7  ;;  %v1283_v12 = vld [vmem:[#allocation2 + $0x151] sm:$0xff]  ;;  %v1284_v7 = vld [vmem:[#allocation2 + $0x159] sm:$0xff]  ;;  %v3556_v23 = vadd.f32 %v10710_v43, %v3467_v50 }
 0x291   : > { %v1315_v3 = vpack.c.bf16 %v1283_v12, %v1283_v12  ;;  %v10737_v50 = vld [vmem:[%s11990_s3] ss:$0 sm:$0xff] }
 0x292   : > { %v3363_v41 = vpop.f32.mrf.mxu0 }
 0x293   : > { %v3364_v36 = vadd.f32 %v3363_v41, %v3275_v20  ;;  %v1376_v41 = vld [vmem:[#allocation2 + $0x12a] sm:$0xff]  ;;  %1347 = vst [vmem:[#allocation3 + $0x37c] sm:$0xf] %v1315_v3 }
 0x294   : > { %v10716_v45 = vpop.f32.mrf.mxu3  ;;  %v1408_v46 = vpack.c.bf16 %v1376_v41, %v1376_v41 }
 0x295   : > { %v3468_v27 = vpop.f32.mrf.mxu2  ;;  %3678 = vmatmul.bf16.gmra.mxu0 %v7700_v54  ;;  %v1187_v54 = vld [vmem:[#allocation2 + $0x150] sm:$0xff] }
 0x296   : > { %v3452_v24 = vpop.f32.mrf.mxu1  ;;  %v1219_v56 = vpack.c.bf16 %v1187_v54, %v1187_v54  ;;  %v10731_v54 = vld [vmem:[%s11989_s2] ss:$0 sm:$0xff]  ;;  %v3469_v43 = vadd.f32 %v3468_v27, %v10576_v5  ;;  %1440 = vst [vmem:[#allocation3 + $0x314] sm:$0xf] %v1408_v46  ;;  %v9237_v46 = vld [vmem:[#allocation3 + $0x2c8] sm:$0xf0] }
 0x297   : > { %v10718_v30 = vadd.f32 %v3452_v24, %v3364_v36  ;;  %v7801_v36 = vld [vmem:[#allocation3 + $0x30c] sm:$0xf0]  ;;  %v1407_v24 = vpack.c.bf16 %v1375_v63, %v1375_v63 }
 0x298   : > { %1251 = vst [vmem:[#allocation3 + $0x378] sm:$0xf] %v1219_v56  ;;  %v7804_v12 = vor.u32 %v9241_v4, %v7801_v36  ;;  %v1189_v36 = vld [vmem:[#allocation2 + $0x168] sm:$0xff] }
 0x299   : > { %12104 = vst [vmem:[#allocation59_spill] sm:$0xff] %v10718_v30  ;;  %3599 = vmatmul.bf16.gmra.mxu3 %v7768_v32  ;;  %v1220_v32 = vpack.c.bf16 %v1188_v16, %v1188_v16  ;;  %v9245_v16 = vld [vmem:[#allocation3 + $0x308] sm:$0xf0]  ;;  %v9522_v30 = vld [vmem:[#allocation9 + $0x70] sm:$0xff] }
 0x29a   : > { %3510 = vmatmul.bf16.gmra.mxu2 %v7764_v34  ;;  %v3365_v20 = vpop.f32.mrf.mxu0  ;;  %1439 = vst [vmem:[#allocation3 + $0x2f0] sm:$0xf] %v1407_v24  ;;  %v7800_v56 = vor.u32 %v9245_v16, %v7799_v53  ;;  %v1190_v24 = vld [vmem:[#allocation2 + $0x170] sm:$0xff] }
 0x29b   : > { %v10722_v40 = vadd.f32 %v3365_v20, %v3277_v59  ;;  %v1316_v59 = vpack.c.bf16 %v1284_v7, %v1284_v7  ;;  %1252 = vst [vmem:[#allocation3 + $0x39c] sm:$0xf] %v1220_v32  ;;  %v3558_v7 = vadd.f32 %v10716_v45, %v3469_v43  ;;  %v1222_v45 = vpack.c.bf16 %v1190_v24, %v1190_v24  ;;  %v1286_v53 = vld [vmem:[#allocation2 + $0x171] sm:$0xff]  ;;  %v1377_v43 = vld [vmem:[#allocation2 + $0x13a] sm:$0xff] }
 0x29c   : > { %v10720_v48 = vpop.f32.mrf.mxu3  ;;  %v1409_v24 = vpack.c.bf16 %v1377_v43, %v1377_v43  ;;  %6290 = vmatpush.bf16.msrb.mxu2 %v9522_v30 }
 0x29d   : > { %12105 = vst [vmem:[#allocation60_spill] sm:$0xff] %v10722_v40  ;;  %v3471_v15 = vpop.f32.mrf.mxu2  ;;  %v9254_v40 = vld [vmem:[#allocation3 + $0x350] sm:$0xf0] }
 0x29e   : > { %1348 = vst [vmem:[#allocation3 + $0x3a0] sm:$0xf] %v1316_v59  ;;  %v3472_v41 = vadd.f32 %v3471_v15, %v10582_v13  ;;  %v1378_v13 = vld [vmem:[#allocation2 + $0x142] sm:$0xff] }
 0x29f   : > { %1254 = vst [vmem:[#allocation3 + $0x3e4] sm:$0xf] %v1222_v45 }
 0x2a0   : > { %v3561_v15 = vadd.f32 %v10720_v48, %v3472_v41  ;;  %v1410_v48 = vpack.c.bf16 %v1378_v13, %v1378_v13  ;;  %1441 = vst [vmem:[#allocation3 + $0x338] sm:$0xf] %v1409_v24 }
 0x2a2   : > { %v3644_v20 = vpop.f32.mrf.mxu0  ;;  %1442 = vst [vmem:[#allocation3 + $0x35c] sm:$0xf] %v1410_v48  ;;  %v1192_v48 = vld [vmem:[#allocation2 + $0x188] sm:$0xff] }
 0x2a3   : > { %v3645_v60 = vadd.f32 %v3644_v20, %v3556_v23  ;;  %v1285_v23 = vld [vmem:[#allocation2 + $0x169] sm:$0xff]  ;;  %v1221_v20 = vpack.c.bf16 %v1189_v36, %v1189_v36 }
 0x2a4   : > { %v10726_v34 = vpop.f32.mrf.mxu3 }
 0x2a5   : > { %v3473_v44 = vpop.f32.mrf.mxu2  ;;  %v3724_v42 = vmax.f32 %v3645_v60, 0.0  ;;  %3683 = vmatmul.bf16.gmra.mxu0 %v7736_v35  ;;  %v7771_v35 = vld [vmem:[#allocation3 + $0x2a8] sm:$0xf]  ;;  %v1317_v60 = vpack.c.bf16 %v1285_v23, %v1285_v23  ;;  %1253 = vst [vmem:[#allocation3 + $0x3c0] sm:$0xf] %v1221_v20 }
 0x2a7   : > { %v3760_v32 = vmul.f32 %v10731_v54, %v3724_v42  ;;  %v7837_v42 = vld [vmem:[#allocation3 + $0x354] sm:$0xf0]  ;;  %1349 = vst [vmem:[#allocation3 + $0x3c4] sm:$0xf] %v1317_v60 }
 0x2a9   : > { %3604 = vmatmul.bf16.gmra.mxu3 %v7804_v12  ;;  %v3796_v3 = vadd.f32 %v10737_v50, %v3760_v32  ;;  %v9250_v12 = vld [vmem:[#allocation3 + $0x334] sm:$0xf] }
 0x2aa   : > { %3515 = vmatmul.bf16.gmra.mxu2 %v7800_v56  ;;  %v3646_v5 = vpop.f32.mrf.mxu0  ;;  %v1318_v56 = vpack.c.bf16 %v1286_v53, %v1286_v53  ;;  %v7840_v20 = vor.u32 %v9250_v12, %v7837_v42 }
 0x2ab   : > { %3828 = vst [vmem:[#allocation2 + $0x19] sm:$0xff] %v3796_v3  ;;  %v3647_v27 = vadd.f32 %v3646_v5, %v3558_v7  ;;  %v7772_v7 = vor.u32 %v9237_v46, %v7771_v35  ;;  %v3474_v35 = vadd.f32 %v3473_v44, %v10587_v57 }
 0x2ac   : > { %v10742_v63 = vpop.f32.mrf.mxu3  ;;  %1350 = vst [vmem:[#allocation3 + $0x3e8] sm:$0xf] %v1318_v56 }
 0x2ad   : > { %v10745_v59 = vpop.f32.mrf.mxu2  ;;  %v3725_v4 = vmax.f32 %v3647_v27, 0.0  ;;  %v7835_v27 = vld [vmem:[#allocation3 + $0x330] sm:$0xf]  ;;  %v3563_v56 = vadd.f32 %v10726_v34, %v3474_v35 }
 0x2ae   : > { %v7836_v43 = vor.u32 %v9254_v40, %v7835_v27  ;;  %v3477_v34 = vadd.f32 %v10745_v59, %v10598_v0  ;;  %v1287_v35 = vld [vmem:[#allocation2 + $0x181] sm:$0xff]  ;;  %v1379_v59 = vld [vmem:[#allocation2 + $0x152] sm:$0xff] }
 0x2af   : > { %v3761_v16 = vmul.f32 %v10731_v54, %v3725_v4  ;;  %v1319_v0 = vpack.c.bf16 %v1287_v35, %v1287_v35 }
 0x2b1   : > { %v3797_v32 = vadd.f32 %v10737_v50, %v3761_v16  ;;  %1351 = vst [vmem:[#allocation3 + $0x40c] sm:$0xf] %v1319_v0 }
 0x2b2   : > { %v3649_v5 = vpop.f32.mrf.mxu0  ;;  %v3862_v36 = vld [vmem:[#allocation2 + $0x18] sm:$0xff] }
 0x2b3   : > { %v3958_v4 = vld [vmem:[#allocation2 + $0x19] sm:$0xff]  ;;  %3829 = vst [vmem:[#allocation2 + $0x21] sm:$0xff] %v3797_v32  ;;  %v3650_v23 = vadd.f32 %v3649_v5, %v3561_v15  ;;  %v3894_v53 = vpack.c.bf16 %v3862_v36, %v3862_v36  ;;  %v3991_v60 = vpack.c.bf16 %v3797_v32, %v3797_v32 }
 0x2b4   : > { %v10750_v3 = vpop.f32.mrf.mxu3  ;;  %v3990_v41 = vpack.c.bf16 %v3958_v4, %v3958_v4  ;;  %v4244_v16 = vld [vmem:[#allocation2 + $0x19] sm:$0xff] }
 0x2b5   : > { %v10753_v46 = vpop.f32.mrf.mxu2  ;;  %v3726_v45 = vmax.f32 %v3650_v23, 0.0  ;;  %3688 = vmatmul.bf16.gmra.mxu0 %v7772_v7  ;;  %3926 = vst [vmem:[#allocation3 + $0x48] sm:$0xf] %v3894_v53  ;;  %v4276_v42 = vpack.c.bf16 %v4244_v16, %v4244_v16  ;;  %v9538_v7 = vld [vmem:[#allocation9 + $0xf0] sm:$0xff]  ;;  %v1224_v16 = vpack.c.bf16 %v1192_v48, %v1192_v48 }
 0x2b6   : > { %4022 = vst [vmem:[#allocation3 + $0x4c] sm:$0xf] %v3990_v41  ;;  %v9546_v5 = vld [vmem:[#allocation9 + $0x130] sm:$0xff]  ;;  %6468 = vmatpush.bf16.msrb.mxu0 %v9538_v7  ;;  %v1411_v7 = vpack.c.bf16 %v1379_v59, %v1379_v59 }
 0x2b7   : > { %v3762_v12 = vmul.f32 %v10731_v54, %v3726_v45  ;;  %4023 = vst [vmem:[#allocation3 + $0x70] sm:$0xf] %v3991_v60  ;;  %v7807_v23 = vld [vmem:[#allocation3 + $0x2f0] sm:$0xf]  ;;  %6557 = vmatpush.bf16.msrb.mxu1 %v9546_v5  ;;  %v9259_v60 = vld [vmem:[#allocation3 + $0x37c] sm:$0xf] }
 0x2b8   : > { %4212 = vst [vmem:[#allocation3 + $0xc] sm:$0xf] %v3894_v53  ;;  %v9246_v53 = vld [vmem:[#allocation3 + $0x310] sm:$0xf0] }
 0x2b9   : > { %3609 = vmatmul.bf16.gmra.mxu3 %v7840_v20  ;;  %v3798_v57 = vadd.f32 %v10737_v50, %v3762_v12  ;;  %4308 = vst [vmem:[#allocation3 + $0x10] sm:$0xf] %v4276_v42  ;;  %v1191_v20 = vld [vmem:[#allocation2 + $0x180] sm:$0xff]  ;;  %v7873_v12 = vld [vmem:[#allocation3 + $0x39c] sm:$0xf0] }
 0x2ba   : > { %3520 = vmatmul.bf16.gmra.mxu2 %v7836_v43  ;;  %v3651_v30 = vpop.f32.mrf.mxu0  ;;  %v3863_v13 = vld [vmem:[#allocation2 + $0x20] sm:$0xff]  ;;  %v1223_v41 = vpack.c.bf16 %v1191_v20, %v1191_v20  ;;  %v1288_v43 = vld [vmem:[#allocation2 + $0x189] sm:$0xff]  ;;  %1256 = vst [vmem:[#allocation3 + $0x42c] sm:$0xf] %v1224_v16  ;;  %v7876_v20 = vor.u32 %v9259_v60, %v7873_v12 }
 0x2bb   : > { %v4054_v15 = vld [vmem:[#allocation2 + $0x1a] sm:$0xff]  ;;  %v4055_v40 = vld [vmem:[#allocation2 + $0x22] sm:$0xff]  ;;  %3830 = vst [vmem:[#allocation2 + $0x31] sm:$0xff] %v3798_v57  ;;  %v3652_v22 = vadd.f32 %v3651_v30, %v3563_v56  ;;  %v10760_v32 = vpack.c.bf16 %v3863_v13, %v3863_v13  ;;  %v1320_v42 = vpack.c.bf16 %v1288_v43, %v1288_v43  ;;  %v3566_v57 = vadd.f32 %v10742_v63, %v3477_v34 }
 0x2bc   : > { %v10758_v44 = vpop.f32.mrf.mxu3  ;;  %v4086_v27 = vpack.c.bf16 %v4054_v15, %v4054_v15  ;;  %v4087_v36 = vpack.c.bf16 %v4055_v40, %v4055_v40  ;;  %1255 = vst [vmem:[#allocation3 + $0x408] sm:$0xf] %v1223_v41  ;;  %v1380_v56 = vld [vmem:[#allocation2 + $0x15a] sm:$0xff]  ;;  %v7808_v13 = vor.u32 %v9246_v53, %v7807_v23  ;;  %v3479_v23 = vadd.f32 %v10753_v46, %v10604_v52 }
 0x2bd   : > { %v10764_v24 = vpop.f32.mrf.mxu2  ;;  %v3727_v4 = vmax.f32 %v3652_v22, 0.0  ;;  %3927 = vst [vmem:[#allocation3 + $0x6c] sm:$0xf] %v10760_v32  ;;  %v1412_v41 = vpack.c.bf16 %v1380_v56, %v1380_v56  ;;  %v8315_v35 = vld [vmem:[#allocation3 + $0x48] sm:$0xf] }
 0x2be   : > { %4118 = vst [vmem:[#allocation3 + $0x50] sm:$0xf] %v4086_v27  ;;  %v3568_v59 = vadd.f32 %v10750_v3, %v3479_v23  ;;  %v3482_v3 = vadd.f32 %v10764_v24, %v10610_v39  ;;  %v7909_v23 = vld [vmem:[#allocation3 + $0x3e4] sm:$0xf0]  ;;  %v1381_v39 = vld [vmem:[#allocation2 + $0x16a] sm:$0xff] }
 0x2bf   : > { %v3763_v45 = vmul.f32 %v10731_v54, %v3727_v4  ;;  %4119 = vst [vmem:[#allocation3 + $0x74] sm:$0xf] %v4087_v36  ;;  %v7871_v36 = vld [vmem:[#allocation3 + $0x378] sm:$0xf]  ;;  %v9263_v4 = vld [vmem:[#allocation3 + $0x398] sm:$0xf0] }
 0x2c0   : > { %1352 = vst [vmem:[#allocation3 + $0x430] sm:$0xf] %v1320_v42  ;;  %v7872_v0 = vor.u32 %v9263_v4, %v7871_v36  ;;  %v7843_v36 = vld [vmem:[#allocation3 + $0x338] sm:$0xf]  ;;  %v1193_v4 = vld [vmem:[#allocation2 + $0x198] sm:$0xff] }
 0x2c1   : > { %v3799_v30 = vadd.f32 %v10737_v50, %v3763_v45  ;;  %1443 = vst [vmem:[#allocation3 + $0x380] sm:$0xf] %v1411_v7 }
 0x2c2   : > { %v3654_v40 = vpop.f32.mrf.mxu0  ;;  %v3864_v22 = vld [vmem:[#allocation2 + $0x30] sm:$0xff]  ;;  %1444 = vst [vmem:[#allocation3 + $0x3a4] sm:$0xf] %v1412_v41  ;;  %v9780_v41 = vld [vmem:[#allocation2 + $0x8] sm:$0xff] }
 0x2c3   : > { %v3960_v5 = vld [vmem:[#allocation2 + $0x31] sm:$0xff]  ;;  %3831 = vst [vmem:[#allocation2 + $0x39] sm:$0xff] %v3799_v30  ;;  %v3655_v27 = vadd.f32 %v3654_v40, %v3566_v57  ;;  %v3896_v48 = vpack.c.bf16 %v3864_v22, %v3864_v22  ;;  %v3993_v43 = vpack.c.bf16 %v3799_v30, %v3799_v30 }
 0x2c4   : > { %v10770_v15 = vpop.f32.mrf.mxu3  ;;  %v9377_v63 = vld [vmem:[#allocation3 + $0x68] sm:$0xf0]  ;;  %v3992_v34 = vpack.c.bf16 %v3960_v5, %v3960_v5  ;;  %4213 = vst [vmem:[#allocation3 + $0x30] sm:$0xf] %v10760_v32  ;;  %v1225_v32 = vpack.c.bf16 %v1193_v4, %v1193_v4 }
 0x2c5   : > { %v10774_v53 = vpop.f32.mrf.mxu2  ;;  %v3728_v45 = vmax.f32 %v3655_v27, 0.0  ;;  %3693 = vmatmul.bf16.gmra.mxu0 %v7808_v13  ;;  %v8316_v16 = vor.u32 %v9377_v63, %v8315_v35  ;;  %3928 = vst [vmem:[#allocation3 + $0x90] sm:$0xf] %v3896_v48  ;;  %v9268_v27 = vld [vmem:[#allocation3 + $0x3c4] sm:$0xf]  ;;  %v1226_v35 = vpack.c.bf16 %v9780_v41, %v9780_v41  ;;  %v1289_v63 = vld [vmem:[#allocation2 + $0x199] sm:$0xff] }
 0x2c6   : > { %4024 = vst [vmem:[#allocation3 + $0x94] sm:$0xf] %v3992_v34  ;;  %v1290_v34 = vld [vmem:[#allocation2 + $0x1a1] sm:$0xff] }
 0x2c7   : > { %v3764_v60 = vmul.f32 %v10731_v54, %v3728_v45  ;;  %6213 = vmatmul.bf16.gmra.mxu1 %v8316_v16  ;;  %4025 = vst [vmem:[#allocation3 + $0xb8] sm:$0xf] %v3993_v43  ;;  %v1321_v45 = vpack.c.bf16 %v1289_v63, %v1289_v63  ;;  %v10790_v24 = vpack.c.bf16 %v1290_v34, %v1290_v34  ;;  %v1382_v16 = vld [vmem:[#allocation2 + $0x172] sm:$0xff] }
 0x2c8   : > { %4214 = vst [vmem:[#allocation3 + $0x54] sm:$0xf] %v3896_v48  ;;  %v3571_v43 = vadd.f32 %v10758_v44, %v3482_v3  ;;  %v1414_v3 = vpack.c.bf16 %v1382_v16, %v1382_v16  ;;  %v9520_v34 = vld [vmem:[#allocation9 + $0x60] sm:$0xff] }
 0x2c9   : > { %3614 = vmatmul.bf16.gmra.mxu3 %v7876_v20  ;;  %v3800_v12 = vadd.f32 %v10737_v50, %v3764_v60  ;;  %v9255_v20 = vld [vmem:[#allocation3 + $0x358] sm:$0xf0]  ;;  %1257 = vst [vmem:[#allocation3 + $0x450] sm:$0xf] %v1225_v32 }
 0x2ca   : > { %3525 = vmatmul.bf16.gmra.mxu2 %v7872_v0  ;;  %v3656_v46 = vpop.f32.mrf.mxu0  ;;  %v3865_v42 = vld [vmem:[#allocation2 + $0x38] sm:$0xff]  ;;  %v7844_v60 = vor.u32 %v9255_v20, %v7843_v36  ;;  %1258 = vst [vmem:[#allocation3 + $0x474] sm:$0xf] %v1226_v35 }
 0x2cb   : > { %v4056_v56 = vld [vmem:[#allocation2 + $0x32] sm:$0xff]  ;;  %v4057_v57 = vld [vmem:[#allocation2 + $0x3a] sm:$0xff]  ;;  %3832 = vst [vmem:[#allocation2 + $0x49] sm:$0xff] %v3800_v12  ;;  %v3657_v30 = vadd.f32 %v3656_v46, %v3568_v59  ;;  %v10782_v13 = vpack.c.bf16 %v3865_v42, %v3865_v42 }
 0x2cc   : > { %v10779_v52 = vpop.f32.mrf.mxu3  ;;  %v4088_v40 = vpack.c.bf16 %v4056_v56, %v4056_v56  ;;  %v4089_v22 = vpack.c.bf16 %v4057_v57, %v4057_v57  ;;  %v9521_v59 = vld [vmem:[#allocation9 + $0x68] sm:$0xff]  ;;  %v7912_v56 = vor.u32 %v9268_v27, %v7909_v23  ;;  %1353 = vst [vmem:[#allocation3 + $0x454] sm:$0xf] %v1321_v45  ;;  %v8351_v36 = vld [vmem:[#allocation3 + $0x90] sm:$0xf]  ;;  %v3484_v27 = vadd.f32 %v10774_v53, %v10613_v28 }
 0x2cd   : > { %v10786_v7 = vpop.f32.mrf.mxu2  ;;  %v3729_v5 = vmax.f32 %v3657_v30, 0.0  ;;  %3929 = vst [vmem:[#allocation3 + $0xb4] sm:$0xf] %v10782_v13  ;;  %v9529_v12 = vld [vmem:[#allocation9 + $0xa8] sm:$0xff]  ;;  %v1413_v30 = vpack.c.bf16 %v1381_v39, %v1381_v39  ;;  %6291 = vmatpush.bf16.msrb.mxu2 %v9521_v59 }
 0x2ce   : > { %4120 = vst [vmem:[#allocation3 + $0x98] sm:$0xf] %v4088_v40  ;;  %6380 = vmatpush.bf16.msrb.mxu3 %v9529_v12  ;;  %v3573_v53 = vadd.f32 %v10770_v15, %v3484_v27  ;;  %v9519_v12 = vld [vmem:[#allocation9 + $0x58] sm:$0xff] }
 0x2cf   : > { %v3765_v48 = vmul.f32 %v10731_v54, %v3729_v5  ;;  %4121 = vst [vmem:[#allocation3 + $0xbc] sm:$0xf] %v4089_v22  ;;  %v7907_v22 = vld [vmem:[#allocation3 + $0x3c0] sm:$0xf]  ;;  %v9272_v5 = vld [vmem:[#allocation3 + $0x3e0] sm:$0xf0] }
 0x2d0   : > { %1354 = vst [vmem:[#allocation3 + $0x478] sm:$0xf] %v10790_v24  ;;  %v7908_v23 = vor.u32 %v9272_v5, %v7907_v22  ;;  %v10808_v16 = vld [vmem:[#allocation3 + $0x450] sm:$0xf] }
 0x2d1   : > { %v10794_v0 = vadd.f32 %v10737_v50, %v3765_v48  ;;  %v9528_v48 = vld [vmem:[#allocation9 + $0xa0] sm:$0xff]  ;;  %1445 = vst [vmem:[#allocation3 + $0x3c8] sm:$0xf] %v1413_v30  ;;  %6292 = vmatpush.bf16.msrb.mxu2 %v9520_v34  ;;  %v10810_v28 = vld [vmem:[#allocation3 + $0x470] sm:$0xf0] }
 0x2d2   : > { %v3659_v42 = vpop.f32.mrf.mxu0  ;;  %v3866_v57 = vld [vmem:[#allocation2 + $0x48] sm:$0xff]  ;;  %1446 = vst [vmem:[#allocation3 + $0x3ec] sm:$0xf] %v1414_v3  ;;  %6381 = vmatpush.bf16.msrb.mxu3 %v9528_v48  ;;  %v9537_v3 = vld [vmem:[#allocation9 + $0xe8] sm:$0xff]  ;;  %v9518_v34 = vld [vmem:[#allocation9 + $0x50] sm:$0xff] }
 0x2d3   : > { %3833 = vst [vmem:[#allocation2 + $0x51] sm:$0xff] %v10794_v0  ;;  %v3660_v40 = vadd.f32 %v3659_v42, %v3571_v43  ;;  %v10799_v44 = vpack.c.bf16 %v3866_v57, %v3866_v57  ;;  %v3962_v43 = vld [vmem:[#allocation2 + $0x49] sm:$0xff]  ;;  %v10814_v59 = vld [vmem:[#allocation3 + $0x454] sm:$0xf]  ;;  %6469 = vmatpush.bf16.msrb.mxu0 %v9537_v3 }
 0x2d4   : > { %v10796_v46 = vpop.f32.mrf.mxu3  ;;  %v9386_v4 = vld [vmem:[#allocation3 + $0xb0] sm:$0xf0]  ;;  %4530 = vst [vmem:[#allocation3 + $0x450] sm:$0xf] %v1225_v32  ;;  %v9527_v42 = vld [vmem:[#allocation9 + $0x98] sm:$0xff] }
 0x2d5   : > { %v10804_v20 = vpop.f32.mrf.mxu2  ;;  %v3730_v41 = vmax.f32 %v3660_v40, 0.0  ;;  %3698 = vmatmul.bf16.gmra.mxu0 %v7844_v60  ;;  %v8352_v63 = vor.u32 %v9386_v4, %v8351_v36  ;;  %3930 = vst [vmem:[#allocation3 + $0xd8] sm:$0xf] %v10799_v44  ;;  %v3994_v40 = vpack.c.bf16 %v3962_v43, %v3962_v43  ;;  %v3995_v36 = vpack.c.bf16 %v10794_v0, %v10794_v0  ;;  %v7879_v4 = vld [vmem:[#allocation3 + $0x380] sm:$0xf]  ;;  %v9526_v0 = vld [vmem:[#allocation9 + $0x90] sm:$0xff] }
 0x2d6   : > { %4531 = vst [vmem:[#allocation3 + $0x474] sm:$0xf] %v1226_v35  ;;  %v9545_v35 = vld [vmem:[#allocation9 + $0x128] sm:$0xff]  ;;  %6293 = vmatpush.bf16.msrb.mxu2 %v9519_v12  ;;  %6382 = vmatpush.bf16.msrb.mxu3 %v9527_v42  ;;  %v1384_v43 = vld [vmem:[#allocation2 + $0x18a] sm:$0xff] }
 0x2d7   : > { %v3766_v39 = vmul.f32 %v10731_v54, %v3730_v41  ;;  %6218 = vmatmul.bf16.gmra.mxu1 %v8352_v63  ;;  %4626 = vst [vmem:[#allocation3 + $0x454] sm:$0xf] %v1321_v45  ;;  %v10820_v15 = vld [vmem:[#allocation3 + $0x474] sm:$0xf0]  ;;  %v3487_v45 = vadd.f32 %v10786_v7, %v10619_v49  ;;  %v7945_v49 = vld [vmem:[#allocation3 + $0x42c] sm:$0xf0]  ;;  %v1416_v7 = vpack.c.bf16 %v1384_v43, %v1384_v43 }
 0x2d8   : > { %4627 = vst [vmem:[#allocation3 + $0x478] sm:$0xf] %v10790_v24  ;;  %6558 = vmatpush.bf16.msrb.mxu1 %v9545_v35 }
 0x2d9   : > { %3619 = vmatmul.bf16.gmra.mxu3 %v7912_v56  ;;  %v3802_v60 = vadd.f32 %v10737_v50, %v3766_v39  ;;  %v1383_v39 = vld [vmem:[#allocation2 + $0x182] sm:$0xff]  ;;  %4026 = vst [vmem:[#allocation3 + $0xdc] sm:$0xf] %v3994_v40  ;;  %v3576_v42 = vadd.f32 %v10779_v52, %v3487_v45 }
 0x2da   : > { %3530 = vmatmul.bf16.gmra.mxu2 %v7908_v23  ;;  %v3661_v57 = vpop.f32.mrf.mxu0  ;;  %v3867_v30 = vld [vmem:[#allocation2 + $0x50] sm:$0xff]  ;;  %4027 = vst [vmem:[#allocation3 + $0x100] sm:$0xf] %v3995_v36  ;;  %6383 = vmatpush.bf16.msrb.mxu3 %v9526_v0 }
 0x2db   : > { %v4058_v22 = vld [vmem:[#allocation2 + $0x4a] sm:$0xff]  ;;  %3834 = vst [vmem:[#allocation2 + $0x61] sm:$0xff] %v3802_v60  ;;  %v3662_v5 = vadd.f32 %v3661_v57, %v3573_v53  ;;  %v10818_v32 = vpack.c.bf16 %v3867_v30, %v3867_v30  ;;  %v4059_v48 = vld [vmem:[#allocation2 + $0x52] sm:$0xff]  ;;  %v1415_v53 = vpack.c.bf16 %v1383_v39, %v1383_v39  ;;  %v9277_v60 = vld [vmem:[#allocation3 + $0x40c] sm:$0xf]  ;;  %6294 = vmatpush.bf16.msrb.mxu2 %v9518_v34 }
 0x2dc   : > { %v10816_v56 = vpop.f32.mrf.mxu3  ;;  %v4090_v27 = vpack.c.bf16 %v4058_v22, %v4058_v22  ;;  %v9264_v23 = vld [vmem:[#allocation3 + $0x3a0] sm:$0xf0]  ;;  %v4091_v12 = vpack.c.bf16 %v4059_v48, %v4059_v48  ;;  %v9517_v22 = vld [vmem:[#allocation9 + $0x48] sm:$0xff]  ;;  %1448 = vst [vmem:[#allocation3 + $0x434] sm:$0xf] %v1416_v7  ;;  %v7948_v52 = vor.u32 %v9277_v60, %v7945_v49 }
 0x2dd   : > { %v10827_v41 = vpop.f32.mrf.mxu2  ;;  %v3731_v63 = vmax.f32 %v3662_v5, 0.0  ;;  %3931 = vst [vmem:[#allocation3 + $0xfc] sm:$0xf] %v10818_v32  ;;  %v7880_v30 = vor.u32 %v9264_v23, %v7879_v4  ;;  %v9525_v5 = vld [vmem:[#allocation9 + $0x88] sm:$0xff]  ;;  %v8387_v4 = vld [vmem:[#allocation3 + $0xd8] sm:$0xf] }
 0x2de   : > { %4122 = vst [vmem:[#allocation3 + $0xe0] sm:$0xf] %v4090_v27  ;;  %v7943_v27 = vld [vmem:[#allocation3 + $0x408] sm:$0xf]  ;;  %v9281_v48 = vld [vmem:[#allocation3 + $0x428] sm:$0xf0]  ;;  %6384 = vmatpush.bf16.msrb.mxu3 %v9525_v5 }
 0x2df   : > { %v3767_v24 = vmul.f32 %v10731_v54, %v3731_v63  ;;  %1447 = vst [vmem:[#allocation3 + $0x410] sm:$0xf] %v1415_v53  ;;  %v3400_v63 = vadd.f32 %v10624_v47, %v10622_v61  ;;  %6295 = vmatpush.bf16.msrb.mxu2 %v9517_v22  ;;  %v9516_v61 = vld [vmem:[#allocation9 + $0x40] sm:$0xff]  ;;  %v7944_v60 = vor.u32 %v9281_v48, %v7943_v27  ;;  %v1385_v27 = vld [vmem:[#allocation2 + $0x19a] sm:$0xff]  ;;  %v1386_v48 = vld [vmem:[#allocation2 + $0x1a2] sm:$0xff] }
 0x2e0   : > { %4123 = vst [vmem:[#allocation3 + $0x104] sm:$0xf] %v4091_v12  ;;  %v9524_v47 = vld [vmem:[#allocation9 + $0x80] sm:$0xff] }
 0x2e1   : > { %v3803_v57 = vadd.f32 %v10737_v50, %v3767_v24  ;;  %v3489_v0 = vadd.f32 %v10804_v20, %v3400_v63  ;;  %4215 = vst [vmem:[#allocation3 + $0x78] sm:$0xf] %v10782_v13 }
 0x2e2   : > { %v3664_v3 = vpop.f32.mrf.mxu0  ;;  %v3868_v35 = vld [vmem:[#allocation2 + $0x60] sm:$0xff]  ;;  %6385 = vmatpush.bf16.msrb.mxu3 %v9524_v47  ;;  %4216 = vst [vmem:[#allocation3 + $0x9c] sm:$0xf] %v10799_v44 }
 0x2e3   : > { %v3964_v36 = vld [vmem:[#allocation2 + $0x61] sm:$0xff]  ;;  %3835 = vst [vmem:[#allocation2 + $0x69] sm:$0xff] %v3803_v57  ;;  %v3665_v34 = vadd.f32 %v3664_v3, %v3576_v42  ;;  %v10837_v45 = vpack.c.bf16 %v3868_v35, %v3868_v35  ;;  %v3997_v49 = vpack.c.bf16 %v3803_v57, %v3803_v57  ;;  %6296 = vmatpush.bf16.msrb.mxu2 %v9516_v61 }
 0x2e4   : > { %v10833_v40 = vpop.f32.mrf.mxu3  ;;  %v9395_v23 = vld [vmem:[#allocation3 + $0xf8] sm:$0xf0]  ;;  %v3996_v53 = vpack.c.bf16 %v3964_v36, %v3964_v36  ;;  %v3578_v20 = vadd.f32 %v10796_v46, %v3489_v0  ;;  %v3492_v46 = vadd.f32 %v10827_v41, %v10634_v37  ;;  %v1418_v0 = vpack.c.bf16 %v1386_v48, %v1386_v48  ;;  %4217 = vst [vmem:[#allocation3 + $0xc0] sm:$0xf] %v10818_v32 }
 0x2e5   : > { %v10840_v39 = vpop.f32.mrf.mxu2  ;;  %v3732_v24 = vmax.f32 %v3665_v34, 0.0  ;;  %3703 = vmatmul.bf16.gmra.mxu0 %v7880_v30  ;;  %v8388_v43 = vor.u32 %v9395_v23, %v8387_v4  ;;  %3932 = vst [vmem:[#allocation3 + $0x120] sm:$0xf] %v10837_v45  ;;  %v9273_v4 = vld [vmem:[#allocation3 + $0x3e8] sm:$0xf0]  ;;  %v1417_v23 = vpack.c.bf16 %v1385_v27, %v1385_v27  ;;  %v7980_v32 = vor.u32 %v10810_v28, %v10808_v16 }
 0x2e6   : > { %4028 = vst [vmem:[#allocation3 + $0x124] sm:$0xf] %v3996_v53  ;;  %v3581_v44 = vadd.f32 %v10816_v56, %v3492_v46  ;;  %v7984_v53 = vor.u32 %v10814_v59, %v10820_v15  ;;  %v9536_v15 = vld [vmem:[#allocation9 + $0xe0] sm:$0xff]  ;;  %v4245_v46 = vld [vmem:[#allocation2 + $0x21] sm:$0xff] }
 0x2e7   : > { %v3768_v7 = vmul.f32 %v10731_v54, %v3732_v24  ;;  %6223 = vmatmul.bf16.gmra.mxu1 %v8388_v43  ;;  %4029 = vst [vmem:[#allocation3 + $0x148] sm:$0xf] %v3997_v49  ;;  %v3405_v43 = vadd.f32 %v10639_v62, %v10637_v29  ;;  %6470 = vmatpush.bf16.msrb.mxu0 %v9536_v15 }
 0x2e8   : > { %1449 = vst [vmem:[#allocation3 + $0x458] sm:$0xf] %v1417_v23 }
 0x2e9   : > { %3624 = vmatmul.bf16.gmra.mxu3 %v7948_v52  ;;  %v3804_v12 = vadd.f32 %v10737_v50, %v3768_v7  ;;  %v7915_v52 = vld [vmem:[#allocation3 + $0x3c8] sm:$0xf]  ;;  %1450 = vst [vmem:[#allocation3 + $0x47c] sm:$0xf] %v1418_v0  ;;  %v3494_v29 = vadd.f32 %v10840_v39, %v3405_v43  ;;  %v9534_v43 = vld [vmem:[#allocation9 + $0xd0] sm:$0xff] }
 0x2ea   : > { %3535 = vmatmul.bf16.gmra.mxu2 %v7944_v60  ;;  %v3666_v30 = vpop.f32.mrf.mxu0  ;;  %v3869_v22 = vld [vmem:[#allocation2 + $0x68] sm:$0xff]  ;;  %v7916_v41 = vor.u32 %v9273_v4, %v7915_v52  ;;  %4218 = vst [vmem:[#allocation3 + $0xe4] sm:$0xf] %v10837_v45 }
 0x2eb   : > { %v4060_v5 = vld [vmem:[#allocation2 + $0x62] sm:$0xff]  ;;  %v4061_v13 = vld [vmem:[#allocation2 + $0x6a] sm:$0xff]  ;;  %3836 = vst [vmem:[#allocation2 + $0x79] sm:$0xff] %v3804_v12  ;;  %v3667_v57 = vadd.f32 %v3666_v30, %v3578_v20  ;;  %v10849_v3 = vpack.c.bf16 %v3869_v22, %v3869_v22  ;;  %v3583_v39 = vadd.f32 %v10833_v40, %v3494_v29  ;;  %v3410_v29 = vadd.f32 %v10648_v51, %v10646_v31 }
 0x2ec   : > { %v10847_v42 = vpop.f32.mrf.mxu3  ;;  %v4092_v35 = vpack.c.bf16 %v4060_v5, %v4060_v5  ;;  %v4093_v36 = vpack.c.bf16 %v4061_v13, %v4061_v13  ;;  %v8423_v30 = vld [vmem:[#allocation3 + $0x120] sm:$0xf] }
 0x2ed   : > { %v10854_v63 = vpop.f32.mrf.mxu2  ;;  %v3733_v34 = vmax.f32 %v3667_v57, 0.0  ;;  %3933 = vst [vmem:[#allocation3 + $0x144] sm:$0xf] %v10849_v3 }
 0x2ee   : > { %4124 = vst [vmem:[#allocation3 + $0x128] sm:$0xf] %v4092_v35 }
 0x2ef   : > { %v3769_v24 = vmul.f32 %v10731_v54, %v3733_v34  ;;  %4125 = vst [vmem:[#allocation3 + $0x14c] sm:$0xf] %v4093_v36  ;;  %v10874_v57 = vld [vmem:[#allocation3 + $0x458] sm:$0xf] }
 0x2f0   : > { %v10876_v45 = vld [vmem:[#allocation3 + $0x478] sm:$0xf0]  ;;  %4722 = vst [vmem:[#allocation3 + $0x458] sm:$0xf] %v1417_v23  ;;  %v9544_v23 = vld [vmem:[#allocation9 + $0x120] sm:$0xff] }
 0x2f1   : > { %v3805_v37 = vadd.f32 %v10737_v50, %v3769_v24  ;;  %4723 = vst [vmem:[#allocation3 + $0x47c] sm:$0xf] %v1418_v0  ;;  %v9535_v36 = vld [vmem:[#allocation9 + $0xd8] sm:$0xff]  ;;  %v3497_v0 = vadd.f32 %v10854_v63, %v10643_v55  ;;  %6559 = vmatpush.bf16.msrb.mxu1 %v9544_v23 }
 0x2f2   : > { %v3669_v47 = vpop.f32.mrf.mxu0  ;;  %v3870_v60 = vld [vmem:[#allocation2 + $0x78] sm:$0xff]  ;;  %4219 = vst [vmem:[#allocation3 + $0x108] sm:$0xf] %v10849_v3  ;;  %6471 = vmatpush.bf16.msrb.mxu0 %v9535_v36 }
 0x2f3   : > { %v3966_v49 = vld [vmem:[#allocation2 + $0x79] sm:$0xff]  ;;  %3837 = vst [vmem:[#allocation2 + $0x81] sm:$0xff] %v3805_v37  ;;  %v3670_v7 = vadd.f32 %v3669_v47, %v3581_v44  ;;  %v3902_v56 = vpack.c.bf16 %v3870_v60, %v3870_v60  ;;  %v3999_v12 = vpack.c.bf16 %v3805_v37, %v3805_v37  ;;  %v4246_v44 = vld [vmem:[#allocation2 + $0x31] sm:$0xff]  ;;  %v4277_v47 = vpack.c.bf16 %v4245_v46, %v4245_v46  ;;  %v9282_v60 = vld [vmem:[#allocation3 + $0x430] sm:$0xf0] }
 0x2f4   : > { %v10862_v61 = vpop.f32.mrf.mxu3  ;;  %v3998_v20 = vpack.c.bf16 %v3966_v49, %v3966_v49  ;;  %v9404_v22 = vld [vmem:[#allocation3 + $0x140] sm:$0xf0]  ;;  %v4247_v3 = vld [vmem:[#allocation2 + $0x39] sm:$0xff]  ;;  %v10887_v49 = vpack.c.bf16 %v4246_v44, %v4246_v44  ;;  %v3586_v63 = vadd.f32 %v10847_v42, %v3497_v0 }
 0x2f5   : > { %v10869_v62 = vpop.f32.mrf.mxu2  ;;  %v3734_v5 = vmax.f32 %v3670_v7, 0.0  ;;  %3708 = vmatmul.bf16.gmra.mxu0 %v7916_v41  ;;  %v8424_v59 = vor.u32 %v9404_v22, %v8423_v30  ;;  %3934 = vst [vmem:[#allocation3 + $0x168] sm:$0xf] %v3902_v56  ;;  %v10890_v55 = vpack.c.bf16 %v4247_v3, %v4247_v3  ;;  %v9533_v22 = vld [vmem:[#allocation9 + $0xc8] sm:$0xff]  ;;  %v9364_v42 = vld [vmem:[#allocation3 + $0x4] sm:$0xf] }
 0x2f6   : > { %4030 = vst [vmem:[#allocation3 + $0x16c] sm:$0xf] %v3998_v20  ;;  %v8287_v20 = vld [vmem:[#allocation3 + $0x8] sm:$0xf]  ;;  %6472 = vmatpush.bf16.msrb.mxu0 %v9534_v43  ;;  %v3499_v31 = vadd.f32 %v10869_v62, %v3410_v29 }
 0x2f7   : > { %v3770_v13 = vmul.f32 %v10731_v54, %v3734_v5  ;;  %6228 = vmatmul.bf16.gmra.mxu1 %v8424_v59  ;;  %4031 = vst [vmem:[#allocation3 + $0x190] sm:$0xf] %v3999_v12  ;;  %v8281_v36 = vld [vmem:[#allocation3 + $0x24] sm:$0xf0] }
 0x2f8   : > { %4220 = vst [vmem:[#allocation3 + $0x12c] sm:$0xf] %v3902_v56  ;;  %v9369_v56 = vld [vmem:[#allocation3 + $0x28] sm:$0xf0]  ;;  %v8284_v44 = vor.u32 %v9364_v42, %v8281_v36 }
 0x2f9   : > { %3629 = vmatmul.bf16.gmra.mxu3 %v7984_v53  ;;  %v3806_v35 = vadd.f32 %v10737_v50, %v3770_v13  ;;  %v7951_v53 = vld [vmem:[#allocation3 + $0x410] sm:$0xf]  ;;  %4309 = vst [vmem:[#allocation3 + $0x34] sm:$0xf] %v4277_v47  ;;  %v8288_v15 = vor.u32 %v9369_v56, %v8287_v20  ;;  %v3588_v47 = vadd.f32 %v10862_v61, %v3499_v31  ;;  %v9373_v31 = vld [vmem:[#allocation3 + $0x4c] sm:$0xf] }
 0x2fa   : > { %3540 = vmatmul.bf16.gmra.mxu2 %v7980_v32  ;;  %v3671_v28 = vpop.f32.mrf.mxu0  ;;  %v3871_v34 = vld [vmem:[#allocation2 + $0x80] sm:$0xff]  ;;  %v7952_v30 = vor.u32 %v9282_v60, %v7951_v53  ;;  %4310 = vst [vmem:[#allocation3 + $0x58] sm:$0xf] %v10887_v49  ;;  %6473 = vmatpush.bf16.msrb.mxu0 %v9533_v22 }
 0x2fb   : > { %v4062_v27 = vld [vmem:[#allocation2 + $0x7a] sm:$0xff]  ;;  %v4063_v48 = vld [vmem:[#allocation2 + $0x82] sm:$0xff]  ;;  %3838 = vst [vmem:[#allocation2 + $0x91] sm:$0xff] %v3806_v35  ;;  %v3672_v52 = vadd.f32 %v3671_v28, %v3583_v39  ;;  %v3903_v4 = vpack.c.bf16 %v3871_v34, %v3871_v34 }
 0x2fc   : > { %v10880_v16 = vpop.f32.mrf.mxu3  ;;  %v4094_v24 = vpack.c.bf16 %v4062_v27, %v4062_v27  ;;  %v4095_v40 = vpack.c.bf16 %v4063_v48, %v4063_v48  ;;  %v4248_v39 = vld [vmem:[#allocation2 + $0x49] sm:$0xff]  ;;  %v4249_v27 = vld [vmem:[#allocation2 + $0x51] sm:$0xff]  ;;  %4311 = vst [vmem:[#allocation3 + $0x7c] sm:$0xf] %v10890_v55 }
 0x2fd   : > { %v10885_v37 = vpop.f32.mrf.mxu2  ;;  %v3735_v41 = vmax.f32 %v3672_v52, 0.0  ;;  %3935 = vst [vmem:[#allocation3 + $0x18c] sm:$0xf] %v3903_v4  ;;  %v8459_v48 = vld [vmem:[#allocation3 + $0x168] sm:$0xf]  ;;  %v10905_v0 = vpack.c.bf16 %v4249_v27, %v4249_v27 }
 0x2fe   : > { %4126 = vst [vmem:[#allocation3 + $0x170] sm:$0xf] %v4094_v24  ;;  %v9532_v24 = vld [vmem:[#allocation9 + $0xc0] sm:$0xff]  ;;  %v3502_v61 = vadd.f32 %v10885_v37, %v10651_v1  ;;  %v7988_v1 = vor.u32 %v10876_v45, %v10874_v57  ;;  %v8323_v37 = vld [vmem:[#allocation3 + $0x50] sm:$0xf] }
 0x2ff   : > { %v3771_v7 = vmul.f32 %v10731_v54, %v3735_v41  ;;  %4127 = vst [vmem:[#allocation3 + $0x194] sm:$0xf] %v4095_v40  ;;  %v10903_v40 = vpack.c.bf16 %v4248_v39, %v4248_v39  ;;  %v4250_v41 = vld [vmem:[#allocation2 + $0x61] sm:$0xff]  ;;  %6474 = vmatpush.bf16.msrb.mxu0 %v9532_v24 }
 0x300   : > { %4221 = vst [vmem:[#allocation3 + $0x150] sm:$0xf] %v3903_v4  ;;  %v10908_v62 = vpack.c.bf16 %v4250_v41, %v4250_v41  ;;  %v3591_v36 = vadd.f32 %v10880_v16, %v3502_v61 }
 0x301   : > { %v3807_v12 = vadd.f32 %v10737_v50, %v3771_v7  ;;  %4312 = vst [vmem:[#allocation3 + $0xa0] sm:$0xf] %v10903_v40 }
 0x302   : > { %v3674_v59 = vpop.f32.mrf.mxu0  ;;  %v3872_v32 = vld [vmem:[#allocation2 + $0x90] sm:$0xff]  ;;  %4313 = vst [vmem:[#allocation3 + $0xc4] sm:$0xf] %v10905_v0 }
 0x303   : > { %v3968_v13 = vld [vmem:[#allocation2 + $0x91] sm:$0xff]  ;;  %3839 = vst [vmem:[#allocation2 + $0x99] sm:$0xff] %v3807_v12  ;;  %v3675_v35 = vadd.f32 %v3674_v59, %v3586_v63  ;;  %v3904_v46 = vpack.c.bf16 %v3872_v32, %v3872_v32  ;;  %v4001_v34 = vpack.c.bf16 %v3807_v12, %v3807_v12  ;;  %v4340_v32 = vld [vmem:[#allocation2 + $0x1a] sm:$0xff] }
 0x304   : > { %v10896_v5 = vpop.f32.mrf.mxu3  ;;  %v4000_v28 = vpack.c.bf16 %v3968_v13, %v3968_v13  ;;  %v9413_v52 = vld [vmem:[#allocation3 + $0x188] sm:$0xf0]  ;;  %4314 = vst [vmem:[#allocation3 + $0xe8] sm:$0xf] %v10908_v62  ;;  %v4251_v13 = vld [vmem:[#allocation2 + $0x69] sm:$0xff]  ;;  %v4372_v42 = vpack.c.bf16 %v4340_v32, %v4340_v32 }
 0x305   : > { %v10901_v51 = vpop.f32.mrf.mxu2  ;;  %v3736_v4 = vmax.f32 %v3675_v35, 0.0  ;;  %3713 = vmatmul.bf16.gmra.mxu0 %v7952_v30  ;;  %v8460_v23 = vor.u32 %v9413_v52, %v8459_v48  ;;  %3936 = vst [vmem:[#allocation3 + $0x1b0] sm:$0xf] %v3904_v46  ;;  %v10922_v35 = vpack.c.bf16 %v4251_v13, %v4251_v13  ;;  %v9378_v48 = vld [vmem:[#allocation3 + $0x70] sm:$0xf0]  ;;  %v3415_v52 = vadd.f32 %v10656_v25, %v10654_v18  ;;  %v4437_v18 = vld [vmem:[#allocation2 + $0x38] sm:$0xff] }
 0x306   : > { %4032 = vst [vmem:[#allocation3 + $0x1b4] sm:$0xf] %v4000_v28  ;;  %v4341_v28 = vld [vmem:[#allocation2 + $0x22] sm:$0xff]  ;;  %v4252_v25 = vld [vmem:[#allocation2 + $0x79] sm:$0xff] }
 0x307   : > { %v3772_v43 = vmul.f32 %v10731_v54, %v3736_v4  ;;  %6233 = vmatmul.bf16.gmra.mxu1 %v8460_v23  ;;  %4033 = vst [vmem:[#allocation3 + $0x1d8] sm:$0xf] %v4001_v34  ;;  %v4436_v23 = vld [vmem:[#allocation2 + $0x30] sm:$0xff]  ;;  %v4373_v24 = vpack.c.bf16 %v4341_v28, %v4341_v28 }
 0x308   : > { %4222 = vst [vmem:[#allocation3 + $0x174] sm:$0xf] %v3904_v46 }
 0x309   : > { %6386 = vmatmul.bf16.vlgmr.msrb.gmra.mxu3 %v8288_v15  ;;  %v3808_v3 = vadd.f32 %v10737_v50, %v3772_v43  ;;  %4315 = vst [vmem:[#allocation3 + $0x10c] sm:$0xf] %v10922_v35 }
 0x30a   : > { %6297 = vmatmul.bf16.vlgmr.msrb.gmra.mxu2 %v8284_v44  ;;  %v3676_v60 = vpop.f32.mrf.mxu0  ;;  %v3873_v7 = vld [vmem:[#allocation2 + $0x98] sm:$0xff]  ;;  %4404 = vst [vmem:[#allocation3 + $0x14] sm:$0xf] %v4372_v42  ;;  %v3504_v44 = vadd.f32 %v10901_v51, %v3415_v52  ;;  %v10942_v51 = vpack.c.bf16 %v4252_v25, %v4252_v25  ;;  %v4253_v52 = vld [vmem:[#allocation2 + $0x81] sm:$0xff] }
 0x30b   : > { %v4064_v20 = vld [vmem:[#allocation2 + $0x92] sm:$0xff]  ;;  %v4065_v56 = vld [vmem:[#allocation2 + $0x9a] sm:$0xff]  ;;  %3840 = vst [vmem:[#allocation2 + $0xa9] sm:$0xff] %v3808_v3  ;;  %v3677_v63 = vadd.f32 %v3676_v60, %v3588_v47  ;;  %v3905_v12 = vpack.c.bf16 %v3873_v7, %v3873_v7  ;;  %v4002_v29 = vpack.c.bf16 %v3808_v3, %v3808_v3  ;;  %v8324_v3 = vor.u32 %v9378_v48, %v8323_v37  ;;  %v9382_v25 = vld [vmem:[#allocation3 + $0x94] sm:$0xf] }
 0x30c   : > { %v10913_v53 = vpop.f32.mrf.mxu3  ;;  %v4096_v30 = vpack.c.bf16 %v4064_v20, %v4064_v20  ;;  %v4097_v22 = vpack.c.bf16 %v4065_v56, %v4065_v56  ;;  %v8495_v57 = vld [vmem:[#allocation3 + $0x1b0] sm:$0xf]  ;;  %v4468_v7 = vpack.c.bf16 %v4436_v23, %v4436_v23  ;;  %4405 = vst [vmem:[#allocation3 + $0x38] sm:$0xf] %v4373_v24  ;;  %v3420_v24 = vadd.f32 %v10664_v6, %v10662_v8 }
 0x30d   : > { %v10919_v59 = vpop.f32.mrf.mxu2  ;;  %v3737_v15 = vmax.f32 %v3677_v63, 0.0  ;;  %3937 = vst [vmem:[#allocation3 + $0x1d4] sm:$0xf] %v3905_v12  ;;  %v8317_v47 = vld [vmem:[#allocation3 + $0x6c] sm:$0xf0] }
 0x30e   : > { %4128 = vst [vmem:[#allocation3 + $0x1b8] sm:$0xf] %v4096_v30  ;;  %v10939_v20 = vld [vmem:[%s11989_s2] ss:$0 sm:$0xff]  ;;  %v8320_v63 = vor.u32 %v9373_v31, %v8317_v47  ;;  %v3593_v30 = vadd.f32 %v10896_v5, %v3504_v44  ;;  %v3507_v28 = vadd.f32 %v10919_v59, %v10659_v11  ;;  %v10959_v31 = vpack.c.bf16 %v4253_v52, %v4253_v52  ;;  %v9387_v59 = vld [vmem:[#allocation3 + $0xb8] sm:$0xf0] }
 0x30f   : > { %v3773_v39 = vmul.f32 %v10731_v54, %v3737_v15  ;;  %4129 = vst [vmem:[#allocation3 + $0x1dc] sm:$0xf] %v4097_v22  ;;  %v10948_v22 = vld [vmem:[%s11990_s3] ss:$0 sm:$0xff]  ;;  %v9365_v47 = vld [vmem:[#allocation3 + $0xc] sm:$0xf] }
 0x310   : > { %4034 = vst [vmem:[#allocation3 + $0x1fc] sm:$0xf] %v4002_v29 }
 0x311   : > { %v3809_v46 = vadd.f32 %v10737_v50, %v3773_v39  ;;  %4223 = vst [vmem:[#allocation3 + $0x198] sm:$0xf] %v3905_v12  ;;  %v4469_v12 = vpack.c.bf16 %v4437_v18, %v4437_v18 }
 0x312   : > { %v3679_v27 = vpop.f32.mrf.mxu0  ;;  %v3874_v54 = vld [vmem:[#allocation2 + $0xa8] sm:$0xff]  ;;  %4316 = vst [vmem:[#allocation3 + $0x130] sm:$0xf] %v10942_v51 }
 0x313   : > { %3841 = vst [vmem:[#allocation2 + $0xb1] sm:$0xff] %v3809_v46  ;;  %v3680_v16 = vadd.f32 %v3679_v27, %v3591_v36  ;;  %v3906_v50 = vpack.c.bf16 %v3874_v54, %v3874_v54  ;;  %v4003_v4 = vpack.c.bf16 %v3809_v46, %v3809_v46  ;;  %v9543_v36 = vld [vmem:[#allocation9 + $0x118] sm:$0xff]  ;;  %v4342_v54 = vld [vmem:[#allocation2 + $0x32] sm:$0xff] }
 0x314   : > { %v10928_v34 = vpop.f32.mrf.mxu3  ;;  %v9422_v45 = vld [vmem:[#allocation3 + $0x1d0] sm:$0xf0]  ;;  %4500 = vst [vmem:[#allocation3 + $0x18] sm:$0xf] %v4468_v7  ;;  %6560 = vmatpush.bf16.msrb.mxu1 %v9543_v36  ;;  %v4374_v23 = vpack.c.bf16 %v4342_v54, %v4342_v54 }
 0x315   : > { %v10934_v41 = vpop.f32.mrf.mxu2  ;;  %v3738_v43 = vmax.f32 %v3680_v16, 0.0  ;;  %3718 = vmatmul.bf16.gmra.mxu0 %v7988_v1  ;;  %v8496_v60 = vor.u32 %v9422_v45, %v8495_v57  ;;  %3938 = vst [vmem:[#allocation3 + $0x1f8] sm:$0xf] %v3906_v50  ;;  %v3596_v57 = vadd.f32 %v10913_v53, %v3507_v28  ;;  %v4343_v45 = vld [vmem:[#allocation2 + $0x3a] sm:$0xff] }
 0x316   : > { %4035 = vst [vmem:[#allocation3 + $0x220] sm:$0xf] %v4003_v4  ;;  %v8289_v4 = vld [vmem:[#allocation3 + $0x2c] sm:$0xf0]  ;;  %v3509_v8 = vadd.f32 %v10934_v41, %v3420_v24  ;;  %v10972_v41 = vpop.f32.mrf.mxu1 }
 0x317   : > { %v3774_v56 = vmul.f32 %v10939_v20, %v3738_v43  ;;  %6238 = vmatmul.bf16.gmra.mxu1 %v8496_v60  ;;  %4224 = vst [vmem:[#allocation3 + $0x1bc] sm:$0xf] %v3906_v50  ;;  %v8359_v50 = vld [vmem:[#allocation3 + $0x98] sm:$0xf]  ;;  %v8292_v53 = vor.u32 %v9365_v47, %v8289_v4 }
 0x318   : > { %4501 = vst [vmem:[#allocation3 + $0x3c] sm:$0xf] %v4469_v12  ;;  %v4438_v60 = vld [vmem:[#allocation2 + $0x48] sm:$0xff]  ;;  %v8360_v12 = vor.u32 %v9387_v59, %v8359_v50  ;;  %v3598_v28 = vadd.f32 %v10928_v34, %v3509_v8  ;;  %v9396_v8 = vld [vmem:[#allocation3 + $0x100] sm:$0xf0] }
 0x319   : > { %6391 = vmatmul.bf16.gmra.mxu3 %v8324_v3  ;;  %v3810_v29 = vadd.f32 %v10948_v22, %v3774_v56  ;;  %4317 = vst [vmem:[#allocation3 + $0x154] sm:$0xf] %v10959_v31 }
 0x31a   : > { %6302 = vmatmul.bf16.gmra.mxu2 %v8320_v63  ;;  %v3681_v15 = vpop.f32.mrf.mxu0  ;;  %v3875_v32 = vld [vmem:[#allocation2 + $0xb0] sm:$0xff]  ;;  %4406 = vst [vmem:[#allocation3 + $0x5c] sm:$0xf] %v4374_v23 }
 0x31b   : > { %v4066_v13 = vld [vmem:[#allocation2 + $0xaa] sm:$0xff]  ;;  %v4067_v39 = vld [vmem:[#allocation2 + $0xb2] sm:$0xff]  ;;  %3842 = vst [vmem:[#allocation2 + $0xc1] sm:$0xff] %v3810_v29  ;;  %v3682_v42 = vadd.f32 %v3681_v15, %v3593_v30  ;;  %v3907_v5 = vpack.c.bf16 %v3875_v32, %v3875_v32  ;;  %v4004_v37 = vpack.c.bf16 %v3810_v29, %v3810_v29  ;;  %v4375_v15 = vpack.c.bf16 %v4343_v45, %v4343_v45 }
 0x31c   : > { %v10952_v61 = vpop.f32.mrf.mxu3  ;;  %v4098_v46 = vpack.c.bf16 %v4066_v13, %v4066_v13  ;;  %v4099_v1 = vpack.c.bf16 %v4067_v39, %v4067_v39  ;;  %v4439_v63 = vld [vmem:[#allocation2 + $0x50] sm:$0xff]  ;;  %v8531_v30 = vld [vmem:[#allocation3 + $0x1f8] sm:$0xf]  ;;  %4596 = vst [vmem:[#allocation3 + $0x1c] sm:$0xf] %v10887_v49 }
 0x31d   : > { %v10956_v27 = vpop.f32.mrf.mxu2  ;;  %v3739_v48 = vmax.f32 %v3682_v42, 0.0  ;;  %3939 = vst [vmem:[#allocation3 + $0x21c] sm:$0xf] %v3907_v5  ;;  %v8353_v13 = vld [vmem:[#allocation3 + $0xb4] sm:$0xf0]  ;;  %v4470_v42 = vpack.c.bf16 %v4438_v60, %v4438_v60  ;;  %v4471_v36 = vpack.c.bf16 %v4439_v63, %v4439_v63  ;;  %v4345_v45 = vld [vmem:[#allocation2 + $0x52] sm:$0xff] }
 0x31e   : > { %4130 = vst [vmem:[#allocation3 + $0x200] sm:$0xf] %v4098_v46  ;;  %v3512_v34 = vadd.f32 %v10956_v27, %v10667_v17  ;;  %v4377_v60 = vpack.c.bf16 %v4345_v45, %v4345_v45  ;;  %v8395_v17 = vld [vmem:[#allocation3 + $0xe0] sm:$0xf]  ;;  %v4441_v27 = vld [vmem:[#allocation2 + $0x68] sm:$0xff] }
 0x31f   : > { %v3775_v16 = vmul.f32 %v10939_v20, %v3739_v48  ;;  %4131 = vst [vmem:[#allocation3 + $0x224] sm:$0xf] %v4099_v1  ;;  %v8356_v1 = vor.u32 %v9382_v25, %v8353_v13  ;;  %v9374_v25 = vld [vmem:[#allocation3 + $0x54] sm:$0xf] }
 0x320   : > { %4036 = vst [vmem:[#allocation3 + $0x244] sm:$0xf] %v4004_v37 }
 0x321   : > { %v3811_v11 = vadd.f32 %v10948_v22, %v3775_v16  ;;  %4225 = vst [vmem:[#allocation3 + $0x1e0] sm:$0xf] %v3907_v5  ;;  %v4344_v5 = vld [vmem:[#allocation2 + $0x4a] sm:$0xff] }
 0x322   : > { %v3684_v43 = vpop.f32.mrf.mxu0  ;;  %v3876_v3 = vld [vmem:[#allocation2 + $0xc0] sm:$0xff]  ;;  %4407 = vst [vmem:[#allocation3 + $0x80] sm:$0xf] %v4375_v15  ;;  %v4376_v37 = vpack.c.bf16 %v4344_v5, %v4344_v5 }
 0x323   : > { %3843 = vst [vmem:[#allocation2 + $0xc9] sm:$0xff] %v3811_v11  ;;  %v3685_v18 = vadd.f32 %v3684_v43, %v3596_v57  ;;  %v3908_v7 = vpack.c.bf16 %v3876_v3, %v3876_v3  ;;  %v4005_v56 = vpack.c.bf16 %v3811_v11, %v3811_v11  ;;  %v4440_v3 = vld [vmem:[#allocation2 + $0x60] sm:$0xff] }
 0x324   : > { %v10965_v44 = vpop.f32.mrf.mxu3  ;;  %v9431_v29 = vld [vmem:[#allocation3 + $0x218] sm:$0xf0]  ;;  %4502 = vst [vmem:[#allocation3 + $0x60] sm:$0xf] %v4470_v42 }
 0x325   : > { %v10969_v6 = vpop.f32.mrf.mxu2  ;;  %v3740_v32 = vmax.f32 %v3685_v18, 0.0  ;;  %6475 = vmatmul.bf16.vlgmr.msrb.gmra.mxu0 %v8292_v53  ;;  %v8532_v39 = vor.u32 %v9431_v29, %v8531_v30  ;;  %3940 = vst [vmem:[#allocation3 + $0x240] sm:$0xf] %v3908_v7  ;;  %v8325_v53 = vld [vmem:[#allocation3 + $0x74] sm:$0xf0]  ;;  %v3425_v30 = vadd.f32 %v10672_v21, %v10670_v58 }
 0x326   : > { %4037 = vst [vmem:[#allocation3 + $0x268] sm:$0xf] %v4005_v56  ;;  %v3601_v56 = vadd.f32 %v10952_v61, %v3512_v34  ;;  %v8328_v61 = vor.u32 %v9374_v25, %v8325_v53  ;;  %v8389_v21 = vld [vmem:[#allocation3 + $0xfc] sm:$0xf0] }
 0x327   : > { %v3776_v46 = vmul.f32 %v10939_v20, %v3740_v32  ;;  %6243 = vmatmul.bf16.gmra.mxu1 %v8532_v39  ;;  %4226 = vst [vmem:[#allocation3 + $0x204] sm:$0xf] %v3908_v7  ;;  %v4472_v7 = vpack.c.bf16 %v4440_v3, %v4440_v3  ;;  %v9391_v39 = vld [vmem:[#allocation3 + $0xdc] sm:$0xf] }
 0x328   : > { %4503 = vst [vmem:[#allocation3 + $0x84] sm:$0xf] %v4471_v36 }
 0x329   : > { %6396 = vmatmul.bf16.gmra.mxu3 %v8360_v12  ;;  %v3812_v48 = vadd.f32 %v10948_v22, %v3776_v46  ;;  %4408 = vst [vmem:[#allocation3 + $0xa4] sm:$0xf] %v4376_v37  ;;  %v10985_v12 = vpop.f32.mrf.mxu1  ;;  %v3514_v37 = vadd.f32 %v10969_v6, %v3425_v30  ;;  %v9405_v30 = vld [vmem:[#allocation3 + $0x148] sm:$0xf0] }
 0x32a   : > { %6307 = vmatmul.bf16.gmra.mxu2 %v8356_v1  ;;  %v3686_v52 = vpop.f32.mrf.mxu0  ;;  %v3877_v16 = vld [vmem:[#allocation2 + $0xc8] sm:$0xff]  ;;  %4409 = vst [vmem:[#allocation3 + $0xc8] sm:$0xf] %v4377_v60  ;;  %v4473_v1 = vpack.c.bf16 %v4441_v27, %v4441_v27 }
 0x32b   : > { %v4068_v50 = vld [vmem:[#allocation2 + $0xc2] sm:$0xff]  ;;  %v4069_v4 = vld [vmem:[#allocation2 + $0xca] sm:$0xff]  ;;  %3844 = vst [vmem:[#allocation2 + $0xd9] sm:$0xff] %v3812_v48  ;;  %v3687_v23 = vadd.f32 %v3686_v52, %v3598_v28  ;;  %v3909_v57 = vpack.c.bf16 %v3877_v16, %v3877_v16  ;;  %v4006_v24 = vpack.c.bf16 %v3812_v48, %v3812_v48  ;;  %v8396_v48 = vor.u32 %v9396_v8, %v8395_v17 }
 0x32c   : > { %v10976_v54 = vpop.f32.mrf.mxu3  ;;  %v4100_v11 = vpack.c.bf16 %v4068_v50, %v4068_v50  ;;  %v4101_v59 = vpack.c.bf16 %v4069_v4, %v4069_v4  ;;  %v8567_v36 = vld [vmem:[#allocation3 + $0x240] sm:$0xf]  ;;  %4504 = vst [vmem:[#allocation3 + $0xa8] sm:$0xf] %v4472_v7  ;;  %v8392_v50 = vor.u32 %v9391_v39, %v8389_v21  ;;  %v3603_v4 = vadd.f32 %v10965_v44, %v3514_v37 }
 0x32d   : > { %v10980_v43 = vpop.f32.mrf.mxu2  ;;  %v3741_v47 = vmax.f32 %v3687_v23, 0.0  ;;  %3941 = vst [vmem:[#allocation3 + $0x264] sm:$0xf] %v3909_v57  ;;  %v8361_v17 = vld [vmem:[#allocation3 + $0xbc] sm:$0xf0] }
 0x32e   : > { %4132 = vst [vmem:[#allocation3 + $0x248] sm:$0xf] %v4100_v11  ;;  %v3517_v49 = vadd.f32 %v10980_v43, %v10675_v19  ;;  %v8431_v43 = vld [vmem:[#allocation3 + $0x128] sm:$0xf] }
 0x32f   : > { %v3777_v18 = vmul.f32 %v10939_v20, %v3741_v47  ;;  %4133 = vst [vmem:[#allocation3 + $0x26c] sm:$0xf] %v4101_v59  ;;  %v9542_v47 = vld [vmem:[#allocation9 + $0x110] sm:$0xff]  ;;  %v8432_v37 = vor.u32 %v9405_v30, %v8431_v43 }
 0x330   : > { %4038 = vst [vmem:[#allocation3 + $0x28c] sm:$0xf] %v4006_v24  ;;  %6561 = vmatpush.bf16.msrb.mxu1 %v9542_v47  ;;  %v4443_v30 = vld [vmem:[#allocation2 + $0x80] sm:$0xff] }
 0x331   : > { %v3813_v63 = vadd.f32 %v10948_v22, %v3777_v18  ;;  %4227 = vst [vmem:[#allocation3 + $0x228] sm:$0xf] %v3909_v57  ;;  %v11001_v44 = vpop.f32.mrf.mxu1 }
 0x332   : > { %v3689_v15 = vpop.f32.mrf.mxu0  ;;  %v3878_v32 = vld [vmem:[#allocation2 + $0xd8] sm:$0xff]  ;;  %4505 = vst [vmem:[#allocation3 + $0xcc] sm:$0xf] %v4473_v1 }
 0x333   : > { %3845 = vst [vmem:[#allocation2 + $0xe1] sm:$0xff] %v3813_v63  ;;  %v3690_v13 = vadd.f32 %v3689_v15, %v3601_v56  ;;  %v3910_v42 = vpack.c.bf16 %v3878_v32, %v3878_v32  ;;  %v4007_v5 = vpack.c.bf16 %v3813_v63, %v3813_v63  ;;  %v4346_v56 = vld [vmem:[#allocation2 + $0x62] sm:$0xff]  ;;  %v3430_v15 = vadd.f32 %v10680_v26, %v10678_v33 }
 0x334   : > { %v10989_v29 = vpop.f32.mrf.mxu3  ;;  %v9440_v46 = vld [vmem:[#allocation3 + $0x260] sm:$0xf0]  ;;  %4597 = vst [vmem:[#allocation3 + $0x40] sm:$0xf] %v10890_v55  ;;  %v4378_v27 = vpack.c.bf16 %v4346_v56, %v4346_v56 }
 0x335   : > { %v10992_v28 = vpop.f32.mrf.mxu2  ;;  %v3742_v58 = vmax.f32 %v3690_v13, 0.0  ;;  %6480 = vmatmul.bf16.gmra.mxu0 %v8328_v61  ;;  %v8568_v52 = vor.u32 %v9440_v46, %v8567_v36  ;;  %3942 = vst [vmem:[#allocation3 + $0x288] sm:$0xf] %v3910_v42  ;;  %v4254_v55 = vld [vmem:[#allocation2 + $0x91] sm:$0xff]  ;;  %v9383_v13 = vld [vmem:[#allocation3 + $0x9c] sm:$0xf] }
 0x336   : > { %4039 = vst [vmem:[#allocation3 + $0x2b0] sm:$0xf] %v4007_v5  ;;  %v11008_v7 = vpack.c.bf16 %v4254_v55, %v4254_v55  ;;  %v4347_v61 = vld [vmem:[#allocation2 + $0x6a] sm:$0xff]  ;;  %v9400_v5 = vld [vmem:[#allocation3 + $0x124] sm:$0xf]  ;;  %v3519_v33 = vadd.f32 %v10992_v28, %v3430_v15 }
 0x337   : > { %v3778_v16 = vmul.f32 %v10939_v20, %v3742_v58  ;;  %6248 = vmatmul.bf16.gmra.mxu1 %v8568_v52  ;;  %4228 = vst [vmem:[#allocation3 + $0x24c] sm:$0xf] %v3910_v42  ;;  %v8425_v52 = vld [vmem:[#allocation3 + $0x144] sm:$0xf0] }
 0x338   : > { %4598 = vst [vmem:[#allocation3 + $0x64] sm:$0xf] %v10903_v40  ;;  %v3606_v40 = vadd.f32 %v10976_v54, %v3517_v49  ;;  %v8364_v54 = vor.u32 %v9383_v13, %v8361_v17  ;;  %v8428_v28 = vor.u32 %v9400_v5, %v8425_v52  ;;  %v4475_v13 = vpack.c.bf16 %v4443_v30, %v4443_v30 }
 0x339   : > { %6401 = vmatmul.bf16.gmra.mxu3 %v8396_v48  ;;  %v3814_v6 = vadd.f32 %v10948_v22, %v3778_v16  ;;  %4318 = vst [vmem:[#allocation3 + $0x178] sm:$0xf] %v11008_v7 }
 0x33a   : > { %6312 = vmatmul.bf16.gmra.mxu2 %v8392_v50  ;;  %v3691_v57 = vpop.f32.mrf.mxu0  ;;  %v3879_v11 = vld [vmem:[#allocation2 + $0xe0] sm:$0xff]  ;;  %4410 = vst [vmem:[#allocation3 + $0xec] sm:$0xf] %v4378_v27 }
 0x33b   : > { %v4070_v59 = vld [vmem:[#allocation2 + $0xda] sm:$0xff]  ;;  %v4071_v45 = vld [vmem:[#allocation2 + $0xe2] sm:$0xff]  ;;  %3846 = vst [vmem:[#allocation2 + $0xf1] sm:$0xff] %v3814_v6  ;;  %v3692_v24 = vadd.f32 %v3691_v57, %v3603_v4  ;;  %v3911_v34 = vpack.c.bf16 %v3879_v11, %v3879_v11  ;;  %v4008_v18 = vpack.c.bf16 %v3814_v6, %v3814_v6  ;;  %v4379_v4 = vpack.c.bf16 %v4347_v61, %v4347_v61 }
 0x33c   : > { %v10998_v23 = vpop.f32.mrf.mxu3  ;;  %v4102_v3 = vpack.c.bf16 %v4070_v59, %v4070_v59  ;;  %v4103_v60 = vpack.c.bf16 %v4071_v45, %v4071_v45  ;;  %v8603_v58 = vld [vmem:[#allocation3 + $0x288] sm:$0xf]  ;;  %v3608_v45 = vadd.f32 %v10989_v29, %v3519_v33  ;;  %4599 = vst [vmem:[#allocation3 + $0x88] sm:$0xf] %v10905_v0  ;;  %v3435_v61 = vadd.f32 %v10688_v38, %v10686_v2 }
 0x33d   : > { %v11006_v25 = vpop.f32.mrf.mxu2  ;;  %v3743_v53 = vmax.f32 %v3692_v24, 0.0  ;;  %3943 = vst [vmem:[#allocation3 + $0x2ac] sm:$0xf] %v3911_v34  ;;  %v4255_v50 = vld [vmem:[#allocation2 + $0x99] sm:$0xff] }
 0x33e   : > { %4134 = vst [vmem:[#allocation3 + $0x290] sm:$0xf] %v4102_v3  ;;  %v11023_v6 = vpack.c.bf16 %v4255_v50, %v4255_v50  ;;  %v4442_v57 = vld [vmem:[#allocation2 + $0x78] sm:$0xff]  ;;  %v3522_v29 = vadd.f32 %v11006_v25, %v10683_v14  ;;  %v8467_v14 = vld [vmem:[#allocation3 + $0x170] sm:$0xf] }
 0x33f   : > { %v3779_v63 = vmul.f32 %v10939_v20, %v3743_v53  ;;  %4135 = vst [vmem:[#allocation3 + $0x2b4] sm:$0xf] %v4103_v60  ;;  %v4474_v59 = vpack.c.bf16 %v4442_v57, %v4442_v57  ;;  %v9414_v25 = vld [vmem:[#allocation3 + $0x190] sm:$0xf0] }
 0x340   : > { %4040 = vst [vmem:[#allocation3 + $0x2d4] sm:$0xf] %v4008_v18  ;;  %v3611_v0 = vadd.f32 %v10998_v23, %v3522_v29 }
 0x341   : > { %v3815_v19 = vadd.f32 %v10948_v22, %v3779_v63  ;;  %4229 = vst [vmem:[#allocation3 + $0x270] sm:$0xf] %v3911_v34 }
 0x342   : > { %v3694_v32 = vpop.f32.mrf.mxu0  ;;  %v3880_v39 = vld [vmem:[#allocation2 + $0xf0] sm:$0xff]  ;;  %4319 = vst [vmem:[#allocation3 + $0x19c] sm:$0xf] %v11023_v6 }
 0x343   : > { %3847 = vst [vmem:[#allocation2 + $0xf9] sm:$0xff] %v3815_v19  ;;  %v3695_v42 = vadd.f32 %v3694_v32, %v3606_v40  ;;  %v3912_v36 = vpack.c.bf16 %v3880_v39, %v3880_v39  ;;  %v4009_v46 = vpack.c.bf16 %v3815_v19, %v3815_v19  ;;  %v4256_v19 = vld [vmem:[#allocation2 + $0xa9] sm:$0xff]  ;;  %v8397_v32 = vld [vmem:[#allocation3 + $0x104] sm:$0xf0] }
 0x344   : > { %v11015_v8 = vpop.f32.mrf.mxu3  ;;  %v11018_v1 = vpop.f32.mrf.mxu1  ;;  %v9449_v21 = vld [vmem:[#allocation3 + $0x2a8] sm:$0xf0]  ;;  %4411 = vst [vmem:[#allocation3 + $0x110] sm:$0xf] %v4379_v4  ;;  %v11038_v43 = vpack.c.bf16 %v4256_v19, %v4256_v19 }
 0x345   : > { %v11021_v26 = vpop.f32.mrf.mxu2  ;;  %v3744_v48 = vmax.f32 %v3695_v42, 0.0  ;;  %6485 = vmatmul.bf16.gmra.mxu0 %v8364_v54  ;;  %v8604_v16 = vor.u32 %v9449_v21, %v8603_v58  ;;  %3944 = vst [vmem:[#allocation3 + $0x2d0] sm:$0xf] %v3912_v36  ;;  %v9392_v54 = vld [vmem:[#allocation3 + $0xe4] sm:$0xf] }
 0x346   : > { %4041 = vst [vmem:[#allocation3 + $0x2f8] sm:$0xf] %v4009_v46  ;;  %v4348_v46 = vld [vmem:[#allocation2 + $0x7a] sm:$0xff]  ;;  %v8400_v23 = vor.u32 %v9392_v54, %v8397_v32  ;;  %v3524_v38 = vadd.f32 %v11021_v26, %v3435_v61 }
 0x347   : > { %v3780_v11 = vmul.f32 %v10939_v20, %v3744_v48  ;;  %6253 = vmatmul.bf16.gmra.mxu1 %v8604_v16  ;;  %4230 = vst [vmem:[#allocation3 + $0x294] sm:$0xf] %v3912_v36  ;;  %v9409_v58 = vld [vmem:[#allocation3 + $0x16c] sm:$0xf]  ;;  %v4349_v48 = vld [vmem:[#allocation2 + $0x82] sm:$0xff]  ;;  %v8468_v16 = vor.u32 %v9414_v25, %v8467_v14 }
 0x348   : > { %4506 = vst [vmem:[#allocation3 + $0xf0] sm:$0xf] %v4474_v59  ;;  %v4445_v25 = vld [vmem:[#allocation2 + $0x98] sm:$0xff]  ;;  %v8433_v54 = vld [vmem:[#allocation3 + $0x14c] sm:$0xf0] }
 0x349   : > { %6406 = vmatmul.bf16.gmra.mxu3 %v8432_v37  ;;  %v3816_v24 = vadd.f32 %v10948_v22, %v3780_v11  ;;  %4320 = vst [vmem:[#allocation3 + $0x1c0] sm:$0xf] %v11038_v43  ;;  %v8461_v11 = vld [vmem:[#allocation3 + $0x18c] sm:$0xf0] }
 0x34a   : > { %6317 = vmatmul.bf16.gmra.mxu2 %v8428_v28  ;;  %v3696_v47 = vpop.f32.mrf.mxu0  ;;  %v3881_v3 = vld [vmem:[#allocation2 + $0xf8] sm:$0xff]  ;;  %4507 = vst [vmem:[#allocation3 + $0x114] sm:$0xf] %v4475_v13  ;;  %v8464_v26 = vor.u32 %v9409_v58, %v8461_v11 }
 0x34b   : > { %v4072_v60 = vld [vmem:[#allocation2 + $0xf2] sm:$0xff]  ;;  %v4073_v18 = vld [vmem:[#allocation2 + $0xfa] sm:$0xff]  ;;  %3848 = vst [vmem:[#allocation2 + $0x109] sm:$0xff] %v3816_v24  ;;  %v3697_v49 = vadd.f32 %v3696_v47, %v3608_v45  ;;  %v3913_v53 = vpack.c.bf16 %v3881_v3, %v3881_v3  ;;  %v4010_v17 = vpack.c.bf16 %v3816_v24, %v3816_v24  ;;  %v4380_v45 = vpack.c.bf16 %v4348_v46, %v4348_v46 }
 0x34c   : > { %v11029_v34 = vpop.f32.mrf.mxu3  ;;  %v4104_v55 = vpack.c.bf16 %v4072_v60, %v4072_v60  ;;  %v4105_v56 = vpack.c.bf16 %v4073_v18, %v4073_v18  ;;  %v11031_v63 = vpop.f32.mrf.mxu1  ;;  %v8639_v50 = vld [vmem:[#allocation3 + $0x2d0] sm:$0xf]  ;;  %v4257_v28 = vld [vmem:[#allocation2 + $0xb1] sm:$0xff]  ;;  %v4381_v47 = vpack.c.bf16 %v4349_v48, %v4349_v48  ;;  %4600 = vst [vmem:[#allocation3 + $0xac] sm:$0xf] %v10908_v62 }
 0x34d   : > { %v11036_v27 = vpop.f32.mrf.mxu2  ;;  %v3745_v40 = vmax.f32 %v3697_v49, 0.0  ;;  %3945 = vst [vmem:[#allocation3 + $0x2f4] sm:$0xf] %v3913_v53  ;;  %v11053_v24 = vpack.c.bf16 %v4257_v28, %v4257_v28  ;;  %v4444_v3 = vld [vmem:[#allocation2 + $0x90] sm:$0xff]  ;;  %v3613_v49 = vadd.f32 %v11015_v8, %v3524_v38 }
 0x34e   : > { %4136 = vst [vmem:[#allocation3 + $0x2d8] sm:$0xf] %v4104_v55  ;;  %v4476_v18 = vpack.c.bf16 %v4444_v3, %v4444_v3 }
 0x34f   : > { %v3781_v15 = vmul.f32 %v10939_v20, %v3745_v40  ;;  %4137 = vst [vmem:[#allocation3 + $0x2fc] sm:$0xf] %v4105_v56 }
 0x350   : > { %4042 = vst [vmem:[#allocation3 + $0x31c] sm:$0xf] %v4010_v17 }
 0x351   : > { %v3817_v39 = vadd.f32 %v10948_v22, %v3781_v15  ;;  %4231 = vst [vmem:[#allocation3 + $0x2b8] sm:$0xf] %v3913_v53  ;;  %v9541_v15 = vld [vmem:[#allocation9 + $0x108] sm:$0xff] }
 0x352   : > { %v3699_v5 = vpop.f32.mrf.mxu0  ;;  %v3882_v36 = vld [vmem:[#allocation2 + $0x108] sm:$0xff]  ;;  %4321 = vst [vmem:[#allocation3 + $0x1e4] sm:$0xf] %v11053_v24  ;;  %6562 = vmatpush.bf16.msrb.mxu1 %v9541_v15 }
 0x353   : > { %3849 = vst [vmem:[#allocation2 + $0x111] sm:$0xff] %v3817_v39  ;;  %v3700_v37 = vadd.f32 %v3699_v5, %v3611_v0  ;;  %v3914_v21 = vpack.c.bf16 %v3882_v36, %v3882_v36  ;;  %v4011_v33 = vpack.c.bf16 %v3817_v39, %v3817_v39  ;;  %v3527_v0 = vadd.f32 %v11036_v27, %v10691_v9  ;;  %v9401_v9 = vld [vmem:[#allocation3 + $0x12c] sm:$0xf] }
 0x354   : > { %v11045_v42 = vpop.f32.mrf.mxu3  ;;  %v11048_v52 = vpop.f32.mrf.mxu1  ;;  %v9458_v2 = vld [vmem:[#allocation3 + $0x2f0] sm:$0xf0]  ;;  %4412 = vst [vmem:[#allocation3 + $0x134] sm:$0xf] %v4380_v45  ;;  %v4477_v5 = vpack.c.bf16 %v4445_v25, %v4445_v25  ;;  %v8497_v45 = vld [vmem:[#allocation3 + $0x1d4] sm:$0xf0] }
 0x355   : > { %v11051_v4 = vpop.f32.mrf.mxu2  ;;  %v3746_v57 = vmax.f32 %v3700_v37, 0.0  ;;  %6490 = vmatmul.bf16.gmra.mxu0 %v8400_v23  ;;  %v8640_v59 = vor.u32 %v9458_v2, %v8639_v50  ;;  %3946 = vst [vmem:[#allocation3 + $0x318] sm:$0xf] %v3914_v21  ;;  %v3616_v36 = vadd.f32 %v11029_v34, %v3527_v0  ;;  %v8503_v37 = vld [vmem:[#allocation3 + $0x1b8] sm:$0xf]  ;;  %v8436_v50 = vor.u32 %v9401_v9, %v8433_v54 }
 0x356   : > { %4043 = vst [vmem:[#allocation3 + $0x340] sm:$0xf] %v4011_v33  ;;  %v9423_v23 = vld [vmem:[#allocation3 + $0x1d8] sm:$0xf0]  ;;  %v12106_v33 = vld [vmem:[#allocation52_spill] sm:$0xff] }
 0x357   : > { %v3782_v60 = vmul.f32 %v10939_v20, %v3746_v57  ;;  %6258 = vmatmul.bf16.gmra.mxu1 %v8640_v59  ;;  %4232 = vst [vmem:[#allocation3 + $0x2dc] sm:$0xf] %v3914_v21  ;;  %v3440_v48 = vadd.f32 %v12106_v33, %v10694_v10  ;;  %v9418_v34 = vld [vmem:[#allocation3 + $0x1b4] sm:$0xf]  ;;  %v4446_v0 = vld [vmem:[#allocation2 + $0xa8] sm:$0xff] }
 0x358   : > { %4413 = vst [vmem:[#allocation3 + $0x158] sm:$0xf] %v4381_v47  ;;  %v8504_v47 = vor.u32 %v9423_v23, %v8503_v37  ;;  %v8469_v25 = vld [vmem:[#allocation3 + $0x194] sm:$0xf0]  ;;  %v8539_v37 = vld [vmem:[#allocation3 + $0x200] sm:$0xf] }
 0x359   : > { %6411 = vmatmul.bf16.gmra.mxu3 %v8468_v16  ;;  %v11059_v53 = vadd.f32 %v10948_v22, %v3782_v60  ;;  %4508 = vst [vmem:[#allocation3 + $0x138] sm:$0xf] %v4476_v18  ;;  %v3529_v59 = vadd.f32 %v11051_v4, %v3440_v48  ;;  %v4350_v60 = vld [vmem:[#allocation2 + $0x92] sm:$0xff]  ;;  %v4630_v9 = vld [vmem:[#allocation2 + $0x4a] sm:$0xff] }
 0x35a   : > { %6322 = vmatmul.bf16.gmra.mxu2 %v8464_v26  ;;  %v3701_v56 = vpop.f32.mrf.mxu0  ;;  %v3883_v17 = vld [vmem:[#allocation2 + $0x110] sm:$0xff]  ;;  %4509 = vst [vmem:[#allocation3 + $0x15c] sm:$0xf] %v4477_v5  ;;  %v4351_v26 = vld [vmem:[#allocation2 + $0x9a] sm:$0xff]  ;;  %v4382_v18 = vpack.c.bf16 %v4350_v60, %v4350_v60  ;;  %v12109_v23 = vld [vmem:[#allocation55_spill] sm:$0xff] }
 0x35b   : > { %v4074_v29 = vld [vmem:[#allocation2 + $0x10a] sm:$0xff]  ;;  %v4075_v40 = vld [vmem:[#allocation2 + $0x112] sm:$0xff]  ;;  %3850 = vst [vmem:[#allocation2 + $0x121] sm:$0xff] %v11059_v53  ;;  %v3702_v19 = vadd.f32 %v3701_v56, %v3613_v49  ;;  %v3915_v30 = vpack.c.bf16 %v3883_v17, %v3883_v17  ;;  %v4383_v4 = vpack.c.bf16 %v4351_v26, %v4351_v26  ;;  %v3618_v49 = vadd.f32 %v11045_v42, %v3529_v59  ;;  %v4629_v5 = vld [vmem:[#allocation2 + $0x3a] sm:$0xff] }
 0x35c   : > { %v11061_v55 = vpop.f32.mrf.mxu3  ;;  %v4106_v32 = vpack.c.bf16 %v4074_v29, %v4074_v29  ;;  %v4107_v13 = vpack.c.bf16 %v4075_v40, %v4075_v40  ;;  %v11064_v8 = vpop.f32.mrf.mxu1  ;;  %v8675_v57 = vld [vmem:[#allocation3 + $0x318] sm:$0xf]  ;;  %4601 = vst [vmem:[#allocation3 + $0xd0] sm:$0xf] %v10922_v35  ;;  %v8500_v35 = vor.u32 %v9418_v34, %v8497_v45  ;;  %v9432_v48 = vld [vmem:[#allocation3 + $0x220] sm:$0xf0] }
 0x35d   : > { %v11068_v39 = vpop.f32.mrf.mxu2  ;;  %v3747_v14 = vmax.f32 %v3702_v19, 0.0  ;;  %3947 = vst [vmem:[#allocation3 + $0x33c] sm:$0xf] %v3915_v30  ;;  %v4258_v60 = vld [vmem:[#allocation2 + $0xc1] sm:$0xff] }
 0x35e   : > { %4138 = vst [vmem:[#allocation3 + $0x320] sm:$0xf] %v4106_v32 }
 0x35f   : > { %v3783_v61 = vmul.f32 %v10939_v20, %v3747_v14  ;;  %4139 = vst [vmem:[#allocation3 + $0x344] sm:$0xf] %v4107_v13  ;;  %v9410_v14 = vld [vmem:[#allocation3 + $0x174] sm:$0xf] }
 0x360   : > { %4233 = vst [vmem:[#allocation3 + $0x300] sm:$0xf] %v3915_v30 }
 0x361   : > { %v11073_v46 = vadd.f32 %v10948_v22, %v3783_v61  ;;  %4602 = vst [vmem:[#allocation3 + $0xf4] sm:$0xf] %v10942_v51  ;;  %v4478_v61 = vpack.c.bf16 %v4446_v0, %v4446_v0 }
 0x362   : > { %v3704_v58 = vpop.f32.mrf.mxu0  ;;  %v3884_v21 = vld [vmem:[#allocation2 + $0x120] sm:$0xff]  ;;  %4603 = vst [vmem:[#allocation3 + $0x118] sm:$0xf] %v10959_v31  ;;  %v12107_v31 = vld [vmem:[#allocation53_spill] sm:$0xff] }
 0x363   : > { %3851 = vst [vmem:[#allocation2 + $0x129] sm:$0xff] %v11073_v46  ;;  %v3705_v16 = vadd.f32 %v3704_v58, %v3616_v36  ;;  %v3916_v2 = vpack.c.bf16 %v3884_v21, %v3884_v21  ;;  %v3532_v42 = vadd.f32 %v11068_v39, %v12107_v31  ;;  %v12108_v58 = vld [vmem:[#allocation54_spill] sm:$0xff] }
 0x364   : > { %v11075_v27 = vpop.f32.mrf.mxu3  ;;  %v11081_v38 = vpop.f32.mrf.mxu1  ;;  %v9467_v11 = vld [vmem:[#allocation3 + $0x338] sm:$0xf0]  ;;  %4604 = vst [vmem:[#allocation3 + $0x13c] sm:$0xf] %v11008_v7  ;;  %v4628_v7 = vld [vmem:[#allocation2 + $0x32] sm:$0xff]  ;;  %v3445_v21 = vadd.f32 %v12109_v23, %v12108_v58  ;;  %v4012_v58 = vpack.c.bf16 %v11059_v53, %v11059_v53 }
 0x365   : > { %v11085_v28 = vpop.f32.mrf.mxu2  ;;  %v3748_v62 = vmax.f32 %v3705_v16, 0.0  ;;  %6495 = vmatmul.bf16.gmra.mxu0 %v8436_v50  ;;  %v8676_v10 = vor.u32 %v9467_v11, %v8675_v57  ;;  %3948 = vst [vmem:[#allocation3 + $0x360] sm:$0xf] %v3916_v2  ;;  %v4660_v54 = vpack.c.bf16 %v4628_v7, %v4628_v7  ;;  %v3621_v39 = vadd.f32 %v11061_v55, %v3532_v42 }
 0x366   : > { %4234 = vst [vmem:[#allocation3 + $0x324] sm:$0xf] %v3916_v2  ;;  %v8472_v55 = vor.u32 %v9410_v14, %v8469_v25  ;;  %v4661_v50 = vpack.c.bf16 %v4629_v5, %v4629_v5  ;;  %v4662_v11 = vpack.c.bf16 %v4630_v9, %v4630_v9  ;;  %v3534_v59 = vadd.f32 %v11085_v28, %v3445_v21  ;;  %v9540_v14 = vld [vmem:[#allocation9 + $0x100] sm:$0xff]  ;;  %v4448_v21 = vld [vmem:[#allocation2 + $0xc0] sm:$0xff] }
 0x367   : > { %v3784_v3 = vmul.f32 %v10939_v20, %v3748_v62  ;;  %6263 = vmatmul.bf16.gmra.mxu1 %v8676_v10  ;;  %4414 = vst [vmem:[#allocation3 + $0x17c] sm:$0xf] %v4382_v18  ;;  %v8540_v10 = vor.u32 %v9432_v48, %v8539_v37  ;;  %v4290_v18 = vpack.c.bf16 %v4258_v60, %v4258_v60  ;;  %v4259_v37 = vld [vmem:[#allocation2 + $0xc9] sm:$0xff] }
 0x368   : > { %4415 = vst [vmem:[#allocation3 + $0x1a0] sm:$0xf] %v4383_v4  ;;  %v4447_v4 = vld [vmem:[#allocation2 + $0xb0] sm:$0xff]  ;;  %6563 = vmatpush.bf16.msrb.mxu1 %v9540_v14  ;;  %v4291_v23 = vpack.c.bf16 %v4259_v37, %v4259_v37 }
 0x369   : > { %6416 = vmatmul.bf16.gmra.mxu3 %v8504_v47  ;;  %v11092_v56 = vadd.f32 %v10948_v22, %v3784_v3  ;;  %4605 = vst [vmem:[#allocation3 + $0x160] sm:$0xf] %v11023_v6  ;;  %v8533_v47 = vld [vmem:[#allocation3 + $0x21c] sm:$0xf0] }
 0x36a   : > { %6327 = vmatmul.bf16.gmra.mxu2 %v8500_v35  ;;  %v3706_v29 = vpop.f32.mrf.mxu0  ;;  %v3885_v40 = vld [vmem:[#allocation2 + $0x128] sm:$0xff]  ;;  %4606 = vst [vmem:[#allocation3 + $0x184] sm:$0xf] %v11038_v43  ;;  %v8505_v48 = vld [vmem:[#allocation3 + $0x1dc] sm:$0xf0] }
 0x36b   : > { %3852 = vst [vmem:[#allocation2 + $0x139] sm:$0xff] %v11092_v56  ;;  %v3707_v51 = vadd.f32 %v3706_v29, %v3618_v49  ;;  %v3917_v19 = vpack.c.bf16 %v3885_v40, %v3885_v40  ;;  %v9427_v35 = vld [vmem:[#allocation3 + $0x1fc] sm:$0xf]  ;;  %v4479_v29 = vpack.c.bf16 %v4447_v4, %v4447_v4  ;;  %v4353_v40 = vld [vmem:[#allocation2 + $0xb2] sm:$0xff] }
 0x36c   : > { %v11095_v17 = vpop.f32.mrf.mxu3  ;;  %v11098_v30 = vpop.f32.mrf.mxu1  ;;  %4607 = vst [vmem:[#allocation3 + $0x1a8] sm:$0xf] %v11053_v24  ;;  %v8711_v57 = vld [vmem:[#allocation3 + $0x360] sm:$0xf]  ;;  %v8536_v28 = vor.u32 %v9427_v35, %v8533_v47  ;;  %v4385_v25 = vpack.c.bf16 %v4353_v40, %v4353_v40 }
 0x36d   : > { %v11102_v15 = vpop.f32.mrf.mxu2  ;;  %v3749_v32 = vmax.f32 %v3707_v51, 0.0  ;;  %3949 = vst [vmem:[#allocation3 + $0x384] sm:$0xf] %v3917_v19  ;;  %v4352_v49 = vld [vmem:[#allocation2 + $0xaa] sm:$0xff] }
 0x36e   : > { %4235 = vst [vmem:[#allocation3 + $0x348] sm:$0xf] %v3917_v19  ;;  %v4384_v51 = vpack.c.bf16 %v4352_v49, %v4352_v49  ;;  %v3623_v19 = vadd.f32 %v11075_v27, %v3534_v59  ;;  %v12110_v27 = vld [vmem:[#allocation56_spill] sm:$0xff]  ;;  %v12112_v59 = vld [vmem:[#allocation58_spill] sm:$0xff] }
 0x36f   : > { %v3785_v13 = vmul.f32 %v10939_v20, %v3749_v32  ;;  %4510 = vst [vmem:[#allocation3 + $0x180] sm:$0xf] %v4478_v61  ;;  %v3537_v5 = vadd.f32 %v11102_v15, %v12110_v27  ;;  %v4354_v27 = vld [vmem:[#allocation2 + $0xc2] sm:$0xff] }
 0x370   : > { %4692 = vst [vmem:[#allocation3 + $0x20] sm:$0xf] %v4660_v54 }
 0x371   : > { %v11109_v36 = vadd.f32 %v10948_v22, %v3785_v13  ;;  %4693 = vst [vmem:[#allocation3 + $0x44] sm:$0xf] %v4661_v50  ;;  %v3626_v15 = vadd.f32 %v11095_v17, %v3537_v5 }
 0x372   : > { %v3709_v33 = vpop.f32.mrf.mxu0  ;;  %v3886_v16 = vld [vmem:[#allocation2 + $0x138] sm:$0xff]  ;;  %4694 = vst [vmem:[#allocation3 + $0x68] sm:$0xf] %v4662_v11 }
 0x373   : > { %3853 = vst [vmem:[#allocation2 + $0x141] sm:$0xff] %v11109_v36  ;;  %v3710_v43 = vadd.f32 %v3709_v33, %v3621_v39  ;;  %v3918_v34 = vpack.c.bf16 %v3886_v16, %v3886_v16  ;;  %v9419_v33 = vld [vmem:[#allocation3 + $0x1bc] sm:$0xf]  ;;  %v4480_v16 = vpack.c.bf16 %v4448_v21, %v4448_v21  ;;  %v12111_v11 = vld [vmem:[#allocation57_spill] sm:$0xff]  ;;  %v4386_v21 = vpack.c.bf16 %v4354_v27, %v4354_v27 }
 0x374   : > { %v11114_v6 = vpop.f32.mrf.mxu3  ;;  %v11117_v2 = vpop.f32.mrf.mxu1  ;;  %v9476_v24 = vld [vmem:[#allocation3 + $0x380] sm:$0xf0]  ;;  %4322 = vst [vmem:[#allocation3 + $0x208] sm:$0xf] %v4290_v18 }
 0x375   : > { %v11120_v62 = vpop.f32.mrf.mxu2  ;;  %v3750_v45 = vmax.f32 %v3710_v43, 0.0  ;;  %6500 = vmatmul.bf16.gmra.mxu0 %v8472_v55  ;;  %v8712_v3 = vor.u32 %v9476_v24, %v8711_v57  ;;  %3950 = vst [vmem:[#allocation3 + $0x3a8] sm:$0xf] %v3918_v34  ;;  %v8575_v55 = vld [vmem:[#allocation3 + $0x248] sm:$0xf] }
 0x376   : > { %4236 = vst [vmem:[#allocation3 + $0x36c] sm:$0xf] %v3918_v34  ;;  %v4631_v34 = vld [vmem:[#allocation2 + $0x52] sm:$0xff]  ;;  %v9441_v24 = vld [vmem:[#allocation3 + $0x268] sm:$0xf0] }
 0x377   : > { %v3786_v26 = vmul.f32 %v10939_v20, %v3750_v45  ;;  %6268 = vmatmul.bf16.gmra.mxu1 %v8712_v3  ;;  %4511 = vst [vmem:[#allocation3 + $0x1a4] sm:$0xf] %v4479_v29  ;;  %v3450_v45 = vadd.f32 %v12112_v59, %v12111_v11  ;;  %v4663_v35 = vpack.c.bf16 %v4631_v34, %v4631_v34  ;;  %v8541_v11 = vld [vmem:[#allocation3 + $0x224] sm:$0xf0] }
 0x378   : > { %4416 = vst [vmem:[#allocation3 + $0x1c4] sm:$0xf] %v4384_v51  ;;  %v8576_v29 = vor.u32 %v9441_v24, %v8575_v55  ;;  %v4260_v51 = vld [vmem:[#allocation2 + $0xd9] sm:$0xff]  ;;  %v4077_v24 = vld [vmem:[#allocation2 + $0x12a] sm:$0xff] }
 0x379   : > { %6421 = vmatmul.bf16.gmra.mxu3 %v8540_v10  ;;  %v11125_v31 = vadd.f32 %v10948_v22, %v3786_v26  ;;  %4417 = vst [vmem:[#allocation3 + $0x1e8] sm:$0xf] %v4385_v25  ;;  %v8508_v10 = vor.u32 %v9419_v33, %v8505_v48  ;;  %v12113_v48 = vld [vmem:[#allocation59_spill] sm:$0xff] }
 0x37a   : > { %6332 = vmatmul.bf16.gmra.mxu2 %v8536_v28  ;;  %v3711_v32 = vpop.f32.mrf.mxu0  ;;  %v3887_v7 = vld [vmem:[#allocation2 + $0x140] sm:$0xff]  ;;  %4608 = vst [vmem:[#allocation3 + $0x1cc] sm:$0xf] %v4290_v18  ;;  %v3539_v18 = vadd.f32 %v11120_v62, %v3450_v45  ;;  %v8569_v28 = vld [vmem:[#allocation3 + $0x264] sm:$0xf0]  ;;  %v4449_v62 = vld [vmem:[#allocation2 + $0xc8] sm:$0xff]  ;;  %v4109_v45 = vpack.c.bf16 %v4077_v24, %v4077_v24 }
 0x37b   : > { %3854 = vst [vmem:[#allocation2 + $0x151] sm:$0xff] %v11125_v31  ;;  %v3712_v13 = vadd.f32 %v3711_v32, %v3623_v19  ;;  %v3919_v0 = vpack.c.bf16 %v3887_v7, %v3887_v7  ;;  %v9436_v32 = vld [vmem:[#allocation3 + $0x244] sm:$0xf]  ;;  %v4013_v7 = vpack.c.bf16 %v11073_v46, %v11073_v46  ;;  %v4481_v25 = vpack.c.bf16 %v4449_v62, %v4449_v62  ;;  %v4355_v46 = vld [vmem:[#allocation2 + $0xca] sm:$0xff] }
 0x37c   : > { %v11127_v42 = vpop.f32.mrf.mxu3  ;;  %v11130_v61 = vpop.f32.mrf.mxu1  ;;  %4044 = vst [vmem:[#allocation3 + $0x364] sm:$0xf] %v4012_v58  ;;  %v8747_v60 = vld [vmem:[#allocation3 + $0x3a8] sm:$0xf]  ;;  %v8572_v14 = vor.u32 %v9436_v32, %v8569_v28  ;;  %v8611_v28 = vld [vmem:[#allocation3 + $0x290] sm:$0xf] }
 0x37d   : > { %v11134_v54 = vpop.f32.mrf.mxu2  ;;  %v3751_v39 = vmax.f32 %v3712_v13, 0.0  ;;  %3951 = vst [vmem:[#allocation3 + $0x3cc] sm:$0xf] %v3919_v0  ;;  %v11156_v13 = vpack.c.bf16 %v4260_v51, %v4260_v51  ;;  %v9450_v32 = vld [vmem:[#allocation3 + $0x2b0] sm:$0xf0] }
 0x37e   : > { %4237 = vst [vmem:[#allocation3 + $0x390] sm:$0xf] %v3919_v0  ;;  %v11161_v0 = vld [vmem:[%s11992_s5] ss:$0 sm:$0xff] }
 0x37f   : > { %v3787_v9 = vmul.f32 %v10939_v20, %v3751_v39  ;;  %4323 = vst [vmem:[#allocation3 + $0x22c] sm:$0xf] %v4291_v23  ;;  %v6210_v33 = vadd.f32 %v11161_v0, %v10985_v12  ;;  %v6212_v27 = vadd.f32 %v11161_v0, %v11001_v44  ;;  %v9445_v44 = vld [vmem:[#allocation3 + $0x28c] sm:$0xf] }
 0x380   : > { %4512 = vst [vmem:[#allocation3 + $0x1c8] sm:$0xf] %v4480_v16  ;;  %v3542_v16 = vadd.f32 %v11134_v54, %v12113_v48  ;;  %v9428_v54 = vld [vmem:[#allocation3 + $0x204] sm:$0xf] }
 0x381   : > { %v11141_v43 = vadd.f32 %v10948_v22, %v3787_v9  ;;  %4609 = vst [vmem:[#allocation3 + $0x1f0] sm:$0xf] %v4291_v23  ;;  %v8544_v62 = vor.u32 %v9428_v54, %v8541_v11 }
 0x382   : > { %v3714_v57 = vpop.f32.mrf.mxu0  ;;  %v3888_v53 = vld [vmem:[#allocation2 + $0x150] sm:$0xff]  ;;  %4695 = vst [vmem:[#allocation3 + $0x8c] sm:$0xf] %v4663_v35  ;;  %v3631_v35 = vadd.f32 %v11127_v42, %v3542_v16  ;;  %v4015_v16 = vpack.c.bf16 %v11109_v36, %v11109_v36 }
 0x383   : > { %3855 = vst [vmem:[#allocation2 + $0x159] sm:$0xff] %v11141_v43  ;;  %v3715_v47 = vadd.f32 %v3714_v57, %v3626_v15  ;;  %v3920_v17 = vpack.c.bf16 %v3888_v53, %v3888_v53  ;;  %v4076_v57 = vld [vmem:[#allocation2 + $0x122] sm:$0xff]  ;;  %v11178_v53 = vld [vmem:[%s11989_s2] ss:$0 sm:$0xff] }
 0x384   : > { %v11143_v50 = vpop.f32.mrf.mxu3  ;;  %v11148_v3 = vpop.f32.mrf.mxu1  ;;  %v9485_v26 = vld [vmem:[#allocation3 + $0x3c8] sm:$0xf0]  ;;  %4045 = vst [vmem:[#allocation3 + $0x388] sm:$0xf] %v4013_v7  ;;  %v4108_v59 = vpack.c.bf16 %v4076_v57, %v4076_v57 }
 0x385   : > { %v11151_v4 = vpop.f32.mrf.mxu2  ;;  %v3752_v49 = vmax.f32 %v3715_v47, 0.0  ;;  %6505 = vmatmul.bf16.gmra.mxu0 %v8508_v10  ;;  %v8748_v40 = vor.u32 %v9485_v26, %v8747_v60  ;;  %3952 = vst [vmem:[#allocation3 + $0x3f0] sm:$0xf] %v3920_v17  ;;  %v9555_v10 = vld [vmem:[#allocation9 + $0x178] sm:$0xff]  ;;  %v4014_v60 = vpack.c.bf16 %v11092_v56, %v11092_v56 }
 0x386   : > { %4238 = vst [vmem:[#allocation3 + $0x3b4] sm:$0xf] %v3920_v17  ;;  %v9563_v17 = vld [vmem:[#allocation9 + $0x1b8] sm:$0xff]  ;;  %6645 = vmatpush.bf16.msra.mxu2 %v9555_v10 }
 0x387   : > { %v3788_v19 = vmul.f32 %v10939_v20, %v3752_v49  ;;  %6273 = vmatmul.bf16.gmra.mxu1 %v8748_v40  ;;  %v3628_v20 = vadd.f32 %v11114_v6, %v3539_v18  ;;  %4324 = vst [vmem:[#allocation3 + $0x250] sm:$0xf] %v11156_v13  ;;  %v4261_v26 = vld [vmem:[#allocation2 + $0xe1] sm:$0xff]  ;;  %v11189_v18 = vld [vmem:[%s11990_s3] ss:$0 sm:$0xff]  ;;  %v12114_v40 = vld [vmem:[#allocation60_spill] sm:$0xff]  ;;  %6734 = vmatpush.bf16.msra.mxu3 %v9563_v17 }
 0x388   : > { %4513 = vst [vmem:[#allocation3 + $0x1ec] sm:$0xf] %v4481_v25  ;;  %v3455_v51 = vadd.f32 %v10972_v41, %v12114_v40  ;;  %v11197_v25 = vpack.c.bf16 %v4261_v26, %v4261_v26  ;;  %v9571_v10 = vld [vmem:[#allocation9 + $0x1f8] sm:$0xff] }
 0x389   : > { %6426 = vmatmul.bf16.gmra.mxu3 %v8576_v29  ;;  %v11165_v5 = vadd.f32 %v10948_v22, %v3788_v19  ;;  %v4387_v22 = vpack.c.bf16 %v4355_v46, %v4355_v46  ;;  %4418 = vst [vmem:[#allocation3 + $0x20c] sm:$0xf] %v4386_v21  ;;  %v4450_v29 = vld [vmem:[#allocation2 + $0xd8] sm:$0xff]  ;;  %v8612_v21 = vor.u32 %v9450_v32, %v8611_v28  ;;  %v9579_v17 = vld [vmem:[#allocation9 + $0x238] sm:$0xff] }
 0x38a   : > { %6337 = vmatmul.bf16.gmra.mxu2 %v8572_v14  ;;  %v3716_v37 = vpop.f32.mrf.mxu0  ;;  %v3889_v9 = vld [vmem:[#allocation2 + $0x158] sm:$0xff]  ;;  %4140 = vst [vmem:[#allocation3 + $0x368] sm:$0xf] %v4108_v59  ;;  %v4357_v59 = vld [vmem:[#allocation2 + $0xe2] sm:$0xff]  ;;  %v6215_v28 = vadd.f32 %v11161_v0, %v11018_v1  ;;  %6823 = vmatpush.bf16.msra.mxu0 %v9571_v10  ;;  %v4452_v1 = vld [vmem:[#allocation2 + $0xf0] sm:$0xff] }
 0x38b   : > { %3856 = vst [vmem:[#allocation2 + $0x169] sm:$0xff] %v11165_v5  ;;  %v3717_v58 = vadd.f32 %v3716_v37, %v3628_v20  ;;  %v3921_v23 = vpack.c.bf16 %v3889_v9, %v3889_v9  ;;  %v3544_v37 = vadd.f32 %v11151_v4, %v3455_v51  ;;  %v4451_v4 = vld [vmem:[#allocation2 + $0xe0] sm:$0xff]  ;;  %6912 = vmatpush.bf16.msra.mxu1 %v9579_v17 }
 0x38c   : > { %v6387_v39 = vpop.f32.mrf.mxu3  ;;  %v11171_v6 = vpop.f32.mrf.mxu1  ;;  %4419 = vst [vmem:[#allocation3 + $0x230] sm:$0xf] %v4387_v22  ;;  %v8783_v41 = vld [vmem:[#allocation3 + $0x3f0] sm:$0xf]  ;;  %v4483_v57 = vpack.c.bf16 %v4451_v4, %v4451_v4 }
 0x38d   : > { %v6298_v15 = vpop.f32.mrf.mxu2  ;;  %v3753_v55 = vmax.f32 %v3717_v58, 0.0  ;;  %3953 = vst [vmem:[#allocation3 + $0x414] sm:$0xf] %v3921_v23  ;;  %v4359_v10 = vld [vmem:[#allocation2 + $0xfa] sm:$0xff] }
 0x38e   : > { %v6299_v34 = vadd.f32 %v6298_v15, %v6210_v33  ;;  %4239 = vst [vmem:[#allocation3 + $0x3d8] sm:$0xf] %v3921_v23  ;;  %v8605_v23 = vld [vmem:[#allocation3 + $0x2ac] sm:$0xf0] }
 0x38f   : > { %v3789_v12 = vmul.f32 %v11178_v53, %v3753_v55  ;;  %4141 = vst [vmem:[#allocation3 + $0x38c] sm:$0xf] %v4109_v45  ;;  %v4356_v15 = vld [vmem:[#allocation2 + $0xda] sm:$0xff] }
 0x390   : > { %v11181_v47 = vadd.f32 %v6387_v39, %v6299_v34  ;;  %4046 = vst [vmem:[#allocation3 + $0x3ac] sm:$0xf] %v4014_v60  ;;  %v4482_v39 = vpack.c.bf16 %v4450_v29, %v4450_v29  ;;  %v8608_v34 = vor.u32 %v9445_v44, %v8605_v23  ;;  %v11210_v24 = vpack.c.bf16 %v4356_v15, %v4356_v15  ;;  %v9459_v23 = vld [vmem:[#allocation3 + $0x2f8] sm:$0xf0] }
 0x391   : > { %v11192_v49 = vadd.f32 %v11189_v18, %v3789_v12  ;;  %4325 = vst [vmem:[#allocation3 + $0x274] sm:$0xf] %v11197_v25  ;;  %v3633_v12 = vadd.f32 %v11143_v50, %v3544_v37 }
 0x392   : > { %v3719_v56 = vpop.f32.mrf.mxu0  ;;  %v3890_v7 = vld [vmem:[#allocation2 + $0x168] sm:$0xff]  ;;  %4514 = vst [vmem:[#allocation3 + $0x210] sm:$0xf] %v4482_v39  ;;  %v9437_v39 = vld [vmem:[#allocation3 + $0x24c] sm:$0xf] }
 0x393   : > { %3857 = vst [vmem:[#allocation2 + $0x171] sm:$0xff] %v11192_v49  ;;  %v3720_v42 = vadd.f32 %v3719_v56, %v3631_v35  ;;  %v3922_v14 = vpack.c.bf16 %v3890_v7, %v3890_v7  ;;  %v11214_v35 = vpack.c.bf16 %v4357_v59, %v4357_v59  ;;  %v4079_v56 = vld [vmem:[#allocation2 + $0x142] sm:$0xff]  ;;  %v4358_v59 = vld [vmem:[#allocation2 + $0xf2] sm:$0xff] }
 0x394   : > { %v6389_v19 = vpop.f32.mrf.mxu3  ;;  %v11201_v20 = vpop.f32.mrf.mxu1  ;;  %v9494_v46 = vld [vmem:[#allocation3 + $0x410] sm:$0xf0]  ;;  %4047 = vst [vmem:[#allocation3 + $0x3d0] sm:$0xf] %v4015_v16  ;;  %v11241_v17 = vpack.c.bf16 %v4358_v59, %v4358_v59  ;;  %v4019_v59 = vpack.c.bf16 %v11192_v49, %v11192_v49 }
 0x395   : > { %v6300_v9 = vpop.f32.mrf.mxu2  ;;  %v3754_v58 = vmax.f32 %v3720_v42, 0.0  ;;  %6510 = vmatmul.bf16.gmra.mxu0 %v8544_v62  ;;  %v8784_v33 = vor.u32 %v9494_v46, %v8783_v41  ;;  %3954 = vst [vmem:[#allocation3 + $0x438] sm:$0xf] %v3922_v14  ;;  %v4111_v42 = vpack.c.bf16 %v4079_v56, %v4079_v56  ;;  %v4262_v62 = vld [vmem:[#allocation2 + $0xf1] sm:$0xff]  ;;  %v4016_v41 = vpack.c.bf16 %v11125_v31, %v11125_v31  ;;  %v9570_v49 = vld [vmem:[#allocation9 + $0x1f0] sm:$0xff] }
 0x396   : > { %v6301_v22 = vadd.f32 %v6300_v9, %v6212_v27  ;;  %4240 = vst [vmem:[#allocation3 + $0x3fc] sm:$0xf] %v3922_v14  ;;  %v8577_v27 = vld [vmem:[#allocation3 + $0x26c] sm:$0xf0]  ;;  %v4294_v37 = vpack.c.bf16 %v4262_v62, %v4262_v62  ;;  %v6217_v31 = vadd.f32 %v11161_v0, %v11031_v63  ;;  %6824 = vmatpush.bf16.msra.mxu0 %v9570_v49  ;;  %v4267_v49 = vld [vmem:[#allocation2 + $0x129] sm:$0xff] }
 0x397   : > { %v3790_v48 = vmul.f32 %v11178_v53, %v3754_v58  ;;  %6278 = vmatmul.bf16.gmra.mxu1 %v8784_v33  ;;  %4515 = vst [vmem:[#allocation3 + $0x234] sm:$0xf] %v4483_v57  ;;  %v8647_v58 = vld [vmem:[#allocation3 + $0x2d8] sm:$0xf]  ;;  %v9454_v57 = vld [vmem:[#allocation3 + $0x2d4] sm:$0xf] }
 0x398   : > { %v11208_v55 = vadd.f32 %v6389_v19, %v6301_v22  ;;  %4420 = vst [vmem:[#allocation3 + $0x254] sm:$0xf] %v11210_v24  ;;  %v4078_v19 = vld [vmem:[#allocation2 + $0x13a] sm:$0xff]  ;;  %v8641_v22 = vld [vmem:[#allocation3 + $0x2f4] sm:$0xf0]  ;;  %v8648_v4 = vor.u32 %v9459_v23, %v8647_v58 }
 0x399   : > { %6431 = vmatmul.bf16.gmra.mxu3 %v8612_v21  ;;  %v3826_v11 = vadd.f32 %v11189_v18, %v3790_v48  ;;  %v4110_v7 = vpack.c.bf16 %v4078_v19, %v4078_v19  ;;  %4421 = vst [vmem:[#allocation3 + $0x278] sm:$0xf] %v11214_v35  ;;  %v4484_v21 = vpack.c.bf16 %v4452_v1, %v4452_v1  ;;  %v4263_v63 = vld [vmem:[#allocation2 + $0xf9] sm:$0xff]  ;;  %v9446_v58 = vld [vmem:[#allocation3 + $0x294] sm:$0xf] }
 0x39a   : > { %6342 = vmatmul.bf16.gmra.mxu2 %v8608_v34  ;;  %v3721_v36 = vpop.f32.mrf.mxu0  ;;  %v3891_v54 = vld [vmem:[#allocation2 + $0x170] sm:$0xff]  ;;  %4610 = vst [vmem:[#allocation3 + $0x214] sm:$0xf] %v11156_v13  ;;  %v8580_v48 = vor.u32 %v9437_v39, %v8577_v27  ;;  %v4018_v1 = vpack.c.bf16 %v11165_v5, %v11165_v5  ;;  %v9562_v39 = vld [vmem:[#allocation9 + $0x1b0] sm:$0xff] }
 0x39b   : > { %3858 = vst [vmem:[#allocation2 + $0x181] sm:$0xff] %v3826_v11  ;;  %v3722_v60 = vadd.f32 %v3721_v36, %v3633_v12  ;;  %v3923_v26 = vpack.c.bf16 %v3891_v54, %v3891_v54  ;;  %v4017_v12 = vpack.c.bf16 %v11141_v43, %v11141_v43  ;;  %v4453_v11 = vld [vmem:[#allocation2 + $0xf8] sm:$0xff]  ;;  %v4295_v36 = vpack.c.bf16 %v4263_v63, %v4263_v63  ;;  %v4264_v27 = vld [vmem:[#allocation2 + $0x109] sm:$0xff]  ;;  %v9370_v23 = vld [vmem:[#allocation3 + $0x30] sm:$0xf0] }
 0x39c   : > { %v6392_v45 = vpop.f32.mrf.mxu3  ;;  %v11218_v50 = vpop.f32.mrf.mxu1  ;;  %4142 = vst [vmem:[#allocation3 + $0x3b0] sm:$0xf] %v4110_v7  ;;  %v4485_v54 = vpack.c.bf16 %v4453_v11, %v4453_v11  ;;  %v4081_v7 = vld [vmem:[#allocation2 + $0x15a] sm:$0xff]  ;;  %6735 = vmatpush.bf16.msra.mxu3 %v9562_v39  ;;  %v9463_v11 = vld [vmem:[#allocation3 + $0x31c] sm:$0xf] }
 0x39d   : > { %v6303_v29 = vpop.f32.mrf.mxu2  ;;  %v3755_v40 = vmax.f32 %v3722_v60, 0.0  ;;  %3955 = vst [vmem:[#allocation3 + $0x45c] sm:$0xf] %v3923_v26  ;;  %v11243_v60 = vpack.c.bf16 %v4359_v10, %v4359_v10 }
 0x39e   : > { %v6304_v51 = vadd.f32 %v6303_v29, %v6215_v28  ;;  %4241 = vst [vmem:[#allocation3 + $0x420] sm:$0xf] %v3923_v26  ;;  %v4632_v26 = vld [vmem:[#allocation2 + $0x62] sm:$0xff] }
 0x39f   : > { %v3791_v32 = vmul.f32 %v11178_v53, %v3755_v40  ;;  %4143 = vst [vmem:[#allocation3 + $0x3d4] sm:$0xf] %v4111_v42  ;;  %v8613_v42 = vld [vmem:[#allocation3 + $0x2b4] sm:$0xf0] }
 0x3a0   : > { %v11223_v14 = vadd.f32 %v6392_v45, %v6304_v51  ;;  %4048 = vst [vmem:[#allocation3 + $0x3f4] sm:$0xf] %v4016_v41  ;;  %v4664_v51 = vpack.c.bf16 %v4632_v26, %v4632_v26 }
 0x3a1   : > { %v3827_v46 = vadd.f32 %v11189_v18, %v3791_v32  ;;  %v8819_v18 = vld [vmem:[#allocation3 + $0x438] sm:$0xf]  ;;  %4326 = vst [vmem:[#allocation3 + $0x298] sm:$0xf] %v4294_v37  ;;  %v4080_v32 = vld [vmem:[#allocation2 + $0x152] sm:$0xff] }
 0x3a2   : > { %v6476_v9 = vpop.f32.mrf.mxu0  ;;  %4516 = vst [vmem:[#allocation3 + $0x258] sm:$0xf] %v4484_v21  ;;  %v4112_v62 = vpack.c.bf16 %v4080_v32, %v4080_v32 }
 0x3a3   : > { %3859 = vst [vmem:[#allocation2 + $0x189] sm:$0xff] %v3827_v46  ;;  %v11230_v33 = vadd.f32 %v6476_v9, %v11181_v47  ;;  %v8644_v47 = vor.u32 %v9454_v57, %v8641_v22  ;;  %v9554_v46 = vld [vmem:[#allocation9 + $0x170] sm:$0xff]  ;;  %v4633_v9 = vld [vmem:[#allocation2 + $0x6a] sm:$0xff] }
 0x3a4   : > { %v6394_v53 = vpop.f32.mrf.mxu3  ;;  %v11234_v13 = vpop.f32.mrf.mxu1  ;;  %v9503_v44 = vld [vmem:[#allocation3 + $0x458] sm:$0xf0]  ;;  %4611 = vst [vmem:[#allocation3 + $0x238] sm:$0xf] %v11197_v25  ;;  %v6220_v25 = vadd.f32 %v11161_v0, %v11048_v52  ;;  %6646 = vmatpush.bf16.msra.mxu2 %v9554_v46 }
 0x3a5   : > { %v6305_v16 = vpop.f32.mrf.mxu2  ;;  %6515 = vmatmul.bf16.gmra.mxu0 %v8580_v48  ;;  %v8820_v15 = vor.u32 %v9503_v44, %v8819_v18  ;;  %4049 = vst [vmem:[#allocation3 + $0x418] sm:$0xf] %v4017_v12  ;;  %v4454_v52 = vld [vmem:[#allocation2 + $0x108] sm:$0xff]  ;;  %v8683_v48 = vld [vmem:[#allocation3 + $0x320] sm:$0xf]  ;;  %v8616_v18 = vor.u32 %v9446_v58, %v8613_v42  ;;  %v4665_v44 = vpack.c.bf16 %v4633_v9, %v4633_v9  ;;  %v9578_v42 = vld [vmem:[#allocation9 + $0x230] sm:$0xff] }
 0x3a6   : > { %v6306_v34 = vadd.f32 %v6305_v16, %v6217_v31  ;;  %4327 = vst [vmem:[#allocation3 + $0x2bc] sm:$0xf] %v4295_v36  ;;  %v9468_v31 = vld [vmem:[#allocation3 + $0x340] sm:$0xf0]  ;;  %v6222_v16 = vadd.f32 %v11161_v0, %v11064_v8  ;;  %6913 = vmatpush.bf16.msra.mxu1 %v9578_v42  ;;  %v4457_v42 = vld [vmem:[#allocation2 + $0x128] sm:$0xff] }
 0x3a7   : > { %6283 = vmatmul.bf16.gmra.mxu1 %v8820_v15  ;;  %4517 = vst [vmem:[#allocation3 + $0x27c] sm:$0xf] %v4485_v54  ;;  %v8677_v15 = vld [vmem:[#allocation3 + $0x33c] sm:$0xf0] }
 0x3a8   : > { %v11239_v45 = vadd.f32 %v6394_v53, %v6306_v34  ;;  %4422 = vst [vmem:[#allocation3 + $0x29c] sm:$0xf] %v11241_v17  ;;  %v4296_v53 = vpack.c.bf16 %v4264_v27, %v4264_v27  ;;  %v8295_v34 = vld [vmem:[#allocation3 + $0x10] sm:$0xf]  ;;  %v4265_v8 = vld [vmem:[#allocation2 + $0x111] sm:$0xff] }
 0x3a9   : > { %6436 = vmatmul.bf16.gmra.mxu3 %v8648_v4  ;;  %4423 = vst [vmem:[#allocation3 + $0x2c0] sm:$0xf] %v11243_v60  ;;  %v8296_v12 = vor.u32 %v9370_v23, %v8295_v34  ;;  %v4360_v54 = vld [vmem:[#allocation2 + $0x10a] sm:$0xff]  ;;  %v4297_v26 = vpack.c.bf16 %v4265_v8, %v4265_v8  ;;  %v4083_v9 = vld [vmem:[#allocation2 + $0x172] sm:$0xff]  ;;  %v4266_v23 = vld [vmem:[#allocation2 + $0x121] sm:$0xff]  ;;  %v6227_v8 = vadd.f32 %v11161_v0, %v11098_v30 }
 0x3aa   : > { %6347 = vmatmul.bf16.gmra.mxu2 %v8644_v47  ;;  %v6478_v29 = vpop.f32.mrf.mxu0  ;;  %4612 = vst [vmem:[#allocation3 + $0x25c] sm:$0xf] %v4294_v37  ;;  %v4486_v37 = vpack.c.bf16 %v4454_v52, %v4454_v52  ;;  %v8684_v47 = vor.u32 %v9468_v31, %v8683_v48  ;;  %v4115_v58 = vpack.c.bf16 %v4083_v9, %v4083_v9  ;;  %v4362_v30 = vld [vmem:[#allocation2 + $0x122] sm:$0xff] }
 0x3ab   : > { %v11246_v43 = vadd.f32 %v6478_v29, %v11208_v55  ;;  %v4113_v55 = vpack.c.bf16 %v4081_v7, %v4081_v7  ;;  %4613 = vst [vmem:[#allocation3 + $0x280] sm:$0xf] %v4295_v36  ;;  %v4455_v36 = vld [vmem:[#allocation2 + $0x110] sm:$0xff]  ;;  %v4298_v48 = vpack.c.bf16 %v4266_v23, %v4266_v23 }
 0x3ac   : > { %v6397_v28 = vpop.f32.mrf.mxu3  ;;  %v11250_v40 = vpop.f32.mrf.mxu1  ;;  %4696 = vst [vmem:[#allocation3 + $0xb0] sm:$0xf] %v4664_v51  ;;  %v4361_v29 = vld [vmem:[#allocation2 + $0x112] sm:$0xff]  ;;  %v4634_v51 = vld [vmem:[#allocation2 + $0x7a] sm:$0xff] }
 0x3ad   : > { %v6308_v19 = vpop.f32.mrf.mxu2  ;;  %4144 = vst [vmem:[#allocation3 + $0x3f8] sm:$0xf] %v4112_v62 }
 0x3ae   : > { %v6309_v56 = vadd.f32 %v6308_v19, %v6220_v25  ;;  %4145 = vst [vmem:[#allocation3 + $0x41c] sm:$0xf] %v4113_v55  ;;  %v11269_v25 = vpack.c.bf16 %v4360_v54, %v4360_v54  ;;  %v11271_v19 = vpack.c.bf16 %v4361_v29, %v4361_v29  ;;  %v4666_v55 = vpack.c.bf16 %v4634_v51, %v4634_v51  ;;  %v8713_v54 = vld [vmem:[#allocation3 + $0x384] sm:$0xf0] }
 0x3af   : > { %4050 = vst [vmem:[#allocation3 + $0x43c] sm:$0xf] %v4018_v1  ;;  %v6225_v1 = vadd.f32 %v11161_v0, %v11081_v38  ;;  %v4636_v38 = vld [vmem:[#allocation2 + $0x92] sm:$0xff] }
 0x3b0   : > { %v11256_v41 = vadd.f32 %v6397_v28, %v6309_v56  ;;  %4328 = vst [vmem:[#allocation3 + $0x2e0] sm:$0xf] %v4296_v53  ;;  %v4487_v28 = vpack.c.bf16 %v4455_v36, %v4455_v36  ;;  %v4635_v56 = vld [vmem:[#allocation2 + $0x82] sm:$0xff] }
 0x3b1   : > { %4518 = vst [vmem:[#allocation3 + $0x2a0] sm:$0xf] %v4486_v37  ;;  %v4667_v52 = vpack.c.bf16 %v4635_v56, %v4635_v56  ;;  %v4456_v37 = vld [vmem:[#allocation2 + $0x120] sm:$0xff] }
 0x3b2   : > { %v6481_v22 = vpop.f32.mrf.mxu0  ;;  %4614 = vst [vmem:[#allocation3 + $0x2a4] sm:$0xf] %v4296_v53  ;;  %v4082_v53 = vld [vmem:[#allocation2 + $0x16a] sm:$0xff]  ;;  %v4488_v31 = vpack.c.bf16 %v4456_v37, %v4456_v37 }
 0x3b3   : > { %v11259_v5 = vadd.f32 %v6481_v22, %v11223_v14  ;;  %v8680_v14 = vor.u32 %v9463_v11, %v8677_v15  ;;  %4697 = vst [vmem:[#allocation3 + $0xd4] sm:$0xf] %v4665_v44  ;;  %v8649_v22 = vld [vmem:[#allocation3 + $0x2fc] sm:$0xf0]  ;;  %v9455_v44 = vld [vmem:[#allocation3 + $0x2dc] sm:$0xf] }
 0x3b4   : > { %v6399_v21 = vpop.f32.mrf.mxu3  ;;  %v11263_v4 = vpop.f32.mrf.mxu1  ;;  %4051 = vst [vmem:[#allocation3 + $0x460] sm:$0xf] %v4019_v59  ;;  %v8652_v11 = vor.u32 %v9455_v44, %v8649_v22  ;;  %v4458_v44 = vld [vmem:[#allocation2 + $0x138] sm:$0xff] }
 0x3b5   : > { %v6310_v57 = vpop.f32.mrf.mxu2  ;;  %6520 = vmatmul.bf16.gmra.mxu0 %v8616_v18  ;;  %4329 = vst [vmem:[#allocation3 + $0x304] sm:$0xf] %v4297_v26  ;;  %v4637_v18 = vld [vmem:[#allocation2 + $0x9a] sm:$0xff] }
 0x3b6   : > { %v6311_v63 = vadd.f32 %v6310_v57, %v6222_v16  ;;  %4519 = vst [vmem:[#allocation3 + $0x2c4] sm:$0xf] %v4487_v28  ;;  %v9379_v16 = vld [vmem:[#allocation3 + $0x78] sm:$0xf0]  ;;  %v8719_v57 = vld [vmem:[#allocation3 + $0x368] sm:$0xf]  ;;  %v4669_v59 = vpack.c.bf16 %v4637_v18, %v4637_v18 }
 0x3b7   : > { %6564 = vmatmul.bf16.vlgmr.msrb.gmra.mxu1 %v8296_v12  ;;  %4424 = vst [vmem:[#allocation3 + $0x2e4] sm:$0xf] %v11269_v25  ;;  %v4668_v12 = vpack.c.bf16 %v4636_v38, %v4636_v38  ;;  %v6230_v38 = vadd.f32 %v11161_v0, %v11117_v2  ;;  %v4268_v18 = vld [vmem:[#allocation2 + $0x139] sm:$0xff]  ;;  %v9464_v2 = vld [vmem:[#allocation3 + $0x324] sm:$0xf] }
 0x3b8   : > { %v11267_v10 = vadd.f32 %v6399_v21, %v6311_v63  ;;  %4425 = vst [vmem:[#allocation3 + $0x308] sm:$0xf] %v11271_v19 }
 0x3b9   : > { %6441 = vmatmul.bf16.gmra.mxu3 %v8684_v47  ;;  %4615 = vst [vmem:[#allocation3 + $0x2c8] sm:$0xf] %v4297_v26  ;;  %v9477_v47 = vld [vmem:[#allocation3 + $0x388] sm:$0xf0]  ;;  %v4638_v26 = vld [vmem:[#allocation2 + $0xaa] sm:$0xff] }
 0x3ba   : > { %6352 = vmatmul.bf16.gmra.mxu2 %v8680_v14  ;;  %v6483_v7 = vpop.f32.mrf.mxu0  ;;  %4698 = vst [vmem:[#allocation3 + $0xf8] sm:$0xf] %v4666_v55  ;;  %v8331_v14 = vld [vmem:[#allocation3 + $0x58] sm:$0xf]  ;;  %v8720_v29 = vor.u32 %v9477_v47, %v8719_v57  ;;  %v4670_v56 = vpack.c.bf16 %v4638_v26, %v4638_v26  ;;  %v4300_v57 = vpack.c.bf16 %v4268_v18, %v4268_v18 }
 0x3bb   : > { %v11274_v62 = vadd.f32 %v6483_v7, %v11239_v45  ;;  %v4114_v45 = vpack.c.bf16 %v4082_v53, %v4082_v53  ;;  %4699 = vst [vmem:[#allocation3 + $0x11c] sm:$0xf] %v4667_v52  ;;  %v8332_v51 = vor.u32 %v9379_v16, %v8331_v14  ;;  %v4489_v52 = vpack.c.bf16 %v4457_v42, %v4457_v42  ;;  %v4639_v53 = vld [vmem:[#allocation2 + $0xb2] sm:$0xff] }
 0x3bc   : > { %v6402_v32 = vpop.f32.mrf.mxu3  ;;  %v11278_v27 = vpop.f32.mrf.mxu1  ;;  %4147 = vst [vmem:[#allocation3 + $0x464] sm:$0xf] %v4115_v58  ;;  %v4671_v37 = vpack.c.bf16 %v4639_v53, %v4639_v53  ;;  %v4490_v47 = vpack.c.bf16 %v4458_v44, %v4458_v44  ;;  %v9552_v53 = vld [vmem:[#allocation9 + $0x160] sm:$0xff]  ;;  %v9551_v44 = vld [vmem:[#allocation9 + $0x158] sm:$0xff] }
 0x3bd   : > { %v6313_v46 = vpop.f32.mrf.mxu2  ;;  %4146 = vst [vmem:[#allocation3 + $0x440] sm:$0xf] %v4114_v45 }
 0x3be   : > { %v6314_v39 = vadd.f32 %v6313_v46, %v6225_v1  ;;  %4330 = vst [vmem:[#allocation3 + $0x328] sm:$0xf] %v4298_v48  ;;  %v4299_v1 = vpack.c.bf16 %v4267_v49, %v4267_v49  ;;  %v4363_v46 = vld [vmem:[#allocation2 + $0x12a] sm:$0xff] }
 0x3bf   : > { %4520 = vst [vmem:[#allocation3 + $0x2e8] sm:$0xf] %v4488_v31  ;;  %v11295_v9 = vpack.c.bf16 %v4363_v46, %v4363_v46 }
 0x3c0   : > { %v11282_v21 = vadd.f32 %v6402_v32, %v6314_v39  ;;  %4616 = vst [vmem:[#allocation3 + $0x2ec] sm:$0xf] %v4298_v48  ;;  %v9472_v32 = vld [vmem:[#allocation3 + $0x364] sm:$0xf]  ;;  %v11293_v39 = vpack.c.bf16 %v4362_v30, %v4362_v30  ;;  %v9481_v30 = vld [vmem:[#allocation3 + $0x3ac] sm:$0xf] }
 0x3c1   : > { %4700 = vst [vmem:[#allocation3 + $0x140] sm:$0xf] %v4668_v12  ;;  %v8716_v7 = vor.u32 %v9472_v32, %v8713_v54  ;;  %v9388_v12 = vld [vmem:[#allocation3 + $0xc0] sm:$0xf0] }
 0x3c2   : > { %v6486_v34 = vpop.f32.mrf.mxu0  ;;  %4701 = vst [vmem:[#allocation3 + $0x164] sm:$0xf] %v4669_v59  ;;  %v8755_v59 = vld [vmem:[#allocation3 + $0x3b0] sm:$0xf] }
 0x3c3   : > { %v11285_v63 = vadd.f32 %v6486_v34, %v11256_v41  ;;  %4702 = vst [vmem:[#allocation3 + $0x188] sm:$0xf] %v4670_v56  ;;  %v9561_v34 = vld [vmem:[#allocation9 + $0x1a8] sm:$0xff] }
 0x3c4   : > { %v6404_v15 = vpop.f32.mrf.mxu3  ;;  %v11289_v36 = vpop.f32.mrf.mxu1  ;;  %4331 = vst [vmem:[#allocation3 + $0x34c] sm:$0xf] %v4299_v1  ;;  %6736 = vmatpush.bf16.msra.mxu3 %v9561_v34 }
 0x3c5   : > { %v6315_v28 = vpop.f32.mrf.mxu2  ;;  %6525 = vmatmul.bf16.gmra.mxu0 %v8652_v11  ;;  %4521 = vst [vmem:[#allocation3 + $0x30c] sm:$0xf] %v4489_v52 }
 0x3c6   : > { %v6316_v41 = vadd.f32 %v6315_v28, %v6227_v8  ;;  %4426 = vst [vmem:[#allocation3 + $0x32c] sm:$0xf] %v11293_v39  ;;  %v9486_v8 = vld [vmem:[#allocation3 + $0x3d0] sm:$0xf0]  ;;  %v6232_v28 = vadd.f32 %v11161_v0, %v11130_v61 }
 0x3c7   : > { %6569 = vmatmul.bf16.gmra.mxu1 %v8332_v51  ;;  %4427 = vst [vmem:[#allocation3 + $0x350] sm:$0xf] %v11295_v9  ;;  %v4641_v51 = vld [vmem:[#allocation2 + $0xca] sm:$0xff]  ;;  %v8756_v32 = vor.u32 %v9486_v8, %v8755_v59  ;;  %v4269_v61 = vld [vmem:[#allocation2 + $0x141] sm:$0xff] }
 0x3c8   : > { %v11291_v55 = vadd.f32 %v6404_v15, %v6316_v41  ;;  %4617 = vst [vmem:[#allocation3 + $0x310] sm:$0xf] %v4299_v1  ;;  %v9553_v15 = vld [vmem:[#allocation9 + $0x168] sm:$0xff]  ;;  %v8749_v41 = vld [vmem:[#allocation3 + $0x3cc] sm:$0xf0]  ;;  %v4673_v42 = vpack.c.bf16 %v4641_v51, %v4641_v51 }
 0x3c9   : > { %6446 = vmatmul.bf16.gmra.mxu3 %v8720_v29  ;;  %4703 = vst [vmem:[#allocation3 + $0x1ac] sm:$0xf] %v4671_v37  ;;  %6647 = vmatpush.bf16.msra.mxu2 %v9553_v15  ;;  %v8367_v29 = vld [vmem:[#allocation3 + $0xa0] sm:$0xf]  ;;  %v4459_v1 = vld [vmem:[#allocation2 + $0x140] sm:$0xff]  ;;  %v8752_v46 = vor.u32 %v9481_v30, %v8749_v41  ;;  %v6235_v15 = vadd.f32 %v11161_v0, %v11148_v3  ;;  %v4179_v30 = vld [vmem:[#allocation2 + $0x188] sm:$0xff] }
 0x3ca   : > { %6357 = vmatmul.bf16.gmra.mxu2 %v8716_v7  ;;  %v6488_v58 = vpop.f32.mrf.mxu0  ;;  %4706 = vst [vmem:[#allocation3 + $0x218] sm:$0xf] %v11210_v24  ;;  %v8368_v7 = vor.u32 %v9388_v12, %v8367_v29  ;;  %v4491_v37 = vpack.c.bf16 %v4459_v1, %v4459_v1  ;;  %v8721_v3 = vld [vmem:[#allocation3 + $0x38c] sm:$0xf0]  ;;  %v9490_v1 = vld [vmem:[#allocation3 + $0x3f4] sm:$0xf] }
 0x3cb   : > { %v11298_v23 = vadd.f32 %v6488_v58, %v11267_v10  ;;  %v8685_v10 = vld [vmem:[#allocation3 + $0x344] sm:$0xf0]  ;;  %4707 = vst [vmem:[#allocation3 + $0x23c] sm:$0xf] %v11214_v35  ;;  %v4640_v35 = vld [vmem:[#allocation2 + $0xc2] sm:$0xff]  ;;  %v4301_v58 = vpack.c.bf16 %v4269_v61, %v4269_v61 }
 0x3cc   : > { %v6407_v45 = vpop.f32.mrf.mxu3  ;;  %v11302_v22 = vpop.f32.mrf.mxu1  ;;  %4332 = vst [vmem:[#allocation3 + $0x370] sm:$0xf] %v4300_v57  ;;  %v8688_v26 = vor.u32 %v9464_v2, %v8685_v10  ;;  %v4672_v49 = vpack.c.bf16 %v4640_v35, %v4640_v35  ;;  %v9577_v10 = vld [vmem:[#allocation9 + $0x228] sm:$0xff]  ;;  %v9558_v59 = vld [vmem:[#allocation9 + $0x190] sm:$0xff]  ;;  %v9495_v35 = vld [vmem:[#allocation3 + $0x418] sm:$0xf0] }
 0x3cd   : > { %v6318_v48 = vpop.f32.mrf.mxu2  ;;  %4522 = vst [vmem:[#allocation3 + $0x330] sm:$0xf] %v4490_v47  ;;  %6648 = vmatpush.bf16.msra.mxu2 %v9552_v53  ;;  %6914 = vmatpush.bf16.msra.mxu1 %v9577_v10  ;;  %v4270_v2 = vld [vmem:[#allocation2 + $0x151] sm:$0xff] }
 0x3ce   : > { %v6319_v31 = vadd.f32 %v6318_v48, %v6230_v38  ;;  %4618 = vst [vmem:[#allocation3 + $0x334] sm:$0xf] %v4300_v57  ;;  %v4178_v57 = vld [vmem:[#allocation2 + $0x180] sm:$0xff]  ;;  %v4302_v8 = vpack.c.bf16 %v4270_v2, %v4270_v2 }
 0x3cf   : > { %4708 = vst [vmem:[#allocation3 + $0x260] sm:$0xf] %v11241_v17  ;;  %v9569_v17 = vld [vmem:[#allocation9 + $0x1e8] sm:$0xff]  ;;  %v9482_v2 = vld [vmem:[#allocation3 + $0x3b4] sm:$0xf] }
 0x3d0   : > { %v11306_v16 = vadd.f32 %v6407_v45, %v6319_v31  ;;  %4704 = vst [vmem:[#allocation3 + $0x1d0] sm:$0xf] %v4672_v49  ;;  %v9560_v45 = vld [vmem:[#allocation9 + $0x1a0] sm:$0xff]  ;;  %v9559_v31 = vld [vmem:[#allocation9 + $0x198] sm:$0xff]  ;;  %6825 = vmatpush.bf16.msra.mxu0 %v9569_v17 }
 0x3d1   : > { %4705 = vst [vmem:[#allocation3 + $0x1f4] sm:$0xf] %v4673_v42  ;;  %6737 = vmatpush.bf16.msra.mxu3 %v9560_v45  ;;  %6649 = vmatpush.bf16.msra.mxu2 %v9551_v44  ;;  %v8785_v49 = vld [vmem:[#allocation3 + $0x414] sm:$0xf0] }
 0x3d2   : > { %v6491_v14 = vpop.f32.mrf.mxu0  ;;  %4709 = vst [vmem:[#allocation3 + $0x284] sm:$0xf] %v11243_v60  ;;  %v8788_v45 = vor.u32 %v9490_v1, %v8785_v49  ;;  %v9568_v49 = vld [vmem:[#allocation9 + $0x1e0] sm:$0xff]  ;;  %v6245_v1 = vadd.f32 %v11161_v0, %v11234_v13 }
 0x3d3   : > { %v11311_v54 = vadd.f32 %v6491_v14, %v11282_v21  ;;  %4333 = vst [vmem:[#allocation3 + $0x394] sm:$0xf] %v4301_v58  ;;  %v9550_v14 = vld [vmem:[#allocation9 + $0x150] sm:$0xff] }
 0x3d4   : > { %v6409_v11 = vpop.f32.mrf.mxu3  ;;  %v11315_v24 = vpop.f32.mrf.mxu1  ;;  %4523 = vst [vmem:[#allocation3 + $0x354] sm:$0xf] %v4491_v37  ;;  %6826 = vmatpush.bf16.msra.mxu0 %v9568_v49 }
 0x3d5   : > { %v6320_v56 = vpop.f32.mrf.mxu2  ;;  %6530 = vmatmul.bf16.gmra.mxu0 %v8688_v26  ;;  %4619 = vst [vmem:[#allocation3 + $0x358] sm:$0xf] %v4301_v58  ;;  %6738 = vmatpush.bf16.msra.mxu3 %v9559_v31  ;;  %v8791_v26 = vld [vmem:[#allocation3 + $0x3f8] sm:$0xf]  ;;  %v9556_v58 = vld [vmem:[#allocation9 + $0x180] sm:$0xff]  ;;  %v6240_v31 = vadd.f32 %v11161_v0, %v11201_v20 }
 0x3d6   : > { %v6321_v21 = vadd.f32 %v6320_v56, %v6232_v28  ;;  %4710 = vst [vmem:[#allocation3 + $0x2a8] sm:$0xf] %v11269_v25  ;;  %v9473_v28 = vld [vmem:[#allocation3 + $0x36c] sm:$0xf]  ;;  %6650 = vmatpush.bf16.msra.mxu2 %v9550_v14  ;;  %v6237_v56 = vadd.f32 %v11161_v0, %v11171_v6  ;;  %v8792_v42 = vor.u32 %v9495_v35, %v8791_v26  ;;  %v9548_v6 = vld [vmem:[#allocation9 + $0x140] sm:$0xff] }
 0x3d7   : > { %6574 = vmatmul.bf16.gmra.mxu1 %v8368_v7  ;;  %4711 = vst [vmem:[#allocation3 + $0x2cc] sm:$0xf] %v11271_v19  ;;  %v9557_v19 = vld [vmem:[#allocation9 + $0x188] sm:$0xff]  ;;  %v8724_v51 = vor.u32 %v9473_v28, %v8721_v3  ;;  %v9406_v3 = vld [vmem:[#allocation3 + $0x150] sm:$0xf0]  ;;  %v6242_v26 = vadd.f32 %v11161_v0, %v11218_v50 }
 0x3d8   : > { %v11318_v52 = vadd.f32 %v6409_v11, %v6321_v21  ;;  %4712 = vst [vmem:[#allocation3 + $0x2f0] sm:$0xf] %v11293_v39  ;;  %v9397_v11 = vld [vmem:[#allocation3 + $0x108] sm:$0xf0]  ;;  %v8821_v35 = vld [vmem:[#allocation3 + $0x45c] sm:$0xf0] }
 0x3d9   : > { %6451 = vmatmul.bf16.gmra.mxu3 %v8756_v32  ;;  %4713 = vst [vmem:[#allocation3 + $0x314] sm:$0xf] %v11295_v9  ;;  %v8403_v32 = vld [vmem:[#allocation3 + $0xe8] sm:$0xf] }
 0x3da   : > { %6362 = vmatmul.bf16.gmra.mxu2 %v8752_v46  ;;  %v6493_v48 = vpop.f32.mrf.mxu0  ;;  %6739 = vmatpush.bf16.msra.mxu3 %v9558_v59  ;;  %4334 = vst [vmem:[#allocation3 + $0x3b8] sm:$0xf] %v4302_v8  ;;  %v9549_v7 = vld [vmem:[#allocation9 + $0x148] sm:$0xff]  ;;  %v8404_v21 = vor.u32 %v9397_v11, %v8403_v32  ;;  %v8827_v59 = vld [vmem:[#allocation3 + $0x440] sm:$0xf] }
 0x3db   : > { %v11322_v18 = vadd.f32 %v6493_v48, %v11291_v55  ;;  %v4210_v55 = vpack.c.bf16 %v4178_v57, %v4178_v57  ;;  %4620 = vst [vmem:[#allocation3 + $0x37c] sm:$0xf] %v4302_v8  ;;  %v4271_v46 = vld [vmem:[#allocation2 + $0x159] sm:$0xff]  ;;  %6651 = vmatpush.bf16.msra.mxu2 %v9549_v7  ;;  %v9499_v32 = vld [vmem:[#allocation3 + $0x43c] sm:$0xf]  ;;  %v4273_v7 = vld [vmem:[#allocation2 + $0x171] sm:$0xff] }
 0x3dc   : > { %v6412_v38 = vpop.f32.mrf.mxu3  ;;  %v11326_v34 = vpop.f32.mrf.mxu1  ;;  %v4303_v37 = vpack.c.bf16 %v4271_v46, %v4271_v46 }
 0x3dd   : > { %v6323_v60 = vpop.f32.mrf.mxu2  ;;  %4242 = vst [vmem:[#allocation3 + $0x444] sm:$0xf] %v4210_v55 }
 0x3de   : > { %v6324_v47 = vadd.f32 %v6323_v60, %v6235_v15  ;;  %6740 = vmatpush.bf16.msra.mxu3 %v9557_v19  ;;  %4335 = vst [vmem:[#allocation3 + $0x3dc] sm:$0xf] %v4303_v37  ;;  %v4272_v60 = vld [vmem:[#allocation2 + $0x169] sm:$0xff] }
 0x3df   : > { %4621 = vst [vmem:[#allocation3 + $0x3a0] sm:$0xf] %v4303_v37  ;;  %6652 = vmatpush.bf16.msra.mxu2 %v9548_v6  ;;  %v4304_v55 = vpack.c.bf16 %v4272_v60, %v4272_v60 }
 0x3e0   : > { %v11331_v12 = vadd.f32 %v6412_v38, %v6324_v47  ;;  %v8757_v47 = vld [vmem:[#allocation3 + $0x3d4] sm:$0xf0] }
 0x3e1   : > { %4336 = vst [vmem:[#allocation3 + $0x400] sm:$0xf] %v4304_v55  ;;  %v8760_v20 = vor.u32 %v9482_v2, %v8757_v47  ;;  %v9491_v47 = vld [vmem:[#allocation3 + $0x3fc] sm:$0xf]  ;;  %v8303_v2 = vld [vmem:[#allocation3 + $0x18] sm:$0xf] }
 0x3e2   : > { %v6496_v29 = vpop.f32.mrf.mxu0  ;;  %6741 = vmatpush.bf16.msra.mxu3 %v9556_v58  ;;  %4622 = vst [vmem:[#allocation3 + $0x3c4] sm:$0xf] %v4304_v55  ;;  %v4274_v58 = vld [vmem:[#allocation2 + $0x181] sm:$0xff]  ;;  %v9565_v55 = vld [vmem:[#allocation9 + $0x1c8] sm:$0xff] }
 0x3e3   : > { %v11335_v39 = vadd.f32 %v6496_v29, %v11306_v16  ;;  %v4211_v16 = vpack.c.bf16 %v4179_v30, %v4179_v30  ;;  %v9567_v30 = vld [vmem:[#allocation9 + $0x1d8] sm:$0xff] }
 0x3e4   : > { %v6414_v25 = vpop.f32.mrf.mxu3  ;;  %v11339_v41 = vpop.f32.mrf.mxu1  ;;  %6827 = vmatpush.bf16.msra.mxu0 %v9567_v30 }
 0x3e5   : > { %v6325_v9 = vpop.f32.mrf.mxu2  ;;  %6535 = vmatmul.bf16.gmra.mxu0 %v8724_v51  ;;  %4243 = vst [vmem:[#allocation3 + $0x468] sm:$0xf] %v4211_v16 }
 0x3e6   : > { %v6326_v61 = vadd.f32 %v6325_v9, %v6237_v56  ;;  %v8824_v9 = vor.u32 %v9499_v32, %v8821_v35  ;;  %v4275_v32 = vld [vmem:[#allocation2 + $0x189] sm:$0xff] }
 0x3e7   : > { %6579 = vmatmul.bf16.gmra.mxu1 %v8404_v21  ;;  %v4307_v49 = vpack.c.bf16 %v4275_v32, %v4275_v32 }
 0x3e8   : > { %v6415_v53 = vadd.f32 %v6414_v25, %v6326_v61  ;;  %v8439_v25 = vld [vmem:[#allocation3 + $0x130] sm:$0xf]  ;;  %v9576_v61 = vld [vmem:[#allocation9 + $0x220] sm:$0xff] }
 0x3e9   : > { %6456 = vmatmul.bf16.gmra.mxu3 %v8792_v42  ;;  %v8440_v51 = vor.u32 %v9406_v3, %v8439_v25  ;;  %v4305_v42 = vpack.c.bf16 %v4273_v7, %v4273_v7  ;;  %6915 = vmatpush.bf16.msra.mxu1 %v9576_v61  ;;  %v11370_v3 = vld [vmem:[%s11992_s5] ss:$0 sm:$0xff]  ;;  %v8297_v25 = vld [vmem:[#allocation3 + $0x34] sm:$0xf0]  ;;  %4339 = vst [vmem:[#allocation3 + $0x46c] sm:$0xf] %v4307_v49 }
 0x3ea   : > { %6367 = vmatmul.bf16.gmra.mxu2 %v8788_v45  ;;  %v6498_v48 = vpop.f32.mrf.mxu0  ;;  %4625 = vst [vmem:[#allocation3 + $0x430] sm:$0xf] %v4307_v49  ;;  %v6250_v30 = vadd.f32 %v11370_v3, %v11263_v4  ;;  %v9375_v4 = vld [vmem:[#allocation3 + $0x5c] sm:$0xf] }
 0x3eb   : > { %v11342_v17 = vadd.f32 %v6498_v48, %v11318_v52  ;;  %v9504_v52 = vld [vmem:[#allocation3 + $0x460] sm:$0xf0]  ;;  %4337 = vst [vmem:[#allocation3 + $0x424] sm:$0xf] %v4305_v42  ;;  %v9566_v48 = vld [vmem:[#allocation9 + $0x1d0] sm:$0xff] }
 0x3ec   : > { %v6417_v38 = vpop.f32.mrf.mxu3  ;;  %v11346_v44 = vpop.f32.mrf.mxu1  ;;  %v8828_v19 = vor.u32 %v9504_v52, %v8827_v59  ;;  %4623 = vst [vmem:[#allocation3 + $0x3e8] sm:$0xf] %v4305_v42  ;;  %6828 = vmatpush.bf16.msra.mxu0 %v9566_v48  ;;  %v8475_v59 = vld [vmem:[#allocation3 + $0x178] sm:$0xf]  ;;  %v4364_v52 = vld [vmem:[#allocation2 + $0x13a] sm:$0xff] }
 0x3ed   : > { %v6328_v10 = vpop.f32.mrf.mxu2  ;;  %v8829_v48 = vld [vmem:[#allocation3 + $0x464] sm:$0xf0] }
 0x3ee   : > { %v6329_v15 = vadd.f32 %v6328_v10, %v6240_v31  ;;  %v4306_v31 = vpack.c.bf16 %v4274_v58, %v4274_v58  ;;  %v9371_v10 = vld [vmem:[#allocation3 + $0x38] sm:$0xf0] }
 0x3f0   : > { %v6418_v57 = vadd.f32 %v6417_v38, %v6329_v15  ;;  %v8793_v38 = vld [vmem:[#allocation3 + $0x41c] sm:$0xf0]  ;;  %v9415_v15 = vld [vmem:[#allocation3 + $0x198] sm:$0xf0]  ;;  %4338 = vst [vmem:[#allocation3 + $0x448] sm:$0xf] %v4306_v31  ;;  %6829 = vmatpush.bf16.msra.mxu0 %v9565_v55  ;;  %v6252_v55 = vadd.f32 %v11370_v3, %v11278_v27 }
 0x3f1   : > { %v8796_v13 = vor.u32 %v9491_v47, %v8793_v38  ;;  %4624 = vst [vmem:[#allocation3 + $0x40c] sm:$0xf] %v4306_v31  ;;  %v8476_v35 = vor.u32 %v9415_v15, %v8475_v59  ;;  %v9500_v15 = vld [vmem:[#allocation3 + $0x444] sm:$0xf]  ;;  %v4461_v59 = vld [vmem:[#allocation2 + $0x158] sm:$0xff] }
 0x3f2   : > { %v6501_v14 = vpop.f32.mrf.mxu0  ;;  %v8832_v47 = vor.u32 %v9500_v15, %v8829_v48  ;;  %v8305_v48 = vld [vmem:[#allocation3 + $0x3c] sm:$0xf0]  ;;  %v9389_v15 = vld [vmem:[#allocation3 + $0xc8] sm:$0xf0] }
 0x3f3   : > { %v11349_v8 = vadd.f32 %v6501_v14, %v11331_v12 }
 0x3f4   : > { %v6419_v11 = vpop.f32.mrf.mxu3  ;;  %v11353_v28 = vpop.f32.mrf.mxu1 }
 0x3f5   : > { %v6330_v29 = vpop.f32.mrf.mxu2  ;;  %6540 = vmatmul.bf16.gmra.mxu0 %v8760_v20  ;;  %v4365_v20 = vld [vmem:[#allocation2 + $0x142] sm:$0xff] }
 0x3f6   : > { %v6331_v56 = vadd.f32 %v6330_v29, %v6242_v26  ;;  %v8304_v29 = vor.u32 %v9371_v10, %v8303_v2  ;;  %v8339_v2 = vld [vmem:[#allocation3 + $0x60] sm:$0xf] }
 0x3f7   : > { %6584 = vmatmul.bf16.gmra.mxu1 %v8440_v51  ;;  %v4397_v51 = vpack.c.bf16 %v4365_v20, %v4365_v20  ;;  %v8333_v20 = vld [vmem:[#allocation3 + $0x7c] sm:$0xf0] }
 0x3f8   : > { %v11355_v12 = vadd.f32 %v6419_v11, %v6331_v56  ;;  %v6247_v11 = vadd.f32 %v11370_v3, %v11250_v40 }
 0x3f9   : > { %6461 = vmatmul.bf16.gmra.mxu3 %v8828_v19  ;;  %v4396_v19 = vpack.c.bf16 %v4364_v52, %v4364_v52  ;;  %4429 = vst [vmem:[#allocation3 + $0x398] sm:$0xf] %v4397_v51 }
 0x3fa   : > { %6372 = vmatmul.bf16.gmra.mxu2 %v8824_v9  ;;  %v6503_v21 = vpop.f32.mrf.mxu0  ;;  %v9564_v9 = vld [vmem:[#allocation9 + $0x1c0] sm:$0xff]  ;;  %4715 = vst [vmem:[#allocation3 + $0x35c] sm:$0xf] %v4397_v51 }
 0x3fb   : > { %v11357_v16 = vadd.f32 %v6503_v21, %v6415_v53  ;;  %4428 = vst [vmem:[#allocation3 + $0x374] sm:$0xf] %v4396_v19  ;;  %6830 = vmatpush.bf16.msra.mxu0 %v9564_v9  ;;  %v9575_v9 = vld [vmem:[#allocation9 + $0x218] sm:$0xff] }
 0x3fc   : > { %v6422_v50 = vpop.f32.mrf.mxu3  ;;  %v11361_v46 = vpop.f32.mrf.mxu1  ;;  %4714 = vst [vmem:[#allocation3 + $0x338] sm:$0xf] %v4396_v19  ;;  %6916 = vmatpush.bf16.msra.mxu1 %v9575_v9 }
 0x3fd   : > { %v6333_v45 = vpop.f32.mrf.mxu2 }
 0x3fe   : > { %v6334_v6 = vadd.f32 %v6333_v45, %v6245_v1  ;;  %v4460_v1 = vld [vmem:[#allocation2 + $0x150] sm:$0xff] }
 0x400   : > { %v11363_v37 = vadd.f32 %v6422_v50, %v6334_v6  ;;  %v4492_v6 = vpack.c.bf16 %v4460_v1, %v4460_v1  ;;  %v4462_v1 = vld [vmem:[#allocation2 + $0x168] sm:$0xff] }
 0x402   : > { %v6506_v60 = vpop.f32.mrf.mxu0  ;;  %4524 = vst [vmem:[#allocation3 + $0x378] sm:$0xf] %v4492_v6  ;;  %v4494_v6 = vpack.c.bf16 %v4462_v1, %v4462_v1 }
 0x403   : > { %v11365_v0 = vadd.f32 %v6506_v60, %v6418_v57  ;;  %v9366_v57 = vld [vmem:[#allocation3 + $0x14] sm:$0xf] }
 0x404   : > { %v6424_v53 = vpop.f32.mrf.mxu3  ;;  %v11374_v14 = vpop.f32.mrf.mxu1  ;;  %v8300_v7 = vor.u32 %v9366_v57, %v8297_v25  ;;  %v4493_v25 = vpack.c.bf16 %v4461_v59, %v4461_v59  ;;  %4526 = vst [vmem:[#allocation3 + $0x3c0] sm:$0xf] %v4494_v6  ;;  %v9384_v59 = vld [vmem:[#allocation3 + $0xa4] sm:$0xf] }
 0x405   : > { %v6335_v26 = vpop.f32.mrf.mxu2  ;;  %6545 = vmatmul.bf16.gmra.mxu0 %v8796_v13  ;;  %v9376_v6 = vld [vmem:[#allocation3 + $0x64] sm:$0xf] }
 0x406   : > { %v6336_v56 = vadd.f32 %v6335_v26, %v6247_v11  ;;  %v8511_v11 = vld [vmem:[#allocation3 + $0x1c0] sm:$0xf]  ;;  %4525 = vst [vmem:[#allocation3 + $0x39c] sm:$0xf] %v4493_v25 }
 0x407   : > { %6589 = vmatmul.bf16.gmra.mxu1 %v8476_v35  ;;  %v4367_v35 = vld [vmem:[#allocation2 + $0x15a] sm:$0xff] }
 0x408   : > { %v6425_v40 = vadd.f32 %v6424_v53, %v6336_v56  ;;  %v9380_v53 = vld [vmem:[#allocation3 + $0x80] sm:$0xf0]  ;;  %v4399_v51 = vpack.c.bf16 %v4367_v35, %v4367_v35  ;;  %v8336_v56 = vor.u32 %v9375_v4, %v8333_v20 }
 0x409   : > { %6742 = vmatmul.bf16.vlgmr.msra.gmra.mxu3 %v8304_v29  ;;  %v8340_v26 = vor.u32 %v9380_v53, %v8339_v2  ;;  %v4366_v29 = vld [vmem:[#allocation2 + $0x152] sm:$0xff]  ;;  %v9367_v53 = vld [vmem:[#allocation3 + $0x1c] sm:$0xf] }
 0x40a   : > { %6653 = vmatmul.bf16.vlgmr.msra.gmra.mxu2 %v8300_v7  ;;  %v6508_v50 = vpop.f32.mrf.mxu0  ;;  %v4398_v19 = vpack.c.bf16 %v4366_v29, %v4366_v29  ;;  %4431 = vst [vmem:[#allocation3 + $0x3e0] sm:$0xf] %v4399_v51  ;;  %v8547_v2 = vld [vmem:[#allocation3 + $0x208] sm:$0xf] }
 0x40b   : > { %v11377_v21 = vadd.f32 %v6508_v50, %v11355_v12  ;;  %v9424_v12 = vld [vmem:[#allocation3 + $0x1e0] sm:$0xf0]  ;;  %4717 = vst [vmem:[#allocation3 + $0x3a4] sm:$0xf] %v4399_v51  ;;  %v6260_v51 = vadd.f32 %v11370_v3, %v11315_v24  ;;  %v8583_v24 = vld [vmem:[#allocation3 + $0x250] sm:$0xf] }
 0x40c   : > { %v6427_v42 = vpop.f32.mrf.mxu3  ;;  %v11381_v61 = vpop.f32.mrf.mxu1  ;;  %v8512_v57 = vor.u32 %v9424_v12, %v8511_v11  ;;  %4430 = vst [vmem:[#allocation3 + $0x3bc] sm:$0xf] %v4398_v19 }
 0x40d   : > { %v6338_v45 = vpop.f32.mrf.mxu2  ;;  %4716 = vst [vmem:[#allocation3 + $0x380] sm:$0xf] %v4398_v19 }
 0x40e   : > { %v6339_v58 = vadd.f32 %v6338_v45, %v6250_v30 }
 0x410   : > { %v6428_v38 = vadd.f32 %v6427_v42, %v6339_v58  ;;  %v6255_v42 = vadd.f32 %v11370_v3, %v11289_v36  ;;  %v6257_v36 = vadd.f32 %v11370_v3, %v11302_v22 }
 0x412   : > { %v6511_v10 = vpop.f32.mrf.mxu0 }
 0x413   : > { %v11384_v60 = vadd.f32 %v6511_v10, %v11363_v37 }
 0x414   : > { %v6429_v31 = vpop.f32.mrf.mxu3  ;;  %v11388_v13 = vpop.f32.mrf.mxu1 }
 0x415   : > { %v6340_v52 = vpop.f32.mrf.mxu2  ;;  %6550 = vmatmul.bf16.gmra.mxu0 %v8832_v47  ;;  %v8308_v47 = vor.u32 %v9367_v53, %v8305_v48  ;;  %v9442_v48 = vld [vmem:[#allocation3 + $0x270] sm:$0xf0]  ;;  %v8411_v53 = vld [vmem:[#allocation3 + $0xf0] sm:$0xf] }
 0x416   : > { %v6341_v37 = vadd.f32 %v6340_v52, %v6252_v55  ;;  %v8375_v55 = vld [vmem:[#allocation3 + $0xa8] sm:$0xf] }
 0x417   : > { %6594 = vmatmul.bf16.gmra.mxu1 %v8512_v57  ;;  %v8369_v52 = vld [vmem:[#allocation3 + $0xc4] sm:$0xf0]  ;;  %v8376_v20 = vor.u32 %v9389_v15, %v8375_v55  ;;  %v4463_v57 = vld [vmem:[#allocation2 + $0x170] sm:$0xff]  ;;  %v8405_v55 = vld [vmem:[#allocation3 + $0x10c] sm:$0xf0] }
 0x418   : > { %v6430_v27 = vadd.f32 %v6429_v31, %v6341_v37  ;;  %v4495_v29 = vpack.c.bf16 %v4463_v57, %v4463_v57  ;;  %v8372_v35 = vor.u32 %v9384_v59, %v8369_v52 }
 0x419   : > { %6747 = vmatmul.bf16.gmra.mxu3 %v8340_v26 }
 0x41a   : > { %6658 = vmatmul.bf16.gmra.mxu2 %v8336_v56  ;;  %v6513_v7 = vpop.f32.mrf.mxu0  ;;  %4527 = vst [vmem:[#allocation3 + $0x3e4] sm:$0xf] %v4495_v29 }
 0x41b   : > { %v11390_v49 = vadd.f32 %v6513_v7, %v6425_v40  ;;  %v9433_v40 = vld [vmem:[#allocation3 + $0x228] sm:$0xf0] }
 0x41c   : > { %v6432_v32 = vpop.f32.mrf.mxu3  ;;  %v11394_v50 = vpop.f32.mrf.mxu1  ;;  %v8548_v26 = vor.u32 %v9433_v40, %v8547_v2 }
 0x41d   : > { %v6343_v30 = vpop.f32.mrf.mxu2 }
 0x41e   : > { %v6344_v45 = vadd.f32 %v6343_v30, %v6255_v42  ;;  %v8341_v42 = vld [vmem:[#allocation3 + $0x84] sm:$0xf0] }
 0x420   : > { %v6433_v58 = vadd.f32 %v6432_v32, %v6344_v45  ;;  %v9398_v45 = vld [vmem:[#allocation3 + $0x110] sm:$0xf0] }
 0x421   : > { %v8412_v2 = vor.u32 %v9398_v45, %v8411_v53 }
 0x422   : > { %v6516_v10 = vpop.f32.mrf.mxu0 }
 0x423   : > { %v11396_v12 = vadd.f32 %v6516_v10, %v6428_v38  ;;  %v8344_v10 = vor.u32 %v9376_v6, %v8341_v42 }
 0x424   : > { %v6434_v31 = vpop.f32.mrf.mxu3  ;;  %v11400_v4 = vpop.f32.mrf.mxu1 }
 0x425   : > { %v6345_v11 = vpop.f32.mrf.mxu2  ;;  %6831 = vmatmul.bf16.vlgmr.msra.gmra.mxu0 %v8308_v47 }
 0x426   : > { %v6346_v25 = vadd.f32 %v6345_v11, %v6257_v36  ;;  %v9393_v36 = vld [vmem:[#allocation3 + $0xec] sm:$0xf]  ;;  %v8584_v11 = vor.u32 %v9442_v48, %v8583_v24 }
 0x427   : > { %6599 = vmatmul.bf16.gmra.mxu1 %v8548_v26  ;;  %v8408_v52 = vor.u32 %v9393_v36, %v8405_v55  ;;  %v9574_v26 = vld [vmem:[#allocation9 + $0x210] sm:$0xff]  ;;  %v8441_v36 = vld [vmem:[#allocation3 + $0x154] sm:$0xf0] }
 0x428   : > { %v6435_v38 = vadd.f32 %v6434_v31, %v6346_v25  ;;  %6917 = vmatpush.bf16.msra.mxu1 %v9574_v26 }
 0x429   : > { %6752 = vmatmul.bf16.gmra.mxu3 %v8376_v20 }
 0x42a   : > { %6663 = vmatmul.bf16.gmra.mxu2 %v8372_v35  ;;  %v6518_v37 = vpop.f32.mrf.mxu0 }
 0x42b   : > { %v11402_v19 = vadd.f32 %v6518_v37, %v6430_v27  ;;  %v6262_v27 = vadd.f32 %v11370_v3, %v11326_v34 }
 0x42c   : > { %v6437_v22 = vpop.f32.mrf.mxu3  ;;  %v11406_v56 = vpop.f32.mrf.mxu1 }
 0x42d   : > { %v6348_v32 = vpop.f32.mrf.mxu2 }
 0x42e   : > { %v6349_v7 = vadd.f32 %v6348_v32, %v6260_v51  ;;  %v8377_v51 = vld [vmem:[#allocation3 + $0xcc] sm:$0xf0]  ;;  %v9407_v32 = vld [vmem:[#allocation3 + $0x158] sm:$0xf0] }
 0x430   : > { %v6438_v9 = vadd.f32 %v6437_v22, %v6349_v7 }
 0x432   : > { %v6521_v1 = vpop.f32.mrf.mxu0 }
 0x433   : > { %v11408_v31 = vadd.f32 %v6521_v1, %v6433_v58  ;;  %v9451_v1 = vld [vmem:[#allocation3 + $0x2b8] sm:$0xf0] }
 0x434   : > { %v6439_v30 = vpop.f32.mrf.mxu3  ;;  %v6565_v15 = vpop.f32.mrf.mxu1 }
 0x435   : > { %v6350_v40 = vpop.f32.mrf.mxu2  ;;  %v11413_v47 = vadd.f32 %v6565_v15, %v11230_v33  ;;  %6836 = vmatmul.bf16.gmra.mxu0 %v8344_v10  ;;  %v6265_v33 = vadd.f32 %v11370_v3, %v11339_v41  ;;  %v6267_v41 = vadd.f32 %v11370_v3, %v11346_v44  ;;  %v4369_v15 = vld [vmem:[#allocation2 + $0x172] sm:$0xff] }
 0x436   : > { %v6351_v59 = vadd.f32 %v6350_v40, %v6262_v27  ;;  %v8619_v27 = vld [vmem:[#allocation3 + $0x298] sm:$0xf]  ;;  %v9402_v40 = vld [vmem:[#allocation3 + $0x134] sm:$0xf] }
 0x437   : > { %6604 = vmatmul.bf16.gmra.mxu1 %v8584_v11  ;;  %v8620_v55 = vor.u32 %v9451_v1, %v8619_v27 }
 0x438   : > { %v6440_v58 = vadd.f32 %v6439_v30, %v6351_v59  ;;  %v9385_v30 = vld [vmem:[#allocation3 + $0xac] sm:$0xf]  ;;  %v8444_v59 = vor.u32 %v9402_v40, %v8441_v36  ;;  %v4371_v40 = vld [vmem:[#allocation2 + $0x18a] sm:$0xff] }
 0x439   : > { %6757 = vmatmul.bf16.gmra.mxu3 %v8412_v2  ;;  %v8380_v6 = vor.u32 %v9385_v30, %v8377_v51  ;;  %v4401_v2 = vpack.c.bf16 %v4369_v15, %v4369_v15  ;;  %v9460_v30 = vld [vmem:[#allocation3 + $0x300] sm:$0xf0]  ;;  %v4465_v15 = vld [vmem:[#allocation2 + $0x188] sm:$0xff] }
 0x43a   : > { %6668 = vmatmul.bf16.gmra.mxu2 %v8408_v52  ;;  %v6523_v34 = vpop.f32.mrf.mxu0 }
 0x43b   : > { %v11415_v57 = vadd.f32 %v6523_v34, %v6435_v38  ;;  %v8447_v38 = vld [vmem:[#allocation3 + $0x138] sm:$0xf]  ;;  %4433 = vst [vmem:[#allocation3 + $0x428] sm:$0xf] %v4401_v2  ;;  %v6270_v34 = vadd.f32 %v11370_v3, %v11353_v28 }
 0x43c   : > { %v6442_v20 = vpop.f32.mrf.mxu3  ;;  %v6567_v25 = vpop.f32.mrf.mxu1  ;;  %v8448_v10 = vor.u32 %v9407_v32, %v8447_v38  ;;  %4719 = vst [vmem:[#allocation3 + $0x3ec] sm:$0xf] %v4401_v2  ;;  %v8477_v2 = vld [vmem:[#allocation3 + $0x19c] sm:$0xf0] }
 0x43d   : > { %v6353_v29 = vpop.f32.mrf.mxu2  ;;  %v11420_v35 = vadd.f32 %v6567_v25, %v11246_v43  ;;  %v4368_v43 = vld [vmem:[#allocation2 + $0x16a] sm:$0xff] }
 0x43e   : > { %v6354_v22 = vadd.f32 %v6353_v29, %v6265_v33  ;;  %v4464_v33 = vld [vmem:[#allocation2 + $0x180] sm:$0xff] }
 0x440   : > { %v6443_v37 = vadd.f32 %v6442_v20, %v6354_v22  ;;  %v4496_v22 = vpack.c.bf16 %v4464_v33, %v4464_v33  ;;  %v9573_v33 = vld [vmem:[#allocation9 + $0x208] sm:$0xff] }
 0x441   : > { %6918 = vmatpush.bf16.msra.mxu1 %v9573_v33 }
 0x442   : > { %v6526_v42 = vpop.f32.mrf.mxu0  ;;  %4528 = vst [vmem:[#allocation3 + $0x408] sm:$0xf] %v4496_v22 }
 0x443   : > { %v11422_v45 = vadd.f32 %v6526_v42, %v6438_v9  ;;  %v4400_v9 = vpack.c.bf16 %v4368_v43, %v4368_v43  ;;  %v9416_v42 = vld [vmem:[#allocation3 + $0x1a0] sm:$0xf0] }
 0x444   : > { %v6444_v7 = vpop.f32.mrf.mxu3  ;;  %v6570_v48 = vpop.f32.mrf.mxu1 }
 0x445   : > { %v6355_v53 = vpop.f32.mrf.mxu2  ;;  %v11427_v24 = vadd.f32 %v6570_v48, %v11259_v5  ;;  %6841 = vmatmul.bf16.gmra.mxu0 %v8380_v6  ;;  %4432 = vst [vmem:[#allocation3 + $0x404] sm:$0xf] %v4400_v9  ;;  %v8655_v48 = vld [vmem:[#allocation3 + $0x2e0] sm:$0xf] }
 0x446   : > { %v6356_v11 = vadd.f32 %v6355_v53, %v6267_v41  ;;  %4718 = vst [vmem:[#allocation3 + $0x3c8] sm:$0xf] %v4400_v9  ;;  %v8483_v41 = vld [vmem:[#allocation3 + $0x180] sm:$0xf]  ;;  %v8656_v43 = vor.u32 %v9460_v30, %v8655_v48  ;;  %v4370_v53 = vld [vmem:[#allocation2 + $0x182] sm:$0xff] }
 0x447   : > { %6609 = vmatmul.bf16.gmra.mxu1 %v8620_v55  ;;  %v8484_v27 = vor.u32 %v9416_v42, %v8483_v41  ;;  %v9411_v9 = vld [vmem:[#allocation3 + $0x17c] sm:$0xf]  ;;  %v9425_v41 = vld [vmem:[#allocation3 + $0x1e8] sm:$0xf0] }
 0x448   : > { %v6445_v44 = vadd.f32 %v6444_v7, %v6356_v11  ;;  %v8413_v7 = vld [vmem:[#allocation3 + $0x114] sm:$0xf0]  ;;  %v4402_v11 = vpack.c.bf16 %v4370_v53, %v4370_v53  ;;  %v9469_v48 = vld [vmem:[#allocation3 + $0x348] sm:$0xf0]  ;;  %v9420_v53 = vld [vmem:[#allocation3 + $0x1c4] sm:$0xf] }
 0x449   : > { %6762 = vmatmul.bf16.gmra.mxu3 %v8448_v10  ;;  %v6272_v10 = vadd.f32 %v11370_v3, %v11361_v46 }
 0x44a   : > { %6673 = vmatmul.bf16.gmra.mxu2 %v8444_v59  ;;  %v6528_v20 = vpop.f32.mrf.mxu0  ;;  %v4403_v59 = vpack.c.bf16 %v4371_v40, %v4371_v40  ;;  %4434 = vst [vmem:[#allocation3 + $0x44c] sm:$0xf] %v4402_v11  ;;  %v8513_v40 = vld [vmem:[#allocation3 + $0x1e4] sm:$0xf0] }
 0x44b   : > { %v11429_v5 = vadd.f32 %v6528_v20, %v6440_v58  ;;  %v9394_v58 = vld [vmem:[#allocation3 + $0xf4] sm:$0xf]  ;;  %v8480_v20 = vor.u32 %v9411_v9, %v8477_v2  ;;  %4720 = vst [vmem:[#allocation3 + $0x410] sm:$0xf] %v4402_v11 }
 0x44c   : > { %v6447_v52 = vpop.f32.mrf.mxu3  ;;  %v6572_v26 = vpop.f32.mrf.mxu1  ;;  %v8416_v28 = vor.u32 %v9394_v58, %v8413_v7  ;;  %4435 = vst [vmem:[#allocation3 + $0x470] sm:$0xf] %v4403_v59 }
 0x44d   : > { %v6358_v25 = vpop.f32.mrf.mxu2  ;;  %v11434_v29 = vadd.f32 %v6572_v26, %v11274_v62  ;;  %4721 = vst [vmem:[#allocation3 + $0x434] sm:$0xf] %v4403_v59 }
 0x44e   : > { %v6359_v51 = vadd.f32 %v6358_v25, %v6270_v34  ;;  %v6275_v25 = vadd.f32 %v11370_v3, %v11374_v14  ;;  %v6277_v14 = vadd.f32 %v11370_v3, %v11381_v61 }
 0x450   : > { %v6448_v32 = vadd.f32 %v6447_v52, %v6359_v51 }
 0x452   : > { %v6531_v38 = vpop.f32.mrf.mxu0 }
 0x453   : > { %v11436_v6 = vadd.f32 %v6531_v38, %v6443_v37  ;;  %v4497_v37 = vpack.c.bf16 %v4465_v15, %v4465_v15 }
 0x454   : > { %v6449_v1 = vpop.f32.mrf.mxu3  ;;  %v6575_v62 = vpop.f32.mrf.mxu1 }
 0x455   : > { %v6360_v36 = vpop.f32.mrf.mxu2  ;;  %v11441_v55 = vadd.f32 %v6575_v62, %v11285_v63  ;;  %6846 = vmatmul.bf16.gmra.mxu0 %v8416_v28  ;;  %4529 = vst [vmem:[#allocation3 + $0x42c] sm:$0xf] %v4497_v37  ;;  %v9403_v28 = vld [vmem:[#allocation3 + $0x13c] sm:$0xf]  ;;  %v8516_v37 = vor.u32 %v9420_v53, %v8513_v40 }
 0x456   : > { %v6361_v52 = vadd.f32 %v6360_v36, %v6272_v10 }
 0x457   : > { %6614 = vmatmul.bf16.gmra.mxu1 %v8656_v43  ;;  %v8691_v43 = vld [vmem:[#allocation3 + $0x328] sm:$0xf] }
 0x458   : > { %v6450_v46 = vadd.f32 %v6449_v1, %v6361_v52  ;;  %v8449_v1 = vld [vmem:[#allocation3 + $0x15c] sm:$0xf0]  ;;  %v8692_v9 = vor.u32 %v9469_v48, %v8691_v43  ;;  %v6280_v52 = vadd.f32 %v11370_v3, %v11388_v13  ;;  %v8727_v48 = vld [vmem:[#allocation3 + $0x370] sm:$0xf] }
 0x459   : > { %6767 = vmatmul.bf16.gmra.mxu3 %v8484_v27  ;;  %v8452_v10 = vor.u32 %v9403_v28, %v8449_v1  ;;  %v8519_v27 = vld [vmem:[#allocation3 + $0x1c8] sm:$0xf]  ;;  %v9412_v1 = vld [vmem:[#allocation3 + $0x184] sm:$0xf]  ;;  %v8555_v28 = vld [vmem:[#allocation3 + $0x210] sm:$0xf] }
 0x45a   : > { %6678 = vmatmul.bf16.gmra.mxu2 %v8480_v20  ;;  %v6533_v26 = vpop.f32.mrf.mxu0  ;;  %v8520_v36 = vor.u32 %v9425_v41, %v8519_v27  ;;  %v6282_v41 = vadd.f32 %v11370_v3, %v11394_v50 }
 0x45b   : > { %v11443_v63 = vadd.f32 %v6533_v26, %v6445_v44 }
 0x45c   : > { %v6452_v34 = vpop.f32.mrf.mxu3  ;;  %v6577_v22 = vpop.f32.mrf.mxu1 }
 0x45d   : > { %v6363_v51 = vpop.f32.mrf.mxu2  ;;  %v11448_v7 = vadd.f32 %v6577_v22, %v11298_v23 }
 0x45e   : > { %v6364_v42 = vadd.f32 %v6363_v51, %v6275_v25  ;;  %v8485_v25 = vld [vmem:[#allocation3 + $0x1a4] sm:$0xf0] }
 0x460   : > { %v6453_v30 = vadd.f32 %v6452_v34, %v6364_v42  ;;  %v9434_v42 = vld [vmem:[#allocation3 + $0x230] sm:$0xf0] }
 0x461   : > { %v8556_v27 = vor.u32 %v9434_v42, %v8555_v28  ;;  %v8585_v28 = vld [vmem:[#allocation3 + $0x274] sm:$0xf0] }
 0x462   : > { %v6536_v58 = vpop.f32.mrf.mxu0 }
 0x463   : > { %v11450_v44 = vadd.f32 %v6536_v58, %v6448_v32 }
 0x464   : > { %v6454_v38 = vpop.f32.mrf.mxu3  ;;  %v6580_v62 = vpop.f32.mrf.mxu1 }
 0x465   : > { %v6365_v15 = vpop.f32.mrf.mxu2  ;;  %v11455_v23 = vadd.f32 %v6580_v62, %v11311_v54  ;;  %6851 = vmatmul.bf16.gmra.mxu0 %v8452_v10  ;;  %v8549_v62 = vld [vmem:[#allocation3 + $0x22c] sm:$0xf0] }
 0x466   : > { %v6366_v2 = vadd.f32 %v6365_v15, %v6277_v14  ;;  %v9429_v14 = vld [vmem:[#allocation3 + $0x20c] sm:$0xf] }
 0x467   : > { %6619 = vmatmul.bf16.gmra.mxu1 %v8692_v9  ;;  %v8552_v53 = vor.u32 %v9429_v14, %v8549_v62 }
 0x468   : > { %v6455_v32 = vadd.f32 %v6454_v38, %v6366_v2  ;;  %v9478_v38 = vld [vmem:[#allocation3 + $0x390] sm:$0xf0] }
 0x469   : > { %6772 = vmatmul.bf16.gmra.mxu3 %v8520_v36  ;;  %v8728_v43 = vor.u32 %v9478_v38, %v8727_v48  ;;  %v9572_v36 = vld [vmem:[#allocation9 + $0x200] sm:$0xff]  ;;  %v8591_v38 = vld [vmem:[#allocation3 + $0x258] sm:$0xf] }
 0x46a   : > { %6683 = vmatmul.bf16.gmra.mxu2 %v8516_v37  ;;  %v6538_v61 = vpop.f32.mrf.mxu0  ;;  %6919 = vmatpush.bf16.msra.mxu1 %v9572_v36 }
 0x46b   : > { %v11457_v59 = vadd.f32 %v6538_v61, %v6450_v46  ;;  %v8488_v46 = vor.u32 %v9412_v1, %v8485_v25  ;;  %v9443_v25 = vld [vmem:[#allocation3 + $0x278] sm:$0xf0] }
 0x46c   : > { %v6457_v11 = vpop.f32.mrf.mxu3  ;;  %v6582_v54 = vpop.f32.mrf.mxu1  ;;  %v8592_v48 = vor.u32 %v9443_v25, %v8591_v38  ;;  %v8799_v25 = vld [vmem:[#allocation3 + $0x400] sm:$0xf] }
 0x46d   : > { %v6368_v20 = vpop.f32.mrf.mxu2  ;;  %v11462_v34 = vadd.f32 %v6582_v54, %v11322_v18  ;;  %v8521_v54 = vld [vmem:[#allocation3 + $0x1ec] sm:$0xf0] }
 0x46e   : > { %v6369_v26 = vadd.f32 %v6368_v20, %v6280_v52 }
 0x470   : > { %v6458_v33 = vadd.f32 %v6457_v11, %v6369_v26 }
 0x472   : > { %v6541_v51 = vpop.f32.mrf.mxu0 }
 0x473   : > { %v11464_v58 = vadd.f32 %v6541_v51, %v6453_v30  ;;  %v9487_v51 = vld [vmem:[#allocation3 + $0x3d8] sm:$0xf0] }
 0x474   : > { %v6459_v22 = vpop.f32.mrf.mxu3  ;;  %v6585_v13 = vpop.f32.mrf.mxu1 }
 0x475   : > { %v6370_v10 = vpop.f32.mrf.mxu2  ;;  %v11469_v18 = vadd.f32 %v6585_v13, %v11335_v39  ;;  %6856 = vmatmul.bf16.gmra.mxu0 %v8488_v46  ;;  %v6285_v39 = vadd.f32 %v11370_v3, %v11400_v4  ;;  %v6287_v4 = vadd.f32 %v11370_v3, %v11406_v56  ;;  %v8763_v46 = vld [vmem:[#allocation3 + $0x3b8] sm:$0xf]  ;;  %v9438_v13 = vld [vmem:[#allocation3 + $0x254] sm:$0xf] }
 0x476   : > { %v6371_v15 = vadd.f32 %v6370_v10, %v6282_v41  ;;  %v8764_v10 = vor.u32 %v9487_v51, %v8763_v46  ;;  %v8588_v62 = vor.u32 %v9438_v13, %v8585_v28 }
 0x477   : > { %6624 = vmatmul.bf16.gmra.mxu1 %v8728_v43 }
 0x478   : > { %v6460_v30 = vadd.f32 %v6459_v22, %v6371_v15  ;;  %v9421_v22 = vld [vmem:[#allocation3 + $0x1cc] sm:$0xf] }
 0x479   : > { %6777 = vmatmul.bf16.gmra.mxu3 %v8556_v27 }
 0x47a   : > { %6688 = vmatmul.bf16.gmra.mxu2 %v8552_v53  ;;  %v6543_v50 = vpop.f32.mrf.mxu0 }
 0x47b   : > { %v11471_v9 = vadd.f32 %v6543_v50, %v6455_v32  ;;  %v8524_v32 = vor.u32 %v9421_v22, %v8521_v54  ;;  %v8557_v50 = vld [vmem:[#allocation3 + $0x234] sm:$0xf0] }
 0x47c   : > { %v6462_v40 = vpop.f32.mrf.mxu3  ;;  %v6587_v2 = vpop.f32.mrf.mxu1 }
 0x47d   : > { %v6373_v37 = vpop.f32.mrf.mxu2  ;;  %v11476_v11 = vadd.f32 %v6587_v2, %v11342_v17  ;;  %v9452_v2 = vld [vmem:[#allocation3 + $0x2c0] sm:$0xf0] }
 0x47e   : > { %v6374_v61 = vadd.f32 %v6373_v37, %v6285_v39  ;;  %v9430_v37 = vld [vmem:[#allocation3 + $0x214] sm:$0xf] }
 0x480   : > { %v6463_v52 = vadd.f32 %v6462_v40, %v6374_v61  ;;  %v9496_v61 = vld [vmem:[#allocation3 + $0x420] sm:$0xf0] }
 0x482   : > { %v6546_v26 = vpop.f32.mrf.mxu0 }
 0x483   : > { %v11478_v42 = vadd.f32 %v6546_v26, %v6458_v33 }
 0x484   : > { %v6464_v20 = vpop.f32.mrf.mxu3  ;;  %v6590_v1 = vpop.f32.mrf.mxu1 }
 0x485   : > { %v6375_v41 = vpop.f32.mrf.mxu2  ;;  %v11483_v17 = vadd.f32 %v6590_v1, %v11349_v8  ;;  %6861 = vmatmul.bf16.gmra.mxu0 %v8524_v32  ;;  %v8621_v32 = vld [vmem:[#allocation3 + $0x2bc] sm:$0xf0] }
 0x486   : > { %v6376_v14 = vadd.f32 %v6375_v41, %v6287_v4  ;;  %v8800_v4 = vor.u32 %v9496_v61, %v8799_v25  ;;  %v8657_v61 = vld [vmem:[#allocation3 + $0x304] sm:$0xf0] }
 0x487   : > { %6629 = vmatmul.bf16.gmra.mxu1 %v8764_v10 }
 0x488   : > { %v6465_v33 = vadd.f32 %v6464_v20, %v6376_v14  ;;  %v8560_v20 = vor.u32 %v9430_v37, %v8557_v50 }
 0x489   : > { %6782 = vmatmul.bf16.gmra.mxu3 %v8592_v48 }
 0x48a   : > { %6693 = vmatmul.bf16.gmra.mxu2 %v8588_v62  ;;  %v6548_v3 = vpop.f32.mrf.mxu0  ;;  %v8593_v62 = vld [vmem:[#allocation3 + $0x27c] sm:$0xf0] }
 0x48b   : > { %v11485_v56 = vadd.f32 %v6548_v3, %v6460_v30  ;;  %v8627_v30 = vld [vmem:[#allocation3 + $0x2a0] sm:$0xf]  ;;  %v9461_v3 = vld [vmem:[#allocation3 + $0x308] sm:$0xf0] }
 0x48c   : > { %v6743_v27 = vpop.f32.mrf.mxu3  ;;  %v6592_v43 = vpop.f32.mrf.mxu1 }
 0x48d   : > { %v6654_v15 = vpop.f32.mrf.mxu2  ;;  %v11488_v8 = vadd.f32 %v6592_v43, %v11357_v16  ;;  %v9447_v16 = vld [vmem:[#allocation3 + $0x29c] sm:$0xf] }
 0x48e   : > { %v6655_v53 = vadd.f32 %v6654_v15, %v11413_v47  ;;  %v8628_v47 = vor.u32 %v9452_v2, %v8627_v30  ;;  %v9439_v43 = vld [vmem:[#allocation3 + $0x25c] sm:$0xf]  ;;  %v9505_v15 = vld [vmem:[#allocation3 + $0x468] sm:$0xf0] }
 0x48f   : > { %v8596_v50 = vor.u32 %v9439_v43, %v8593_v62 }
 0x490   : > { %v6744_v40 = vadd.f32 %v6743_v27, %v6655_v53 }
 0x492   : > { %v6551_v39 = vpop.f32.mrf.mxu0 }
 0x493   : > { %v11491_v54 = vadd.f32 %v6551_v39, %v6463_v52  ;;  %v8624_v52 = vor.u32 %v9447_v16, %v8621_v32  ;;  %v8835_v39 = vld [vmem:[#allocation3 + $0x448] sm:$0xf] }
 0x494   : > { %v6745_v36 = vpop.f32.mrf.mxu3  ;;  %v6595_v26 = vpop.f32.mrf.mxu1 }
 0x495   : > { %v6656_v22 = vpop.f32.mrf.mxu2  ;;  %v11494_v51 = vadd.f32 %v6595_v26, %v11365_v0  ;;  %6866 = vmatmul.bf16.gmra.mxu0 %v8560_v20  ;;  %v8836_v20 = vor.u32 %v9505_v15, %v8835_v39  ;;  %v8693_v15 = vld [vmem:[#allocation3 + $0x34c] sm:$0xf0] }
 0x496   : > { %v6657_v1 = vadd.f32 %v6656_v22, %v11420_v35 }
 0x497   : > { %6634 = vmatmul.bf16.gmra.mxu1 %v8800_v4 }
 0x498   : > { %v6746_v38 = vadd.f32 %v6745_v36, %v6657_v1 }
 0x499   : > { %6787 = vmatmul.bf16.gmra.mxu3 %v8628_v47 }
 0x49a   : > { %6698 = vmatmul.bf16.gmra.mxu2 %v8624_v52  ;;  %v6553_v41 = vpop.f32.mrf.mxu0  ;;  %v8629_v52 = vld [vmem:[#allocation3 + $0x2c4] sm:$0xf0] }
 0x49b   : > { %v11497_v13 = vadd.f32 %v6553_v41, %v6465_v33  ;;  %v8663_v33 = vld [vmem:[#allocation3 + $0x2e8] sm:$0xf] }
 0x49c   : > { %v6748_v46 = vpop.f32.mrf.mxu3  ;;  %v6597_v28 = vpop.f32.mrf.mxu1 }
 0x49d   : > { %v6659_v48 = vpop.f32.mrf.mxu2  ;;  %v11500_v0 = vadd.f32 %v6597_v28, %v11377_v21  ;;  %v9456_v21 = vld [vmem:[#allocation3 + $0x2e4] sm:$0xf]  ;;  %v9470_v28 = vld [vmem:[#allocation3 + $0x350] sm:$0xf0] }
 0x49e   : > { %v6660_v10 = vadd.f32 %v6659_v48, %v11427_v24  ;;  %v8664_v24 = vor.u32 %v9461_v3, %v8663_v33  ;;  %v9448_v48 = vld [vmem:[#allocation3 + $0x2a4] sm:$0xf] }
 0x4a0   : > { %v6749_v14 = vadd.f32 %v6748_v46, %v6660_v10  ;;  %v8311_v46 = vld [vmem:[#allocation3 + $0x20] sm:$0xf]  ;;  %v9372_v10 = vld [vmem:[#allocation3 + $0x40] sm:$0xf0] }
 0x4a2   : > { %v6832_v35 = vpop.f32.mrf.mxu0 }
 0x4a3   : > { %v11503_v53 = vadd.f32 %v6832_v35, %v6744_v40  ;;  %v8660_v40 = vor.u32 %v9456_v21, %v8657_v61  ;;  %v8699_v35 = vld [vmem:[#allocation3 + $0x330] sm:$0xf] }
 0x4a4   : > { %v6750_v27 = vpop.f32.mrf.mxu3  ;;  %v6600_v36 = vpop.f32.mrf.mxu1 }
 0x4a5   : > { %v6661_v2 = vpop.f32.mrf.mxu2  ;;  %v11506_v37 = vadd.f32 %v6600_v36, %v11384_v60  ;;  %6871 = vmatmul.bf16.gmra.mxu0 %v8596_v50  ;;  %v8312_v50 = vor.u32 %v9372_v10, %v8311_v46 }
 0x4a6   : > { %v6662_v26 = vadd.f32 %v6661_v2, %v11434_v29 }
 0x4a7   : > { %6639 = vmatmul.bf16.gmra.mxu1 %v8836_v20 }
 0x4a8   : > { %v6751_v30 = vadd.f32 %v6750_v27, %v6662_v26  ;;  %v8632_v27 = vor.u32 %v9448_v48, %v8629_v52  ;;  %v8729_v48 = vld [vmem:[#allocation3 + $0x394] sm:$0xf0] }
 0x4a9   : > { %6792 = vmatmul.bf16.gmra.mxu3 %v8664_v24 }
 0x4aa   : > { %6703 = vmatmul.bf16.gmra.mxu2 %v8660_v40  ;;  %v6834_v22 = vpop.f32.mrf.mxu0  ;;  %v8665_v40 = vld [vmem:[#allocation3 + $0x30c] sm:$0xf0] }
 0x4ab   : > { %v11509_v16 = vadd.f32 %v6834_v22, %v6746_v38 }
 0x4ac   : > { %v6753_v25 = vpop.f32.mrf.mxu3  ;;  %v6602_v32 = vpop.f32.mrf.mxu1 }
 0x4ad   : > { %v6664_v47 = vpop.f32.mrf.mxu2  ;;  %v11512_v60 = vadd.f32 %v6602_v32, %v11390_v49  ;;  %v9465_v49 = vld [vmem:[#allocation3 + $0x32c] sm:$0xf]  ;;  %v9479_v32 = vld [vmem:[#allocation3 + $0x398] sm:$0xf0] }
 0x4ae   : > { %v6665_v4 = vadd.f32 %v6664_v47, %v11441_v55  ;;  %v8700_v55 = vor.u32 %v9470_v28, %v8699_v35  ;;  %v8696_v39 = vor.u32 %v9465_v49, %v8693_v15  ;;  %v9457_v47 = vld [vmem:[#allocation3 + $0x2ec] sm:$0xf] }
 0x4af   : > { %v8668_v46 = vor.u32 %v9457_v47, %v8665_v40 }
 0x4b0   : > { %v6754_v1 = vadd.f32 %v6753_v25, %v6665_v4  ;;  %v8347_v25 = vld [vmem:[#allocation3 + $0x68] sm:$0xf]  ;;  %v9381_v4 = vld [vmem:[#allocation3 + $0x88] sm:$0xf0] }
 0x4b1   : > { %v8348_v10 = vor.u32 %v9381_v4, %v8347_v25  ;;  %v8771_v25 = vld [vmem:[#allocation3 + $0x3c0] sm:$0xf] }
 0x4b2   : > { %v6837_v41 = vpop.f32.mrf.mxu0 }
 0x4b3   : > { %v11515_v62 = vadd.f32 %v6837_v41, %v6749_v14 }
 0x4b4   : > { %v6755_v29 = vpop.f32.mrf.mxu3  ;;  %v6605_v38 = vpop.f32.mrf.mxu1 }
 0x4b5   : > { %v6666_v3 = vpop.f32.mrf.mxu2  ;;  %v11518_v43 = vadd.f32 %v6605_v38, %v11396_v12  ;;  %6876 = vmatmul.bf16.gmra.mxu0 %v8632_v27 }
 0x4b6   : > { %v6667_v36 = vadd.f32 %v6666_v3, %v11448_v7 }
 0x4b7   : > { %6920 = vmatmul.bf16.vlgmr.msra.gmra.mxu1 %v8312_v50  ;;  %v8701_v50 = vld [vmem:[#allocation3 + $0x354] sm:$0xf0] }
 0x4b8   : > { %v6756_v33 = vadd.f32 %v6755_v29, %v6667_v36  ;;  %v8735_v29 = vld [vmem:[#allocation3 + $0x378] sm:$0xf]  ;;  %v8383_v36 = vld [vmem:[#allocation3 + $0xb0] sm:$0xf] }
 0x4b9   : > { %6797 = vmatmul.bf16.gmra.mxu3 %v8700_v55 }
 0x4ba   : > { %6708 = vmatmul.bf16.gmra.mxu2 %v8696_v39  ;;  %v6839_v2 = vpop.f32.mrf.mxu0 }
 0x4bb   : > { %v11521_v21 = vadd.f32 %v6839_v2, %v6751_v30  ;;  %v9488_v2 = vld [vmem:[#allocation3 + $0x3e0] sm:$0xf0] }
 0x4bc   : > { %v6758_v14 = vpop.f32.mrf.mxu3  ;;  %v6607_v61 = vpop.f32.mrf.mxu1 }
 0x4bd   : > { %v6669_v24 = vpop.f32.mrf.mxu2  ;;  %v11524_v12 = vadd.f32 %v6607_v61, %v11402_v19  ;;  %v9474_v19 = vld [vmem:[#allocation3 + $0x374] sm:$0xf] }
 0x4be   : > { %v6670_v20 = vadd.f32 %v6669_v24, %v11455_v23  ;;  %v8736_v23 = vor.u32 %v9479_v32, %v8735_v29  ;;  %v8732_v35 = vor.u32 %v9474_v19, %v8729_v48  ;;  %v9390_v61 = vld [vmem:[#allocation3 + $0xd0] sm:$0xf0]  ;;  %v8765_v32 = vld [vmem:[#allocation3 + $0x3dc] sm:$0xf0] }
 0x4bf   : > { %v8384_v47 = vor.u32 %v9390_v61, %v8383_v36  ;;  %v9497_v36 = vld [vmem:[#allocation3 + $0x428] sm:$0xf0]  ;;  %v9492_v61 = vld [vmem:[#allocation3 + $0x404] sm:$0xf] }
 0x4c0   : > { %v6759_v26 = vadd.f32 %v6758_v14, %v6670_v20 }
 0x4c2   : > { %v6842_v22 = vpop.f32.mrf.mxu0 }
 0x4c3   : > { %v11527_v52 = vadd.f32 %v6842_v22, %v6754_v1  ;;  %v9483_v22 = vld [vmem:[#allocation3 + $0x3bc] sm:$0xf] }
 0x4c4   : > { %v6760_v7 = vpop.f32.mrf.mxu3  ;;  %v6610_v30 = vpop.f32.mrf.mxu1 }
 0x4c5   : > { %v6671_v41 = vpop.f32.mrf.mxu2  ;;  %v11530_v28 = vadd.f32 %v6610_v30, %v11408_v31  ;;  %6881 = vmatmul.bf16.gmra.mxu0 %v8668_v46  ;;  %v8768_v30 = vor.u32 %v9483_v22, %v8765_v32 }
 0x4c6   : > { %v6672_v27 = vadd.f32 %v6671_v41, %v11462_v34  ;;  %v9466_v34 = vld [vmem:[#allocation3 + $0x334] sm:$0xf] }
 0x4c7   : > { %6925 = vmatmul.bf16.gmra.mxu1 %v8348_v10  ;;  %v8704_v20 = vor.u32 %v9466_v34, %v8701_v50 }
 0x4c8   : > { %v6761_v38 = vadd.f32 %v6760_v7, %v6672_v27 }
 0x4c9   : > { %6802 = vmatmul.bf16.gmra.mxu3 %v8736_v23 }
 0x4ca   : > { %6713 = vmatmul.bf16.gmra.mxu2 %v8732_v35  ;;  %v6844_v3 = vpop.f32.mrf.mxu0 }
 0x4cb   : > { %v11533_v49 = vadd.f32 %v6844_v3, %v6756_v33  ;;  %v8419_v3 = vld [vmem:[#allocation3 + $0xf8] sm:$0xf] }
 0x4cc   : > { %v6763_v1 = vpop.f32.mrf.mxu3  ;;  %v6612_v15 = vpop.f32.mrf.mxu1 }
 0x4cd   : > { %v6674_v55 = vpop.f32.mrf.mxu2  ;;  %v11536_v31 = vadd.f32 %v6612_v15, %v11415_v57  ;;  %v8772_v57 = vor.u32 %v9488_v2, %v8771_v25 }
 0x4d2   : > { %v6847_v14 = vpop.f32.mrf.mxu0 }
 0x4d3   : > { %v11538_v24 = vadd.f32 %v6847_v14, %v6759_v26  ;;  %v9399_v14 = vld [vmem:[#allocation3 + $0x118] sm:$0xf0] }
 0x4d4   : > { %v6765_v39 = vpop.f32.mrf.mxu3  ;;  %v6615_v40 = vpop.f32.mrf.mxu1 }
 0x4d5   : > { %v6676_v7 = vpop.f32.mrf.mxu2  ;;  %v11541_v33 = vadd.f32 %v6615_v40, %v11422_v45  ;;  %6886 = vmatmul.bf16.gmra.mxu0 %v8704_v20  ;;  %v6675_v45 = vadd.f32 %v6674_v55, %v11469_v18  ;;  %v8807_v18 = vld [vmem:[#allocation3 + $0x408] sm:$0xf] }
 0x4d6   : > { %v6677_v4 = vadd.f32 %v6676_v7, %v11476_v11  ;;  %v8737_v11 = vld [vmem:[#allocation3 + $0x39c] sm:$0xf0]  ;;  %v8808_v20 = vor.u32 %v9497_v36, %v8807_v18 }
 0x4d7   : > { %6930 = vmatmul.bf16.gmra.mxu1 %v8384_v47  ;;  %v6764_v35 = vadd.f32 %v6763_v1, %v6675_v45  ;;  %v8420_v1 = vor.u32 %v9399_v14, %v8419_v3 }
 0x4d8   : > { %v6766_v46 = vadd.f32 %v6765_v39, %v6677_v4  ;;  %v9475_v39 = vld [vmem:[#allocation3 + $0x37c] sm:$0xf] }
 0x4d9   : > { %6807 = vmatmul.bf16.gmra.mxu3 %v8772_v57  ;;  %v8740_v2 = vor.u32 %v9475_v39, %v8737_v11  ;;  %v8455_v11 = vld [vmem:[#allocation3 + $0x140] sm:$0xf]  ;;  %v9501_v39 = vld [vmem:[#allocation3 + $0x44c] sm:$0xf] }
 0x4da   : > { %6718 = vmatmul.bf16.gmra.mxu2 %v8768_v30  ;;  %v6849_v29 = vpop.f32.mrf.mxu0 }
 0x4db   : > { %v11544_v41 = vadd.f32 %v6849_v29, %v6761_v38  ;;  %v8773_v29 = vld [vmem:[#allocation3 + $0x3e4] sm:$0xf0] }
 0x4dc   : > { %v6768_v26 = vpop.f32.mrf.mxu3  ;;  %v6617_v19 = vpop.f32.mrf.mxu1 }
 0x4dd   : > { %v6679_v48 = vpop.f32.mrf.mxu2  ;;  %v11548_v23 = vadd.f32 %v6617_v19, %v11429_v5  ;;  %v8843_v19 = vld [vmem:[#allocation3 + $0x450] sm:$0xf] }
 0x4de   : > { %v6680_v10 = vadd.f32 %v6679_v48, %v11483_v17  ;;  %v8801_v17 = vld [vmem:[#allocation3 + $0x424] sm:$0xf0] }
 0x4df   : > { %v8804_v7 = vor.u32 %v9492_v61, %v8801_v17 }
 0x4e0   : > { %v6769_v27 = vadd.f32 %v6768_v26, %v6680_v10  ;;  %v9484_v10 = vld [vmem:[#allocation3 + $0x3c4] sm:$0xf] }
 0x4e2   : > { %v6852_v50 = vpop.f32.mrf.mxu0 }
 0x4e3   : > { %v11551_v38 = vadd.f32 %v6852_v50, %v6764_v35  ;;  %v9408_v35 = vld [vmem:[#allocation3 + $0x160] sm:$0xf0] }
 0x4e4   : > { %v6770_v15 = vpop.f32.mrf.mxu3  ;;  %v6620_v34 = vpop.f32.mrf.mxu1  ;;  %v8456_v14 = vor.u32 %v9408_v35, %v8455_v11 }
 0x4e5   : > { %v6681_v55 = vpop.f32.mrf.mxu2  ;;  %v11554_v5 = vadd.f32 %v6620_v34, %v11436_v6  ;;  %6891 = vmatmul.bf16.gmra.mxu0 %v8740_v2 }
 0x4e6   : > { %v6682_v40 = vadd.f32 %v6681_v55, %v11488_v8  ;;  %v9506_v8 = vld [vmem:[#allocation3 + $0x470] sm:$0xf0] }
 0x4e7   : > { %6935 = vmatmul.bf16.gmra.mxu1 %v8420_v1 }
 0x4e8   : > { %v6771_v25 = vadd.f32 %v6770_v15, %v6682_v40  ;;  %v8844_v15 = vor.u32 %v9506_v8, %v8843_v19 }
 0x4e9   : > { %6812 = vmatmul.bf16.gmra.mxu3 %v8808_v20 }
 0x4ea   : > { %6723 = vmatmul.bf16.gmra.mxu2 %v8804_v7  ;;  %v6854_v32 = vpop.f32.mrf.mxu0  ;;  %v8809_v7 = vld [vmem:[#allocation3 + $0x42c] sm:$0xf0] }
 0x4eb   : > { %v11557_v57 = vadd.f32 %v6854_v32, %v6766_v46  ;;  %v8776_v46 = vor.u32 %v9484_v10, %v8773_v29  ;;  %v9493_v32 = vld [vmem:[#allocation3 + $0x40c] sm:$0xf] }
 0x4ec   : > { %v6773_v22 = vpop.f32.mrf.mxu3  ;;  %v6622_v47 = vpop.f32.mrf.mxu1  ;;  %v8812_v29 = vor.u32 %v9493_v32, %v8809_v7 }
 0x4ed   : > { %v6684_v4 = vpop.f32.mrf.mxu2  ;;  %v11560_v6 = vadd.f32 %v6622_v47, %v11443_v63  ;;  %v8491_v47 = vld [vmem:[#allocation3 + $0x188] sm:$0xf] }
 0x4ee   : > { %v6685_v30 = vadd.f32 %v6684_v4, %v11494_v51  ;;  %v8837_v51 = vld [vmem:[#allocation3 + $0x46c] sm:$0xf0]  ;;  %v9417_v4 = vld [vmem:[#allocation3 + $0x1a8] sm:$0xf0] }
 0x4ef   : > { %v8840_v18 = vor.u32 %v9501_v39, %v8837_v51 }
 0x4f0   : > { %v6774_v26 = vadd.f32 %v6773_v22, %v6685_v30 }
 0x4f2   : > { %v6857_v48 = vpop.f32.mrf.mxu0 }
 0x4f3   : > { %v11563_v3 = vadd.f32 %v6857_v48, %v6769_v27 }
 0x4f4   : > { %v6775_v45 = vpop.f32.mrf.mxu3  ;;  %v6625_v50 = vpop.f32.mrf.mxu1 }
 0x4f5   : > { %v6686_v36 = vpop.f32.mrf.mxu2  ;;  %v11566_v63 = vadd.f32 %v6625_v50, %v11450_v44  ;;  %6896 = vmatmul.bf16.gmra.mxu0 %v8776_v46  ;;  %v9502_v50 = vld [vmem:[#allocation3 + $0x454] sm:$0xf] }
 0x4f6   : > { %v6687_v2 = vadd.f32 %v6686_v36, %v11500_v0 }
 0x4f7   : > { %6940 = vmatmul.bf16.gmra.mxu1 %v8456_v14 }
 0x4f8   : > { %v6776_v34 = vadd.f32 %v6775_v45, %v6687_v2  ;;  %v9426_v2 = vld [vmem:[#allocation3 + $0x1f0] sm:$0xf0] }
 0x4f9   : > { %6817 = vmatmul.bf16.gmra.mxu3 %v8844_v15 }
 0x4fa   : > { %6728 = vmatmul.bf16.gmra.mxu2 %v8840_v18  ;;  %v6859_v55 = vpop.f32.mrf.mxu0 }
 0x4fb   : > { %v11569_v61 = vadd.f32 %v6859_v55, %v6771_v25 }
 0x4fc   : > { %v6778_v27 = vpop.f32.mrf.mxu3  ;;  %v6627_v17 = vpop.f32.mrf.mxu1 }
 0x4fd   : > { %v6689_v20 = vpop.f32.mrf.mxu2  ;;  %v11572_v44 = vadd.f32 %v6627_v17, %v11457_v59  ;;  %v8492_v59 = vor.u32 %v9417_v4, %v8491_v47 }
 0x4fe   : > { %v6690_v1 = vadd.f32 %v6689_v20, %v11506_v37 }
 0x500   : > { %v6779_v40 = vadd.f32 %v6778_v27, %v6690_v1 }
 0x502   : > { %v6862_v0 = vpop.f32.mrf.mxu0 }
 0x503   : > { %v11575_v30 = vadd.f32 %v6862_v0, %v6774_v26 }
 0x504   : > { %v6780_v22 = vpop.f32.mrf.mxu3  ;;  %v6630_v19 = vpop.f32.mrf.mxu1 }
 0x505   : > { %v6691_v25 = vpop.f32.mrf.mxu2  ;;  %v11578_v8 = vadd.f32 %v6630_v19, %v11464_v58  ;;  %6901 = vmatmul.bf16.gmra.mxu0 %v8812_v29  ;;  %v8845_v58 = vld [vmem:[#allocation3 + $0x474] sm:$0xf0]  ;;  %v9435_v19 = vld [vmem:[#allocation3 + $0x238] sm:$0xf0] }
 0x506   : > { %v6692_v45 = vadd.f32 %v6691_v25, %v11512_v60  ;;  %v8848_v39 = vor.u32 %v9502_v50, %v8845_v58  ;;  %v8527_v60 = vld [vmem:[#allocation3 + $0x1d0] sm:$0xf]  ;;  %v8563_v29 = vld [vmem:[#allocation3 + $0x218] sm:$0xf] }
 0x507   : > { %6945 = vmatmul.bf16.gmra.mxu1 %v8492_v59 }
 0x508   : > { %v6781_v37 = vadd.f32 %v6780_v22, %v6692_v45 }
 0x50a   : > { %v6864_v10 = vpop.f32.mrf.mxu0 }
 0x50b   : > { %v11581_v11 = vadd.f32 %v6864_v10, %v6776_v34 }
 0x50c   : > { %v6783_v48 = vpop.f32.mrf.mxu3  ;;  %v6632_v35 = vpop.f32.mrf.mxu1 }
 0x50d   : > { %v6694_v46 = vpop.f32.mrf.mxu2  ;;  %v11584_v26 = vadd.f32 %v6632_v35, %v11471_v9  ;;  %v8528_v9 = vor.u32 %v9426_v2, %v8527_v60  ;;  %v9444_v60 = vld [vmem:[#allocation3 + $0x280] sm:$0xf0] }
 0x50e   : > { %v6695_v15 = vadd.f32 %v6694_v46, %v11518_v43 }
 0x510   : > { %v6784_v36 = vadd.f32 %v6783_v48, %v6695_v15  ;;  %v8564_v48 = vor.u32 %v9435_v19, %v8563_v29  ;;  %v7058_v29 = vld [vmem:[#allocation10 + $0x60] sm:$0xff]  ;;  %v9462_v19 = vld [vmem:[#allocation3 + $0x310] sm:$0xf0] }
 0x512   : > { %v6867_v14 = vpop.f32.mrf.mxu0 }
 0x513   : > { %v11587_v18 = vadd.f32 %v6867_v14, %v6779_v40  ;;  %v8599_v14 = vld [vmem:[#allocation3 + $0x260] sm:$0xf] }
 0x514   : > { %v6785_v51 = vpop.f32.mrf.mxu3  ;;  %v6635_v27 = vpop.f32.mrf.mxu1 }
 0x515   : > { %v6696_v34 = vpop.f32.mrf.mxu2  ;;  %v11590_v55 = vadd.f32 %v6635_v27, %v11478_v42  ;;  %6906 = vmatmul.bf16.gmra.mxu0 %v8848_v39  ;;  %v7061_v42 = vld [vmem:[#allocation10 + $0x78] sm:$0xff] }
 0x516   : > { %v6697_v17 = vadd.f32 %v6696_v34, %v11524_v12  ;;  %7063 = vmatpush.msrb.mxu2 %v7061_v42  ;;  %v8600_v34 = vor.u32 %v9444_v60, %v8599_v14 }
 0x517   : > { %6950 = vmatmul.bf16.gmra.mxu1 %v8528_v9 }
 0x518   : > { %v6786_v43 = vadd.f32 %v6785_v51, %v6697_v17  ;;  %v7060_v51 = vld [vmem:[#allocation10 + $0x70] sm:$0xff] }
 0x519   : > { %7064 = vmatpush.msrb.mxu2 %v7060_v51  ;;  %v9480_v51 = vld [vmem:[#allocation3 + $0x3a0] sm:$0xf0] }
 0x51a   : > { %v6869_v20 = vpop.f32.mrf.mxu0 }
 0x51b   : > { %v11593_v7 = vadd.f32 %v6869_v20, %v6781_v37 }
 0x51c   : > { %v6788_v1 = vpop.f32.mrf.mxu3  ;;  %v6637_v22 = vpop.f32.mrf.mxu1 }
 0x51d   : > { %v6699_v0 = vpop.f32.mrf.mxu2  ;;  %v11596_v40 = vadd.f32 %v6637_v22, %v11485_v56  ;;  %v9453_v22 = vld [vmem:[#allocation3 + $0x2c8] sm:$0xf0] }
 0x51e   : > { %v6700_v32 = vadd.f32 %v6699_v0, %v11530_v28 }
 0x520   : > { %v6789_v47 = vadd.f32 %v6788_v1, %v6700_v32  ;;  %v8635_v1 = vld [vmem:[#allocation3 + $0x2a8] sm:$0xf] }
 0x522   : > { %v6872_v4 = vpop.f32.mrf.mxu0 }
 0x523   : > { %v11599_v12 = vadd.f32 %v6872_v4, %v6784_v36 }
 0x524   : > { %v6640_v25 = vpop.f32.mrf.mxu1  ;;  %v6790_v45 = vpop.f32.mrf.mxu3 }
 0x525   : > { %v6701_v59 = vpop.f32.mrf.mxu2  ;;  %v11602_v37 = vadd.f32 %v6640_v25, %v11491_v54 }
 0x526   : > { %v6702_v56 = vadd.f32 %v6701_v59, %v11536_v31 }
 0x527   : > { %6955 = vmatmul.bf16.gmra.mxu1 %v8564_v48 }
 0x528   : > { %v6791_v10 = vadd.f32 %v6790_v45, %v6702_v56  ;;  %v7057_v56 = vld [vmem:[#allocation10 + $0x58] sm:$0xff] }
 0x52a   : > { %v6874_v28 = vpop.f32.mrf.mxu0 }
 0x52b   : > { %v11605_v35 = vadd.f32 %v6874_v28, %v6786_v43  ;;  %v7059_v43 = vld [vmem:[#allocation10 + $0x68] sm:$0xff]  ;;  %v9471_v28 = vld [vmem:[#allocation3 + $0x358] sm:$0xf0] }
 0x52c   : > { %v6642_v46 = vpop.f32.mrf.mxu1  ;;  %v6793_v36 = vpop.f32.mrf.mxu3  ;;  %7065 = vmatpush.msrb.mxu2 %v7059_v43 }
 0x52d   : > { %v6704_v15 = vpop.f32.mrf.mxu2  ;;  %v11608_v50 = vadd.f32 %v6642_v46, %v11497_v13 }
 0x52e   : > { %v6705_v58 = vadd.f32 %v6704_v15, %v11541_v33  ;;  %7066 = vmatpush.msrb.mxu2 %v7058_v29 }
 0x530   : > { %v6794_v39 = vadd.f32 %v6793_v36, %v6705_v58  ;;  %7067 = vmatpush.msrb.mxu2 %v7057_v56  ;;  %v7056_v36 = vld [vmem:[#allocation10 + $0x50] sm:$0xff]  ;;  %v7099_v56 = vld [vmem:[#allocation12 + $0x78] sm:$0xff] }
 0x531   : > { %7101 = vmatpush.msrb.mxu3 %v7099_v56 }
 0x532   : > { %v6877_v54 = vpop.f32.mrf.mxu0  ;;  %7068 = vmatpush.msrb.mxu2 %v7056_v36 }
 0x533   : > { %v11611_v31 = vadd.f32 %v6877_v54, %v6789_v47  ;;  %v8636_v47 = vor.u32 %v9453_v22, %v8635_v1  ;;  %v7054_v1 = vld [vmem:[#allocation10 + $0x40] sm:$0xff]  ;;  %v8815_v22 = vld [vmem:[#allocation3 + $0x410] sm:$0xf] }
 0x534   : > { %v6921_v2 = vpop.f32.mrf.mxu1 }
 0x535   : > { %v11614_v27 = vadd.f32 %v6921_v2, %v11503_v53  ;;  %v7055_v2 = vld [vmem:[#allocation10 + $0x48] sm:$0xff] }
 0x536   : > { %7069 = vmatpush.msrb.mxu2 %v7055_v2 }
 0x537   : > { %6960 = vmatmul.bf16.gmra.mxu1 %v8600_v34  ;;  %v8779_v34 = vld [vmem:[#allocation3 + $0x3c8] sm:$0xf] }
 0x538   : > { %7070 = vmatpush.msrb.mxu2 %v7054_v1 }
 0x53a   : > { %v6879_v9 = vpop.f32.mrf.mxu0 }
 0x53b   : > { %v11616_v13 = vadd.f32 %v6879_v9, %v6791_v10  ;;  %v8707_v10 = vld [vmem:[#allocation3 + $0x338] sm:$0xf]  ;;  %v9489_v9 = vld [vmem:[#allocation3 + $0x3e8] sm:$0xf0] }
 0x53c   : > { %v6923_v17 = vpop.f32.mrf.mxu1  ;;  %v8708_v15 = vor.u32 %v9471_v28, %v8707_v10  ;;  %v8780_v43 = vor.u32 %v9489_v9, %v8779_v34  ;;  %v7052_v28 = vld [vmem:[#allocation10 + $0x30] sm:$0xff] }
 0x53d   : > { %v11619_v33 = vadd.f32 %v6923_v17, %v11509_v16  ;;  %v8671_v16 = vld [vmem:[#allocation3 + $0x2f0] sm:$0xf] }
 0x53e   : > { %v8672_v45 = vor.u32 %v9462_v19, %v8671_v16  ;;  %v7053_v16 = vld [vmem:[#allocation10 + $0x38] sm:$0xff] }
 0x53f   : > { %12115 = vst [vmem:[#allocation52_spill] sm:$0xff] %v11619_v33  ;;  %v8851_v19 = vld [vmem:[#allocation3 + $0x458] sm:$0xf]  ;;  %7071 = vmatpush.msrb.mxu2 %v7053_v16 }
 0x541   : > { %7072 = vmatpush.msrb.mxu2 %v7052_v28 }
 0x542   : > { %v6882_v20 = vpop.f32.mrf.mxu0 }
 0x543   : > { %v11621_v0 = vadd.f32 %v6882_v20, %v6794_v39  ;;  %v8743_v39 = vld [vmem:[#allocation3 + $0x380] sm:$0xf] }
 0x544   : > { %v6926_v32 = vpop.f32.mrf.mxu1  ;;  %v8744_v14 = vor.u32 %v9480_v51, %v8743_v39  ;;  %v7051_v39 = vld [vmem:[#allocation10 + $0x28] sm:$0xff]  ;;  %v11673_v51 = vpop.f32.mrf.mxu3 }
 0x545   : > { %v11624_v53 = vadd.f32 %v6926_v32, %v11515_v62  ;;  %v9498_v32 = vld [vmem:[#allocation3 + $0x430] sm:$0xf0]  ;;  %7073 = vmatpush.msrb.mxu2 %v7051_v39 }
 0x547   : > { %12116 = vst [vmem:[#allocation53_spill] sm:$0xff] %v11624_v53  ;;  %6965 = vmatmul.bf16.gmra.mxu1 %v8636_v47 }
 0x54c   : > { %v6928_v42 = vpop.f32.mrf.mxu1  ;;  %v11682_v34 = vpop.f32.mrf.mxu3 }
 0x54d   : > { %v11627_v4 = vadd.f32 %v6928_v42, %v11521_v21  ;;  %v8816_v42 = vor.u32 %v9498_v32, %v8815_v22  ;;  %v7096_v22 = vld [vmem:[#allocation12 + $0x60] sm:$0xff] }
 0x54f   : > { %12117 = vst [vmem:[#allocation54_spill] sm:$0xff] %v11627_v4 }
 0x554   : > { %v6931_v25 = vpop.f32.mrf.mxu1 }
 0x555   : > { %v11630_v59 = vadd.f32 %v6931_v25, %v11527_v52  ;;  %v9507_v25 = vld [vmem:[#allocation3 + $0x478] sm:$0xf0] }
 0x557   : > { %12118 = vst [vmem:[#allocation55_spill] sm:$0xff] %v11630_v59  ;;  %6970 = vmatmul.bf16.gmra.mxu1 %v8672_v45 }
 0x55c   : > { %v6933_v48 = vpop.f32.mrf.mxu1 }
 0x55d   : > { %v11633_v62 = vadd.f32 %v6933_v48, %v11533_v49 }
 0x55f   : > { %12119 = vst [vmem:[#allocation56_spill] sm:$0xff] %v11633_v62 }
 0x564   : > { %v6936_v21 = vpop.f32.mrf.mxu1 }
 0x565   : > { %v11636_v46 = vadd.f32 %v6936_v21, %v11538_v24 }
 0x567   : > { %12120 = vst [vmem:[#allocation57_spill] sm:$0xff] %v11636_v46  ;;  %6975 = vmatmul.bf16.gmra.mxu1 %v8708_v15  ;;  %v7098_v15 = vld [vmem:[#allocation12 + $0x70] sm:$0xff] }
 0x568   : > { %7102 = vmatpush.msrb.mxu3 %v7098_v15 }
 0x56c   : > { %v6938_v58 = vpop.f32.mrf.mxu1 }
 0x56d   : > { %v11639_v52 = vadd.f32 %v6938_v58, %v11544_v41 }
 0x56f   : > { %12121 = vst [vmem:[#allocation58_spill] sm:$0xff] %v11639_v52 }
 0x574   : > { %v6941_v49 = vpop.f32.mrf.mxu1 }
 0x575   : > { %v11642_v54 = vadd.f32 %v6941_v49, %v11551_v38 }
 0x577   : > { %6980 = vmatmul.bf16.gmra.mxu1 %v8744_v14 }
 0x57c   : > { %v6943_v60 = vpop.f32.mrf.mxu1 }
 0x57d   : > { %v11645_v24 = vadd.f32 %v6943_v60, %v11557_v57 }
 0x57f   : > { %12122 = vst [vmem:[#allocation59_spill] sm:$0xff] %v11645_v24 }
 0x584   : > { %v6946_v41 = vpop.f32.mrf.mxu1 }
 0x585   : > { %v11648_v17 = vadd.f32 %v6946_v41, %v11563_v3  ;;  %v7050_v41 = vld [vmem:[#allocation10 + $0x20] sm:$0xff] }
 0x586   : > { %7074 = vmatpush.msrb.mxu2 %v7050_v41 }
 0x587   : > { %6985 = vmatmul.bf16.gmra.mxu1 %v8780_v43 }
 0x58c   : > { %v6948_v20 = vpop.f32.mrf.mxu1 }
 0x58d   : > { %v11651_v38 = vadd.f32 %v6948_v20, %v11569_v61  ;;  %v8852_v61 = vor.u32 %v9507_v25, %v8851_v19 }
 0x58f   : > { %12123 = vst [vmem:[#allocation60_spill] sm:$0xff] %v11651_v38 }
 0x594   : > { %v6951_v57 = vpop.f32.mrf.mxu1 }
 0x595   : > { %v11654_v47 = vadd.f32 %v6951_v57, %v11575_v30 }
 0x597   : > { %12124 = vst [vmem:[#allocation61_spill] sm:$0xff] %v11654_v47  ;;  %6990 = vmatmul.bf16.gmra.mxu1 %v8816_v42 }
 0x59c   : > { %v6953_v29 = vpop.f32.mrf.mxu1 }
 0x59d   : > { %v11657_v3 = vadd.f32 %v6953_v29, %v11581_v11 }
 0x59f   : > { %12125 = vst [vmem:[#allocation62_spill] sm:$0xff] %v11657_v3 }
 0x5a4   : > { %v6956_v45 = vpop.f32.mrf.mxu1 }
 0x5a5   : > { %v11660_v48 = vadd.f32 %v6956_v45, %v11587_v18  ;;  %v11671_v18 = vpop.f32.mrf.mxu2 }
 0x5a7   : > { %12126 = vst [vmem:[#allocation63_spill] sm:$0xff] %v11660_v48  ;;  %6995 = vmatmul.bf16.gmra.mxu1 %v8852_v61 }
 0x5ac   : > { %v6958_v30 = vpop.f32.mrf.mxu1 }
 0x5ad   : > { %v11663_v10 = vadd.f32 %v6958_v30, %v11593_v7  ;;  %v11675_v7 = vpop.f32.mrf.mxu0  ;;  %v11680_v60 = vpop.f32.mrf.mxu2  ;;  %v7048_v30 = vld [vmem:[#allocation10 + $0x10] sm:$0xff] }
 0x5b4   : > { %v6961_v11 = vpop.f32.mrf.mxu1 }
 0x5b5   : > { %v11666_v21 = vadd.f32 %v6961_v11, %v11599_v12  ;;  %v7097_v12 = vld [vmem:[#allocation12 + $0x68] sm:$0xff]  ;;  %v11687_v9 = vpop.f32.mrf.mxu0  ;;  %v6711_v43 = vpop.f32.mrf.mxu2  ;;  %v7001_v11 = vadd.f32 %v11619_v33, %v11614_v27 }
 0x5b6   : > { %7103 = vmatpush.msrb.mxu3 %v7097_v12 }
 0x5b8   : > { %7104 = vmatpush.msrb.mxu3 %v7096_v22 }
 0x5bc   : > { %v6963_v58 = vpop.f32.mrf.mxu1 }
 0x5bd   : > { %v11669_v36 = vadd.f32 %v6963_v58, %v11605_v35  ;;  %v11694_v32 = vpop.f32.mrf.mxu0  ;;  %v6714_v57 = vpop.f32.mrf.mxu2  ;;  %v7002_v58 = vadd.f32 %v7001_v11, %v11624_v53  ;;  %v7047_v53 = vld [vmem:[#allocation10 + $0x8] sm:$0xff] }
 0x5bf   : > { %v7003_v12 = vadd.f32 %v7002_v58, %v11627_v4 }
 0x5c1   : > { %v7004_v41 = vadd.f32 %v7003_v12, %v11630_v59  ;;  %v7093_v59 = vld [vmem:[#allocation12 + $0x48] sm:$0xff] }
 0x5c3   : > { %v7005_v22 = vadd.f32 %v7004_v41, %v11633_v62 }
 0x5c4   : > { %v6966_v49 = vpop.f32.mrf.mxu1 }
 0x5c5   : > { %v11678_v14 = vadd.f32 %v6966_v49, %v11611_v31  ;;  %v11692_v31 = vpop.f32.mrf.mxu3  ;;  %v11700_v16 = vpop.f32.mrf.mxu0 }
 0x5c6   : > { %v6716_v25 = vpop.f32.mrf.mxu2 }
 0x5cc   : > { %v6968_v2 = vpop.f32.mrf.mxu1 }
 0x5cd   : > { %v11685_v35 = vadd.f32 %v6968_v2, %v11616_v13  ;;  %v7049_v13 = vld [vmem:[#allocation10 + $0x18] sm:$0xff]  ;;  %v11698_v29 = vpop.f32.mrf.mxu3  ;;  %v11706_v45 = vpop.f32.mrf.mxu0  ;;  %v7094_v2 = vld [vmem:[#allocation12 + $0x50] sm:$0xff] }
 0x5ce   : > { %7075 = vmatpush.msrb.mxu2 %v7049_v13  ;;  %v6719_v28 = vpop.f32.mrf.mxu2 }
 0x5d0   : > { %7076 = vmatpush.msrb.mxu2 %v7048_v30 }
 0x5d2   : > { %7077 = vmatpush.msrb.mxu2 %v7047_v53 }
 0x5d4   : > { %v6971_v20 = vpop.f32.mrf.mxu1 }
 0x5d5   : > { %v11690_v1 = vadd.f32 %v6971_v20, %v11621_v0  ;;  %v7095_v0 = vld [vmem:[#allocation12 + $0x58] sm:$0xff]  ;;  %v11704_v61 = vpop.f32.mrf.mxu3  ;;  %v11717_v49 = vpop.f32.mrf.mxu0 }
 0x5d6   : > { %7105 = vmatpush.msrb.mxu3 %v7095_v0  ;;  %v6721_v20 = vpop.f32.mrf.mxu2  ;;  %v7006_v0 = vadd.f32 %v7005_v22, %v11636_v46 }
 0x5d8   : > { %7106 = vmatpush.msrb.mxu3 %v7094_v2  ;;  %v7007_v11 = vadd.f32 %v7006_v0, %v11639_v52 }
 0x5da   : > { %v7008_v58 = vadd.f32 %v7007_v11, %v11642_v54  ;;  %7107 = vmatpush.msrb.mxu3 %v7093_v59  ;;  %v6710_v59 = vadd.f32 %v11680_v60, %v11554_v5  ;;  %v6717_v60 = vadd.f32 %v6716_v25, %v11572_v44  ;;  %v6722_v44 = vadd.f32 %v6721_v20, %v11584_v26 }
 0x5dc   : > { %v11696_v42 = vpop.f32.mrf.mxu1  ;;  %v7009_v2 = vadd.f32 %v7008_v58, %v11645_v24  ;;  %v6707_v24 = vadd.f32 %v11671_v18, %v11548_v23  ;;  %v6799_v23 = vadd.f32 %v11682_v34, %v6710_v59  ;;  %v6720_v34 = vadd.f32 %v6719_v28, %v11578_v8  ;;  %v7090_v59 = vld [vmem:[#allocation12 + $0x30] sm:$0xff] }
 0x5dd   : > { %v11715_v39 = vpop.f32.mrf.mxu3  ;;  %v11726_v33 = vpop.f32.mrf.mxu0 }
 0x5de   : > { %v6724_v4 = vpop.f32.mrf.mxu2  ;;  %v7010_v41 = vadd.f32 %v7009_v2, %v11648_v17  ;;  %v6809_v25 = vadd.f32 %v11715_v39, %v6720_v34  ;;  %v7086_v34 = vld [vmem:[#allocation12 + $0x10] sm:$0xff] }
 0x5df   : > { %v6725_v8 = vadd.f32 %v6724_v4, %v11590_v55 }
 0x5e0   : > { %v7011_v62 = vadd.f32 %v7010_v41, %v11651_v38  ;;  %v6898_v55 = vadd.f32 %v11717_v49, %v6809_v25  ;;  %v7089_v49 = vld [vmem:[#allocation12 + $0x28] sm:$0xff] }
 0x5e2   : > { %v7012_v0 = vadd.f32 %v7011_v62, %v11654_v47  ;;  %v6712_v62 = vadd.f32 %v6711_v43, %v11560_v6  ;;  %v6796_v47 = vadd.f32 %v11673_v51, %v6707_v24  ;;  %v6888_v6 = vadd.f32 %v11687_v9, %v6799_v23 }
 0x5e3   : > { %v6806_v9 = vadd.f32 %v11704_v61, %v6717_v60  ;;  %v7046_v61 = vld [vmem:[#allocation10] sm:$0xff] }
 0x5e4   : > { %v11702_v19 = vpop.f32.mrf.mxu1  ;;  %v7013_v53 = vadd.f32 %v7012_v0, %v11657_v3  ;;  %v6885_v18 = vadd.f32 %v11675_v7, %v6796_v47  ;;  %v6801_v5 = vadd.f32 %v11692_v31, %v6712_v62  ;;  %7078 = vmatpush.msrb.mxu2 %v7046_v61 }
 0x5e5   : > { %v6810_v30 = vpop.f32.mrf.mxu3  ;;  %v11735_v52 = vpop.f32.mrf.mxu0  ;;  %v11766_v7 = vadd.f32 %v11702_v19, %v6888_v6  ;;  %v6895_v19 = vadd.f32 %v11706_v45, %v6806_v9  ;;  %v7091_v45 = vld [vmem:[#allocation12 + $0x38] sm:$0xff] }
 0x5e6   : > { %v7014_v11 = vadd.f32 %v7013_v53, %v11660_v48  ;;  %v6726_v58 = vpop.f32.mrf.mxu2  ;;  %v6715_v53 = vadd.f32 %v6714_v57, %v11566_v63  ;;  %v11759_v51 = vadd.f32 %v11696_v42, %v6885_v18  ;;  %v6890_v47 = vadd.f32 %v11694_v32, %v6801_v5  ;;  %v7088_v18 = vld [vmem:[#allocation12 + $0x20] sm:$0xff] }
 0x5e7   : > { %v6811_v20 = vadd.f32 %v6810_v30, %v6722_v44  ;;  %v7085_v44 = vld [vmem:[#allocation12 + $0x8] sm:$0xff] }
 0x5e8   : > { %v7015_v2 = vadd.f32 %v7014_v11, %v11663_v10  ;;  %v6804_v63 = vadd.f32 %v11698_v29, %v6715_v53 }
 0x5e9   : > { %v6900_v30 = vadd.f32 %v11726_v33, %v6811_v20 }
 0x5ea   : > { %v7016_v41 = vadd.f32 %v7015_v2, %v11666_v21  ;;  %v6893_v31 = vadd.f32 %v11700_v16, %v6804_v63  ;;  %v7092_v16 = vld [vmem:[#allocation12 + $0x40] sm:$0xff] }
 0x5eb   : > { %7108 = vmatpush.msrb.mxu3 %v7092_v16 }
 0x5ec   : > { %v11708_v56 = vpop.f32.mrf.mxu1  ;;  %v7017_v3 = vadd.f32 %v7016_v41, %v11669_v36 }
 0x5ed   : > { %v6813_v22 = vpop.f32.mrf.mxu3  ;;  %v6904_v48 = vpop.f32.mrf.mxu0  ;;  %v11773_v42 = vadd.f32 %v11708_v56, %v6890_v47  ;;  %v6727_v56 = vadd.f32 %v6726_v58, %v11596_v40  ;;  %7109 = vmatpush.msrb.mxu3 %v7091_v45  ;;  %v10022_v40 = vmov 256.0  }
 0x5ee   : > { %v7018_v11 = vadd.f32 %v7017_v3, %v11678_v14  ;;  %v6729_v43 = vpop.f32.mrf.mxu2  ;;  %v6814_v41 = vadd.f32 %v6813_v22, %v6725_v8  ;;  %9774 = vrcp.f32 %v10022_v40  ;;  %v7100_v40 = vld [vmem:[%s11996_s9] sm:$0x1] }
 0x5ef   : > { %7110 = vmatpush.msrb.mxu3 %v7090_v59 }
 0x5f0   : > { %v7019_v24 = vadd.f32 %v7018_v11, %v11685_v35  ;;  %v6903_v23 = vadd.f32 %v11735_v52, %v6814_v41  ;;  %v7062_v41 = vld [vmem:[%s11994_s7] sm:$0x1] }
 0x5f1   : > { %7111 = vmatpush.msrb.mxu3 %v7089_v49 }
 0x5f2   : > { %v7020_v3 = vadd.f32 %v7019_v24, %v11690_v1  ;;  %v7087_v24 = vld [vmem:[#allocation12 + $0x18] sm:$0xff] }
 0x5f3   : > { %7112 = vmatpush.msrb.mxu3 %v7088_v18 }
 0x5f4   : > { %v11712_v15 = vpop.f32.mrf.mxu1  ;;  %v7021_v57 = vadd.f32 %v7020_v3, %v11759_v51  ;;  %v9775_v52 = vpop.eup %9774 }
 0x5f5   : > { %v6815_v0 = vpop.f32.mrf.mxu3  ;;  %v11780_v26 = vadd.f32 %v11712_v15, %v6893_v31  ;;  %v6907_v2 = vpop.f32.mrf.mxu0  ;;  %v6730_v15 = vadd.f32 %v6729_v43, %v11602_v37  ;;  %7113 = vmatpush.msrb.mxu3 %v7087_v24  ;;  %vm7043_vm0 = vweird.f32 %v9775_v52 }
 0x5f6   : > { %v7022_v28 = vadd.f32 %v7021_v57, %v11766_v7  ;;  %v6731_v58 = vpop.f32.mrf.mxu2  ;;  %v7084_v57 = vld [vmem:[#allocation12] sm:$0xff] }
 0x5f7   : > { %7114 = vmatpush.msrb.mxu3 %v7086_v34 }
 0x5f8   : > { %v7023_v4 = vadd.f32 %v7022_v28, %v11773_v42 }
 0x5f9   : > { %7115 = vmatpush.msrb.mxu3 %v7085_v44 }
 0x5fa   : > { %v7024_v62 = vadd.f32 %v7023_v4, %v11780_v26 }
 0x5fb   : > { %7116 = vmatpush.msrb.mxu3 %v7084_v57 }
 0x5fc   : > { %v11722_v13 = vpop.f32.mrf.mxu1 }
 0x5fd   : > { %v6818_v29 = vpop.f32.mrf.mxu3  ;;  %v11786_v39 = vadd.f32 %v11722_v13, %v6895_v19  ;;  %v6816_v13 = vadd.f32 %v6815_v0, %v6727_v56  ;;  %v6909_v47 = vpop.f32.mrf.mxu0 }
 0x5fe   : > { %v6819_v33 = vadd.f32 %v6818_v29, %v6730_v15 }
 0x5ff   : > { %v7025_v22 = vadd.f32 %v7024_v62, %v11786_v39  ;;  %v6905_v5 = vadd.f32 %v6904_v48, %v6816_v13 }
 0x600   : > { %v6908_v63 = vadd.f32 %v6907_v2, %v6819_v33 }
 0x604   : > { %v11730_v12 = vpop.f32.mrf.mxu1 }
 0x605   : > { %v11792_v53 = vadd.f32 %v11730_v12, %v6898_v55  ;;  %v6732_v12 = vadd.f32 %v6731_v58, %v11608_v50  ;;  %v6820_v0 = vpop.f32.mrf.mxu3 }
 0x607   : > { %v7026_v60 = vadd.f32 %v7025_v22, %v11792_v53  ;;  %v6821_v3 = vadd.f32 %v6820_v0, %v6732_v12 }
 0x609   : > { %v6910_v9 = vadd.f32 %v6909_v47, %v6821_v3  ;;  %v12127_v47 = vld [vmem:[#allocation52_spill] sm:$0xff] }
 0x60c   : > { %v11738_v46 = vpop.f32.mrf.mxu1 }
 0x60d   : > { %v11797_v37 = vadd.f32 %v11738_v46, %v6900_v30 }
 0x60f   : > { %v7027_v43 = vadd.f32 %v7026_v60, %v11797_v37 }
 0x614   : > { %v6991_v38 = vpop.f32.mrf.mxu1 }
 0x615   : > { %v11801_v6 = vadd.f32 %v6991_v38, %v6903_v23  ;;  %v7039_v38 = vmul.f32 256.0, %v9775_v52 }
 0x617   : > { %v7028_v50 = vadd.f32 %v7027_v43, %v11801_v6  ;;  %v7040_v25 = vsub.f32 1.0, %v7039_v38  ;;  %v12129_v38 = vld [vmem:[#allocation54_spill] sm:$0xff] }
 0x619   : > { %v7041_v61 = vmul.f32 %v9775_v52, %v7040_v25  ;;  %v12132_v25 = vld [vmem:[#allocation57_spill] sm:$0xff] }
 0x61b   : > { %v7042_v2 = vadd.f32 %v9775_v52, %v7041_v61  ;;  %v12134_v61 = vld [vmem:[#allocation23_spill] sm:$0xff] }
 0x61c   : > { %v6993_v32 = vpop.f32.mrf.mxu1 }
 0x61d   : > { %v11804_v46 = vadd.f32 %v6993_v32, %v6905_v5  ;;  %v7044_v4 = vsel %vm7043_vm0, %v9775_v52, %v7042_v2 }
 0x61f   : > { %v7029_v31 = vadd.f32 %v7028_v50, %v11804_v46  ;;  %v12128_v50 = vld [vmem:[#allocation53_spill] sm:$0xff] }
 0x624   : > { %v6996_v11 = vpop.f32.mrf.mxu1 }
 0x625   : > { %v11807_v48 = vadd.f32 %v6996_v11, %v6908_v63 }
 0x627   : > { %v7030_v29 = vadd.f32 %v7029_v31, %v11807_v48  ;;  %v12130_v31 = vld [vmem:[#allocation55_spill] sm:$0xff] }
 0x62c   : > { %v6998_v8 = vpop.f32.mrf.mxu1 }
 0x62d   : > { %v11811_v32 = vadd.f32 %v6998_v8, %v6910_v9  ;;  %v12131_v8 = vld [vmem:[#allocation56_spill] sm:$0xff] }
 0x62f   : > { %v7031_v19 = vadd.f32 %v7030_v29, %v11811_v32 }
 0x631   : > { %v7032_v28 = vrot.slane %v7031_v19, 4 }
 0x633   : > { %v7033_v16 = vadd.f32 %v7032_v28, %v7031_v19 }
 0x635   : > { %v7034_v20 = vrot.slane %v7033_v16, 2 }
 0x637   : > { %v7035_v56 = vadd.f32 %v7034_v20, %v7033_v16  ;;  %v12135_v20 = vld [vmem:[#allocation26_spill] sm:$0xff] }
 0x639   : > { %v7036_v55 = vrot.slane %v7035_v56, 1 }
 0x63b   : > { %v7037_v45 = vadd.f32 %v7036_v55, %v7035_v56  ;;  %v12136_v56 = vld [vmem:[#allocation58_spill] sm:$0xff] }
 0x63d   : > { %v7045_v59 = vmul.f32 %v7044_v4, %v7037_v45  ;;  %v12137_v4 = vld [vmem:[#allocation27_spill] sm:$0xff] }
 0x63f   : > { %7079 = vmatmul.f32.vlgmr.msrb.gmra.mxu2 %v7045_v59 }
 0x6c2   : > { %v7080_v15 = vpop.f32.mrf.mxu2 }
 0x6c3   : > { %v7081_v30 = vadd.f32 %v7080_v15, %v7062_v41  ;;  %v12138_v41 = vld [vmem:[#allocation30_spill] sm:$0xff] }
 0x6c5   : > { %v7083_v62 = vmax.f32 %v7081_v30, 0.0  ;;  %v12139_v30 = vld [vmem:[#allocation59_spill] sm:$0xff] }
 0x6c7   : > { %7117 = vmatmul.f32.vlgmr.msrb.gmra.mxu3 %v7083_v62 }
 0x74a   : > { %v7118_v49 = vpop.f32.mrf.mxu3 }
 0x74b   : > { %v7119_v58 = vadd.f32 %v7118_v49, %v7100_v40  ;;  %v12140_v49 = vld [vmem:[#allocation31_spill] sm:$0xff] }
 0x74d   : > { %v9141_v13 = vmul.f32 -1.442695, %v7119_v58 }
 0x74f   : > { %9776 = vpow2.f32 %v9141_v13  ;;  %v12141_v13 = vld [vmem:[#allocation34_spill] sm:$0xff] }
 0x755   : > { %v9777_v23 = vpop.eup %9776 }
 0x756   : > { %v7124_v22 = vadd.f32 1.0, %v9777_v23 }
 0x758   : > { %9778 = vrcp.f32 %v7124_v22  ;;  %v7136_v60 = vand.u32 2147483648, %v7124_v22  ;;  %vm7130_vm2 = vweird.f32 %v7124_v22  ;;  %v7134_v24 = vand.u32 2147483647, %v7124_v22 }
 0x75a   : > { %v7137_v52 = vor.u32 1.1754944e-38, %v7136_v60  ;;  %vm7135_vm4 = vcmp.eq.f32.partialorder %v7134_v24, 8.507059e+37  ;;  %v12144_v24 = vld [vmem:[#allocation61_spill] sm:$0xff] }
 0x75e   : > { %v9779_v18 = vpop.eup %9778 }
 0x75f   : > { %v7126_v33 = vmul.f32 %v9779_v18, %v7124_v22  ;;  %vm7131_vm1 = vweird.f32 %v9779_v18 }
 0x760   : > { %vm7132_vm3 = vmor %vm7130_vm2, %vm7131_vm1 }
 0x761   : > { %v7127_v11 = vsub.f32 1.0, %v7126_v33 }
 0x763   : > { %v7128_v12 = vmul.f32 %v9779_v18, %v7127_v11  ;;  %v12142_v11 = vld [vmem:[#allocation60_spill] sm:$0xff] }
 0x765   : > { %v7129_v5 = vadd.f32 %v9779_v18, %v7128_v12 }
 0x767   : > { %v7133_v0 = vsel %vm7132_vm3, %v9779_v18, %v7129_v5  ;;  %v12143_v5 = vld [vmem:[#allocation35_spill] sm:$0xff] }
 0x768   : > { %v7138_v63 = vsel %vm7135_vm4, %v7137_v52, %v7133_v0  ;;  %v12145_v52 = vld [vmem:[#allocation38_spill] sm:$0xff] }
 0x769   : > { %v11820_v43 = vperm.slane %v7138_v63, 0 }
 0x76b   : > { %v7141_v34 = vmul.f32 %v11820_v43, %v11614_v27  ;;  %v7142_v3 = vmul.f32 %v11820_v43, %v12127_v47  ;;  %v7143_v44 = vmul.f32 %v11820_v43, %v12128_v50  ;;  %v7144_v9 = vmul.f32 %v11820_v43, %v12129_v38  ;;  %v12133_v27 = vld [vmem:[#allocation22_spill] sm:$0xff]  ;;  %v12148_v38 = vld [vmem:[#allocation63_spill] sm:$0xff] }
 0x76c   : > { %v7145_v57 = vmul.f32 %v11820_v43, %v12130_v31  ;;  %v7146_v29 = vmul.f32 %v11820_v43, %v12131_v8  ;;  %v7147_v19 = vmul.f32 %v11820_v43, %v12132_v25  ;;  %v7148_v55 = vmul.f32 %v11820_v43, %v12136_v56  ;;  %v12149_v31 = vld [vmem:[#allocation42_spill] sm:$0xff]  ;;  %v12150_v25 = vld [vmem:[#allocation43_spill] sm:$0xff] }
 0x76d   : > { %v7173_v28 = vadd.f32 %v12133_v27, %v7141_v34  ;;  %v7174_v16 = vadd.f32 %v12134_v61, %v7142_v3  ;;  %v7175_v2 = vadd.f32 %v12135_v20, %v7143_v44  ;;  %v7176_v45 = vadd.f32 %v12137_v4, %v7144_v9  ;;  %v12147_v3 = vld [vmem:[#allocation39_spill] sm:$0xff]  ;;  %v12151_v61 = vld [vmem:[#allocation46_spill] sm:$0xff] }
 0x76e   : > { %v7149_v59 = vmul.f32 %v11820_v43, %v11642_v54  ;;  %v7177_v15 = vadd.f32 %v12138_v41, %v7145_v57  ;;  %v7150_v62 = vmul.f32 %v11820_v43, %v12139_v30  ;;  %v7151_v40 = vmul.f32 %v11820_v43, %v11648_v17  ;;  %v12146_v17 = vld [vmem:[#allocation62_spill] sm:$0xff]  ;;  %v12152_v56 = vld [vmem:[#allocation47_spill] sm:$0xff] }
 0x76f   : > { %v7178_v58 = vadd.f32 %v12140_v49, %v7146_v29  ;;  %v7179_v23 = vadd.f32 %v12141_v13, %v7147_v19  ;;  %v7205_v22 = vmax.f32 %v7173_v28, 0.0  ;;  %v7206_v18 = vmax.f32 %v7174_v16, 0.0  ;;  %v12156_v13 = vld [vmem:[#allocation21_spill] sm:$0xff] }
 0x770   : > { %v7207_v33 = vmax.f32 %v7175_v2, 0.0  ;;  %v7152_v12 = vmul.f32 %v11820_v43, %v12142_v11  ;;  %v7180_v54 = vadd.f32 %v12143_v5, %v7148_v55  ;;  %v7208_v60 = vmax.f32 %v7176_v45, 0.0  ;;  %v12153_v45 = vld [vmem:[#allocation48_spill] sm:$0xff] }
 0x771   : > { %v7153_v0 = vmul.f32 %v11820_v43, %v12144_v24  ;;  %v7181_v63 = vadd.f32 %v12145_v52, %v7149_v59  ;;  %v7209_v34 = vmax.f32 %v7177_v15, 0.0  ;;  %7237 = vst [vmem:[%s11858_s21] sm:$0xff] %v7205_v22  ;;  %v7154_v47 = vmul.f32 %v11820_v43, %v12146_v17  ;;  %v12154_v15 = vld [vmem:[#allocation49_spill] sm:$0xff]  ;;  %v12161_v17 = vld [vmem:[#allocation32_spill] sm:$0xff] }
 0x772   : > { %v7182_v50 = vadd.f32 %v12147_v3, %v7150_v62  ;;  %v7210_v44 = vmax.f32 %v7178_v58, 0.0  ;;  %7238 = vst [vmem:[%s11858_s21 + $0x8] sm:$0xff] %v7206_v18  ;;  %v7155_v9 = vmul.f32 %v11820_v43, %v12148_v38  ;;  %v7183_v57 = vadd.f32 %v12149_v31, %v7151_v40  ;;  %v12155_v40 = vld [vmem:[#allocation20_spill] sm:$0xff]  ;;  %v12160_v52 = vld [vmem:[#allocation29_spill] sm:$0xff] }
 0x773   : > { %v7211_v8 = vmax.f32 %v7179_v23, 0.0  ;;  %7239 = vst [vmem:[%s11858_s21 + $0x10] sm:$0xff] %v7207_v33  ;;  %v7156_v29 = vmul.f32 %v11820_v43, %v11663_v10  ;;  %v7184_v19 = vadd.f32 %v12150_v25, %v7152_v12  ;;  %v7212_v27 = vmax.f32 %v7180_v54, 0.0  ;;  %v12157_v18 = vld [vmem:[#allocation24_spill] sm:$0xff]  ;;  %v12158_v12 = vld [vmem:[#allocation25_spill] sm:$0xff] }
 0x774   : > { %7240 = vst [vmem:[%s11858_s21 + $0x18] sm:$0xff] %v7208_v60  ;;  %v7157_v28 = vmul.f32 %v11820_v43, %v11666_v21  ;;  %v7185_v16 = vadd.f32 %v12151_v61, %v7153_v0  ;;  %v7213_v20 = vmax.f32 %v7181_v63, 0.0  ;;  %v7158_v2 = vmul.f32 %v11820_v43, %v11669_v36  ;;  %v12159_v60 = vld [vmem:[#allocation28_spill] sm:$0xff]  ;;  %v12166_v61 = vld [vmem:[#allocation41_spill] sm:$0xff] }
 0x775   : > { %7241 = vst [vmem:[%s11858_s21 + $0x20] sm:$0xff] %v7209_v34  ;;  %v7186_v55 = vadd.f32 %v12152_v56, %v7154_v47  ;;  %v7214_v4 = vmax.f32 %v7182_v50, 0.0  ;;  %v7159_v10 = vmul.f32 %v11820_v43, %v11678_v14  ;;  %v7187_v59 = vadd.f32 %v12153_v45, %v7155_v9  ;;  %v12162_v50 = vld [vmem:[#allocation33_spill] sm:$0xff]  ;;  %v12163_v9 = vld [vmem:[#allocation36_spill] sm:$0xff]  ;;  %v12170_v45 = vld [vmem:[#allocation51_spill] sm:$0xff] }
 0x776   : > { %7242 = vst [vmem:[%s11858_s21 + $0x28] sm:$0xff] %v7210_v44  ;;  %v7215_v41 = vmax.f32 %v7183_v57, 0.0  ;;  %v7160_v21 = vmul.f32 %v11820_v43, %v11685_v35  ;;  %v7188_v30 = vadd.f32 %v12154_v15, %v7156_v29  ;;  %v7216_v62 = vmax.f32 %v7184_v19, 0.0  ;;  %v12165_v19 = vld [vmem:[#allocation40_spill] sm:$0xff] }
 0x777   : > { %7243 = vst [vmem:[%s11858_s21 + $0x30] sm:$0xff] %v7211_v8  ;;  %v7161_v36 = vmul.f32 %v11820_v43, %v11690_v1  ;;  %v7189_v49 = vadd.f32 %v12155_v40, %v7157_v28  ;;  %v7217_v58 = vmax.f32 %v7185_v16, 0.0  ;;  %v7162_v14 = vmul.f32 %v11820_v43, %v11759_v51  ;;  %v12164_v8 = vld [vmem:[#allocation37_spill] sm:$0xff] }
 0x778   : > { %7244 = vst [vmem:[%s11858_s21 + $0x38] sm:$0xff] %v7212_v27  ;;  %v7190_v23 = vadd.f32 %v12156_v13, %v7158_v2  ;;  %v7218_v22 = vmax.f32 %v7186_v55, 0.0  ;;  %v7163_v35 = vmul.f32 %v11820_v43, %v11766_v7  ;;  %v7191_v33 = vadd.f32 %v12157_v18, %v7159_v10  ;;  %v12169_v10 = vld [vmem:[#allocation50_spill] sm:$0xff] }
 0x779   : > { %7245 = vst [vmem:[%s11858_s21 + $0x40] sm:$0xff] %v7213_v20  ;;  %v7219_v11 = vmax.f32 %v7187_v59, 0.0  ;;  %v7164_v1 = vmul.f32 %v11820_v43, %v11773_v42  ;;  %v7192_v5 = vadd.f32 %v12158_v12, %v7160_v21  ;;  %v7220_v54 = vmax.f32 %v7188_v30, 0.0  ;;  %v12167_v20 = vld [vmem:[#allocation44_spill] sm:$0xff] }
 0x77a   : > { %7246 = vst [vmem:[%s11858_s21 + $0x48] sm:$0xff] %v7214_v4  ;;  %v7165_v51 = vmul.f32 %v11820_v43, %v11780_v26  ;;  %v7193_v24 = vadd.f32 %v12159_v60, %v7161_v36  ;;  %v7221_v0 = vmax.f32 %v7189_v49, 0.0  ;;  %v7166_v7 = vmul.f32 %v11820_v43, %v11786_v39 }
 0x77b   : > { %7247 = vst [vmem:[%s11858_s21 + $0x50] sm:$0xff] %v7215_v41  ;;  %v7194_v63 = vadd.f32 %v12160_v52, %v7162_v14  ;;  %v7222_v34 = vmax.f32 %v7190_v23, 0.0  ;;  %v7167_v42 = vmul.f32 %v11820_v43, %v11792_v53  ;;  %v7195_v47 = vadd.f32 %v12161_v17, %v7163_v35 }
 0x77c   : > { %7248 = vst [vmem:[%s11858_s21 + $0x58] sm:$0xff] %v7216_v62  ;;  %v7223_v3 = vmax.f32 %v7191_v33, 0.0  ;;  %v7168_v26 = vmul.f32 %v11820_v43, %v11797_v37  ;;  %v7196_v44 = vadd.f32 %v12162_v50, %v7164_v1  ;;  %v7224_v38 = vmax.f32 %v7192_v5, 0.0 }
 0x77d   : > { %7249 = vst [vmem:[%s11858_s21 + $0x60] sm:$0xff] %v7217_v58  ;;  %v7169_v39 = vmul.f32 %v11820_v43, %v11801_v6  ;;  %v7197_v31 = vadd.f32 %v12163_v9, %v7165_v51  ;;  %v7225_v53 = vmax.f32 %v7193_v24, 0.0  ;;  %v7170_v57 = vmul.f32 %v11820_v43, %v11804_v46 }
 0x77e   : > { %7250 = vst [vmem:[%s11858_s21 + $0x68] sm:$0xff] %v7218_v22  ;;  %v7198_v29 = vadd.f32 %v12164_v8, %v7166_v7  ;;  %v7226_v37 = vmax.f32 %v7194_v63, 0.0  ;;  %v7171_v25 = vmul.f32 %v11820_v43, %v11807_v48  ;;  %v7199_v27 = vadd.f32 %v12165_v19, %v7167_v42  ;;  %v12168_v48 = vld [vmem:[#allocation45_spill] sm:$0xff] }
 0x77f   : > { %7251 = vst [vmem:[%s11858_s21 + $0x70] sm:$0xff] %v7219_v11  ;;  %v7227_v6 = vmax.f32 %v7195_v47, 0.0  ;;  %v7172_v28 = vmul.f32 %v11820_v43, %v11811_v32  ;;  %v7200_v16 = vadd.f32 %v12166_v61, %v7168_v26  ;;  %v7228_v46 = vmax.f32 %v7196_v44, 0.0 }
 0x780   : > { %7252 = vst [vmem:[%s11858_s21 + $0x78] sm:$0xff] %v7220_v54  ;;  %v7201_v2 = vadd.f32 %v12167_v20, %v7169_v39  ;;  %v7229_v56 = vmax.f32 %v7197_v31, 0.0  ;;  %v7202_v55 = vadd.f32 %v12168_v48, %v7170_v57  ;;  %v7230_v4 = vmax.f32 %v7198_v29, 0.0 }
 0x781   : > { %7253 = vst [vmem:[%s11858_s21 + $0x80] sm:$0xff] %v7221_v0  ;;  %v7203_v32 = vadd.f32 %v12169_v10, %v7171_v25  ;;  %v7231_v43 = vmax.f32 %v7199_v27, 0.0  ;;  %v7204_v59 = vadd.f32 %v12170_v45, %v7172_v28  ;;  %v7232_v41 = vmax.f32 %v7200_v16, 0.0 }
 0x782   : > { %7254 = vst [vmem:[%s11858_s21 + $0x88] sm:$0xff] %v7222_v34  ;;  %v7233_v21 = vmax.f32 %v7201_v2, 0.0  ;;  %v7234_v15 = vmax.f32 %v7202_v55, 0.0 }
 0x783   : > { %7255 = vst [vmem:[%s11858_s21 + $0x90] sm:$0xff] %v7223_v3  ;;  %v7235_v30 = vmax.f32 %v7203_v32, 0.0  ;;  %v7236_v62 = vmax.f32 %v7204_v59, 0.0 }
 0x784   : > { %7256 = vst [vmem:[%s11858_s21 + $0x98] sm:$0xff] %v7224_v38 }
 0x785   : > { %7257 = vst [vmem:[%s11858_s21 + $0xa0] sm:$0xff] %v7225_v53 }
 0x786   : > { %7258 = vst [vmem:[%s11858_s21 + $0xa8] sm:$0xff] %v7226_v37 }
 0x787   : > { %7259 = vst [vmem:[%s11858_s21 + $0xb0] sm:$0xff] %v7227_v6 }
 0x788   : > { %7260 = vst [vmem:[%s11858_s21 + $0xb8] sm:$0xff] %v7228_v46 }
 0x789   : > { %7261 = vst [vmem:[%s11858_s21 + $0xc0] sm:$0xff] %v7229_v56 }
 0x78a   : > { %7262 = vst [vmem:[%s11858_s21 + $0xc8] sm:$0xff] %v7230_v4 }
 0x78b   : > { %7263 = vst [vmem:[%s11858_s21 + $0xd0] sm:$0xff] %v7231_v43 }
 0x78c   : > { %7264 = vst [vmem:[%s11858_s21 + $0xd8] sm:$0xff] %v7232_v41 }
 0x78d   : > { %7265 = vst [vmem:[%s11858_s21 + $0xe0] sm:$0xff] %v7233_v21 }
 0x78e   : > { %7266 = vst [vmem:[%s11858_s21 + $0xe8] sm:$0xff] %v7234_v15 }
 0x78f   : > { %7267 = vst [vmem:[%s11858_s21 + $0xf0] sm:$0xff] %v7235_v30 }
 0x790   : > { %7268 = vst [vmem:[%s11858_s21 + $0xf8] sm:$0xff] %v7236_v62 }
 0x791   : > { %9963 = shalt.err (!%p9960_p10)
}
 0x792   : > { %s10023_s26 = smov 128   ;;  %s10024_s24 = smov 8  }
 0x793   : > { %9694 = dma.vmem_to_hbm [thread:$0]  (%p10170_p3), %s7283_s27, 4096, %s7285_s22, %s7270_s25, %s10023_s26, %s10023_s26, %s10024_s24  }
 0x794 PF: > { %s7299_s30 = sand.u32 1, %s9998_s13   ;;  %p12171_p12 = scmp.ge.s32.totalorder %s10010_s16, 2 }
 0x795   : > { %s7300_s21 = scalar_lea.sflag [#allocation6], %s7299_s30 }
 0x796   : > { %p9714_p13 = pnand %p12171_p12, %p10115_p6 }
 0x798   : > { %p9715_p0 = pneg %p9714_p13 }
 0x79a   : > { %9993 = dma.done.wait (%p9715_p0), %s7300_s21, 4096  }
 0x79b   : > { %9995 = vsyncadd (%p9715_p0), %s7300_s21, 4294963200  ;;  %s12172_s11 = sld [smem:[#allocation18_spill]]  ;;  %p25_p5 = scmp.ge.s32.totalorder %s10160_s23, 4  }
 0x79c   : > { %s12173_s15 = sld [smem:[#allocation19_spill]]  ;;  %s12174_s13 = smov %s10002_s14 }
 0x79d   : > { %s12176_s16 = smov %s10160_s23  ;;  %27 = sbr.rel (!%p25_p5) target bundleno = 12 (0xc), region = 124 }
 0x7a1   : > { %s12175_s14 = smov %s12172_s11 }
 0x7a2   :  { %7306 = vsyncpa [#allocation5], 1 }
 0x7a3   :  { %7308 = vsyncpa [#allocation5 + $0x1], 1 }
 0x7a4   :  { %7309 = vsyncpa [#allocation8], 1 }
 0x7a5   :  { %7310 = vsyncpa [#allocation11], 1 }
 0x7a6   :  { %7311 = vsyncpa [#allocation6], 1 }
 0x7a7   :  { %7313 = vsyncpa [#allocation6 + $0x1], 1 }

</bundles_post_ra>
